<compile_context>
chip_gen: v5e
topology: v5e:2x2
jax: 0.10.0
libtpu: 0.0.40
codegen_flags: <defaults>
</compile_context>

<pallas_src>
import functools
import math

import jax
import jax.numpy as jnp
from jax import lax
from jax.experimental import pallas as pl
from jax.experimental.pallas import tpu as pltpu


def _vmem_capacity_bytes():
    try:
        return int(pltpu.get_tpu_info().vmem_capacity_bytes)
    except Exception:
        return 64 * 1024 * 1024  # conservative fallback: v7x physical VMEM per TC


# ----------------------------------------------------------------------------
# Kernel 1: 1x1x1 Conv3d (pure channel matmul) + fused ReLU, NCDHW layout.
#   x: (B, C, S) with S = D*H*W,  weight: (N, C)  ->  relu(W @ x[b]) : (B, N, S)
# Spatial axis stays on lanes -> lane-dense output, no layout transpose needed.
# ----------------------------------------------------------------------------
def _pointwise_conv_relu_kernel(x_ref, w_ref, o_ref):
    # x_ref: (C, ts), w_ref: (N, C), o_ref: (N, ts)
    y = jnp.dot(w_ref[...], x_ref[...], preferred_element_type=jnp.float32)
    o_ref[...] = jnp.maximum(y, 0.0)


def pointwise_conv3d_relu(x_ncs, weight):
    """relu(weight @ x) per batch. x_ncs: (B, C, S) f32, weight: (N, C) f32."""
    B, C, S = x_ncs.shape
    N, C2 = weight.shape
    assert C == C2, "channel mismatch"
    x_ncs = x_ncs.astype(jnp.float32)
    weight = weight.astype(jnp.float32)

    cap = _vmem_capacity_bytes()
    budget = int(cap * 0.45)                      # headroom for double-buffering
    vmem_limit = min(int(cap * 0.70), 100 * 1024 * 1024)

    # Pad the (lane) spatial axis to a multiple of 128; padded columns produce
    # relu(W @ 0) = 0 and are sliced off afterwards (exact).
    s_pad = (-S) % 128
    if s_pad:
        x_ncs = jnp.pad(x_ncs, ((0, 0), (0, 0), (0, s_pad)))
    Sp = S + s_pad

    ts = 128
    for cand in (2048, 1024, 512, 256, 128):
        if Sp % cand == 0 and 2 * (C * cand + N * C + N * cand) * 4 <= budget:
            ts = cand
            break
    grid = (B, Sp // ts)

    out = pl.pallas_call(
        _pointwise_conv_relu_kernel,
        out_shape=jax.ShapeDtypeStruct((B, N, Sp), jnp.float32),
        grid_spec=pltpu.PrefetchScalarGridSpec(
            num_scalar_prefetch=0,
            grid=grid,
            in_specs=[
                pl.BlockSpec((None, C, ts), lambda b, s: (b, 0, s)),  # x slab
                pl.BlockSpec((N, C), lambda b, s: (0, 0)),            # W (fetched once)
            ],
            out_specs=pl.BlockSpec((None, N, ts), lambda b, s: (b, 0, s)),
        ),
        compiler_params=pltpu.CompilerParams(
            dimension_semantics=("parallel", "parallel"),
            vmem_limit_bytes=vmem_limit,
        ),
        cost_estimate=pl.CostEstimate(
            flops=2 * B * Sp * C * N,
            transcendentals=0,
            bytes_accessed=(B * C * Sp + N * C + B * N * Sp) * 4,
        ),
    )(x_ncs, weight)
    return out[:, :, :S] if s_pad else out


# ----------------------------------------------------------------------------
# Kernel 2: fused MLP head — decoder FC + projector FC + classifier (2 layers),
# torch.cat folded in via a split of the first classifier weight.
# All operands are whole-array VMEM blocks (~7 MB total), single launch.
# ----------------------------------------------------------------------------
def _head_kernel(flat_ref, proj_ref,
                 wdec_ref, bdec_ref, wproj_ref, bproj_ref,
                 w1a_ref, w1b_ref, b1_ref, w2_ref, b2_ref, o_ref):
    f32 = jnp.float32
    flat_feat = jnp.maximum(
        jnp.dot(flat_ref[...], wdec_ref[...], preferred_element_type=f32)
        + bdec_ref[...], 0.0)                                           # (B, 256)
    bottle = jnp.maximum(
        jnp.dot(proj_ref[...], wproj_ref[...], preferred_element_type=f32)
        + bproj_ref[...], 0.0)                                          # (B, 256)
    # classi layer 1 on combi = concat([bottle, flat_feat], axis=1), computed
    # without an in-kernel concat: W1 = [W1a | W1b] along in_features.
    h1 = jnp.maximum(
        jnp.dot(bottle, w1a_ref[...], preferred_element_type=f32)
        + jnp.dot(flat_feat, w1b_ref[...], preferred_element_type=f32)
        + b1_ref[...], 0.0)                                             # (B, 124)
    o_ref[...] = jnp.dot(h1, w2_ref[...], preferred_element_type=f32) + b2_ref[...]


def fused_head(flat, proj_flat, params):
    B = flat.shape[0]
    f32 = jnp.float32

    wdec_t = params["dec_fc"]["w"].astype(f32).T                # (512, 256)
    bdec = params["dec_fc"]["b"].astype(f32).reshape(1, -1)
    wproj_t = params["proj_fc"]["w"].astype(f32).T              # (5832, 256)
    bproj = params["proj_fc"]["b"].astype(f32).reshape(1, -1)
    nb = params["proj_fc"]["w"].shape[0]                        # 256 (bottle width)
    w1 = params["cls_fc1"]["w"].astype(f32)                     # (124, 512)
    w1a_t = w1[:, :nb].T                                        # (256, 124) for bottle
    w1b_t = w1[:, nb:].T                                        # (256, 124) for flat
    b1 = params["cls_fc1"]["b"].astype(f32).reshape(1, -1)
    w2_t = params["cls_fc2"]["w"].astype(f32).T                 # (124, 2)
    b2 = params["cls_fc2"]["b"].astype(f32).reshape(1, -1)

    cap = _vmem_capacity_bytes()
    vmem_limit = min(int(cap * 0.70), 100 * 1024 * 1024)

    K_dec, K_proj = wdec_t.shape[0], wproj_t.shape[0]
    flops = 2 * B * (K_dec * 256 + K_proj * 256 + 512 * 124 + 124 * 2)
    bytes_accessed = 4 * (flat.size + proj_flat.size + wdec_t.size + wproj_t.size
                          + w1.size + w2_t.size + bdec.size + bproj.size
                          + b1.size + b2.size + B * 2)

    return pl.pallas_call(
        _head_kernel,
        out_shape=jax.ShapeDtypeStruct((B, 2), f32),
        compiler_params=pltpu.CompilerParams(vmem_limit_bytes=vmem_limit),
        cost_estimate=pl.CostEstimate(flops=flops, transcendentals=0,
                                      bytes_accessed=bytes_accessed),
    )(flat.astype(f32), proj_flat.astype(f32),
      wdec_t, bdec, wproj_t, bproj, w1a_t, w1b_t, b1, w2_t, b2)


# ----------------------------------------------------------------------------
# Plain-JAX glue ops (stay in XLA)
# ----------------------------------------------------------------------------
def _relu(x):
    return jnp.maximum(x, 0.0)


def _conv3d(x, w, padding):
    # x: (B, C, D, H, W), w: (O, I, kd, kh, kw)
    return lax.conv_general_dilated(
        x, w, window_strides=(1, 1, 1),
        padding=[(padding, padding)] * 3,
        dimension_numbers=("NCDHW", "OIDHW", "NCDHW"))


def _batchnorm3d(x, bn, eps=1e-5):
    # TODO(synk): BatchNorm3d uses eval-mode running statistics here;
    # train-mode batch statistics are not implemented.
    inv = lax.rsqrt(bn["var"] + eps)
    scale = (bn["gamma"] * inv)[None, :, None, None, None]
    shift = (bn["beta"] - bn["mean"] * bn["gamma"] * inv)[None, :, None, None, None]
    return x * scale + shift


def _maxpool3d_2x2(x):
    return lax.reduce_window(
        x, -jnp.inf, lax.max,
        window_dimensions=(1, 1, 2, 2, 2),
        window_strides=(1, 1, 2, 2, 2),
        padding="VALID")


def _linear_ref(x, p):
    return jnp.dot(x, p["w"].T, precision=lax.Precision.HIGHEST) + p["b"]


# ----------------------------------------------------------------------------
# Full DinsdaleDomainPred forward
# ----------------------------------------------------------------------------
def dinsdale_domain_pred_forward(params, bottleneck, feat_map, *, use_pallas=True):
    B = feat_map.shape[0]

    # ---- decoder_block: 4 x [Conv3d(3x3x3,p=1,no bias) -> ReLU -> BN -> MaxPool3d(2)]
    # TODO(synk): tiny 4-channel 3x3x3 Conv3d / MaxPool3d / BatchNorm3d stay in
    # XLA; only the matmul-shaped layers run through the Pallas kernels.
    h = feat_map
    for blk in params["decoder_blocks"]:
        h = _conv3d(h, blk["conv_w"], padding=1)
        h = _relu(h)
        h = _batchnorm3d(h, blk["bn"])
        h = _maxpool3d_2x2(h)
    flat = h.reshape(B, -1)                                          # (B, 512)

    # ---- projector: Conv3d(k=1, pad=1, no bias) -> ReLU -> BN -> Flatten -> Linear
    # The pad=1 border of a bias-free 1x1 conv is 0 and ReLU(0)=0, so padding
    # with zeros AFTER the fused conv+ReLU kernel is exact; BN then acts on the
    # padded (18^3) volume, matching PyTorch.
    Bc, C, D, H, W = bottleneck.shape
    x_ncs = bottleneck.reshape(Bc, C, D * H * W)
    if use_pallas:
        y = pointwise_conv3d_relu(x_ncs, params["proj_conv_w"])     # (B, 1, DHW)
    else:
        y = _relu(jnp.einsum("nc,bcs->bns",
                             params["proj_conv_w"].astype(jnp.float32),
                             x_ncs.astype(jnp.float32),
                             precision=lax.Precision.HIGHEST))
    proj = y.reshape(Bc, -1, D, H, W)                                # (B, 1, 16,16,16)
    proj = jnp.pad(proj, ((0, 0), (0, 0), (1, 1), (1, 1), (1, 1)))   # (B, 1, 18,18,18)
    proj = _batchnorm3d(proj, params["proj_bn"])
    proj_flat = proj.reshape(Bc, -1)                                 # (B, 5832)

    # ---- decoder FC + projector FC + classi (Linear/ReLU/Linear), fused.
    if use_pallas:
        return fused_head(flat, proj_flat, params)                   # (B, 2)

    flat_feat_map = _relu(_linear_ref(flat, params["dec_fc"]))       # (B, 256)
    bottle_feats = _relu(_linear_ref(proj_flat, params["proj_fc"]))  # (B, 256)
    combi = jnp.concatenate([bottle_feats, flat_feat_map], axis=1)   # (B, 512)
    h1 = _relu(_linear_ref(combi, params["cls_fc1"]))
    return _linear_ref(h1, params["cls_fc2"])                        # (B, 2)


# ----------------------------------------------------------------------------
# Deterministic parameter construction
# ----------------------------------------------------------------------------
def init_params(key, init_features=4, num_blocks=4):
    keys = iter(jax.random.split(key, 64))

    def unif(shape, bound):
        return jax.random.uniform(next(keys), shape, jnp.float32, -bound, bound)

    def bn_params(c):
        return dict(
            gamma=jax.random.uniform(next(keys), (c,), jnp.float32, 0.5, 1.5),
            beta=unif((c,), 0.1),
            mean=unif((c,), 0.1),
            var=jax.random.uniform(next(keys), (c,), jnp.float32, 0.5, 1.5),
        )

    def linear_params(out_f, in_f):
        bound = 1.0 / math.sqrt(in_f)
        return dict(w=unif((out_f, in_f), bound), b=unif((out_f,), bound))

    f = init_features
    params = {"decoder_blocks": []}
    for _ in range(num_blocks):
        params["decoder_blocks"].append(dict(
            conv_w=unif((f, f, 3, 3, 3), 1.0 / math.sqrt(f * 27)),
            bn=bn_params(f),
        ))
    params["dec_fc"] = linear_params(256, 512)
    # projector 1x1x1 conv weight stored as (out=1, in=f*64) for the channel matmul
    params["proj_conv_w"] = unif((1, f * 64), 1.0 / math.sqrt(f * 64))
    params["proj_bn"] = bn_params(1)
    params["proj_fc"] = linear_params(256, 5832)
    params["cls_fc1"] = linear_params(124, 512)
    params["cls_fc2"] = linear_params(2, 124)
    return params


if __name__ == "__main__":
    B = 2
    init_features = 4
    key = jax.random.PRNGKey(0)
    k_params, k_bottle, k_feat = jax.random.split(key, 3)

    params = init_params(k_params, init_features=init_features, num_blocks=4)

    # Shapes implied by the module's hard-coded Linear sizes:
    #  * projector: Conv3d(k=1, pad=1) -> Flatten -> Linear(5832 = 18^3, 256)
    #       => bottleneck spatial 16^3 with init_features*64 = 256 channels.
    #  * decoder: 4 x MaxPool3d(2) then Flatten -> Linear(512, 256)
    #       => 4 * (D/16)*(H/16)*(W/16) = 512, e.g. (D,H,W) = (32, 128, 128).
    bottleneck = jax.random.normal(
        k_bottle, (B, init_features * 64, 16, 16, 16), dtype=jnp.float32)
    feat_map = jax.random.normal(
        k_feat, (B, init_features, 32, 128, 128), dtype=jnp.float32)

    fwd = jax.jit(functools.partial(dinsdale_domain_pred_forward, use_pallas=True))
    out = jax.block_until_ready(fwd(params, bottleneck, feat_map))
    assert out.shape == (B, 2)

    # Reference: identical pipeline with the Pallas kernels replaced by jnp ops.
    ref_fwd = jax.jit(functools.partial(dinsdale_domain_pred_forward, use_pallas=False))
    ref = jax.block_until_ready(ref_fwd(params, bottleneck, feat_map))
    assert jnp.allclose(out, ref, atol=1e-2, rtol=1e-2), \
        "Pallas forward mismatch vs JAX reference"

    print("KERNEL_OK")
</pallas_src>

<mosaic_0001>
module attributes {stable_mosaic.version = 11 : i64} {
  func.func @_pointwise_conv_relu_kernel(%arg0: i32, %arg1: i32, %arg2: memref<1x256x2048xf32, #tpu.memory_space<vmem>>, %arg3: memref<1x256xf32, #tpu.memory_space<vmem>>, %arg4: memref<1x1x2048xf32, #tpu.memory_space<vmem>>) attributes {dimension_semantics = [#tpu.dimension_semantics<parallel>, #tpu.dimension_semantics<parallel>], iteration_bounds = array<i64: 2, 2>, scalar_prefetch = 0 : i64, scratch_operands = 0 : i64, tpu.core_type = #tpu.core_type<tc>, window_params = [{transform_indices = @transform_0, window_bounds = array<i64: 1, 256, 2048>}, {pipeline_mode = #tpu.pipeline_mode<synchronous>, transform_indices = @transform_1, window_bounds = array<i64: 1, 256>}, {transform_indices = @transform_2, window_bounds = array<i64: 1, 1, 2048>}]} {
    %c0 = arith.constant 0 : index
    %c0_0 = arith.constant 0 : index
    %0 = vector.load %arg3[%c0, %c0_0] : memref<1x256xf32, #tpu.memory_space<vmem>>, vector<1x256xf32>
    %c0_1 = arith.constant 0 : index
    %c0_2 = arith.constant 0 : index
    %c0_3 = arith.constant 0 : index
    %1 = vector.load %arg2[%c0_1, %c0_2, %c0_3] : memref<1x256x2048xf32, #tpu.memory_space<vmem>>, vector<1x256x2048xf32>
    %2 = vector.shape_cast %1 : vector<1x256x2048xf32> to vector<256x2048xf32>
    %cst = arith.constant dense<0.000000e+00> : vector<1x2048xf32>
    %3 = tpu.matmul %0, %2, %cst {dimension_numbers = #tpu.dot_dimension_numbers<[1], [0], [0], [1], [0, 0, 1, 1], [], []>} : vector<1x256xf32>, vector<256x2048xf32>, vector<1x2048xf32> -> vector<1x2048xf32>
    %cst_4 = arith.constant 0.000000e+00 : f32
    %4 = vector.broadcast %cst_4 : f32 to vector<1x2048xf32>
    %5 = arith.maximumf %3, %4 : vector<1x2048xf32>
    %c0_5 = arith.constant 0 : index
    %c0_6 = arith.constant 0 : index
    %c0_7 = arith.constant 0 : index
    %6 = vector.load %arg4[%c0_5, %c0_6, %c0_7] : memref<1x1x2048xf32, #tpu.memory_space<vmem>>, vector<1x1x2048xf32>
    %7 = vector.shape_cast %6 : vector<1x1x2048xf32> to vector<1x2048xf32>
    %8 = vector.shape_cast %5 : vector<1x2048xf32> to vector<1x1x2048xf32>
    tpu.vector_store %arg4[%c0_5, %c0_6, %c0_7], %8 {strides = array<i32>} : memref<1x1x2048xf32, #tpu.memory_space<vmem>>, vector<1x1x2048xf32>,
    return
  }
  func.func @transform_0(%arg0: i32, %arg1: i32) -> (i32, i32, i32) {
    %c0_i32 = arith.constant 0 : i32
    %c0_i32_0 = arith.constant 0 : i32
    return %arg0, %c0_i32, %arg1 : i32, i32, i32
  }
  func.func @transform_1(%arg0: i32, %arg1: i32) -> (i32, i32) {
    %c0_i32 = arith.constant 0 : i32
    %c0_i32_0 = arith.constant 0 : i32
    %c0_i32_1 = arith.constant 0 : i32
    return %c0_i32, %c0_i32_0 : i32, i32
  }
  func.func @transform_2(%arg0: i32, %arg1: i32) -> (i32, i32, i32) {
    %c0_i32 = arith.constant 0 : i32
    %c0_i32_0 = arith.constant 0 : i32
    return %arg0, %c0_i32, %arg1 : i32, i32, i32
  }
}

module attributes {stable_mosaic.version = 11 : i64} {
  func.func @_head_kernel(%arg0: memref<2x512xf32, #tpu.memory_space<vmem>>, %arg1: memref<2x5832xf32, #tpu.memory_space<vmem>>, %arg2: memref<512x256xf32, #tpu.memory_space<vmem>>, %arg3: memref<1x256xf32, #tpu.memory_space<vmem>>, %arg4: memref<5832x256xf32, #tpu.memory_space<vmem>>, %arg5: memref<1x256xf32, #tpu.memory_space<vmem>>, %arg6: memref<256x124xf32, #tpu.memory_space<vmem>>, %arg7: memref<256x124xf32, #tpu.memory_space<vmem>>, %arg8: memref<1x124xf32, #tpu.memory_space<vmem>>, %arg9: memref<124x2xf32, #tpu.memory_space<vmem>>, %arg10: memref<1x2xf32, #tpu.memory_space<vmem>>, %arg11: memref<2x2xf32, #tpu.memory_space<vmem>>) attributes {dimension_semantics = [], scalar_prefetch = 0 : i64, scratch_operands = 0 : i64, tpu.core_type = #tpu.core_type<tc>} {
    %c0 = arith.constant 0 : index
    %c0_0 = arith.constant 0 : index
    %0 = vector.load %arg0[%c0, %c0_0] : memref<2x512xf32, #tpu.memory_space<vmem>>, vector<2x512xf32>
    %c0_1 = arith.constant 0 : index
    %c0_2 = arith.constant 0 : index
    %1 = vector.load %arg2[%c0_1, %c0_2] : memref<512x256xf32, #tpu.memory_space<vmem>>, vector<512x256xf32>
    %cst = arith.constant dense<0.000000e+00> : vector<2x256xf32>
    %2 = tpu.matmul %0, %1, %cst {dimension_numbers = #tpu.dot_dimension_numbers<[1], [0], [0], [1], [0, 0, 1, 1], [], []>} : vector<2x512xf32>, vector<512x256xf32>, vector<2x256xf32> -> vector<2x256xf32>
    %c0_3 = arith.constant 0 : index
    %c0_4 = arith.constant 0 : index
    %3 = vector.load %arg3[%c0_3, %c0_4] : memref<1x256xf32, #tpu.memory_space<vmem>>, vector<1x256xf32>
    %4 = vector.broadcast %3 : vector<1x256xf32> to vector<2x256xf32>
    %5 = arith.addf %2, %4 : vector<2x256xf32>
    %cst_5 = arith.constant 0.000000e+00 : f32
    %6 = vector.broadcast %cst_5 : f32 to vector<2x256xf32>
    %7 = arith.maximumf %5, %6 : vector<2x256xf32>
    %c0_6 = arith.constant 0 : index
    %c0_7 = arith.constant 0 : index
    %8 = vector.load %arg1[%c0_6, %c0_7] : memref<2x5832xf32, #tpu.memory_space<vmem>>, vector<2x5832xf32>
    %c0_8 = arith.constant 0 : index
    %c0_9 = arith.constant 0 : index
    %9 = vector.load %arg4[%c0_8, %c0_9] : memref<5832x256xf32, #tpu.memory_space<vmem>>, vector<5832x256xf32>
    %cst_10 = arith.constant dense<0.000000e+00> : vector<2x256xf32>
    %10 = tpu.matmul %8, %9, %cst_10 {dimension_numbers = #tpu.dot_dimension_numbers<[1], [0], [0], [1], [0, 0, 1, 1], [], []>} : vector<2x5832xf32>, vector<5832x256xf32>, vector<2x256xf32> -> vector<2x256xf32>
    %c0_11 = arith.constant 0 : index
    %c0_12 = arith.constant 0 : index
    %11 = vector.load %arg5[%c0_11, %c0_12] : memref<1x256xf32, #tpu.memory_space<vmem>>, vector<1x256xf32>
    %12 = vector.broadcast %11 : vector<1x256xf32> to vector<2x256xf32>
    %13 = arith.addf %10, %12 : vector<2x256xf32>
    %cst_13 = arith.constant 0.000000e+00 : f32
    %14 = vector.broadcast %cst_13 : f32 to vector<2x256xf32>
    %15 = arith.maximumf %13, %14 : vector<2x256xf32>
    %c0_14 = arith.constant 0 : index
    %c0_15 = arith.constant 0 : index
    %16 = vector.load %arg6[%c0_14, %c0_15] : memref<256x124xf32, #tpu.memory_space<vmem>>, vector<256x124xf32>
    %cst_16 = arith.constant dense<0.000000e+00> : vector<2x124xf32>
    %17 = tpu.matmul %15, %16, %cst_16 {dimension_numbers = #tpu.dot_dimension_numbers<[1], [0], [0], [1], [0, 0, 1, 1], [], []>} : vector<2x256xf32>, vector<256x124xf32>, vector<2x124xf32> -> vector<2x124xf32>
    %c0_17 = arith.constant 0 : index
    %c0_18 = arith.constant 0 : index
    %18 = vector.load %arg7[%c0_17, %c0_18] : memref<256x124xf32, #tpu.memory_space<vmem>>, vector<256x124xf32>
    %cst_19 = arith.constant dense<0.000000e+00> : vector<2x124xf32>
    %19 = tpu.matmul %7, %18, %cst_19 {dimension_numbers = #tpu.dot_dimension_numbers<[1], [0], [0], [1], [0, 0, 1, 1], [], []>} : vector<2x256xf32>, vector<256x124xf32>, vector<2x124xf32> -> vector<2x124xf32>
    %20 = arith.addf %17, %19 : vector<2x124xf32>
    %c0_20 = arith.constant 0 : index
    %c0_21 = arith.constant 0 : index
    %21 = vector.load %arg8[%c0_20, %c0_21] : memref<1x124xf32, #tpu.memory_space<vmem>>, vector<1x124xf32>
    %22 = vector.broadcast %21 : vector<1x124xf32> to vector<2x124xf32>
    %23 = arith.addf %20, %22 : vector<2x124xf32>
    %cst_22 = arith.constant 0.000000e+00 : f32
    %24 = vector.broadcast %cst_22 : f32 to vector<2x124xf32>
    %25 = arith.maximumf %23, %24 : vector<2x124xf32>
    %c0_23 = arith.constant 0 : index
    %c0_24 = arith.constant 0 : index
    %26 = vector.load %arg9[%c0_23, %c0_24] : memref<124x2xf32, #tpu.memory_space<vmem>>, vector<124x2xf32>
    %cst_25 = arith.constant dense<0.000000e+00> : vector<2x2xf32>
    %27 = tpu.matmul %25, %26, %cst_25 {dimension_numbers = #tpu.dot_dimension_numbers<[1], [0], [0], [1], [0, 0, 1, 1], [], []>} : vector<2x124xf32>, vector<124x2xf32>, vector<2x2xf32> -> vector<2x2xf32>
    %c0_26 = arith.constant 0 : index
    %c0_27 = arith.constant 0 : index
    %28 = vector.load %arg10[%c0_26, %c0_27] : memref<1x2xf32, #tpu.memory_space<vmem>>, vector<1x2xf32>
    %29 = vector.broadcast %28 : vector<1x2xf32> to vector<2x2xf32>
    %30 = arith.addf %27, %29 : vector<2x2xf32>
    %c0_28 = arith.constant 0 : index
    %c0_29 = arith.constant 0 : index
    %31 = vector.load %arg11[%c0_28, %c0_29] : memref<2x2xf32, #tpu.memory_space<vmem>>, vector<2x2xf32>
    tpu.vector_store %arg11[%c0_28, %c0_29], %30 {strides = array<i32>} : memref<2x2xf32, #tpu.memory_space<vmem>>, vector<2x2xf32>,
    return
  }
}

</mosaic_0001>

<bundles_post_ra>
// kernel: dinsdale_domain_pred_forward.2
= control target key start
LH: loop header
LB: loop body
LE: loop exit
PB: predicated region body
PF: predicated region fallthrough
CT: control target
= control target key end

     0   :  { %s2669_s9 = smov 0   ;;  %s2671_s10 = smov 0   ;;  %s4385_s0 = inlined_call_operand.vmem [shape: f32[2,256,4096], index: 0, kind: input, shape index: {}]   ;;  %s4386_s1 = inlined_call_operand.vmem [shape: f32[1,256], index: 1, kind: input, shape index: {}]   ;;  %s4387_s2 = inlined_call_operand.vmem [shape: f32[2,1,4096], index: 2, kind: output, shape index: {}]  }
   0x1   :  { %s2673_s11 = smov 0   ;;  %s2675_s12 = smov 0  }
   0x2   :  { %s2677_s13 = smov 0   ;;  %s2679_s14 = smov 0  }
   0x3   :  { %s2681_s15 = smov 0  }
   0x4 LB: > { %s21_s16 = sadd.s32 1, %s2644_s13  ;;  %s24_s17 = sadd.s32 1, %s2648_s14  ;;  %s2652_s15 = sphi %s2681_s15, %s12_s15   ;;  %s2648_s14 = sphi %s2679_s14, %s4394_s14   ;;  %s2644_s13 = sphi %s2677_s13, %s4393_s13   ;;  %s2640_s12 = sphi %s2675_s12, %s4392_s12   ;;  %s2636_s11 = sphi %s2673_s11, %s4391_s11   ;;  %s2632_s10 = sphi %s2671_s10, %s4390_s10   ;;  %s2628_s9 = sphi %s2669_s9, %s4389_s9  }
   0x5   : > { %p22_p0 = scmp.ge.s32.totalorder %s21_s16, 2  ;;  %p40_p1 = scmp.ne.s32.totalorder %s2632_s10, %s2628_s9 }
   0x6   : > { %p41_p2 = scmp.eq.s32.totalorder %s2652_s15, 0  ;;  %s33_s21 = sadd.s32 1, %s2632_s10 }
   0x7   : > { %s4396_s16 = smov (%p22_p0, %s21_s16), 0  ;;  %s4398_s17 = smov (!%p22_p0, %s24_s17), %s2648_s14 }
   0x8   : > { %p42_p3 = por %p41_p2, %p40_p1  ;;  %p26_p4 = scmp.ge.s32.totalorder %s4398_s17, 2 }
   0x9   : > { %s29_s18 = ssub.s32 %s2644_s13, %s4396_s16  ;;  %p2531_p6 = scmp.ge.s32.totalorder %s2652_s15, 4 }
   0xa   : > { %s4400_s17 = smov (%p26_p4, %s4398_s17), 0 }
   0xb   : > { %s28_s19 = ssub.s32 %s2648_s14, %s4400_s17  ;;  %118 = sbr.rel (%p2531_p6) target bundleno = 535 (0x217), region = 20 }
   0xc   : > { %s30_s20 = sor.u32 %s29_s18, %s28_s19 }
   0xd   : > { %p31_p5 = scmp.eq.s32.totalorder %s30_s20, 0 }
   0xf   : > { %s2720_s22 = scalar_select %p31_p5, %s2632_s10, %s33_s21  }
  0x10   : > { %121 = sbr.rel (!%p42_p3) target bundleno = 535 (0x217), region = 24  ;;  %s123_s23 = sand.u32 (%p42_p3), 1, %s2632_s10  }
  0x11   : > { %s2533_s24 = sshll.u32 (%p42_p3), %s2644_s13, 4  ;;  %s2532_s25 = sshll.u32 (%p42_p3), %s123_s23, 12 }
  0x12   : > { %s2534_s26 = sshll.u32 (%p42_p3), %s2648_s14, 10  ;;  %s2734_s4 = scalar_lea.vmem (%p42_p3), [#allocation2], %s2532_s25 }
  0x13   : > { %s128_s27 = sadd.s32 (%p42_p3), %s2534_s26, %s2533_s24 }
  0x14   : > { %s2535_s28 = sshll.u32 (%p42_p3), %s128_s27, 3 }
  0x15   : > { %s2729_s3 = scalar_lea.vmem %s4385_s0, %s2535_s28 }
  0x16   : > { %v143_v0 = vld [vmem:[%s2729_s3] sm:$0xff]  ;;  %v145_v1 = vld [vmem:[%s2729_s3 + $0x8] sm:$0xff]  ;;  %v147_v2 = vld [vmem:[%s2729_s3 + $0x10] sm:$0xff] }
  0x17   : > { %144 = vst [vmem:[%s2734_s4] sm:$0xff] %v143_v0  ;;  %v149_v3 = vld [vmem:[%s2729_s3 + $0x18] sm:$0xff]  ;;  %v151_v4 = vld [vmem:[%s2729_s3 + $0x20] sm:$0xff]  ;;  %v153_v5 = vld [vmem:[%s2729_s3 + $0x28] sm:$0xff] }
  0x18   : > { %146 = vst [vmem:[%s2734_s4 + $0x8] sm:$0xff] %v145_v1  ;;  %v155_v6 = vld [vmem:[%s2729_s3 + $0x30] sm:$0xff]  ;;  %v157_v7 = vld [vmem:[%s2729_s3 + $0x38] sm:$0xff]  ;;  %v159_v8 = vld [vmem:[%s2729_s3 + $0x40] sm:$0xff] }
  0x19   : > { %148 = vst [vmem:[%s2734_s4 + $0x10] sm:$0xff] %v147_v2  ;;  %v161_v9 = vld [vmem:[%s2729_s3 + $0x48] sm:$0xff]  ;;  %v163_v10 = vld [vmem:[%s2729_s3 + $0x50] sm:$0xff]  ;;  %v165_v11 = vld [vmem:[%s2729_s3 + $0x58] sm:$0xff] }
  0x1a   : > { %150 = vst [vmem:[%s2734_s4 + $0x18] sm:$0xff] %v149_v3  ;;  %v167_v12 = vld [vmem:[%s2729_s3 + $0x60] sm:$0xff]  ;;  %v169_v13 = vld [vmem:[%s2729_s3 + $0x68] sm:$0xff]  ;;  %v171_v14 = vld [vmem:[%s2729_s3 + $0x70] sm:$0xff] }
  0x1b   : > { %152 = vst [vmem:[%s2734_s4 + $0x20] sm:$0xff] %v151_v4  ;;  %v173_v15 = vld [vmem:[%s2729_s3 + $0x78] sm:$0xff]  ;;  %v175_v16 = vld [vmem:[%s2729_s3 + $0x100] sm:$0xff]  ;;  %v177_v17 = vld [vmem:[%s2729_s3 + $0x108] sm:$0xff] }
  0x1c   : > { %154 = vst [vmem:[%s2734_s4 + $0x28] sm:$0xff] %v153_v5  ;;  %v179_v18 = vld [vmem:[%s2729_s3 + $0x110] sm:$0xff]  ;;  %v181_v19 = vld [vmem:[%s2729_s3 + $0x118] sm:$0xff]  ;;  %v183_v20 = vld [vmem:[%s2729_s3 + $0x120] sm:$0xff] }
  0x1d   : > { %156 = vst [vmem:[%s2734_s4 + $0x30] sm:$0xff] %v155_v6  ;;  %v185_v21 = vld [vmem:[%s2729_s3 + $0x128] sm:$0xff]  ;;  %v187_v22 = vld [vmem:[%s2729_s3 + $0x130] sm:$0xff]  ;;  %v189_v23 = vld [vmem:[%s2729_s3 + $0x138] sm:$0xff] }
  0x1e   : > { %158 = vst [vmem:[%s2734_s4 + $0x38] sm:$0xff] %v157_v7  ;;  %v191_v24 = vld [vmem:[%s2729_s3 + $0x140] sm:$0xff]  ;;  %v193_v25 = vld [vmem:[%s2729_s3 + $0x148] sm:$0xff]  ;;  %v195_v26 = vld [vmem:[%s2729_s3 + $0x150] sm:$0xff] }
  0x1f   : > { %160 = vst [vmem:[%s2734_s4 + $0x40] sm:$0xff] %v159_v8  ;;  %v197_v27 = vld [vmem:[%s2729_s3 + $0x158] sm:$0xff]  ;;  %v199_v28 = vld [vmem:[%s2729_s3 + $0x160] sm:$0xff]  ;;  %v201_v29 = vld [vmem:[%s2729_s3 + $0x168] sm:$0xff] }
  0x20   : > { %162 = vst [vmem:[%s2734_s4 + $0x48] sm:$0xff] %v161_v9  ;;  %v203_v30 = vld [vmem:[%s2729_s3 + $0x170] sm:$0xff]  ;;  %v205_v31 = vld [vmem:[%s2729_s3 + $0x178] sm:$0xff]  ;;  %v207_v32 = vld [vmem:[%s2729_s3 + $0x200] sm:$0xff] }
  0x21   : > { %164 = vst [vmem:[%s2734_s4 + $0x50] sm:$0xff] %v163_v10  ;;  %v209_v33 = vld [vmem:[%s2729_s3 + $0x208] sm:$0xff]  ;;  %v211_v34 = vld [vmem:[%s2729_s3 + $0x210] sm:$0xff]  ;;  %v213_v35 = vld [vmem:[%s2729_s3 + $0x218] sm:$0xff] }
  0x22   : > { %166 = vst [vmem:[%s2734_s4 + $0x58] sm:$0xff] %v165_v11  ;;  %v215_v36 = vld [vmem:[%s2729_s3 + $0x220] sm:$0xff]  ;;  %v217_v37 = vld [vmem:[%s2729_s3 + $0x228] sm:$0xff]  ;;  %v219_v38 = vld [vmem:[%s2729_s3 + $0x230] sm:$0xff] }
  0x23   : > { %168 = vst [vmem:[%s2734_s4 + $0x60] sm:$0xff] %v167_v12  ;;  %v221_v39 = vld [vmem:[%s2729_s3 + $0x238] sm:$0xff]  ;;  %v223_v40 = vld [vmem:[%s2729_s3 + $0x240] sm:$0xff]  ;;  %v225_v41 = vld [vmem:[%s2729_s3 + $0x248] sm:$0xff] }
  0x24   : > { %170 = vst [vmem:[%s2734_s4 + $0x68] sm:$0xff] %v169_v13  ;;  %v227_v42 = vld [vmem:[%s2729_s3 + $0x250] sm:$0xff]  ;;  %v229_v43 = vld [vmem:[%s2729_s3 + $0x258] sm:$0xff]  ;;  %v231_v44 = vld [vmem:[%s2729_s3 + $0x260] sm:$0xff] }
  0x25   : > { %172 = vst [vmem:[%s2734_s4 + $0x70] sm:$0xff] %v171_v14  ;;  %v233_v45 = vld [vmem:[%s2729_s3 + $0x268] sm:$0xff]  ;;  %v235_v46 = vld [vmem:[%s2729_s3 + $0x270] sm:$0xff]  ;;  %v237_v47 = vld [vmem:[%s2729_s3 + $0x278] sm:$0xff] }
  0x26   : > { %174 = vst [vmem:[%s2734_s4 + $0x78] sm:$0xff] %v173_v15  ;;  %v239_v48 = vld [vmem:[%s2729_s3 + $0x300] sm:$0xff]  ;;  %v241_v49 = vld [vmem:[%s2729_s3 + $0x308] sm:$0xff]  ;;  %v243_v50 = vld [vmem:[%s2729_s3 + $0x310] sm:$0xff] }
  0x27   : > { %176 = vst [vmem:[%s2734_s4 + $0x80] sm:$0xff] %v175_v16  ;;  %v245_v51 = vld [vmem:[%s2729_s3 + $0x318] sm:$0xff]  ;;  %v247_v52 = vld [vmem:[%s2729_s3 + $0x320] sm:$0xff]  ;;  %v249_v53 = vld [vmem:[%s2729_s3 + $0x328] sm:$0xff] }
  0x28   : > { %178 = vst [vmem:[%s2734_s4 + $0x88] sm:$0xff] %v177_v17  ;;  %v251_v54 = vld [vmem:[%s2729_s3 + $0x330] sm:$0xff]  ;;  %v253_v55 = vld [vmem:[%s2729_s3 + $0x338] sm:$0xff]  ;;  %v255_v56 = vld [vmem:[%s2729_s3 + $0x340] sm:$0xff] }
  0x29   : > { %180 = vst [vmem:[%s2734_s4 + $0x90] sm:$0xff] %v179_v18  ;;  %v257_v57 = vld [vmem:[%s2729_s3 + $0x348] sm:$0xff]  ;;  %v259_v58 = vld [vmem:[%s2729_s3 + $0x350] sm:$0xff]  ;;  %v261_v59 = vld [vmem:[%s2729_s3 + $0x358] sm:$0xff] }
  0x2a   : > { %182 = vst [vmem:[%s2734_s4 + $0x98] sm:$0xff] %v181_v19  ;;  %v263_v60 = vld [vmem:[%s2729_s3 + $0x360] sm:$0xff]  ;;  %v265_v61 = vld [vmem:[%s2729_s3 + $0x368] sm:$0xff]  ;;  %v267_v62 = vld [vmem:[%s2729_s3 + $0x370] sm:$0xff] }
  0x2b   : > { %184 = vst [vmem:[%s2734_s4 + $0xa0] sm:$0xff] %v183_v20  ;;  %v269_v63 = vld [vmem:[%s2729_s3 + $0x378] sm:$0xff]  ;;  %v271_v0 = vld [vmem:[%s2729_s3 + $0x400] sm:$0xff]  ;;  %v273_v1 = vld [vmem:[%s2729_s3 + $0x408] sm:$0xff] }
  0x2c   : > { %186 = vst [vmem:[%s2734_s4 + $0xa8] sm:$0xff] %v185_v21  ;;  %v275_v2 = vld [vmem:[%s2729_s3 + $0x410] sm:$0xff]  ;;  %v277_v3 = vld [vmem:[%s2729_s3 + $0x418] sm:$0xff]  ;;  %v279_v4 = vld [vmem:[%s2729_s3 + $0x420] sm:$0xff] }
  0x2d   : > { %188 = vst [vmem:[%s2734_s4 + $0xb0] sm:$0xff] %v187_v22  ;;  %v281_v5 = vld [vmem:[%s2729_s3 + $0x428] sm:$0xff]  ;;  %v283_v6 = vld [vmem:[%s2729_s3 + $0x430] sm:$0xff]  ;;  %v285_v7 = vld [vmem:[%s2729_s3 + $0x438] sm:$0xff] }
  0x2e   : > { %190 = vst [vmem:[%s2734_s4 + $0xb8] sm:$0xff] %v189_v23  ;;  %v287_v8 = vld [vmem:[%s2729_s3 + $0x440] sm:$0xff]  ;;  %v289_v9 = vld [vmem:[%s2729_s3 + $0x448] sm:$0xff]  ;;  %v291_v10 = vld [vmem:[%s2729_s3 + $0x450] sm:$0xff] }
  0x2f   : > { %192 = vst [vmem:[%s2734_s4 + $0xc0] sm:$0xff] %v191_v24  ;;  %v293_v11 = vld [vmem:[%s2729_s3 + $0x458] sm:$0xff]  ;;  %v295_v12 = vld [vmem:[%s2729_s3 + $0x460] sm:$0xff]  ;;  %v297_v13 = vld [vmem:[%s2729_s3 + $0x468] sm:$0xff] }
  0x30   : > { %194 = vst [vmem:[%s2734_s4 + $0xc8] sm:$0xff] %v193_v25  ;;  %v299_v14 = vld [vmem:[%s2729_s3 + $0x470] sm:$0xff]  ;;  %v301_v15 = vld [vmem:[%s2729_s3 + $0x478] sm:$0xff]  ;;  %v303_v16 = vld [vmem:[%s2729_s3 + $0x500] sm:$0xff] }
  0x31   : > { %196 = vst [vmem:[%s2734_s4 + $0xd0] sm:$0xff] %v195_v26  ;;  %v305_v17 = vld [vmem:[%s2729_s3 + $0x508] sm:$0xff]  ;;  %v307_v18 = vld [vmem:[%s2729_s3 + $0x510] sm:$0xff]  ;;  %v309_v19 = vld [vmem:[%s2729_s3 + $0x518] sm:$0xff] }
  0x32   : > { %198 = vst [vmem:[%s2734_s4 + $0xd8] sm:$0xff] %v197_v27  ;;  %v311_v20 = vld [vmem:[%s2729_s3 + $0x520] sm:$0xff]  ;;  %v313_v21 = vld [vmem:[%s2729_s3 + $0x528] sm:$0xff]  ;;  %v315_v22 = vld [vmem:[%s2729_s3 + $0x530] sm:$0xff] }
  0x33   : > { %200 = vst [vmem:[%s2734_s4 + $0xe0] sm:$0xff] %v199_v28  ;;  %v317_v23 = vld [vmem:[%s2729_s3 + $0x538] sm:$0xff]  ;;  %v319_v24 = vld [vmem:[%s2729_s3 + $0x540] sm:$0xff]  ;;  %v321_v25 = vld [vmem:[%s2729_s3 + $0x548] sm:$0xff] }
  0x34   : > { %202 = vst [vmem:[%s2734_s4 + $0xe8] sm:$0xff] %v201_v29  ;;  %v323_v26 = vld [vmem:[%s2729_s3 + $0x550] sm:$0xff]  ;;  %v325_v27 = vld [vmem:[%s2729_s3 + $0x558] sm:$0xff]  ;;  %v327_v28 = vld [vmem:[%s2729_s3 + $0x560] sm:$0xff] }
  0x35   : > { %204 = vst [vmem:[%s2734_s4 + $0xf0] sm:$0xff] %v203_v30  ;;  %v329_v29 = vld [vmem:[%s2729_s3 + $0x568] sm:$0xff]  ;;  %v331_v30 = vld [vmem:[%s2729_s3 + $0x570] sm:$0xff] }
  0x36   : > { %206 = vst [vmem:[%s2734_s4 + $0xf8] sm:$0xff] %v205_v31  ;;  %v333_v31 = vld [vmem:[%s2729_s3 + $0x578] sm:$0xff] }
  0x37   : > { %208 = vst [vmem:[%s2734_s4 + $0x100] sm:$0xff] %v207_v32  ;;  %v335_v32 = vld [vmem:[%s2729_s3 + $0x600] sm:$0xff] }
  0x38   : > { %210 = vst [vmem:[%s2734_s4 + $0x108] sm:$0xff] %v209_v33  ;;  %v337_v33 = vld [vmem:[%s2729_s3 + $0x608] sm:$0xff] }
  0x39   : > { %212 = vst [vmem:[%s2734_s4 + $0x110] sm:$0xff] %v211_v34  ;;  %v339_v34 = vld [vmem:[%s2729_s3 + $0x610] sm:$0xff] }
  0x3a   : > { %214 = vst [vmem:[%s2734_s4 + $0x118] sm:$0xff] %v213_v35  ;;  %v341_v35 = vld [vmem:[%s2729_s3 + $0x618] sm:$0xff] }
  0x3b   : > { %216 = vst [vmem:[%s2734_s4 + $0x120] sm:$0xff] %v215_v36  ;;  %v343_v36 = vld [vmem:[%s2729_s3 + $0x620] sm:$0xff] }
  0x3c   : > { %218 = vst [vmem:[%s2734_s4 + $0x128] sm:$0xff] %v217_v37  ;;  %v345_v37 = vld [vmem:[%s2729_s3 + $0x628] sm:$0xff] }
  0x3d   : > { %220 = vst [vmem:[%s2734_s4 + $0x130] sm:$0xff] %v219_v38  ;;  %v347_v38 = vld [vmem:[%s2729_s3 + $0x630] sm:$0xff] }
  0x3e   : > { %222 = vst [vmem:[%s2734_s4 + $0x138] sm:$0xff] %v221_v39  ;;  %v349_v39 = vld [vmem:[%s2729_s3 + $0x638] sm:$0xff] }
  0x3f   : > { %224 = vst [vmem:[%s2734_s4 + $0x140] sm:$0xff] %v223_v40  ;;  %v351_v40 = vld [vmem:[%s2729_s3 + $0x640] sm:$0xff] }
  0x40   : > { %226 = vst [vmem:[%s2734_s4 + $0x148] sm:$0xff] %v225_v41  ;;  %v353_v41 = vld [vmem:[%s2729_s3 + $0x648] sm:$0xff] }
  0x41   : > { %228 = vst [vmem:[%s2734_s4 + $0x150] sm:$0xff] %v227_v42  ;;  %v355_v42 = vld [vmem:[%s2729_s3 + $0x650] sm:$0xff] }
  0x42   : > { %230 = vst [vmem:[%s2734_s4 + $0x158] sm:$0xff] %v229_v43  ;;  %v357_v43 = vld [vmem:[%s2729_s3 + $0x658] sm:$0xff] }
  0x43   : > { %232 = vst [vmem:[%s2734_s4 + $0x160] sm:$0xff] %v231_v44  ;;  %v359_v44 = vld [vmem:[%s2729_s3 + $0x660] sm:$0xff] }
  0x44   : > { %234 = vst [vmem:[%s2734_s4 + $0x168] sm:$0xff] %v233_v45  ;;  %v361_v45 = vld [vmem:[%s2729_s3 + $0x668] sm:$0xff] }
  0x45   : > { %236 = vst [vmem:[%s2734_s4 + $0x170] sm:$0xff] %v235_v46  ;;  %v363_v46 = vld [vmem:[%s2729_s3 + $0x670] sm:$0xff] }
  0x46   : > { %238 = vst [vmem:[%s2734_s4 + $0x178] sm:$0xff] %v237_v47  ;;  %v365_v47 = vld [vmem:[%s2729_s3 + $0x678] sm:$0xff] }
  0x47   : > { %240 = vst [vmem:[%s2734_s4 + $0x180] sm:$0xff] %v239_v48  ;;  %v367_v48 = vld [vmem:[%s2729_s3 + $0x700] sm:$0xff] }
  0x48   : > { %242 = vst [vmem:[%s2734_s4 + $0x188] sm:$0xff] %v241_v49  ;;  %v369_v49 = vld [vmem:[%s2729_s3 + $0x708] sm:$0xff] }
  0x49   : > { %244 = vst [vmem:[%s2734_s4 + $0x190] sm:$0xff] %v243_v50  ;;  %v371_v50 = vld [vmem:[%s2729_s3 + $0x710] sm:$0xff] }
  0x4a   : > { %246 = vst [vmem:[%s2734_s4 + $0x198] sm:$0xff] %v245_v51  ;;  %v373_v51 = vld [vmem:[%s2729_s3 + $0x718] sm:$0xff] }
  0x4b   : > { %248 = vst [vmem:[%s2734_s4 + $0x1a0] sm:$0xff] %v247_v52  ;;  %v375_v52 = vld [vmem:[%s2729_s3 + $0x720] sm:$0xff] }
  0x4c   : > { %250 = vst [vmem:[%s2734_s4 + $0x1a8] sm:$0xff] %v249_v53  ;;  %v377_v53 = vld [vmem:[%s2729_s3 + $0x728] sm:$0xff] }
  0x4d   : > { %252 = vst [vmem:[%s2734_s4 + $0x1b0] sm:$0xff] %v251_v54  ;;  %v379_v54 = vld [vmem:[%s2729_s3 + $0x730] sm:$0xff] }
  0x4e   : > { %254 = vst [vmem:[%s2734_s4 + $0x1b8] sm:$0xff] %v253_v55  ;;  %v381_v55 = vld [vmem:[%s2729_s3 + $0x738] sm:$0xff] }
  0x4f   : > { %256 = vst [vmem:[%s2734_s4 + $0x1c0] sm:$0xff] %v255_v56  ;;  %v383_v56 = vld [vmem:[%s2729_s3 + $0x740] sm:$0xff] }
  0x50   : > { %258 = vst [vmem:[%s2734_s4 + $0x1c8] sm:$0xff] %v257_v57  ;;  %v385_v57 = vld [vmem:[%s2729_s3 + $0x748] sm:$0xff] }
  0x51   : > { %260 = vst [vmem:[%s2734_s4 + $0x1d0] sm:$0xff] %v259_v58  ;;  %v387_v58 = vld [vmem:[%s2729_s3 + $0x750] sm:$0xff] }
  0x52   : > { %262 = vst [vmem:[%s2734_s4 + $0x1d8] sm:$0xff] %v261_v59  ;;  %v389_v59 = vld [vmem:[%s2729_s3 + $0x758] sm:$0xff] }
  0x53   : > { %264 = vst [vmem:[%s2734_s4 + $0x1e0] sm:$0xff] %v263_v60  ;;  %v391_v60 = vld [vmem:[%s2729_s3 + $0x760] sm:$0xff] }
  0x54   : > { %266 = vst [vmem:[%s2734_s4 + $0x1e8] sm:$0xff] %v265_v61  ;;  %v393_v61 = vld [vmem:[%s2729_s3 + $0x768] sm:$0xff] }
  0x55   : > { %268 = vst [vmem:[%s2734_s4 + $0x1f0] sm:$0xff] %v267_v62  ;;  %v395_v62 = vld [vmem:[%s2729_s3 + $0x770] sm:$0xff] }
  0x56   : > { %270 = vst [vmem:[%s2734_s4 + $0x1f8] sm:$0xff] %v269_v63  ;;  %v397_v63 = vld [vmem:[%s2729_s3 + $0x778] sm:$0xff] }
  0x57   : > { %272 = vst [vmem:[%s2734_s4 + $0x200] sm:$0xff] %v271_v0  ;;  %v399_v0 = vld [vmem:[%s2729_s3 + $0x800] sm:$0xff] }
  0x58   : > { %274 = vst [vmem:[%s2734_s4 + $0x208] sm:$0xff] %v273_v1  ;;  %v401_v1 = vld [vmem:[%s2729_s3 + $0x808] sm:$0xff] }
  0x59   : > { %276 = vst [vmem:[%s2734_s4 + $0x210] sm:$0xff] %v275_v2  ;;  %v403_v2 = vld [vmem:[%s2729_s3 + $0x810] sm:$0xff] }
  0x5a   : > { %278 = vst [vmem:[%s2734_s4 + $0x218] sm:$0xff] %v277_v3  ;;  %v405_v3 = vld [vmem:[%s2729_s3 + $0x818] sm:$0xff] }
  0x5b   : > { %280 = vst [vmem:[%s2734_s4 + $0x220] sm:$0xff] %v279_v4  ;;  %v407_v4 = vld [vmem:[%s2729_s3 + $0x820] sm:$0xff] }
  0x5c   : > { %282 = vst [vmem:[%s2734_s4 + $0x228] sm:$0xff] %v281_v5  ;;  %v409_v5 = vld [vmem:[%s2729_s3 + $0x828] sm:$0xff] }
  0x5d   : > { %284 = vst [vmem:[%s2734_s4 + $0x230] sm:$0xff] %v283_v6  ;;  %v411_v6 = vld [vmem:[%s2729_s3 + $0x830] sm:$0xff] }
  0x5e   : > { %286 = vst [vmem:[%s2734_s4 + $0x238] sm:$0xff] %v285_v7  ;;  %v413_v7 = vld [vmem:[%s2729_s3 + $0x838] sm:$0xff] }
  0x5f   : > { %288 = vst [vmem:[%s2734_s4 + $0x240] sm:$0xff] %v287_v8  ;;  %v415_v8 = vld [vmem:[%s2729_s3 + $0x840] sm:$0xff] }
  0x60   : > { %290 = vst [vmem:[%s2734_s4 + $0x248] sm:$0xff] %v289_v9  ;;  %v417_v9 = vld [vmem:[%s2729_s3 + $0x848] sm:$0xff] }
  0x61   : > { %292 = vst [vmem:[%s2734_s4 + $0x250] sm:$0xff] %v291_v10  ;;  %v419_v10 = vld [vmem:[%s2729_s3 + $0x850] sm:$0xff] }
  0x62   : > { %294 = vst [vmem:[%s2734_s4 + $0x258] sm:$0xff] %v293_v11  ;;  %v421_v11 = vld [vmem:[%s2729_s3 + $0x858] sm:$0xff] }
  0x63   : > { %296 = vst [vmem:[%s2734_s4 + $0x260] sm:$0xff] %v295_v12  ;;  %v423_v12 = vld [vmem:[%s2729_s3 + $0x860] sm:$0xff] }
  0x64   : > { %298 = vst [vmem:[%s2734_s4 + $0x268] sm:$0xff] %v297_v13  ;;  %v425_v13 = vld [vmem:[%s2729_s3 + $0x868] sm:$0xff] }
  0x65   : > { %300 = vst [vmem:[%s2734_s4 + $0x270] sm:$0xff] %v299_v14  ;;  %v427_v14 = vld [vmem:[%s2729_s3 + $0x870] sm:$0xff] }
  0x66   : > { %302 = vst [vmem:[%s2734_s4 + $0x278] sm:$0xff] %v301_v15  ;;  %v429_v15 = vld [vmem:[%s2729_s3 + $0x878] sm:$0xff] }
  0x67   : > { %304 = vst [vmem:[%s2734_s4 + $0x280] sm:$0xff] %v303_v16  ;;  %v431_v16 = vld [vmem:[%s2729_s3 + $0x900] sm:$0xff] }
  0x68   : > { %306 = vst [vmem:[%s2734_s4 + $0x288] sm:$0xff] %v305_v17  ;;  %v433_v17 = vld [vmem:[%s2729_s3 + $0x908] sm:$0xff] }
  0x69   : > { %308 = vst [vmem:[%s2734_s4 + $0x290] sm:$0xff] %v307_v18  ;;  %v435_v18 = vld [vmem:[%s2729_s3 + $0x910] sm:$0xff] }
  0x6a   : > { %310 = vst [vmem:[%s2734_s4 + $0x298] sm:$0xff] %v309_v19  ;;  %v437_v19 = vld [vmem:[%s2729_s3 + $0x918] sm:$0xff] }
  0x6b   : > { %312 = vst [vmem:[%s2734_s4 + $0x2a0] sm:$0xff] %v311_v20  ;;  %v439_v20 = vld [vmem:[%s2729_s3 + $0x920] sm:$0xff] }
  0x6c   : > { %314 = vst [vmem:[%s2734_s4 + $0x2a8] sm:$0xff] %v313_v21  ;;  %v441_v21 = vld [vmem:[%s2729_s3 + $0x928] sm:$0xff] }
  0x6d   : > { %316 = vst [vmem:[%s2734_s4 + $0x2b0] sm:$0xff] %v315_v22  ;;  %v443_v22 = vld [vmem:[%s2729_s3 + $0x930] sm:$0xff] }
  0x6e   : > { %318 = vst [vmem:[%s2734_s4 + $0x2b8] sm:$0xff] %v317_v23  ;;  %v445_v23 = vld [vmem:[%s2729_s3 + $0x938] sm:$0xff] }
  0x6f   : > { %320 = vst [vmem:[%s2734_s4 + $0x2c0] sm:$0xff] %v319_v24  ;;  %v447_v24 = vld [vmem:[%s2729_s3 + $0x940] sm:$0xff] }
  0x70   : > { %322 = vst [vmem:[%s2734_s4 + $0x2c8] sm:$0xff] %v321_v25  ;;  %v449_v25 = vld [vmem:[%s2729_s3 + $0x948] sm:$0xff] }
  0x71   : > { %324 = vst [vmem:[%s2734_s4 + $0x2d0] sm:$0xff] %v323_v26  ;;  %v451_v26 = vld [vmem:[%s2729_s3 + $0x950] sm:$0xff] }
  0x72   : > { %326 = vst [vmem:[%s2734_s4 + $0x2d8] sm:$0xff] %v325_v27  ;;  %v453_v27 = vld [vmem:[%s2729_s3 + $0x958] sm:$0xff] }
  0x73   : > { %328 = vst [vmem:[%s2734_s4 + $0x2e0] sm:$0xff] %v327_v28  ;;  %v455_v28 = vld [vmem:[%s2729_s3 + $0x960] sm:$0xff] }
  0x74   : > { %330 = vst [vmem:[%s2734_s4 + $0x2e8] sm:$0xff] %v329_v29  ;;  %v457_v29 = vld [vmem:[%s2729_s3 + $0x968] sm:$0xff] }
  0x75   : > { %332 = vst [vmem:[%s2734_s4 + $0x2f0] sm:$0xff] %v331_v30  ;;  %v459_v30 = vld [vmem:[%s2729_s3 + $0x970] sm:$0xff] }
  0x76   : > { %334 = vst [vmem:[%s2734_s4 + $0x2f8] sm:$0xff] %v333_v31  ;;  %v461_v31 = vld [vmem:[%s2729_s3 + $0x978] sm:$0xff] }
  0x77   : > { %336 = vst [vmem:[%s2734_s4 + $0x300] sm:$0xff] %v335_v32  ;;  %v463_v32 = vld [vmem:[%s2729_s3 + $0xa00] sm:$0xff] }
  0x78   : > { %338 = vst [vmem:[%s2734_s4 + $0x308] sm:$0xff] %v337_v33  ;;  %v465_v33 = vld [vmem:[%s2729_s3 + $0xa08] sm:$0xff] }
  0x79   : > { %340 = vst [vmem:[%s2734_s4 + $0x310] sm:$0xff] %v339_v34  ;;  %v467_v34 = vld [vmem:[%s2729_s3 + $0xa10] sm:$0xff] }
  0x7a   : > { %342 = vst [vmem:[%s2734_s4 + $0x318] sm:$0xff] %v341_v35  ;;  %v469_v35 = vld [vmem:[%s2729_s3 + $0xa18] sm:$0xff] }
  0x7b   : > { %344 = vst [vmem:[%s2734_s4 + $0x320] sm:$0xff] %v343_v36  ;;  %v471_v36 = vld [vmem:[%s2729_s3 + $0xa20] sm:$0xff] }
  0x7c   : > { %346 = vst [vmem:[%s2734_s4 + $0x328] sm:$0xff] %v345_v37  ;;  %v473_v37 = vld [vmem:[%s2729_s3 + $0xa28] sm:$0xff] }
  0x7d   : > { %348 = vst [vmem:[%s2734_s4 + $0x330] sm:$0xff] %v347_v38  ;;  %v475_v38 = vld [vmem:[%s2729_s3 + $0xa30] sm:$0xff] }
  0x7e   : > { %350 = vst [vmem:[%s2734_s4 + $0x338] sm:$0xff] %v349_v39  ;;  %v477_v39 = vld [vmem:[%s2729_s3 + $0xa38] sm:$0xff] }
  0x7f   : > { %352 = vst [vmem:[%s2734_s4 + $0x340] sm:$0xff] %v351_v40  ;;  %v479_v40 = vld [vmem:[%s2729_s3 + $0xa40] sm:$0xff] }
  0x80   : > { %354 = vst [vmem:[%s2734_s4 + $0x348] sm:$0xff] %v353_v41  ;;  %v481_v41 = vld [vmem:[%s2729_s3 + $0xa48] sm:$0xff] }
  0x81   : > { %356 = vst [vmem:[%s2734_s4 + $0x350] sm:$0xff] %v355_v42  ;;  %v483_v42 = vld [vmem:[%s2729_s3 + $0xa50] sm:$0xff] }
  0x82   : > { %358 = vst [vmem:[%s2734_s4 + $0x358] sm:$0xff] %v357_v43  ;;  %v485_v43 = vld [vmem:[%s2729_s3 + $0xa58] sm:$0xff] }
  0x83   : > { %360 = vst [vmem:[%s2734_s4 + $0x360] sm:$0xff] %v359_v44  ;;  %v487_v44 = vld [vmem:[%s2729_s3 + $0xa60] sm:$0xff] }
  0x84   : > { %362 = vst [vmem:[%s2734_s4 + $0x368] sm:$0xff] %v361_v45  ;;  %v489_v45 = vld [vmem:[%s2729_s3 + $0xa68] sm:$0xff] }
  0x85   : > { %364 = vst [vmem:[%s2734_s4 + $0x370] sm:$0xff] %v363_v46  ;;  %v491_v46 = vld [vmem:[%s2729_s3 + $0xa70] sm:$0xff] }
  0x86   : > { %366 = vst [vmem:[%s2734_s4 + $0x378] sm:$0xff] %v365_v47  ;;  %v493_v47 = vld [vmem:[%s2729_s3 + $0xa78] sm:$0xff] }
  0x87   : > { %368 = vst [vmem:[%s2734_s4 + $0x380] sm:$0xff] %v367_v48  ;;  %v495_v48 = vld [vmem:[%s2729_s3 + $0xb00] sm:$0xff] }
  0x88   : > { %370 = vst [vmem:[%s2734_s4 + $0x388] sm:$0xff] %v369_v49  ;;  %v497_v49 = vld [vmem:[%s2729_s3 + $0xb08] sm:$0xff] }
  0x89   : > { %372 = vst [vmem:[%s2734_s4 + $0x390] sm:$0xff] %v371_v50  ;;  %v499_v50 = vld [vmem:[%s2729_s3 + $0xb10] sm:$0xff] }
  0x8a   : > { %374 = vst [vmem:[%s2734_s4 + $0x398] sm:$0xff] %v373_v51  ;;  %v501_v51 = vld [vmem:[%s2729_s3 + $0xb18] sm:$0xff] }
  0x8b   : > { %376 = vst [vmem:[%s2734_s4 + $0x3a0] sm:$0xff] %v375_v52  ;;  %v503_v52 = vld [vmem:[%s2729_s3 + $0xb20] sm:$0xff] }
  0x8c   : > { %378 = vst [vmem:[%s2734_s4 + $0x3a8] sm:$0xff] %v377_v53  ;;  %v505_v53 = vld [vmem:[%s2729_s3 + $0xb28] sm:$0xff] }
  0x8d   : > { %380 = vst [vmem:[%s2734_s4 + $0x3b0] sm:$0xff] %v379_v54  ;;  %v507_v54 = vld [vmem:[%s2729_s3 + $0xb30] sm:$0xff] }
  0x8e   : > { %382 = vst [vmem:[%s2734_s4 + $0x3b8] sm:$0xff] %v381_v55  ;;  %v509_v55 = vld [vmem:[%s2729_s3 + $0xb38] sm:$0xff] }
  0x8f   : > { %384 = vst [vmem:[%s2734_s4 + $0x3c0] sm:$0xff] %v383_v56  ;;  %v511_v56 = vld [vmem:[%s2729_s3 + $0xb40] sm:$0xff] }
  0x90   : > { %386 = vst [vmem:[%s2734_s4 + $0x3c8] sm:$0xff] %v385_v57  ;;  %v513_v57 = vld [vmem:[%s2729_s3 + $0xb48] sm:$0xff] }
  0x91   : > { %388 = vst [vmem:[%s2734_s4 + $0x3d0] sm:$0xff] %v387_v58  ;;  %v515_v58 = vld [vmem:[%s2729_s3 + $0xb50] sm:$0xff] }
  0x92   : > { %390 = vst [vmem:[%s2734_s4 + $0x3d8] sm:$0xff] %v389_v59  ;;  %v517_v59 = vld [vmem:[%s2729_s3 + $0xb58] sm:$0xff] }
  0x93   : > { %392 = vst [vmem:[%s2734_s4 + $0x3e0] sm:$0xff] %v391_v60  ;;  %v519_v60 = vld [vmem:[%s2729_s3 + $0xb60] sm:$0xff] }
  0x94   : > { %394 = vst [vmem:[%s2734_s4 + $0x3e8] sm:$0xff] %v393_v61  ;;  %v521_v61 = vld [vmem:[%s2729_s3 + $0xb68] sm:$0xff] }
  0x95   : > { %396 = vst [vmem:[%s2734_s4 + $0x3f0] sm:$0xff] %v395_v62  ;;  %v523_v62 = vld [vmem:[%s2729_s3 + $0xb70] sm:$0xff] }
  0x96   : > { %398 = vst [vmem:[%s2734_s4 + $0x3f8] sm:$0xff] %v397_v63  ;;  %v525_v63 = vld [vmem:[%s2729_s3 + $0xb78] sm:$0xff] }
  0x97   : > { %400 = vst [vmem:[%s2734_s4 + $0x400] sm:$0xff] %v399_v0  ;;  %v527_v0 = vld [vmem:[%s2729_s3 + $0xc00] sm:$0xff] }
  0x98   : > { %402 = vst [vmem:[%s2734_s4 + $0x408] sm:$0xff] %v401_v1  ;;  %v529_v1 = vld [vmem:[%s2729_s3 + $0xc08] sm:$0xff] }
  0x99   : > { %404 = vst [vmem:[%s2734_s4 + $0x410] sm:$0xff] %v403_v2  ;;  %v531_v2 = vld [vmem:[%s2729_s3 + $0xc10] sm:$0xff] }
  0x9a   : > { %406 = vst [vmem:[%s2734_s4 + $0x418] sm:$0xff] %v405_v3  ;;  %v533_v3 = vld [vmem:[%s2729_s3 + $0xc18] sm:$0xff] }
  0x9b   : > { %408 = vst [vmem:[%s2734_s4 + $0x420] sm:$0xff] %v407_v4  ;;  %v535_v4 = vld [vmem:[%s2729_s3 + $0xc20] sm:$0xff] }
  0x9c   : > { %410 = vst [vmem:[%s2734_s4 + $0x428] sm:$0xff] %v409_v5  ;;  %v537_v5 = vld [vmem:[%s2729_s3 + $0xc28] sm:$0xff] }
  0x9d   : > { %412 = vst [vmem:[%s2734_s4 + $0x430] sm:$0xff] %v411_v6  ;;  %v539_v6 = vld [vmem:[%s2729_s3 + $0xc30] sm:$0xff] }
  0x9e   : > { %414 = vst [vmem:[%s2734_s4 + $0x438] sm:$0xff] %v413_v7  ;;  %v541_v7 = vld [vmem:[%s2729_s3 + $0xc38] sm:$0xff] }
  0x9f   : > { %416 = vst [vmem:[%s2734_s4 + $0x440] sm:$0xff] %v415_v8  ;;  %v543_v8 = vld [vmem:[%s2729_s3 + $0xc40] sm:$0xff] }
  0xa0   : > { %418 = vst [vmem:[%s2734_s4 + $0x448] sm:$0xff] %v417_v9  ;;  %v545_v9 = vld [vmem:[%s2729_s3 + $0xc48] sm:$0xff] }
  0xa1   : > { %420 = vst [vmem:[%s2734_s4 + $0x450] sm:$0xff] %v419_v10  ;;  %v547_v10 = vld [vmem:[%s2729_s3 + $0xc50] sm:$0xff] }
  0xa2   : > { %422 = vst [vmem:[%s2734_s4 + $0x458] sm:$0xff] %v421_v11  ;;  %v549_v11 = vld [vmem:[%s2729_s3 + $0xc58] sm:$0xff] }
  0xa3   : > { %424 = vst [vmem:[%s2734_s4 + $0x460] sm:$0xff] %v423_v12  ;;  %v551_v12 = vld [vmem:[%s2729_s3 + $0xc60] sm:$0xff] }
  0xa4   : > { %426 = vst [vmem:[%s2734_s4 + $0x468] sm:$0xff] %v425_v13  ;;  %v553_v13 = vld [vmem:[%s2729_s3 + $0xc68] sm:$0xff] }
  0xa5   : > { %428 = vst [vmem:[%s2734_s4 + $0x470] sm:$0xff] %v427_v14  ;;  %v555_v14 = vld [vmem:[%s2729_s3 + $0xc70] sm:$0xff] }
  0xa6   : > { %430 = vst [vmem:[%s2734_s4 + $0x478] sm:$0xff] %v429_v15  ;;  %v557_v15 = vld [vmem:[%s2729_s3 + $0xc78] sm:$0xff] }
  0xa7   : > { %432 = vst [vmem:[%s2734_s4 + $0x480] sm:$0xff] %v431_v16  ;;  %v559_v16 = vld [vmem:[%s2729_s3 + $0xd00] sm:$0xff] }
  0xa8   : > { %434 = vst [vmem:[%s2734_s4 + $0x488] sm:$0xff] %v433_v17  ;;  %v561_v17 = vld [vmem:[%s2729_s3 + $0xd08] sm:$0xff] }
  0xa9   : > { %436 = vst [vmem:[%s2734_s4 + $0x490] sm:$0xff] %v435_v18  ;;  %v563_v18 = vld [vmem:[%s2729_s3 + $0xd10] sm:$0xff] }
  0xaa   : > { %438 = vst [vmem:[%s2734_s4 + $0x498] sm:$0xff] %v437_v19  ;;  %v565_v19 = vld [vmem:[%s2729_s3 + $0xd18] sm:$0xff] }
  0xab   : > { %440 = vst [vmem:[%s2734_s4 + $0x4a0] sm:$0xff] %v439_v20  ;;  %v567_v20 = vld [vmem:[%s2729_s3 + $0xd20] sm:$0xff] }
  0xac   : > { %442 = vst [vmem:[%s2734_s4 + $0x4a8] sm:$0xff] %v441_v21  ;;  %v569_v21 = vld [vmem:[%s2729_s3 + $0xd28] sm:$0xff] }
  0xad   : > { %444 = vst [vmem:[%s2734_s4 + $0x4b0] sm:$0xff] %v443_v22  ;;  %v571_v22 = vld [vmem:[%s2729_s3 + $0xd30] sm:$0xff] }
  0xae   : > { %446 = vst [vmem:[%s2734_s4 + $0x4b8] sm:$0xff] %v445_v23  ;;  %v573_v23 = vld [vmem:[%s2729_s3 + $0xd38] sm:$0xff] }
  0xaf   : > { %448 = vst [vmem:[%s2734_s4 + $0x4c0] sm:$0xff] %v447_v24  ;;  %v575_v24 = vld [vmem:[%s2729_s3 + $0xd40] sm:$0xff] }
  0xb0   : > { %450 = vst [vmem:[%s2734_s4 + $0x4c8] sm:$0xff] %v449_v25  ;;  %v577_v25 = vld [vmem:[%s2729_s3 + $0xd48] sm:$0xff] }
  0xb1   : > { %452 = vst [vmem:[%s2734_s4 + $0x4d0] sm:$0xff] %v451_v26  ;;  %v579_v26 = vld [vmem:[%s2729_s3 + $0xd50] sm:$0xff] }
  0xb2   : > { %454 = vst [vmem:[%s2734_s4 + $0x4d8] sm:$0xff] %v453_v27  ;;  %v581_v27 = vld [vmem:[%s2729_s3 + $0xd58] sm:$0xff] }
  0xb3   : > { %456 = vst [vmem:[%s2734_s4 + $0x4e0] sm:$0xff] %v455_v28  ;;  %v583_v28 = vld [vmem:[%s2729_s3 + $0xd60] sm:$0xff] }
  0xb4   : > { %458 = vst [vmem:[%s2734_s4 + $0x4e8] sm:$0xff] %v457_v29  ;;  %v585_v29 = vld [vmem:[%s2729_s3 + $0xd68] sm:$0xff] }
  0xb5   : > { %460 = vst [vmem:[%s2734_s4 + $0x4f0] sm:$0xff] %v459_v30  ;;  %v587_v30 = vld [vmem:[%s2729_s3 + $0xd70] sm:$0xff] }
  0xb6   : > { %462 = vst [vmem:[%s2734_s4 + $0x4f8] sm:$0xff] %v461_v31  ;;  %v589_v31 = vld [vmem:[%s2729_s3 + $0xd78] sm:$0xff] }
  0xb7   : > { %464 = vst [vmem:[%s2734_s4 + $0x500] sm:$0xff] %v463_v32  ;;  %v591_v32 = vld [vmem:[%s2729_s3 + $0xe00] sm:$0xff] }
  0xb8   : > { %466 = vst [vmem:[%s2734_s4 + $0x508] sm:$0xff] %v465_v33  ;;  %v593_v33 = vld [vmem:[%s2729_s3 + $0xe08] sm:$0xff] }
  0xb9   : > { %468 = vst [vmem:[%s2734_s4 + $0x510] sm:$0xff] %v467_v34  ;;  %v595_v34 = vld [vmem:[%s2729_s3 + $0xe10] sm:$0xff] }
  0xba   : > { %470 = vst [vmem:[%s2734_s4 + $0x518] sm:$0xff] %v469_v35  ;;  %v597_v35 = vld [vmem:[%s2729_s3 + $0xe18] sm:$0xff] }
  0xbb   : > { %472 = vst [vmem:[%s2734_s4 + $0x520] sm:$0xff] %v471_v36  ;;  %v599_v36 = vld [vmem:[%s2729_s3 + $0xe20] sm:$0xff] }
  0xbc   : > { %474 = vst [vmem:[%s2734_s4 + $0x528] sm:$0xff] %v473_v37  ;;  %v601_v37 = vld [vmem:[%s2729_s3 + $0xe28] sm:$0xff] }
  0xbd   : > { %476 = vst [vmem:[%s2734_s4 + $0x530] sm:$0xff] %v475_v38  ;;  %v603_v38 = vld [vmem:[%s2729_s3 + $0xe30] sm:$0xff] }
  0xbe   : > { %478 = vst [vmem:[%s2734_s4 + $0x538] sm:$0xff] %v477_v39  ;;  %v605_v39 = vld [vmem:[%s2729_s3 + $0xe38] sm:$0xff] }
  0xbf   : > { %480 = vst [vmem:[%s2734_s4 + $0x540] sm:$0xff] %v479_v40  ;;  %v607_v40 = vld [vmem:[%s2729_s3 + $0xe40] sm:$0xff] }
  0xc0   : > { %482 = vst [vmem:[%s2734_s4 + $0x548] sm:$0xff] %v481_v41  ;;  %v609_v41 = vld [vmem:[%s2729_s3 + $0xe48] sm:$0xff] }
  0xc1   : > { %484 = vst [vmem:[%s2734_s4 + $0x550] sm:$0xff] %v483_v42  ;;  %v611_v42 = vld [vmem:[%s2729_s3 + $0xe50] sm:$0xff] }
  0xc2   : > { %486 = vst [vmem:[%s2734_s4 + $0x558] sm:$0xff] %v485_v43  ;;  %v613_v43 = vld [vmem:[%s2729_s3 + $0xe58] sm:$0xff] }
  0xc3   : > { %488 = vst [vmem:[%s2734_s4 + $0x560] sm:$0xff] %v487_v44  ;;  %v615_v44 = vld [vmem:[%s2729_s3 + $0xe60] sm:$0xff] }
  0xc4   : > { %490 = vst [vmem:[%s2734_s4 + $0x568] sm:$0xff] %v489_v45  ;;  %v617_v45 = vld [vmem:[%s2729_s3 + $0xe68] sm:$0xff] }
  0xc5   : > { %492 = vst [vmem:[%s2734_s4 + $0x570] sm:$0xff] %v491_v46  ;;  %v619_v46 = vld [vmem:[%s2729_s3 + $0xe70] sm:$0xff] }
  0xc6   : > { %494 = vst [vmem:[%s2734_s4 + $0x578] sm:$0xff] %v493_v47  ;;  %v621_v47 = vld [vmem:[%s2729_s3 + $0xe78] sm:$0xff] }
  0xc7   : > { %496 = vst [vmem:[%s2734_s4 + $0x580] sm:$0xff] %v495_v48  ;;  %v623_v48 = vld [vmem:[%s2729_s3 + $0xf00] sm:$0xff] }
  0xc8   : > { %498 = vst [vmem:[%s2734_s4 + $0x588] sm:$0xff] %v497_v49  ;;  %v625_v49 = vld [vmem:[%s2729_s3 + $0xf08] sm:$0xff] }
  0xc9   : > { %500 = vst [vmem:[%s2734_s4 + $0x590] sm:$0xff] %v499_v50  ;;  %v627_v50 = vld [vmem:[%s2729_s3 + $0xf10] sm:$0xff] }
  0xca   : > { %502 = vst [vmem:[%s2734_s4 + $0x598] sm:$0xff] %v501_v51  ;;  %v629_v51 = vld [vmem:[%s2729_s3 + $0xf18] sm:$0xff] }
  0xcb   : > { %504 = vst [vmem:[%s2734_s4 + $0x5a0] sm:$0xff] %v503_v52  ;;  %v631_v52 = vld [vmem:[%s2729_s3 + $0xf20] sm:$0xff] }
  0xcc   : > { %506 = vst [vmem:[%s2734_s4 + $0x5a8] sm:$0xff] %v505_v53  ;;  %v633_v53 = vld [vmem:[%s2729_s3 + $0xf28] sm:$0xff] }
  0xcd   : > { %508 = vst [vmem:[%s2734_s4 + $0x5b0] sm:$0xff] %v507_v54  ;;  %v635_v54 = vld [vmem:[%s2729_s3 + $0xf30] sm:$0xff] }
  0xce   : > { %510 = vst [vmem:[%s2734_s4 + $0x5b8] sm:$0xff] %v509_v55  ;;  %v637_v55 = vld [vmem:[%s2729_s3 + $0xf38] sm:$0xff] }
  0xcf   : > { %512 = vst [vmem:[%s2734_s4 + $0x5c0] sm:$0xff] %v511_v56  ;;  %v639_v56 = vld [vmem:[%s2729_s3 + $0xf40] sm:$0xff] }
  0xd0   : > { %514 = vst [vmem:[%s2734_s4 + $0x5c8] sm:$0xff] %v513_v57  ;;  %v641_v57 = vld [vmem:[%s2729_s3 + $0xf48] sm:$0xff] }
  0xd1   : > { %516 = vst [vmem:[%s2734_s4 + $0x5d0] sm:$0xff] %v515_v58  ;;  %v643_v58 = vld [vmem:[%s2729_s3 + $0xf50] sm:$0xff] }
  0xd2   : > { %518 = vst [vmem:[%s2734_s4 + $0x5d8] sm:$0xff] %v517_v59  ;;  %v645_v59 = vld [vmem:[%s2729_s3 + $0xf58] sm:$0xff] }
  0xd3   : > { %520 = vst [vmem:[%s2734_s4 + $0x5e0] sm:$0xff] %v519_v60  ;;  %v647_v60 = vld [vmem:[%s2729_s3 + $0xf60] sm:$0xff] }
  0xd4   : > { %522 = vst [vmem:[%s2734_s4 + $0x5e8] sm:$0xff] %v521_v61  ;;  %v649_v61 = vld [vmem:[%s2729_s3 + $0xf68] sm:$0xff] }
  0xd5   : > { %524 = vst [vmem:[%s2734_s4 + $0x5f0] sm:$0xff] %v523_v62  ;;  %v651_v62 = vld [vmem:[%s2729_s3 + $0xf70] sm:$0xff] }
  0xd6   : > { %526 = vst [vmem:[%s2734_s4 + $0x5f8] sm:$0xff] %v525_v63  ;;  %v653_v63 = vld [vmem:[%s2729_s3 + $0xf78] sm:$0xff] }
  0xd7   : > { %528 = vst [vmem:[%s2734_s4 + $0x600] sm:$0xff] %v527_v0  ;;  %v655_v0 = vld [vmem:[%s2729_s3 + $0x1000] sm:$0xff] }
  0xd8   : > { %530 = vst [vmem:[%s2734_s4 + $0x608] sm:$0xff] %v529_v1  ;;  %v657_v1 = vld [vmem:[%s2729_s3 + $0x1008] sm:$0xff] }
  0xd9   : > { %532 = vst [vmem:[%s2734_s4 + $0x610] sm:$0xff] %v531_v2  ;;  %v659_v2 = vld [vmem:[%s2729_s3 + $0x1010] sm:$0xff] }
  0xda   : > { %534 = vst [vmem:[%s2734_s4 + $0x618] sm:$0xff] %v533_v3  ;;  %v661_v3 = vld [vmem:[%s2729_s3 + $0x1018] sm:$0xff] }
  0xdb   : > { %536 = vst [vmem:[%s2734_s4 + $0x620] sm:$0xff] %v535_v4  ;;  %v663_v4 = vld [vmem:[%s2729_s3 + $0x1020] sm:$0xff] }
  0xdc   : > { %538 = vst [vmem:[%s2734_s4 + $0x628] sm:$0xff] %v537_v5  ;;  %v665_v5 = vld [vmem:[%s2729_s3 + $0x1028] sm:$0xff] }
  0xdd   : > { %540 = vst [vmem:[%s2734_s4 + $0x630] sm:$0xff] %v539_v6  ;;  %v667_v6 = vld [vmem:[%s2729_s3 + $0x1030] sm:$0xff] }
  0xde   : > { %542 = vst [vmem:[%s2734_s4 + $0x638] sm:$0xff] %v541_v7  ;;  %v669_v7 = vld [vmem:[%s2729_s3 + $0x1038] sm:$0xff] }
  0xdf   : > { %544 = vst [vmem:[%s2734_s4 + $0x640] sm:$0xff] %v543_v8  ;;  %v671_v8 = vld [vmem:[%s2729_s3 + $0x1040] sm:$0xff] }
  0xe0   : > { %546 = vst [vmem:[%s2734_s4 + $0x648] sm:$0xff] %v545_v9  ;;  %v673_v9 = vld [vmem:[%s2729_s3 + $0x1048] sm:$0xff] }
  0xe1   : > { %548 = vst [vmem:[%s2734_s4 + $0x650] sm:$0xff] %v547_v10  ;;  %v675_v10 = vld [vmem:[%s2729_s3 + $0x1050] sm:$0xff] }
  0xe2   : > { %550 = vst [vmem:[%s2734_s4 + $0x658] sm:$0xff] %v549_v11  ;;  %v677_v11 = vld [vmem:[%s2729_s3 + $0x1058] sm:$0xff] }
  0xe3   : > { %552 = vst [vmem:[%s2734_s4 + $0x660] sm:$0xff] %v551_v12  ;;  %v679_v12 = vld [vmem:[%s2729_s3 + $0x1060] sm:$0xff] }
  0xe4   : > { %554 = vst [vmem:[%s2734_s4 + $0x668] sm:$0xff] %v553_v13  ;;  %v681_v13 = vld [vmem:[%s2729_s3 + $0x1068] sm:$0xff] }
  0xe5   : > { %556 = vst [vmem:[%s2734_s4 + $0x670] sm:$0xff] %v555_v14  ;;  %v683_v14 = vld [vmem:[%s2729_s3 + $0x1070] sm:$0xff] }
  0xe6   : > { %558 = vst [vmem:[%s2734_s4 + $0x678] sm:$0xff] %v557_v15  ;;  %v685_v15 = vld [vmem:[%s2729_s3 + $0x1078] sm:$0xff] }
  0xe7   : > { %560 = vst [vmem:[%s2734_s4 + $0x680] sm:$0xff] %v559_v16  ;;  %v687_v16 = vld [vmem:[%s2729_s3 + $0x1100] sm:$0xff] }
  0xe8   : > { %562 = vst [vmem:[%s2734_s4 + $0x688] sm:$0xff] %v561_v17  ;;  %v689_v17 = vld [vmem:[%s2729_s3 + $0x1108] sm:$0xff] }
  0xe9   : > { %564 = vst [vmem:[%s2734_s4 + $0x690] sm:$0xff] %v563_v18  ;;  %v691_v18 = vld [vmem:[%s2729_s3 + $0x1110] sm:$0xff] }
  0xea   : > { %566 = vst [vmem:[%s2734_s4 + $0x698] sm:$0xff] %v565_v19  ;;  %v693_v19 = vld [vmem:[%s2729_s3 + $0x1118] sm:$0xff] }
  0xeb   : > { %568 = vst [vmem:[%s2734_s4 + $0x6a0] sm:$0xff] %v567_v20  ;;  %v695_v20 = vld [vmem:[%s2729_s3 + $0x1120] sm:$0xff] }
  0xec   : > { %570 = vst [vmem:[%s2734_s4 + $0x6a8] sm:$0xff] %v569_v21  ;;  %v697_v21 = vld [vmem:[%s2729_s3 + $0x1128] sm:$0xff] }
  0xed   : > { %572 = vst [vmem:[%s2734_s4 + $0x6b0] sm:$0xff] %v571_v22  ;;  %v699_v22 = vld [vmem:[%s2729_s3 + $0x1130] sm:$0xff] }
  0xee   : > { %574 = vst [vmem:[%s2734_s4 + $0x6b8] sm:$0xff] %v573_v23  ;;  %v701_v23 = vld [vmem:[%s2729_s3 + $0x1138] sm:$0xff] }
  0xef   : > { %576 = vst [vmem:[%s2734_s4 + $0x6c0] sm:$0xff] %v575_v24  ;;  %v703_v24 = vld [vmem:[%s2729_s3 + $0x1140] sm:$0xff] }
  0xf0   : > { %578 = vst [vmem:[%s2734_s4 + $0x6c8] sm:$0xff] %v577_v25  ;;  %v705_v25 = vld [vmem:[%s2729_s3 + $0x1148] sm:$0xff] }
  0xf1   : > { %580 = vst [vmem:[%s2734_s4 + $0x6d0] sm:$0xff] %v579_v26  ;;  %v707_v26 = vld [vmem:[%s2729_s3 + $0x1150] sm:$0xff] }
  0xf2   : > { %582 = vst [vmem:[%s2734_s4 + $0x6d8] sm:$0xff] %v581_v27  ;;  %v709_v27 = vld [vmem:[%s2729_s3 + $0x1158] sm:$0xff] }
  0xf3   : > { %584 = vst [vmem:[%s2734_s4 + $0x6e0] sm:$0xff] %v583_v28  ;;  %v711_v28 = vld [vmem:[%s2729_s3 + $0x1160] sm:$0xff] }
  0xf4   : > { %586 = vst [vmem:[%s2734_s4 + $0x6e8] sm:$0xff] %v585_v29  ;;  %v713_v29 = vld [vmem:[%s2729_s3 + $0x1168] sm:$0xff] }
  0xf5   : > { %588 = vst [vmem:[%s2734_s4 + $0x6f0] sm:$0xff] %v587_v30  ;;  %v715_v30 = vld [vmem:[%s2729_s3 + $0x1170] sm:$0xff] }
  0xf6   : > { %590 = vst [vmem:[%s2734_s4 + $0x6f8] sm:$0xff] %v589_v31  ;;  %v717_v31 = vld [vmem:[%s2729_s3 + $0x1178] sm:$0xff] }
  0xf7   : > { %592 = vst [vmem:[%s2734_s4 + $0x700] sm:$0xff] %v591_v32  ;;  %v719_v32 = vld [vmem:[%s2729_s3 + $0x1200] sm:$0xff] }
  0xf8   : > { %594 = vst [vmem:[%s2734_s4 + $0x708] sm:$0xff] %v593_v33  ;;  %v721_v33 = vld [vmem:[%s2729_s3 + $0x1208] sm:$0xff] }
  0xf9   : > { %596 = vst [vmem:[%s2734_s4 + $0x710] sm:$0xff] %v595_v34  ;;  %v723_v34 = vld [vmem:[%s2729_s3 + $0x1210] sm:$0xff] }
  0xfa   : > { %598 = vst [vmem:[%s2734_s4 + $0x718] sm:$0xff] %v597_v35  ;;  %v725_v35 = vld [vmem:[%s2729_s3 + $0x1218] sm:$0xff] }
  0xfb   : > { %600 = vst [vmem:[%s2734_s4 + $0x720] sm:$0xff] %v599_v36  ;;  %v727_v36 = vld [vmem:[%s2729_s3 + $0x1220] sm:$0xff] }
  0xfc   : > { %602 = vst [vmem:[%s2734_s4 + $0x728] sm:$0xff] %v601_v37  ;;  %v729_v37 = vld [vmem:[%s2729_s3 + $0x1228] sm:$0xff] }
  0xfd   : > { %604 = vst [vmem:[%s2734_s4 + $0x730] sm:$0xff] %v603_v38  ;;  %v731_v38 = vld [vmem:[%s2729_s3 + $0x1230] sm:$0xff] }
  0xfe   : > { %606 = vst [vmem:[%s2734_s4 + $0x738] sm:$0xff] %v605_v39  ;;  %v733_v39 = vld [vmem:[%s2729_s3 + $0x1238] sm:$0xff] }
  0xff   : > { %608 = vst [vmem:[%s2734_s4 + $0x740] sm:$0xff] %v607_v40  ;;  %v735_v40 = vld [vmem:[%s2729_s3 + $0x1240] sm:$0xff] }
 0x100   : > { %610 = vst [vmem:[%s2734_s4 + $0x748] sm:$0xff] %v609_v41  ;;  %v737_v41 = vld [vmem:[%s2729_s3 + $0x1248] sm:$0xff] }
 0x101   : > { %612 = vst [vmem:[%s2734_s4 + $0x750] sm:$0xff] %v611_v42  ;;  %v739_v42 = vld [vmem:[%s2729_s3 + $0x1250] sm:$0xff] }
 0x102   : > { %614 = vst [vmem:[%s2734_s4 + $0x758] sm:$0xff] %v613_v43  ;;  %v741_v43 = vld [vmem:[%s2729_s3 + $0x1258] sm:$0xff] }
 0x103   : > { %616 = vst [vmem:[%s2734_s4 + $0x760] sm:$0xff] %v615_v44  ;;  %v743_v44 = vld [vmem:[%s2729_s3 + $0x1260] sm:$0xff] }
 0x104   : > { %618 = vst [vmem:[%s2734_s4 + $0x768] sm:$0xff] %v617_v45  ;;  %v745_v45 = vld [vmem:[%s2729_s3 + $0x1268] sm:$0xff] }
 0x105   : > { %620 = vst [vmem:[%s2734_s4 + $0x770] sm:$0xff] %v619_v46  ;;  %v747_v46 = vld [vmem:[%s2729_s3 + $0x1270] sm:$0xff] }
 0x106   : > { %622 = vst [vmem:[%s2734_s4 + $0x778] sm:$0xff] %v621_v47  ;;  %v749_v47 = vld [vmem:[%s2729_s3 + $0x1278] sm:$0xff] }
 0x107   : > { %624 = vst [vmem:[%s2734_s4 + $0x780] sm:$0xff] %v623_v48  ;;  %v751_v48 = vld [vmem:[%s2729_s3 + $0x1300] sm:$0xff] }
 0x108   : > { %626 = vst [vmem:[%s2734_s4 + $0x788] sm:$0xff] %v625_v49  ;;  %v753_v49 = vld [vmem:[%s2729_s3 + $0x1308] sm:$0xff] }
 0x109   : > { %628 = vst [vmem:[%s2734_s4 + $0x790] sm:$0xff] %v627_v50  ;;  %v755_v50 = vld [vmem:[%s2729_s3 + $0x1310] sm:$0xff] }
 0x10a   : > { %630 = vst [vmem:[%s2734_s4 + $0x798] sm:$0xff] %v629_v51  ;;  %v757_v51 = vld [vmem:[%s2729_s3 + $0x1318] sm:$0xff] }
 0x10b   : > { %632 = vst [vmem:[%s2734_s4 + $0x7a0] sm:$0xff] %v631_v52  ;;  %v759_v52 = vld [vmem:[%s2729_s3 + $0x1320] sm:$0xff] }
 0x10c   : > { %634 = vst [vmem:[%s2734_s4 + $0x7a8] sm:$0xff] %v633_v53  ;;  %v761_v53 = vld [vmem:[%s2729_s3 + $0x1328] sm:$0xff] }
 0x10d   : > { %636 = vst [vmem:[%s2734_s4 + $0x7b0] sm:$0xff] %v635_v54  ;;  %v763_v54 = vld [vmem:[%s2729_s3 + $0x1330] sm:$0xff] }
 0x10e   : > { %638 = vst [vmem:[%s2734_s4 + $0x7b8] sm:$0xff] %v637_v55  ;;  %v765_v55 = vld [vmem:[%s2729_s3 + $0x1338] sm:$0xff] }
 0x10f   : > { %640 = vst [vmem:[%s2734_s4 + $0x7c0] sm:$0xff] %v639_v56  ;;  %v767_v56 = vld [vmem:[%s2729_s3 + $0x1340] sm:$0xff] }
 0x110   : > { %642 = vst [vmem:[%s2734_s4 + $0x7c8] sm:$0xff] %v641_v57  ;;  %v769_v57 = vld [vmem:[%s2729_s3 + $0x1348] sm:$0xff] }
 0x111   : > { %644 = vst [vmem:[%s2734_s4 + $0x7d0] sm:$0xff] %v643_v58  ;;  %v771_v58 = vld [vmem:[%s2729_s3 + $0x1350] sm:$0xff] }
 0x112   : > { %646 = vst [vmem:[%s2734_s4 + $0x7d8] sm:$0xff] %v645_v59  ;;  %v773_v59 = vld [vmem:[%s2729_s3 + $0x1358] sm:$0xff] }
 0x113   : > { %648 = vst [vmem:[%s2734_s4 + $0x7e0] sm:$0xff] %v647_v60  ;;  %v775_v60 = vld [vmem:[%s2729_s3 + $0x1360] sm:$0xff] }
 0x114   : > { %650 = vst [vmem:[%s2734_s4 + $0x7e8] sm:$0xff] %v649_v61  ;;  %v777_v61 = vld [vmem:[%s2729_s3 + $0x1368] sm:$0xff] }
 0x115   : > { %652 = vst [vmem:[%s2734_s4 + $0x7f0] sm:$0xff] %v651_v62  ;;  %v779_v62 = vld [vmem:[%s2729_s3 + $0x1370] sm:$0xff] }
 0x116   : > { %654 = vst [vmem:[%s2734_s4 + $0x7f8] sm:$0xff] %v653_v63  ;;  %v781_v63 = vld [vmem:[%s2729_s3 + $0x1378] sm:$0xff] }
 0x117   : > { %656 = vst [vmem:[%s2734_s4 + $0x800] sm:$0xff] %v655_v0  ;;  %v783_v0 = vld [vmem:[%s2729_s3 + $0x1400] sm:$0xff] }
 0x118   : > { %658 = vst [vmem:[%s2734_s4 + $0x808] sm:$0xff] %v657_v1  ;;  %v785_v1 = vld [vmem:[%s2729_s3 + $0x1408] sm:$0xff] }
 0x119   : > { %660 = vst [vmem:[%s2734_s4 + $0x810] sm:$0xff] %v659_v2  ;;  %v787_v2 = vld [vmem:[%s2729_s3 + $0x1410] sm:$0xff] }
 0x11a   : > { %662 = vst [vmem:[%s2734_s4 + $0x818] sm:$0xff] %v661_v3  ;;  %v789_v3 = vld [vmem:[%s2729_s3 + $0x1418] sm:$0xff] }
 0x11b   : > { %664 = vst [vmem:[%s2734_s4 + $0x820] sm:$0xff] %v663_v4  ;;  %v791_v4 = vld [vmem:[%s2729_s3 + $0x1420] sm:$0xff] }
 0x11c   : > { %666 = vst [vmem:[%s2734_s4 + $0x828] sm:$0xff] %v665_v5  ;;  %v793_v5 = vld [vmem:[%s2729_s3 + $0x1428] sm:$0xff] }
 0x11d   : > { %668 = vst [vmem:[%s2734_s4 + $0x830] sm:$0xff] %v667_v6  ;;  %v795_v6 = vld [vmem:[%s2729_s3 + $0x1430] sm:$0xff] }
 0x11e   : > { %670 = vst [vmem:[%s2734_s4 + $0x838] sm:$0xff] %v669_v7  ;;  %v797_v7 = vld [vmem:[%s2729_s3 + $0x1438] sm:$0xff] }
 0x11f   : > { %672 = vst [vmem:[%s2734_s4 + $0x840] sm:$0xff] %v671_v8  ;;  %v799_v8 = vld [vmem:[%s2729_s3 + $0x1440] sm:$0xff] }
 0x120   : > { %674 = vst [vmem:[%s2734_s4 + $0x848] sm:$0xff] %v673_v9  ;;  %v801_v9 = vld [vmem:[%s2729_s3 + $0x1448] sm:$0xff] }
 0x121   : > { %676 = vst [vmem:[%s2734_s4 + $0x850] sm:$0xff] %v675_v10  ;;  %v803_v10 = vld [vmem:[%s2729_s3 + $0x1450] sm:$0xff] }
 0x122   : > { %678 = vst [vmem:[%s2734_s4 + $0x858] sm:$0xff] %v677_v11  ;;  %v805_v11 = vld [vmem:[%s2729_s3 + $0x1458] sm:$0xff] }
 0x123   : > { %680 = vst [vmem:[%s2734_s4 + $0x860] sm:$0xff] %v679_v12  ;;  %v807_v12 = vld [vmem:[%s2729_s3 + $0x1460] sm:$0xff] }
 0x124   : > { %682 = vst [vmem:[%s2734_s4 + $0x868] sm:$0xff] %v681_v13  ;;  %v809_v13 = vld [vmem:[%s2729_s3 + $0x1468] sm:$0xff] }
 0x125   : > { %684 = vst [vmem:[%s2734_s4 + $0x870] sm:$0xff] %v683_v14  ;;  %v811_v14 = vld [vmem:[%s2729_s3 + $0x1470] sm:$0xff] }
 0x126   : > { %686 = vst [vmem:[%s2734_s4 + $0x878] sm:$0xff] %v685_v15  ;;  %v813_v15 = vld [vmem:[%s2729_s3 + $0x1478] sm:$0xff] }
 0x127   : > { %688 = vst [vmem:[%s2734_s4 + $0x880] sm:$0xff] %v687_v16  ;;  %v815_v16 = vld [vmem:[%s2729_s3 + $0x1500] sm:$0xff] }
 0x128   : > { %690 = vst [vmem:[%s2734_s4 + $0x888] sm:$0xff] %v689_v17  ;;  %v817_v17 = vld [vmem:[%s2729_s3 + $0x1508] sm:$0xff] }
 0x129   : > { %692 = vst [vmem:[%s2734_s4 + $0x890] sm:$0xff] %v691_v18  ;;  %v819_v18 = vld [vmem:[%s2729_s3 + $0x1510] sm:$0xff] }
 0x12a   : > { %694 = vst [vmem:[%s2734_s4 + $0x898] sm:$0xff] %v693_v19  ;;  %v821_v19 = vld [vmem:[%s2729_s3 + $0x1518] sm:$0xff] }
 0x12b   : > { %696 = vst [vmem:[%s2734_s4 + $0x8a0] sm:$0xff] %v695_v20  ;;  %v823_v20 = vld [vmem:[%s2729_s3 + $0x1520] sm:$0xff] }
 0x12c   : > { %698 = vst [vmem:[%s2734_s4 + $0x8a8] sm:$0xff] %v697_v21  ;;  %v825_v21 = vld [vmem:[%s2729_s3 + $0x1528] sm:$0xff] }
 0x12d   : > { %700 = vst [vmem:[%s2734_s4 + $0x8b0] sm:$0xff] %v699_v22  ;;  %v827_v22 = vld [vmem:[%s2729_s3 + $0x1530] sm:$0xff] }
 0x12e   : > { %702 = vst [vmem:[%s2734_s4 + $0x8b8] sm:$0xff] %v701_v23  ;;  %v829_v23 = vld [vmem:[%s2729_s3 + $0x1538] sm:$0xff] }
 0x12f   : > { %704 = vst [vmem:[%s2734_s4 + $0x8c0] sm:$0xff] %v703_v24  ;;  %v831_v24 = vld [vmem:[%s2729_s3 + $0x1540] sm:$0xff] }
 0x130   : > { %706 = vst [vmem:[%s2734_s4 + $0x8c8] sm:$0xff] %v705_v25  ;;  %v833_v25 = vld [vmem:[%s2729_s3 + $0x1548] sm:$0xff] }
 0x131   : > { %708 = vst [vmem:[%s2734_s4 + $0x8d0] sm:$0xff] %v707_v26  ;;  %v835_v26 = vld [vmem:[%s2729_s3 + $0x1550] sm:$0xff] }
 0x132   : > { %710 = vst [vmem:[%s2734_s4 + $0x8d8] sm:$0xff] %v709_v27  ;;  %v837_v27 = vld [vmem:[%s2729_s3 + $0x1558] sm:$0xff] }
 0x133   : > { %712 = vst [vmem:[%s2734_s4 + $0x8e0] sm:$0xff] %v711_v28  ;;  %v839_v28 = vld [vmem:[%s2729_s3 + $0x1560] sm:$0xff] }
 0x134   : > { %714 = vst [vmem:[%s2734_s4 + $0x8e8] sm:$0xff] %v713_v29  ;;  %v841_v29 = vld [vmem:[%s2729_s3 + $0x1568] sm:$0xff] }
 0x135   : > { %716 = vst [vmem:[%s2734_s4 + $0x8f0] sm:$0xff] %v715_v30  ;;  %v843_v30 = vld [vmem:[%s2729_s3 + $0x1570] sm:$0xff] }
 0x136   : > { %718 = vst [vmem:[%s2734_s4 + $0x8f8] sm:$0xff] %v717_v31  ;;  %v845_v31 = vld [vmem:[%s2729_s3 + $0x1578] sm:$0xff] }
 0x137   : > { %720 = vst [vmem:[%s2734_s4 + $0x900] sm:$0xff] %v719_v32  ;;  %v847_v32 = vld [vmem:[%s2729_s3 + $0x1600] sm:$0xff] }
 0x138   : > { %722 = vst [vmem:[%s2734_s4 + $0x908] sm:$0xff] %v721_v33  ;;  %v849_v33 = vld [vmem:[%s2729_s3 + $0x1608] sm:$0xff] }
 0x139   : > { %724 = vst [vmem:[%s2734_s4 + $0x910] sm:$0xff] %v723_v34  ;;  %v851_v34 = vld [vmem:[%s2729_s3 + $0x1610] sm:$0xff] }
 0x13a   : > { %726 = vst [vmem:[%s2734_s4 + $0x918] sm:$0xff] %v725_v35  ;;  %v853_v35 = vld [vmem:[%s2729_s3 + $0x1618] sm:$0xff] }
 0x13b   : > { %728 = vst [vmem:[%s2734_s4 + $0x920] sm:$0xff] %v727_v36  ;;  %v855_v36 = vld [vmem:[%s2729_s3 + $0x1620] sm:$0xff] }
 0x13c   : > { %730 = vst [vmem:[%s2734_s4 + $0x928] sm:$0xff] %v729_v37  ;;  %v857_v37 = vld [vmem:[%s2729_s3 + $0x1628] sm:$0xff] }
 0x13d   : > { %732 = vst [vmem:[%s2734_s4 + $0x930] sm:$0xff] %v731_v38  ;;  %v859_v38 = vld [vmem:[%s2729_s3 + $0x1630] sm:$0xff] }
 0x13e   : > { %734 = vst [vmem:[%s2734_s4 + $0x938] sm:$0xff] %v733_v39  ;;  %v861_v39 = vld [vmem:[%s2729_s3 + $0x1638] sm:$0xff] }
 0x13f   : > { %736 = vst [vmem:[%s2734_s4 + $0x940] sm:$0xff] %v735_v40  ;;  %v863_v40 = vld [vmem:[%s2729_s3 + $0x1640] sm:$0xff] }
 0x140   : > { %738 = vst [vmem:[%s2734_s4 + $0x948] sm:$0xff] %v737_v41  ;;  %v865_v41 = vld [vmem:[%s2729_s3 + $0x1648] sm:$0xff] }
 0x141   : > { %740 = vst [vmem:[%s2734_s4 + $0x950] sm:$0xff] %v739_v42  ;;  %v867_v42 = vld [vmem:[%s2729_s3 + $0x1650] sm:$0xff] }
 0x142   : > { %742 = vst [vmem:[%s2734_s4 + $0x958] sm:$0xff] %v741_v43  ;;  %v869_v43 = vld [vmem:[%s2729_s3 + $0x1658] sm:$0xff] }
 0x143   : > { %744 = vst [vmem:[%s2734_s4 + $0x960] sm:$0xff] %v743_v44  ;;  %v871_v44 = vld [vmem:[%s2729_s3 + $0x1660] sm:$0xff] }
 0x144   : > { %746 = vst [vmem:[%s2734_s4 + $0x968] sm:$0xff] %v745_v45  ;;  %v873_v45 = vld [vmem:[%s2729_s3 + $0x1668] sm:$0xff] }
 0x145   : > { %748 = vst [vmem:[%s2734_s4 + $0x970] sm:$0xff] %v747_v46  ;;  %v875_v46 = vld [vmem:[%s2729_s3 + $0x1670] sm:$0xff] }
 0x146   : > { %750 = vst [vmem:[%s2734_s4 + $0x978] sm:$0xff] %v749_v47  ;;  %v877_v47 = vld [vmem:[%s2729_s3 + $0x1678] sm:$0xff] }
 0x147   : > { %752 = vst [vmem:[%s2734_s4 + $0x980] sm:$0xff] %v751_v48  ;;  %v879_v48 = vld [vmem:[%s2729_s3 + $0x1700] sm:$0xff] }
 0x148   : > { %754 = vst [vmem:[%s2734_s4 + $0x988] sm:$0xff] %v753_v49  ;;  %v881_v49 = vld [vmem:[%s2729_s3 + $0x1708] sm:$0xff] }
 0x149   : > { %756 = vst [vmem:[%s2734_s4 + $0x990] sm:$0xff] %v755_v50  ;;  %v883_v50 = vld [vmem:[%s2729_s3 + $0x1710] sm:$0xff] }
 0x14a   : > { %758 = vst [vmem:[%s2734_s4 + $0x998] sm:$0xff] %v757_v51  ;;  %v885_v51 = vld [vmem:[%s2729_s3 + $0x1718] sm:$0xff] }
 0x14b   : > { %760 = vst [vmem:[%s2734_s4 + $0x9a0] sm:$0xff] %v759_v52  ;;  %v887_v52 = vld [vmem:[%s2729_s3 + $0x1720] sm:$0xff] }
 0x14c   : > { %762 = vst [vmem:[%s2734_s4 + $0x9a8] sm:$0xff] %v761_v53  ;;  %v889_v53 = vld [vmem:[%s2729_s3 + $0x1728] sm:$0xff] }
 0x14d   : > { %764 = vst [vmem:[%s2734_s4 + $0x9b0] sm:$0xff] %v763_v54  ;;  %v891_v54 = vld [vmem:[%s2729_s3 + $0x1730] sm:$0xff] }
 0x14e   : > { %766 = vst [vmem:[%s2734_s4 + $0x9b8] sm:$0xff] %v765_v55  ;;  %v893_v55 = vld [vmem:[%s2729_s3 + $0x1738] sm:$0xff] }
 0x14f   : > { %768 = vst [vmem:[%s2734_s4 + $0x9c0] sm:$0xff] %v767_v56  ;;  %v895_v56 = vld [vmem:[%s2729_s3 + $0x1740] sm:$0xff] }
 0x150   : > { %770 = vst [vmem:[%s2734_s4 + $0x9c8] sm:$0xff] %v769_v57  ;;  %v897_v57 = vld [vmem:[%s2729_s3 + $0x1748] sm:$0xff] }
 0x151   : > { %772 = vst [vmem:[%s2734_s4 + $0x9d0] sm:$0xff] %v771_v58  ;;  %v899_v58 = vld [vmem:[%s2729_s3 + $0x1750] sm:$0xff] }
 0x152   : > { %774 = vst [vmem:[%s2734_s4 + $0x9d8] sm:$0xff] %v773_v59  ;;  %v901_v59 = vld [vmem:[%s2729_s3 + $0x1758] sm:$0xff] }
 0x153   : > { %776 = vst [vmem:[%s2734_s4 + $0x9e0] sm:$0xff] %v775_v60  ;;  %v903_v60 = vld [vmem:[%s2729_s3 + $0x1760] sm:$0xff] }
 0x154   : > { %778 = vst [vmem:[%s2734_s4 + $0x9e8] sm:$0xff] %v777_v61  ;;  %v905_v61 = vld [vmem:[%s2729_s3 + $0x1768] sm:$0xff] }
 0x155   : > { %780 = vst [vmem:[%s2734_s4 + $0x9f0] sm:$0xff] %v779_v62  ;;  %v907_v62 = vld [vmem:[%s2729_s3 + $0x1770] sm:$0xff] }
 0x156   : > { %782 = vst [vmem:[%s2734_s4 + $0x9f8] sm:$0xff] %v781_v63  ;;  %v909_v63 = vld [vmem:[%s2729_s3 + $0x1778] sm:$0xff] }
 0x157   : > { %784 = vst [vmem:[%s2734_s4 + $0xa00] sm:$0xff] %v783_v0  ;;  %v911_v0 = vld [vmem:[%s2729_s3 + $0x1800] sm:$0xff] }
 0x158   : > { %786 = vst [vmem:[%s2734_s4 + $0xa08] sm:$0xff] %v785_v1  ;;  %v913_v1 = vld [vmem:[%s2729_s3 + $0x1808] sm:$0xff] }
 0x159   : > { %788 = vst [vmem:[%s2734_s4 + $0xa10] sm:$0xff] %v787_v2  ;;  %v915_v2 = vld [vmem:[%s2729_s3 + $0x1810] sm:$0xff] }
 0x15a   : > { %790 = vst [vmem:[%s2734_s4 + $0xa18] sm:$0xff] %v789_v3  ;;  %v917_v3 = vld [vmem:[%s2729_s3 + $0x1818] sm:$0xff] }
 0x15b   : > { %792 = vst [vmem:[%s2734_s4 + $0xa20] sm:$0xff] %v791_v4  ;;  %v919_v4 = vld [vmem:[%s2729_s3 + $0x1820] sm:$0xff] }
 0x15c   : > { %794 = vst [vmem:[%s2734_s4 + $0xa28] sm:$0xff] %v793_v5  ;;  %v921_v5 = vld [vmem:[%s2729_s3 + $0x1828] sm:$0xff] }
 0x15d   : > { %796 = vst [vmem:[%s2734_s4 + $0xa30] sm:$0xff] %v795_v6  ;;  %v923_v6 = vld [vmem:[%s2729_s3 + $0x1830] sm:$0xff] }
 0x15e   : > { %798 = vst [vmem:[%s2734_s4 + $0xa38] sm:$0xff] %v797_v7  ;;  %v925_v7 = vld [vmem:[%s2729_s3 + $0x1838] sm:$0xff] }
 0x15f   : > { %800 = vst [vmem:[%s2734_s4 + $0xa40] sm:$0xff] %v799_v8  ;;  %v927_v8 = vld [vmem:[%s2729_s3 + $0x1840] sm:$0xff] }
 0x160   : > { %802 = vst [vmem:[%s2734_s4 + $0xa48] sm:$0xff] %v801_v9  ;;  %v929_v9 = vld [vmem:[%s2729_s3 + $0x1848] sm:$0xff] }
 0x161   : > { %804 = vst [vmem:[%s2734_s4 + $0xa50] sm:$0xff] %v803_v10  ;;  %v931_v10 = vld [vmem:[%s2729_s3 + $0x1850] sm:$0xff] }
 0x162   : > { %806 = vst [vmem:[%s2734_s4 + $0xa58] sm:$0xff] %v805_v11  ;;  %v933_v11 = vld [vmem:[%s2729_s3 + $0x1858] sm:$0xff] }
 0x163   : > { %808 = vst [vmem:[%s2734_s4 + $0xa60] sm:$0xff] %v807_v12  ;;  %v935_v12 = vld [vmem:[%s2729_s3 + $0x1860] sm:$0xff] }
 0x164   : > { %810 = vst [vmem:[%s2734_s4 + $0xa68] sm:$0xff] %v809_v13  ;;  %v937_v13 = vld [vmem:[%s2729_s3 + $0x1868] sm:$0xff] }
 0x165   : > { %812 = vst [vmem:[%s2734_s4 + $0xa70] sm:$0xff] %v811_v14  ;;  %v939_v14 = vld [vmem:[%s2729_s3 + $0x1870] sm:$0xff] }
 0x166   : > { %814 = vst [vmem:[%s2734_s4 + $0xa78] sm:$0xff] %v813_v15  ;;  %v941_v15 = vld [vmem:[%s2729_s3 + $0x1878] sm:$0xff] }
 0x167   : > { %816 = vst [vmem:[%s2734_s4 + $0xa80] sm:$0xff] %v815_v16  ;;  %v943_v16 = vld [vmem:[%s2729_s3 + $0x1900] sm:$0xff] }
 0x168   : > { %818 = vst [vmem:[%s2734_s4 + $0xa88] sm:$0xff] %v817_v17  ;;  %v945_v17 = vld [vmem:[%s2729_s3 + $0x1908] sm:$0xff] }
 0x169   : > { %820 = vst [vmem:[%s2734_s4 + $0xa90] sm:$0xff] %v819_v18  ;;  %v947_v18 = vld [vmem:[%s2729_s3 + $0x1910] sm:$0xff] }
 0x16a   : > { %822 = vst [vmem:[%s2734_s4 + $0xa98] sm:$0xff] %v821_v19  ;;  %v949_v19 = vld [vmem:[%s2729_s3 + $0x1918] sm:$0xff] }
 0x16b   : > { %824 = vst [vmem:[%s2734_s4 + $0xaa0] sm:$0xff] %v823_v20  ;;  %v951_v20 = vld [vmem:[%s2729_s3 + $0x1920] sm:$0xff] }
 0x16c   : > { %826 = vst [vmem:[%s2734_s4 + $0xaa8] sm:$0xff] %v825_v21  ;;  %v953_v21 = vld [vmem:[%s2729_s3 + $0x1928] sm:$0xff] }
 0x16d   : > { %828 = vst [vmem:[%s2734_s4 + $0xab0] sm:$0xff] %v827_v22  ;;  %v955_v22 = vld [vmem:[%s2729_s3 + $0x1930] sm:$0xff] }
 0x16e   : > { %830 = vst [vmem:[%s2734_s4 + $0xab8] sm:$0xff] %v829_v23  ;;  %v957_v23 = vld [vmem:[%s2729_s3 + $0x1938] sm:$0xff] }
 0x16f   : > { %832 = vst [vmem:[%s2734_s4 + $0xac0] sm:$0xff] %v831_v24  ;;  %v959_v24 = vld [vmem:[%s2729_s3 + $0x1940] sm:$0xff] }
 0x170   : > { %834 = vst [vmem:[%s2734_s4 + $0xac8] sm:$0xff] %v833_v25  ;;  %v961_v25 = vld [vmem:[%s2729_s3 + $0x1948] sm:$0xff] }
 0x171   : > { %836 = vst [vmem:[%s2734_s4 + $0xad0] sm:$0xff] %v835_v26  ;;  %v963_v26 = vld [vmem:[%s2729_s3 + $0x1950] sm:$0xff] }
 0x172   : > { %838 = vst [vmem:[%s2734_s4 + $0xad8] sm:$0xff] %v837_v27  ;;  %v965_v27 = vld [vmem:[%s2729_s3 + $0x1958] sm:$0xff] }
 0x173   : > { %840 = vst [vmem:[%s2734_s4 + $0xae0] sm:$0xff] %v839_v28  ;;  %v967_v28 = vld [vmem:[%s2729_s3 + $0x1960] sm:$0xff] }
 0x174   : > { %842 = vst [vmem:[%s2734_s4 + $0xae8] sm:$0xff] %v841_v29  ;;  %v969_v29 = vld [vmem:[%s2729_s3 + $0x1968] sm:$0xff] }
 0x175   : > { %844 = vst [vmem:[%s2734_s4 + $0xaf0] sm:$0xff] %v843_v30  ;;  %v971_v30 = vld [vmem:[%s2729_s3 + $0x1970] sm:$0xff] }
 0x176   : > { %846 = vst [vmem:[%s2734_s4 + $0xaf8] sm:$0xff] %v845_v31  ;;  %v973_v31 = vld [vmem:[%s2729_s3 + $0x1978] sm:$0xff] }
 0x177   : > { %848 = vst [vmem:[%s2734_s4 + $0xb00] sm:$0xff] %v847_v32  ;;  %v975_v32 = vld [vmem:[%s2729_s3 + $0x1a00] sm:$0xff] }
 0x178   : > { %850 = vst [vmem:[%s2734_s4 + $0xb08] sm:$0xff] %v849_v33  ;;  %v977_v33 = vld [vmem:[%s2729_s3 + $0x1a08] sm:$0xff] }
 0x179   : > { %852 = vst [vmem:[%s2734_s4 + $0xb10] sm:$0xff] %v851_v34  ;;  %v979_v34 = vld [vmem:[%s2729_s3 + $0x1a10] sm:$0xff] }
 0x17a   : > { %854 = vst [vmem:[%s2734_s4 + $0xb18] sm:$0xff] %v853_v35  ;;  %v981_v35 = vld [vmem:[%s2729_s3 + $0x1a18] sm:$0xff] }
 0x17b   : > { %856 = vst [vmem:[%s2734_s4 + $0xb20] sm:$0xff] %v855_v36  ;;  %v983_v36 = vld [vmem:[%s2729_s3 + $0x1a20] sm:$0xff] }
 0x17c   : > { %858 = vst [vmem:[%s2734_s4 + $0xb28] sm:$0xff] %v857_v37  ;;  %v985_v37 = vld [vmem:[%s2729_s3 + $0x1a28] sm:$0xff] }
 0x17d   : > { %860 = vst [vmem:[%s2734_s4 + $0xb30] sm:$0xff] %v859_v38  ;;  %v987_v38 = vld [vmem:[%s2729_s3 + $0x1a30] sm:$0xff] }
 0x17e   : > { %862 = vst [vmem:[%s2734_s4 + $0xb38] sm:$0xff] %v861_v39  ;;  %v989_v39 = vld [vmem:[%s2729_s3 + $0x1a38] sm:$0xff] }
 0x17f   : > { %864 = vst [vmem:[%s2734_s4 + $0xb40] sm:$0xff] %v863_v40  ;;  %v991_v40 = vld [vmem:[%s2729_s3 + $0x1a40] sm:$0xff] }
 0x180   : > { %866 = vst [vmem:[%s2734_s4 + $0xb48] sm:$0xff] %v865_v41  ;;  %v993_v41 = vld [vmem:[%s2729_s3 + $0x1a48] sm:$0xff] }
 0x181   : > { %868 = vst [vmem:[%s2734_s4 + $0xb50] sm:$0xff] %v867_v42  ;;  %v995_v42 = vld [vmem:[%s2729_s3 + $0x1a50] sm:$0xff] }
 0x182   : > { %870 = vst [vmem:[%s2734_s4 + $0xb58] sm:$0xff] %v869_v43  ;;  %v997_v43 = vld [vmem:[%s2729_s3 + $0x1a58] sm:$0xff] }
 0x183   : > { %872 = vst [vmem:[%s2734_s4 + $0xb60] sm:$0xff] %v871_v44  ;;  %v999_v44 = vld [vmem:[%s2729_s3 + $0x1a60] sm:$0xff] }
 0x184   : > { %874 = vst [vmem:[%s2734_s4 + $0xb68] sm:$0xff] %v873_v45  ;;  %v1001_v45 = vld [vmem:[%s2729_s3 + $0x1a68] sm:$0xff] }
 0x185   : > { %876 = vst [vmem:[%s2734_s4 + $0xb70] sm:$0xff] %v875_v46  ;;  %v1003_v46 = vld [vmem:[%s2729_s3 + $0x1a70] sm:$0xff] }
 0x186   : > { %878 = vst [vmem:[%s2734_s4 + $0xb78] sm:$0xff] %v877_v47  ;;  %v1005_v47 = vld [vmem:[%s2729_s3 + $0x1a78] sm:$0xff] }
 0x187   : > { %880 = vst [vmem:[%s2734_s4 + $0xb80] sm:$0xff] %v879_v48  ;;  %v1007_v48 = vld [vmem:[%s2729_s3 + $0x1b00] sm:$0xff] }
 0x188   : > { %882 = vst [vmem:[%s2734_s4 + $0xb88] sm:$0xff] %v881_v49  ;;  %v1009_v49 = vld [vmem:[%s2729_s3 + $0x1b08] sm:$0xff] }
 0x189   : > { %884 = vst [vmem:[%s2734_s4 + $0xb90] sm:$0xff] %v883_v50  ;;  %v1011_v50 = vld [vmem:[%s2729_s3 + $0x1b10] sm:$0xff] }
 0x18a   : > { %886 = vst [vmem:[%s2734_s4 + $0xb98] sm:$0xff] %v885_v51  ;;  %v1013_v51 = vld [vmem:[%s2729_s3 + $0x1b18] sm:$0xff] }
 0x18b   : > { %888 = vst [vmem:[%s2734_s4 + $0xba0] sm:$0xff] %v887_v52  ;;  %v1015_v52 = vld [vmem:[%s2729_s3 + $0x1b20] sm:$0xff] }
 0x18c   : > { %890 = vst [vmem:[%s2734_s4 + $0xba8] sm:$0xff] %v889_v53  ;;  %v1017_v53 = vld [vmem:[%s2729_s3 + $0x1b28] sm:$0xff] }
 0x18d   : > { %892 = vst [vmem:[%s2734_s4 + $0xbb0] sm:$0xff] %v891_v54  ;;  %v1019_v54 = vld [vmem:[%s2729_s3 + $0x1b30] sm:$0xff] }
 0x18e   : > { %894 = vst [vmem:[%s2734_s4 + $0xbb8] sm:$0xff] %v893_v55  ;;  %v1021_v55 = vld [vmem:[%s2729_s3 + $0x1b38] sm:$0xff] }
 0x18f   : > { %896 = vst [vmem:[%s2734_s4 + $0xbc0] sm:$0xff] %v895_v56  ;;  %v1023_v56 = vld [vmem:[%s2729_s3 + $0x1b40] sm:$0xff] }
 0x190   : > { %898 = vst [vmem:[%s2734_s4 + $0xbc8] sm:$0xff] %v897_v57  ;;  %v1025_v57 = vld [vmem:[%s2729_s3 + $0x1b48] sm:$0xff] }
 0x191   : > { %900 = vst [vmem:[%s2734_s4 + $0xbd0] sm:$0xff] %v899_v58  ;;  %v1027_v58 = vld [vmem:[%s2729_s3 + $0x1b50] sm:$0xff] }
 0x192   : > { %902 = vst [vmem:[%s2734_s4 + $0xbd8] sm:$0xff] %v901_v59  ;;  %v1029_v59 = vld [vmem:[%s2729_s3 + $0x1b58] sm:$0xff] }
 0x193   : > { %904 = vst [vmem:[%s2734_s4 + $0xbe0] sm:$0xff] %v903_v60  ;;  %v1031_v60 = vld [vmem:[%s2729_s3 + $0x1b60] sm:$0xff] }
 0x194   : > { %906 = vst [vmem:[%s2734_s4 + $0xbe8] sm:$0xff] %v905_v61  ;;  %v1033_v61 = vld [vmem:[%s2729_s3 + $0x1b68] sm:$0xff] }
 0x195   : > { %908 = vst [vmem:[%s2734_s4 + $0xbf0] sm:$0xff] %v907_v62  ;;  %v1035_v62 = vld [vmem:[%s2729_s3 + $0x1b70] sm:$0xff] }
 0x196   : > { %910 = vst [vmem:[%s2734_s4 + $0xbf8] sm:$0xff] %v909_v63  ;;  %v1037_v63 = vld [vmem:[%s2729_s3 + $0x1b78] sm:$0xff] }
 0x197   : > { %912 = vst [vmem:[%s2734_s4 + $0xc00] sm:$0xff] %v911_v0  ;;  %v1039_v0 = vld [vmem:[%s2729_s3 + $0x1c00] sm:$0xff] }
 0x198   : > { %914 = vst [vmem:[%s2734_s4 + $0xc08] sm:$0xff] %v913_v1  ;;  %v1041_v1 = vld [vmem:[%s2729_s3 + $0x1c08] sm:$0xff] }
 0x199   : > { %916 = vst [vmem:[%s2734_s4 + $0xc10] sm:$0xff] %v915_v2  ;;  %v1043_v2 = vld [vmem:[%s2729_s3 + $0x1c10] sm:$0xff] }
 0x19a   : > { %918 = vst [vmem:[%s2734_s4 + $0xc18] sm:$0xff] %v917_v3  ;;  %v1045_v3 = vld [vmem:[%s2729_s3 + $0x1c18] sm:$0xff] }
 0x19b   : > { %920 = vst [vmem:[%s2734_s4 + $0xc20] sm:$0xff] %v919_v4  ;;  %v1047_v4 = vld [vmem:[%s2729_s3 + $0x1c20] sm:$0xff] }
 0x19c   : > { %922 = vst [vmem:[%s2734_s4 + $0xc28] sm:$0xff] %v921_v5  ;;  %v1049_v5 = vld [vmem:[%s2729_s3 + $0x1c28] sm:$0xff] }
 0x19d   : > { %924 = vst [vmem:[%s2734_s4 + $0xc30] sm:$0xff] %v923_v6  ;;  %v1051_v6 = vld [vmem:[%s2729_s3 + $0x1c30] sm:$0xff] }
 0x19e   : > { %926 = vst [vmem:[%s2734_s4 + $0xc38] sm:$0xff] %v925_v7  ;;  %v1053_v7 = vld [vmem:[%s2729_s3 + $0x1c38] sm:$0xff] }
 0x19f   : > { %928 = vst [vmem:[%s2734_s4 + $0xc40] sm:$0xff] %v927_v8  ;;  %v1055_v8 = vld [vmem:[%s2729_s3 + $0x1c40] sm:$0xff] }
 0x1a0   : > { %930 = vst [vmem:[%s2734_s4 + $0xc48] sm:$0xff] %v929_v9  ;;  %v1057_v9 = vld [vmem:[%s2729_s3 + $0x1c48] sm:$0xff] }
 0x1a1   : > { %932 = vst [vmem:[%s2734_s4 + $0xc50] sm:$0xff] %v931_v10  ;;  %v1059_v10 = vld [vmem:[%s2729_s3 + $0x1c50] sm:$0xff] }
 0x1a2   : > { %934 = vst [vmem:[%s2734_s4 + $0xc58] sm:$0xff] %v933_v11  ;;  %v1061_v11 = vld [vmem:[%s2729_s3 + $0x1c58] sm:$0xff] }
 0x1a3   : > { %936 = vst [vmem:[%s2734_s4 + $0xc60] sm:$0xff] %v935_v12  ;;  %v1063_v12 = vld [vmem:[%s2729_s3 + $0x1c60] sm:$0xff] }
 0x1a4   : > { %938 = vst [vmem:[%s2734_s4 + $0xc68] sm:$0xff] %v937_v13  ;;  %v1065_v13 = vld [vmem:[%s2729_s3 + $0x1c68] sm:$0xff] }
 0x1a5   : > { %940 = vst [vmem:[%s2734_s4 + $0xc70] sm:$0xff] %v939_v14  ;;  %v1067_v14 = vld [vmem:[%s2729_s3 + $0x1c70] sm:$0xff] }
 0x1a6   : > { %942 = vst [vmem:[%s2734_s4 + $0xc78] sm:$0xff] %v941_v15  ;;  %v1069_v15 = vld [vmem:[%s2729_s3 + $0x1c78] sm:$0xff] }
 0x1a7   : > { %944 = vst [vmem:[%s2734_s4 + $0xc80] sm:$0xff] %v943_v16  ;;  %v1071_v16 = vld [vmem:[%s2729_s3 + $0x1d00] sm:$0xff] }
 0x1a8   : > { %946 = vst [vmem:[%s2734_s4 + $0xc88] sm:$0xff] %v945_v17  ;;  %v1073_v17 = vld [vmem:[%s2729_s3 + $0x1d08] sm:$0xff] }
 0x1a9   : > { %948 = vst [vmem:[%s2734_s4 + $0xc90] sm:$0xff] %v947_v18  ;;  %v1075_v18 = vld [vmem:[%s2729_s3 + $0x1d10] sm:$0xff] }
 0x1aa   : > { %950 = vst [vmem:[%s2734_s4 + $0xc98] sm:$0xff] %v949_v19  ;;  %v1077_v19 = vld [vmem:[%s2729_s3 + $0x1d18] sm:$0xff] }
 0x1ab   : > { %952 = vst [vmem:[%s2734_s4 + $0xca0] sm:$0xff] %v951_v20  ;;  %v1079_v20 = vld [vmem:[%s2729_s3 + $0x1d20] sm:$0xff] }
 0x1ac   : > { %954 = vst [vmem:[%s2734_s4 + $0xca8] sm:$0xff] %v953_v21  ;;  %v1081_v21 = vld [vmem:[%s2729_s3 + $0x1d28] sm:$0xff] }
 0x1ad   : > { %956 = vst [vmem:[%s2734_s4 + $0xcb0] sm:$0xff] %v955_v22  ;;  %v1083_v22 = vld [vmem:[%s2729_s3 + $0x1d30] sm:$0xff] }
 0x1ae   : > { %958 = vst [vmem:[%s2734_s4 + $0xcb8] sm:$0xff] %v957_v23  ;;  %v1085_v23 = vld [vmem:[%s2729_s3 + $0x1d38] sm:$0xff] }
 0x1af   : > { %960 = vst [vmem:[%s2734_s4 + $0xcc0] sm:$0xff] %v959_v24  ;;  %v1087_v24 = vld [vmem:[%s2729_s3 + $0x1d40] sm:$0xff] }
 0x1b0   : > { %962 = vst [vmem:[%s2734_s4 + $0xcc8] sm:$0xff] %v961_v25  ;;  %v1089_v25 = vld [vmem:[%s2729_s3 + $0x1d48] sm:$0xff] }
 0x1b1   : > { %964 = vst [vmem:[%s2734_s4 + $0xcd0] sm:$0xff] %v963_v26  ;;  %v1091_v26 = vld [vmem:[%s2729_s3 + $0x1d50] sm:$0xff] }
 0x1b2   : > { %966 = vst [vmem:[%s2734_s4 + $0xcd8] sm:$0xff] %v965_v27  ;;  %v1093_v27 = vld [vmem:[%s2729_s3 + $0x1d58] sm:$0xff] }
 0x1b3   : > { %968 = vst [vmem:[%s2734_s4 + $0xce0] sm:$0xff] %v967_v28  ;;  %v1095_v28 = vld [vmem:[%s2729_s3 + $0x1d60] sm:$0xff] }
 0x1b4   : > { %970 = vst [vmem:[%s2734_s4 + $0xce8] sm:$0xff] %v969_v29  ;;  %v1097_v29 = vld [vmem:[%s2729_s3 + $0x1d68] sm:$0xff] }
 0x1b5   : > { %972 = vst [vmem:[%s2734_s4 + $0xcf0] sm:$0xff] %v971_v30  ;;  %v1099_v30 = vld [vmem:[%s2729_s3 + $0x1d70] sm:$0xff] }
 0x1b6   : > { %974 = vst [vmem:[%s2734_s4 + $0xcf8] sm:$0xff] %v973_v31  ;;  %v1101_v31 = vld [vmem:[%s2729_s3 + $0x1d78] sm:$0xff] }
 0x1b7   : > { %976 = vst [vmem:[%s2734_s4 + $0xd00] sm:$0xff] %v975_v32  ;;  %v1103_v32 = vld [vmem:[%s2729_s3 + $0x1e00] sm:$0xff] }
 0x1b8   : > { %978 = vst [vmem:[%s2734_s4 + $0xd08] sm:$0xff] %v977_v33  ;;  %v1105_v33 = vld [vmem:[%s2729_s3 + $0x1e08] sm:$0xff] }
 0x1b9   : > { %980 = vst [vmem:[%s2734_s4 + $0xd10] sm:$0xff] %v979_v34  ;;  %v1107_v34 = vld [vmem:[%s2729_s3 + $0x1e10] sm:$0xff] }
 0x1ba   : > { %982 = vst [vmem:[%s2734_s4 + $0xd18] sm:$0xff] %v981_v35  ;;  %v1109_v35 = vld [vmem:[%s2729_s3 + $0x1e18] sm:$0xff] }
 0x1bb   : > { %984 = vst [vmem:[%s2734_s4 + $0xd20] sm:$0xff] %v983_v36  ;;  %v1111_v36 = vld [vmem:[%s2729_s3 + $0x1e20] sm:$0xff] }
 0x1bc   : > { %986 = vst [vmem:[%s2734_s4 + $0xd28] sm:$0xff] %v985_v37  ;;  %v1113_v37 = vld [vmem:[%s2729_s3 + $0x1e28] sm:$0xff] }
 0x1bd   : > { %988 = vst [vmem:[%s2734_s4 + $0xd30] sm:$0xff] %v987_v38  ;;  %v1115_v38 = vld [vmem:[%s2729_s3 + $0x1e30] sm:$0xff] }
 0x1be   : > { %990 = vst [vmem:[%s2734_s4 + $0xd38] sm:$0xff] %v989_v39  ;;  %v1117_v39 = vld [vmem:[%s2729_s3 + $0x1e38] sm:$0xff] }
 0x1bf   : > { %992 = vst [vmem:[%s2734_s4 + $0xd40] sm:$0xff] %v991_v40  ;;  %v1119_v40 = vld [vmem:[%s2729_s3 + $0x1e40] sm:$0xff] }
 0x1c0   : > { %994 = vst [vmem:[%s2734_s4 + $0xd48] sm:$0xff] %v993_v41  ;;  %v1121_v41 = vld [vmem:[%s2729_s3 + $0x1e48] sm:$0xff] }
 0x1c1   : > { %996 = vst [vmem:[%s2734_s4 + $0xd50] sm:$0xff] %v995_v42  ;;  %v1123_v42 = vld [vmem:[%s2729_s3 + $0x1e50] sm:$0xff] }
 0x1c2   : > { %998 = vst [vmem:[%s2734_s4 + $0xd58] sm:$0xff] %v997_v43  ;;  %v1125_v43 = vld [vmem:[%s2729_s3 + $0x1e58] sm:$0xff] }
 0x1c3   : > { %1000 = vst [vmem:[%s2734_s4 + $0xd60] sm:$0xff] %v999_v44  ;;  %v1127_v44 = vld [vmem:[%s2729_s3 + $0x1e60] sm:$0xff] }
 0x1c4   : > { %1002 = vst [vmem:[%s2734_s4 + $0xd68] sm:$0xff] %v1001_v45  ;;  %v1129_v45 = vld [vmem:[%s2729_s3 + $0x1e68] sm:$0xff] }
 0x1c5   : > { %1004 = vst [vmem:[%s2734_s4 + $0xd70] sm:$0xff] %v1003_v46  ;;  %v1131_v46 = vld [vmem:[%s2729_s3 + $0x1e70] sm:$0xff] }
 0x1c6   : > { %1006 = vst [vmem:[%s2734_s4 + $0xd78] sm:$0xff] %v1005_v47  ;;  %v1133_v47 = vld [vmem:[%s2729_s3 + $0x1e78] sm:$0xff] }
 0x1c7   : > { %1008 = vst [vmem:[%s2734_s4 + $0xd80] sm:$0xff] %v1007_v48  ;;  %v1135_v48 = vld [vmem:[%s2729_s3 + $0x1f00] sm:$0xff] }
 0x1c8   : > { %1010 = vst [vmem:[%s2734_s4 + $0xd88] sm:$0xff] %v1009_v49  ;;  %v1137_v49 = vld [vmem:[%s2729_s3 + $0x1f08] sm:$0xff] }
 0x1c9   : > { %1012 = vst [vmem:[%s2734_s4 + $0xd90] sm:$0xff] %v1011_v50  ;;  %v1139_v50 = vld [vmem:[%s2729_s3 + $0x1f10] sm:$0xff] }
 0x1ca   : > { %1014 = vst [vmem:[%s2734_s4 + $0xd98] sm:$0xff] %v1013_v51  ;;  %v1141_v51 = vld [vmem:[%s2729_s3 + $0x1f18] sm:$0xff] }
 0x1cb   : > { %1016 = vst [vmem:[%s2734_s4 + $0xda0] sm:$0xff] %v1015_v52  ;;  %v1143_v52 = vld [vmem:[%s2729_s3 + $0x1f20] sm:$0xff] }
 0x1cc   : > { %1018 = vst [vmem:[%s2734_s4 + $0xda8] sm:$0xff] %v1017_v53  ;;  %v1145_v53 = vld [vmem:[%s2729_s3 + $0x1f28] sm:$0xff] }
 0x1cd   : > { %1020 = vst [vmem:[%s2734_s4 + $0xdb0] sm:$0xff] %v1019_v54  ;;  %v1147_v54 = vld [vmem:[%s2729_s3 + $0x1f30] sm:$0xff] }
 0x1ce   : > { %1022 = vst [vmem:[%s2734_s4 + $0xdb8] sm:$0xff] %v1021_v55  ;;  %v1149_v55 = vld [vmem:[%s2729_s3 + $0x1f38] sm:$0xff] }
 0x1cf   : > { %1024 = vst [vmem:[%s2734_s4 + $0xdc0] sm:$0xff] %v1023_v56  ;;  %v1151_v56 = vld [vmem:[%s2729_s3 + $0x1f40] sm:$0xff] }
 0x1d0   : > { %1026 = vst [vmem:[%s2734_s4 + $0xdc8] sm:$0xff] %v1025_v57  ;;  %v1153_v57 = vld [vmem:[%s2729_s3 + $0x1f48] sm:$0xff] }
 0x1d1   : > { %1028 = vst [vmem:[%s2734_s4 + $0xdd0] sm:$0xff] %v1027_v58  ;;  %v1155_v58 = vld [vmem:[%s2729_s3 + $0x1f50] sm:$0xff] }
 0x1d2   : > { %1030 = vst [vmem:[%s2734_s4 + $0xdd8] sm:$0xff] %v1029_v59  ;;  %v1157_v59 = vld [vmem:[%s2729_s3 + $0x1f58] sm:$0xff] }
 0x1d3   : > { %1032 = vst [vmem:[%s2734_s4 + $0xde0] sm:$0xff] %v1031_v60  ;;  %v1159_v60 = vld [vmem:[%s2729_s3 + $0x1f60] sm:$0xff] }
 0x1d4   : > { %1034 = vst [vmem:[%s2734_s4 + $0xde8] sm:$0xff] %v1033_v61  ;;  %v1161_v61 = vld [vmem:[%s2729_s3 + $0x1f68] sm:$0xff] }
 0x1d5   : > { %1036 = vst [vmem:[%s2734_s4 + $0xdf0] sm:$0xff] %v1035_v62  ;;  %v1163_v62 = vld [vmem:[%s2729_s3 + $0x1f70] sm:$0xff] }
 0x1d6   : > { %1038 = vst [vmem:[%s2734_s4 + $0xdf8] sm:$0xff] %v1037_v63  ;;  %v1165_v63 = vld [vmem:[%s2729_s3 + $0x1f78] sm:$0xff] }
 0x1d7   : > { %1040 = vst [vmem:[%s2734_s4 + $0xe00] sm:$0xff] %v1039_v0 }
 0x1d8   : > { %1042 = vst [vmem:[%s2734_s4 + $0xe08] sm:$0xff] %v1041_v1 }
 0x1d9   : > { %1044 = vst [vmem:[%s2734_s4 + $0xe10] sm:$0xff] %v1043_v2 }
 0x1da   : > { %1046 = vst [vmem:[%s2734_s4 + $0xe18] sm:$0xff] %v1045_v3 }
 0x1db   : > { %1048 = vst [vmem:[%s2734_s4 + $0xe20] sm:$0xff] %v1047_v4 }
 0x1dc   : > { %1050 = vst [vmem:[%s2734_s4 + $0xe28] sm:$0xff] %v1049_v5 }
 0x1dd   : > { %1052 = vst [vmem:[%s2734_s4 + $0xe30] sm:$0xff] %v1051_v6 }
 0x1de   : > { %1054 = vst [vmem:[%s2734_s4 + $0xe38] sm:$0xff] %v1053_v7 }
 0x1df   : > { %1056 = vst [vmem:[%s2734_s4 + $0xe40] sm:$0xff] %v1055_v8 }
 0x1e0   : > { %1058 = vst [vmem:[%s2734_s4 + $0xe48] sm:$0xff] %v1057_v9 }
 0x1e1   : > { %1060 = vst [vmem:[%s2734_s4 + $0xe50] sm:$0xff] %v1059_v10 }
 0x1e2   : > { %1062 = vst [vmem:[%s2734_s4 + $0xe58] sm:$0xff] %v1061_v11 }
 0x1e3   : > { %1064 = vst [vmem:[%s2734_s4 + $0xe60] sm:$0xff] %v1063_v12 }
 0x1e4   : > { %1066 = vst [vmem:[%s2734_s4 + $0xe68] sm:$0xff] %v1065_v13 }
 0x1e5   : > { %1068 = vst [vmem:[%s2734_s4 + $0xe70] sm:$0xff] %v1067_v14 }
 0x1e6   : > { %1070 = vst [vmem:[%s2734_s4 + $0xe78] sm:$0xff] %v1069_v15 }
 0x1e7   : > { %1072 = vst [vmem:[%s2734_s4 + $0xe80] sm:$0xff] %v1071_v16 }
 0x1e8   : > { %1074 = vst [vmem:[%s2734_s4 + $0xe88] sm:$0xff] %v1073_v17 }
 0x1e9   : > { %1076 = vst [vmem:[%s2734_s4 + $0xe90] sm:$0xff] %v1075_v18 }
 0x1ea   : > { %1078 = vst [vmem:[%s2734_s4 + $0xe98] sm:$0xff] %v1077_v19 }
 0x1eb   : > { %1080 = vst [vmem:[%s2734_s4 + $0xea0] sm:$0xff] %v1079_v20 }
 0x1ec   : > { %1082 = vst [vmem:[%s2734_s4 + $0xea8] sm:$0xff] %v1081_v21 }
 0x1ed   : > { %1084 = vst [vmem:[%s2734_s4 + $0xeb0] sm:$0xff] %v1083_v22 }
 0x1ee   : > { %1086 = vst [vmem:[%s2734_s4 + $0xeb8] sm:$0xff] %v1085_v23 }
 0x1ef   : > { %1088 = vst [vmem:[%s2734_s4 + $0xec0] sm:$0xff] %v1087_v24 }
 0x1f0   : > { %1090 = vst [vmem:[%s2734_s4 + $0xec8] sm:$0xff] %v1089_v25 }
 0x1f1   : > { %1092 = vst [vmem:[%s2734_s4 + $0xed0] sm:$0xff] %v1091_v26 }
 0x1f2   : > { %1094 = vst [vmem:[%s2734_s4 + $0xed8] sm:$0xff] %v1093_v27 }
 0x1f3   : > { %1096 = vst [vmem:[%s2734_s4 + $0xee0] sm:$0xff] %v1095_v28 }
 0x1f4   : > { %1098 = vst [vmem:[%s2734_s4 + $0xee8] sm:$0xff] %v1097_v29 }
 0x1f5   : > { %1100 = vst [vmem:[%s2734_s4 + $0xef0] sm:$0xff] %v1099_v30 }
 0x1f6   : > { %1102 = vst [vmem:[%s2734_s4 + $0xef8] sm:$0xff] %v1101_v31 }
 0x1f7   : > { %1104 = vst [vmem:[%s2734_s4 + $0xf00] sm:$0xff] %v1103_v32 }
 0x1f8   : > { %1106 = vst [vmem:[%s2734_s4 + $0xf08] sm:$0xff] %v1105_v33 }
 0x1f9   : > { %1108 = vst [vmem:[%s2734_s4 + $0xf10] sm:$0xff] %v1107_v34 }
 0x1fa   : > { %1110 = vst [vmem:[%s2734_s4 + $0xf18] sm:$0xff] %v1109_v35 }
 0x1fb   : > { %1112 = vst [vmem:[%s2734_s4 + $0xf20] sm:$0xff] %v1111_v36 }
 0x1fc   : > { %1114 = vst [vmem:[%s2734_s4 + $0xf28] sm:$0xff] %v1113_v37 }
 0x1fd   : > { %1116 = vst [vmem:[%s2734_s4 + $0xf30] sm:$0xff] %v1115_v38 }
 0x1fe   : > { %1118 = vst [vmem:[%s2734_s4 + $0xf38] sm:$0xff] %v1117_v39 }
 0x1ff   : > { %1120 = vst [vmem:[%s2734_s4 + $0xf40] sm:$0xff] %v1119_v40 }
 0x200   : > { %1122 = vst [vmem:[%s2734_s4 + $0xf48] sm:$0xff] %v1121_v41 }
 0x201   : > { %1124 = vst [vmem:[%s2734_s4 + $0xf50] sm:$0xff] %v1123_v42 }
 0x202   : > { %1126 = vst [vmem:[%s2734_s4 + $0xf58] sm:$0xff] %v1125_v43 }
 0x203   : > { %1128 = vst [vmem:[%s2734_s4 + $0xf60] sm:$0xff] %v1127_v44 }
 0x204   : > { %1130 = vst [vmem:[%s2734_s4 + $0xf68] sm:$0xff] %v1129_v45 }
 0x205   : > { %1132 = vst [vmem:[%s2734_s4 + $0xf70] sm:$0xff] %v1131_v46 }
 0x206   : > { %1134 = vst [vmem:[%s2734_s4 + $0xf78] sm:$0xff] %v1133_v47 }
 0x207   : > { %1136 = vst [vmem:[%s2734_s4 + $0xf80] sm:$0xff] %v1135_v48 }
 0x208   : > { %1138 = vst [vmem:[%s2734_s4 + $0xf88] sm:$0xff] %v1137_v49 }
 0x209   : > { %1140 = vst [vmem:[%s2734_s4 + $0xf90] sm:$0xff] %v1139_v50 }
 0x20a   : > { %1142 = vst [vmem:[%s2734_s4 + $0xf98] sm:$0xff] %v1141_v51 }
 0x20b   : > { %1144 = vst [vmem:[%s2734_s4 + $0xfa0] sm:$0xff] %v1143_v52 }
 0x20c   : > { %1146 = vst [vmem:[%s2734_s4 + $0xfa8] sm:$0xff] %v1145_v53 }
 0x20d   : > { %1148 = vst [vmem:[%s2734_s4 + $0xfb0] sm:$0xff] %v1147_v54 }
 0x20e   : > { %1150 = vst [vmem:[%s2734_s4 + $0xfb8] sm:$0xff] %v1149_v55 }
 0x20f   : > { %1152 = vst [vmem:[%s2734_s4 + $0xfc0] sm:$0xff] %v1151_v56 }
 0x210   : > { %1154 = vst [vmem:[%s2734_s4 + $0xfc8] sm:$0xff] %v1153_v57 }
 0x211   : > { %1156 = vst [vmem:[%s2734_s4 + $0xfd0] sm:$0xff] %v1155_v58 }
 0x212   : > { %1158 = vst [vmem:[%s2734_s4 + $0xfd8] sm:$0xff] %v1157_v59 }
 0x213   : > { %1160 = vst [vmem:[%s2734_s4 + $0xfe0] sm:$0xff] %v1159_v60 }
 0x214   : > { %1162 = vst [vmem:[%s2734_s4 + $0xfe8] sm:$0xff] %v1161_v61 }
 0x215   : > { %1164 = vst [vmem:[%s2734_s4 + $0xff0] sm:$0xff] %v1163_v62 }
 0x216   : > { %1166 = vst [vmem:[%s2734_s4 + $0xff8] sm:$0xff] %v1165_v63 }
 0x217 PF: > { %p2536_p7 = scmp.ge.s32.totalorder %s2652_s15, 1  ;;  %p1171_p8 = scmp.lt.s32.totalorder %s2652_s15, 5 }
 0x219   : > { %p1172_p9 = pnand %p2536_p7, %p1171_p8 }
 0x21a   : > { %s1178_s5 = sand.u32 (!%p1172_p9), 1, %s2628_s9   ;;  %s2538_s18 = sshll.u32 (!%p1172_p9), %s2636_s11, 4 }
 0x21b   : > { %1175 = sbr.rel (%p1172_p9) target bundleno = 955 (0x3bb), region = 47  ;;  %s2537_s6 = sshll.u32 (!%p1172_p9), %s1178_s5, 12 }
 0x21c   : > { %s3760_s7 = scalar_lea.vmem (!%p1172_p9), [#allocation2], %s2537_s6  ;;  %p1204_p10 = scmp.lt.s32.totalorder (!%p1172_p9), %s2640_s12, 1 }
 0x21d   : > { %p4309_p11 = scmp.lt.s32.totalorder (!%p1172_p9), %s2538_s18, 31 }
 0x220   : > { %v1454_v0 = vld [vmem:[%s3760_s7 + $0x788] sm:$0xff]  ;;  %v1453_v6 = vld [vmem:[%s3760_s7 + $0x780] sm:$0xff]  ;;  %v1456_v60 = vld [vmem:[%s3760_s7 + $0x798] sm:$0xff]  ;;  %s4402_s12 = smov (!%p1204_p10, %s2640_s12), 1  ;;  %s4404_s18 = smov (!%p4309_p11, %s2538_s18), 31  ;;  %vm2418_vm0 = vcmask 1042434  }
 0x221   : > { %v1710_v1 = vld [vmem:[%s3760_s7 + $0xf88] sm:$0xff]  ;;  %1770 = vmatpush.msra.mxu2 %v1454_v0  ;;  %v1709_v7 = vld [vmem:[%s3760_s7 + $0xf80] sm:$0xff]  ;;  %1730 = vmatpush.msra.mxu0 %v1453_v6  ;;  %v1712_v61 = vld [vmem:[%s3760_s7 + $0xf98] sm:$0xff]  ;;  %s2539_s20 = sshll.u32 %s4402_s12, 5  ;;  %vm2422_vm1 = vcmask 1044484   ;;  %vm2416_vm2 = vcmask 1040384  }
 0x222   : > { %v1438_v2 = vld [vmem:[%s3760_s7 + $0x708] sm:$0xff]  ;;  %1790 = vmatpush.msra.mxu3 %v1710_v1  ;;  %v1437_v8 = vld [vmem:[%s3760_s7 + $0x700] sm:$0xff]  ;;  %1750 = vmatpush.msra.mxu1 %v1709_v7  ;;  %v1440_v0 = vld [vmem:[%s3760_s7 + $0x718] sm:$0xff]  ;;  %vm2420_vm3 = vcmask 1041408   ;;  %s1209_s11 = sadd.s32 %s2539_s20, %s4404_s18  ;;  %vm2424_vm4 = vcmask 1046534   ;;  %vm2426_vm5 = vcmask 1045508  }
 0x223   : > { %v1694_v3 = vld [vmem:[%s3760_s7 + $0xf08] sm:$0xff]  ;;  %1771 = vmatpush.msra.mxu2 %v1438_v2  ;;  %v1693_v9 = vld [vmem:[%s3760_s7 + $0xf00] sm:$0xff]  ;;  %1731 = vmatpush.msra.mxu0 %v1437_v8  ;;  %v1696_v1 = vld [vmem:[%s3760_s7 + $0xf18] sm:$0xff]  ;;  %vm2428_vm6 = vcmask 1043456   ;;  %s4347_s23 = scalar_lea.vmem %s4387_s2, %s1209_s11 }
 0x224   : > { %v1422_v4 = vld [vmem:[%s3760_s7 + $0x688] sm:$0xff]  ;;  %1791 = vmatpush.msra.mxu3 %v1694_v3  ;;  %v1421_v12 = vld [vmem:[%s3760_s7 + $0x680] sm:$0xff]  ;;  %1751 = vmatpush.msra.mxu1 %v1693_v9  ;;  %v1455_v6 = vld [vmem:[%s3760_s7 + $0x790] sm:$0xff] }
 0x225   : > { %v1678_v5 = vld [vmem:[%s3760_s7 + $0xe88] sm:$0xff]  ;;  %1772 = vmatpush.msra.mxu2 %v1422_v4  ;;  %v1677_v13 = vld [vmem:[%s3760_s7 + $0xe80] sm:$0xff]  ;;  %1732 = vmatpush.msra.mxu0 %v1421_v12  ;;  %v1424_v4 = vld [vmem:[%s3760_s7 + $0x698] sm:$0xff] }
 0x226   : > { %v1406_v10 = vld [vmem:[%s3760_s7 + $0x608] sm:$0xff]  ;;  %1792 = vmatpush.msra.mxu3 %v1678_v5  ;;  %v1405_v16 = vld [vmem:[%s3760_s7 + $0x600] sm:$0xff]  ;;  %1752 = vmatpush.msra.mxu1 %v1677_v13  ;;  %v1680_v5 = vld [vmem:[%s3760_s7 + $0xe98] sm:$0xff] }
 0x227   : > { %v1662_v11 = vld [vmem:[%s3760_s7 + $0xe08] sm:$0xff]  ;;  %1773 = vmatpush.msra.mxu2 %v1406_v10  ;;  %v1661_v17 = vld [vmem:[%s3760_s7 + $0xe00] sm:$0xff]  ;;  %1733 = vmatpush.msra.mxu0 %v1405_v16  ;;  %v1711_v7 = vld [vmem:[%s3760_s7 + $0xf90] sm:$0xff] }
 0x228   : > { %v1390_v14 = vld [vmem:[%s3760_s7 + $0x588] sm:$0xff]  ;;  %1793 = vmatpush.msra.mxu3 %v1662_v11  ;;  %v1389_v20 = vld [vmem:[%s3760_s7 + $0x580] sm:$0xff]  ;;  %1753 = vmatpush.msra.mxu1 %v1661_v17  ;;  %v1408_v8 = vld [vmem:[%s3760_s7 + $0x618] sm:$0xff] }
 0x229   : > { %v1646_v15 = vld [vmem:[%s3760_s7 + $0xd88] sm:$0xff]  ;;  %1774 = vmatpush.msra.mxu2 %v1390_v14  ;;  %v1645_v21 = vld [vmem:[%s3760_s7 + $0xd80] sm:$0xff]  ;;  %1734 = vmatpush.msra.mxu0 %v1389_v20  ;;  %v1664_v9 = vld [vmem:[%s3760_s7 + $0xe18] sm:$0xff] }
 0x22a   : > { %v1374_v18 = vld [vmem:[%s3760_s7 + $0x508] sm:$0xff]  ;;  %1794 = vmatpush.msra.mxu3 %v1646_v15  ;;  %v1373_v24 = vld [vmem:[%s3760_s7 + $0x500] sm:$0xff]  ;;  %1754 = vmatpush.msra.mxu1 %v1645_v21  ;;  %v1439_v10 = vld [vmem:[%s3760_s7 + $0x710] sm:$0xff] }
 0x22b   : > { %v1630_v19 = vld [vmem:[%s3760_s7 + $0xd08] sm:$0xff]  ;;  %1775 = vmatpush.msra.mxu2 %v1374_v18  ;;  %v1629_v25 = vld [vmem:[%s3760_s7 + $0xd00] sm:$0xff]  ;;  %1735 = vmatpush.msra.mxu0 %v1373_v24  ;;  %v1695_v11 = vld [vmem:[%s3760_s7 + $0xf10] sm:$0xff] }
 0x22c   : > { %v1358_v22 = vld [vmem:[%s3760_s7 + $0x488] sm:$0xff]  ;;  %1795 = vmatpush.msra.mxu3 %v1630_v19  ;;  %v1357_v28 = vld [vmem:[%s3760_s7 + $0x480] sm:$0xff]  ;;  %1755 = vmatpush.msra.mxu1 %v1629_v25  ;;  %v1392_v12 = vld [vmem:[%s3760_s7 + $0x598] sm:$0xff] }
 0x22d   : > { %v1614_v23 = vld [vmem:[%s3760_s7 + $0xc88] sm:$0xff]  ;;  %1776 = vmatpush.msra.mxu2 %v1358_v22  ;;  %v1613_v29 = vld [vmem:[%s3760_s7 + $0xc80] sm:$0xff]  ;;  %1736 = vmatpush.msra.mxu0 %v1357_v28  ;;  %v1648_v13 = vld [vmem:[%s3760_s7 + $0xd98] sm:$0xff] }
 0x22e   : > { %v1342_v26 = vld [vmem:[%s3760_s7 + $0x408] sm:$0xff]  ;;  %1796 = vmatpush.msra.mxu3 %v1614_v23  ;;  %v1341_v32 = vld [vmem:[%s3760_s7 + $0x400] sm:$0xff]  ;;  %1756 = vmatpush.msra.mxu1 %v1613_v29  ;;  %v1423_v14 = vld [vmem:[%s3760_s7 + $0x690] sm:$0xff] }
 0x22f   : > { %v1598_v27 = vld [vmem:[%s3760_s7 + $0xc08] sm:$0xff]  ;;  %1777 = vmatpush.msra.mxu2 %v1342_v26  ;;  %v1597_v33 = vld [vmem:[%s3760_s7 + $0xc00] sm:$0xff]  ;;  %1737 = vmatpush.msra.mxu0 %v1341_v32  ;;  %v1679_v15 = vld [vmem:[%s3760_s7 + $0xe90] sm:$0xff] }
 0x230   : > { %v1326_v30 = vld [vmem:[%s3760_s7 + $0x388] sm:$0xff]  ;;  %1797 = vmatpush.msra.mxu3 %v1598_v27  ;;  %v1325_v36 = vld [vmem:[%s3760_s7 + $0x380] sm:$0xff]  ;;  %1757 = vmatpush.msra.mxu1 %v1597_v33  ;;  %v1376_v16 = vld [vmem:[%s3760_s7 + $0x518] sm:$0xff] }
 0x231   : > { %v1582_v31 = vld [vmem:[%s3760_s7 + $0xb88] sm:$0xff]  ;;  %1778 = vmatpush.msra.mxu2 %v1326_v30  ;;  %v1581_v37 = vld [vmem:[%s3760_s7 + $0xb80] sm:$0xff]  ;;  %1738 = vmatpush.msra.mxu0 %v1325_v36  ;;  %v1632_v17 = vld [vmem:[%s3760_s7 + $0xd18] sm:$0xff] }
 0x232   : > { %v1310_v34 = vld [vmem:[%s3760_s7 + $0x308] sm:$0xff]  ;;  %1798 = vmatpush.msra.mxu3 %v1582_v31  ;;  %v1309_v40 = vld [vmem:[%s3760_s7 + $0x300] sm:$0xff]  ;;  %1758 = vmatpush.msra.mxu1 %v1581_v37  ;;  %v1407_v18 = vld [vmem:[%s3760_s7 + $0x610] sm:$0xff] }
 0x233   : > { %v1566_v35 = vld [vmem:[%s3760_s7 + $0xb08] sm:$0xff]  ;;  %1779 = vmatpush.msra.mxu2 %v1310_v34  ;;  %v1565_v41 = vld [vmem:[%s3760_s7 + $0xb00] sm:$0xff]  ;;  %1739 = vmatpush.msra.mxu0 %v1309_v40  ;;  %v1663_v19 = vld [vmem:[%s3760_s7 + $0xe10] sm:$0xff] }
 0x234   : > { %v1294_v38 = vld [vmem:[%s3760_s7 + $0x288] sm:$0xff]  ;;  %1799 = vmatpush.msra.mxu3 %v1566_v35  ;;  %v1293_v44 = vld [vmem:[%s3760_s7 + $0x280] sm:$0xff]  ;;  %1759 = vmatpush.msra.mxu1 %v1565_v41  ;;  %v1360_v20 = vld [vmem:[%s3760_s7 + $0x498] sm:$0xff] }
 0x235   : > { %v1550_v39 = vld [vmem:[%s3760_s7 + $0xa88] sm:$0xff]  ;;  %1780 = vmatpush.msra.mxu2 %v1294_v38  ;;  %v1549_v45 = vld [vmem:[%s3760_s7 + $0xa80] sm:$0xff]  ;;  %1740 = vmatpush.msra.mxu0 %v1293_v44  ;;  %v1616_v21 = vld [vmem:[%s3760_s7 + $0xc98] sm:$0xff] }
 0x236   : > { %v1278_v42 = vld [vmem:[%s3760_s7 + $0x208] sm:$0xff]  ;;  %1800 = vmatpush.msra.mxu3 %v1550_v39  ;;  %v1277_v48 = vld [vmem:[%s3760_s7 + $0x200] sm:$0xff]  ;;  %1760 = vmatpush.msra.mxu1 %v1549_v45  ;;  %v1391_v22 = vld [vmem:[%s3760_s7 + $0x590] sm:$0xff] }
 0x237   : > { %v1534_v43 = vld [vmem:[%s3760_s7 + $0xa08] sm:$0xff]  ;;  %1781 = vmatpush.msra.mxu2 %v1278_v42  ;;  %v1533_v49 = vld [vmem:[%s3760_s7 + $0xa00] sm:$0xff]  ;;  %1741 = vmatpush.msra.mxu0 %v1277_v48  ;;  %v1647_v23 = vld [vmem:[%s3760_s7 + $0xd90] sm:$0xff] }
 0x238   : > { %v1262_v46 = vld [vmem:[%s3760_s7 + $0x188] sm:$0xff]  ;;  %1801 = vmatpush.msra.mxu3 %v1534_v43  ;;  %v1261_v52 = vld [vmem:[%s3760_s7 + $0x180] sm:$0xff]  ;;  %1761 = vmatpush.msra.mxu1 %v1533_v49  ;;  %v1344_v24 = vld [vmem:[%s3760_s7 + $0x418] sm:$0xff] }
 0x239   : > { %v1518_v47 = vld [vmem:[%s3760_s7 + $0x988] sm:$0xff]  ;;  %1782 = vmatpush.msra.mxu2 %v1262_v46  ;;  %v1517_v53 = vld [vmem:[%s3760_s7 + $0x980] sm:$0xff]  ;;  %1742 = vmatpush.msra.mxu0 %v1261_v52  ;;  %v1600_v25 = vld [vmem:[%s3760_s7 + $0xc18] sm:$0xff] }
 0x23a   : > { %v1246_v50 = vld [vmem:[%s3760_s7 + $0x108] sm:$0xff]  ;;  %1802 = vmatpush.msra.mxu3 %v1518_v47  ;;  %v1245_v56 = vld [vmem:[%s3760_s7 + $0x100] sm:$0xff]  ;;  %1762 = vmatpush.msra.mxu1 %v1517_v53  ;;  %v1375_v26 = vld [vmem:[%s3760_s7 + $0x510] sm:$0xff] }
 0x23b   : > { %v1502_v51 = vld [vmem:[%s3760_s7 + $0x908] sm:$0xff]  ;;  %1783 = vmatpush.msra.mxu2 %v1246_v50  ;;  %v1501_v57 = vld [vmem:[%s3760_s7 + $0x900] sm:$0xff]  ;;  %1743 = vmatpush.msra.mxu0 %v1245_v56  ;;  %v1631_v27 = vld [vmem:[%s3760_s7 + $0xd10] sm:$0xff] }
 0x23c   : > { %v1230_v54 = vld [vmem:[%s3760_s7 + $0x88] sm:$0xff]  ;;  %1803 = vmatpush.msra.mxu3 %v1502_v51  ;;  %1763 = vmatpush.msra.mxu1 %v1501_v57  ;;  %v1229_v62 = vld [vmem:[%s3760_s7 + $0x80] sm:$0xff]  ;;  %v1328_v28 = vld [vmem:[%s3760_s7 + $0x398] sm:$0xff] }
 0x23d   : > { %v1486_v55 = vld [vmem:[%s3760_s7 + $0x888] sm:$0xff]  ;;  %1784 = vmatpush.msra.mxu2 %v1230_v54  ;;  %v1485_v63 = vld [vmem:[%s3760_s7 + $0x880] sm:$0xff]  ;;  %1744 = vmatpush.msra.mxu0 %v1229_v62  ;;  %v1584_v29 = vld [vmem:[%s3760_s7 + $0xb98] sm:$0xff] }
 0x23e   : > { %v1214_v58 = vld [vmem:[%s3760_s7 + $0x8] sm:$0xff]  ;;  %1804 = vmatpush.msra.mxu3 %v1486_v55  ;;  %v1213_v2 = vld [vmem:[%s3760_s7] sm:$0xff]  ;;  %1764 = vmatpush.msra.mxu1 %v1485_v63  ;;  %v1359_v30 = vld [vmem:[%s3760_s7 + $0x490] sm:$0xff] }
 0x23f   : > { %v1470_v59 = vld [vmem:[%s3760_s7 + $0x808] sm:$0xff]  ;;  %1785 = vmatpush.msra.mxu2 %v1214_v58  ;;  %v1469_v3 = vld [vmem:[%s3760_s7 + $0x800] sm:$0xff]  ;;  %1745 = vmatpush.msra.mxu0 %v1213_v2  ;;  %v1615_v31 = vld [vmem:[%s3760_s7 + $0xc90] sm:$0xff] }
 0x240   : > { %1805 = vmatpush.msra.mxu3 %v1470_v59  ;;  %1765 = vmatpush.msra.mxu1 %v1469_v3  ;;  %v1312_v32 = vld [vmem:[%s3760_s7 + $0x318] sm:$0xff]  ;;  %v1343_v34 = vld [vmem:[%s3760_s7 + $0x410] sm:$0xff]  ;;  %v1212_v36 = vld [vmem:[%s4386_s1] sm:$0x3] }
 0x241   : > { %1850 = vmatpush.msrb.mxu2 %v1456_v60  ;;  %1810 = vmatpush.msrb.mxu0 %v1455_v6  ;;  %v1568_v33 = vld [vmem:[%s3760_s7 + $0xb18] sm:$0xff]  ;;  %v1599_v35 = vld [vmem:[%s3760_s7 + $0xc10] sm:$0xff]  ;;  %v3871_v43 = vperm.slane %v1212_v36, 0  ;;  %v3873_v44 = vperm.slane %v1212_v36, 1  ;;  %v1714_v62 = vld [vmem:[%s3760_s7 + $0xfa8] sm:$0xff] }
 0x242   : > { %1870 = vmatpush.msrb.mxu3 %v1712_v61  ;;  %1830 = vmatpush.msrb.mxu1 %v1711_v7  ;;  %v1296_v37 = vld [vmem:[%s3760_s7 + $0x298] sm:$0xff]  ;;  %v1327_v39 = vld [vmem:[%s3760_s7 + $0x390] sm:$0xff]  ;;  %v1458_v61 = vld [vmem:[%s3760_s7 + $0x7a8] sm:$0xff] }
 0x243   : > { %1851 = vmatpush.msrb.mxu2 %v1440_v0  ;;  %1811 = vmatpush.msrb.mxu0 %v1439_v10  ;;  %v1552_v38 = vld [vmem:[%s3760_s7 + $0xa98] sm:$0xff]  ;;  %v1583_v40 = vld [vmem:[%s3760_s7 + $0xb90] sm:$0xff]  ;;  %v1698_v2 = vld [vmem:[%s3760_s7 + $0xf28] sm:$0xff] }
 0x244   : > { %1871 = vmatpush.msrb.mxu3 %v1696_v1  ;;  %1831 = vmatpush.msrb.mxu1 %v1695_v11  ;;  %v1280_v41 = vld [vmem:[%s3760_s7 + $0x218] sm:$0xff]  ;;  %v1311_v45 = vld [vmem:[%s3760_s7 + $0x310] sm:$0xff]  ;;  %v1442_v1 = vld [vmem:[%s3760_s7 + $0x728] sm:$0xff] }
 0x245   : > { %1852 = vmatpush.msrb.mxu2 %v1424_v4  ;;  %1812 = vmatpush.msrb.mxu0 %v1423_v14  ;;  %v1536_v42 = vld [vmem:[%s3760_s7 + $0xa18] sm:$0xff]  ;;  %v1567_v46 = vld [vmem:[%s3760_s7 + $0xb10] sm:$0xff]  ;;  %v1682_v6 = vld [vmem:[%s3760_s7 + $0xea8] sm:$0xff] }
 0x246   : > { %1872 = vmatpush.msrb.mxu3 %v1680_v5  ;;  %1832 = vmatpush.msrb.mxu1 %v1679_v15  ;;  %v1264_v47 = vld [vmem:[%s3760_s7 + $0x198] sm:$0xff]  ;;  %v1295_v49 = vld [vmem:[%s3760_s7 + $0x290] sm:$0xff]  ;;  %v1426_v5 = vld [vmem:[%s3760_s7 + $0x6a8] sm:$0xff] }
 0x247   : > { %1853 = vmatpush.msrb.mxu2 %v1408_v8  ;;  %1813 = vmatpush.msrb.mxu0 %v1407_v18  ;;  %v1520_v48 = vld [vmem:[%s3760_s7 + $0x998] sm:$0xff]  ;;  %v1551_v50 = vld [vmem:[%s3760_s7 + $0xa90] sm:$0xff]  ;;  %v1713_v10 = vld [vmem:[%s3760_s7 + $0xfa0] sm:$0xff] }
 0x248   : > { %1873 = vmatpush.msrb.mxu3 %v1664_v9  ;;  %1833 = vmatpush.msrb.mxu1 %v1663_v19  ;;  %v1248_v51 = vld [vmem:[%s3760_s7 + $0x118] sm:$0xff]  ;;  %v1279_v53 = vld [vmem:[%s3760_s7 + $0x210] sm:$0xff]  ;;  %v1457_v9 = vld [vmem:[%s3760_s7 + $0x7a0] sm:$0xff] }
 0x249   : > { %1854 = vmatpush.msrb.mxu2 %v1392_v12  ;;  %1814 = vmatpush.msrb.mxu0 %v1391_v22  ;;  %v1504_v52 = vld [vmem:[%s3760_s7 + $0x918] sm:$0xff]  ;;  %v1535_v54 = vld [vmem:[%s3760_s7 + $0xa10] sm:$0xff]  ;;  %v1410_v11 = vld [vmem:[%s3760_s7 + $0x628] sm:$0xff] }
 0x24a   : > { %1874 = vmatpush.msrb.mxu3 %v1648_v13  ;;  %1834 = vmatpush.msrb.mxu1 %v1647_v23  ;;  %v1232_v55 = vld [vmem:[%s3760_s7 + $0x98] sm:$0xff]  ;;  %v1263_v57 = vld [vmem:[%s3760_s7 + $0x190] sm:$0xff]  ;;  %v1666_v12 = vld [vmem:[%s3760_s7 + $0xe28] sm:$0xff] }
 0x24b   : > { %1855 = vmatpush.msrb.mxu2 %v1376_v16  ;;  %1815 = vmatpush.msrb.mxu0 %v1375_v26  ;;  %v1488_v56 = vld [vmem:[%s3760_s7 + $0x898] sm:$0xff]  ;;  %v1519_v58 = vld [vmem:[%s3760_s7 + $0x990] sm:$0xff]  ;;  %v1441_v13 = vld [vmem:[%s3760_s7 + $0x720] sm:$0xff] }
 0x24c   : > { %1875 = vmatpush.msrb.mxu3 %v1632_v17  ;;  %1835 = vmatpush.msrb.mxu1 %v1631_v27  ;;  %v1216_v59 = vld [vmem:[%s3760_s7 + $0x18] sm:$0xff]  ;;  %v1247_v63 = vld [vmem:[%s3760_s7 + $0x110] sm:$0xff]  ;;  %v1697_v14 = vld [vmem:[%s3760_s7 + $0xf20] sm:$0xff] }
 0x24d   : > { %1856 = vmatpush.msrb.mxu2 %v1360_v20  ;;  %1816 = vmatpush.msrb.mxu0 %v1359_v30  ;;  %v1472_v60 = vld [vmem:[%s3760_s7 + $0x818] sm:$0xff]  ;;  %v1503_v0 = vld [vmem:[%s3760_s7 + $0x910] sm:$0xff]  ;;  %v1394_v15 = vld [vmem:[%s3760_s7 + $0x5a8] sm:$0xff] }
 0x24e   : > { %1876 = vmatpush.msrb.mxu3 %v1616_v21  ;;  %1836 = vmatpush.msrb.mxu1 %v1615_v31  ;;  %v1231_v3 = vld [vmem:[%s3760_s7 + $0x90] sm:$0xff]  ;;  %v1650_v16 = vld [vmem:[%s3760_s7 + $0xda8] sm:$0xff]  ;;  %v1425_v17 = vld [vmem:[%s3760_s7 + $0x6a0] sm:$0xff] }
 0x24f   : > { %1857 = vmatpush.msrb.mxu2 %v1344_v24  ;;  %1817 = vmatpush.msrb.mxu0 %v1343_v34  ;;  %v1487_v4 = vld [vmem:[%s3760_s7 + $0x890] sm:$0xff]  ;;  %v1681_v18 = vld [vmem:[%s3760_s7 + $0xea0] sm:$0xff]  ;;  %v1378_v19 = vld [vmem:[%s3760_s7 + $0x528] sm:$0xff] }
 0x250   : > { %1877 = vmatpush.msrb.mxu3 %v1600_v25  ;;  %1837 = vmatpush.msrb.mxu1 %v1599_v35  ;;  %v1215_v7 = vld [vmem:[%s3760_s7 + $0x10] sm:$0xff]  ;;  %v1634_v20 = vld [vmem:[%s3760_s7 + $0xd28] sm:$0xff]  ;;  %v1409_v21 = vld [vmem:[%s3760_s7 + $0x620] sm:$0xff] }
 0x251   : > { %1858 = vmatpush.msrb.mxu2 %v1328_v28  ;;  %1818 = vmatpush.msrb.mxu0 %v1327_v39  ;;  %v1471_v8 = vld [vmem:[%s3760_s7 + $0x810] sm:$0xff]  ;;  %v1665_v22 = vld [vmem:[%s3760_s7 + $0xe20] sm:$0xff]  ;;  %v1362_v23 = vld [vmem:[%s3760_s7 + $0x4a8] sm:$0xff] }
 0x252   : > { %1878 = vmatpush.msrb.mxu3 %v1584_v29  ;;  %1838 = vmatpush.msrb.mxu1 %v1583_v40  ;;  %v1618_v24 = vld [vmem:[%s3760_s7 + $0xca8] sm:$0xff]  ;;  %v1393_v25 = vld [vmem:[%s3760_s7 + $0x5a0] sm:$0xff] }
 0x253   : > { %1859 = vmatpush.msrb.mxu2 %v1312_v32  ;;  %1806 = vmatmul.f32.vlgmr.msra.gmra.mxu3 %v3873_v44  ;;  %v1649_v26 = vld [vmem:[%s3760_s7 + $0xda0] sm:$0xff]  ;;  %v1346_v27 = vld [vmem:[%s3760_s7 + $0x428] sm:$0xff] }
 0x254   : > { %1879 = vmatpush.msrb.mxu3 %v1568_v33  ;;  %1786 = vmatmul.f32.vlgmr.msra.gmra.mxu2 %v3871_v43  ;;  %v1602_v28 = vld [vmem:[%s3760_s7 + $0xc28] sm:$0xff]  ;;  %v1377_v29 = vld [vmem:[%s3760_s7 + $0x520] sm:$0xff] }
 0x255   : > { %1860 = vmatpush.msrb.mxu2 %v1296_v37  ;;  %1819 = vmatpush.msrb.mxu0 %v1311_v45  ;;  %v1633_v30 = vld [vmem:[%s3760_s7 + $0xd20] sm:$0xff]  ;;  %v1330_v31 = vld [vmem:[%s3760_s7 + $0x3a8] sm:$0xff] }
 0x256   : > { %1880 = vmatpush.msrb.mxu3 %v1552_v38  ;;  %1839 = vmatpush.msrb.mxu1 %v1567_v46  ;;  %v1586_v32 = vld [vmem:[%s3760_s7 + $0xba8] sm:$0xff]  ;;  %v1361_v33 = vld [vmem:[%s3760_s7 + $0x4a0] sm:$0xff] }
 0x257   : > { %1861 = vmatpush.msrb.mxu2 %v1280_v41  ;;  %1820 = vmatpush.msrb.mxu0 %v1295_v49  ;;  %v1617_v34 = vld [vmem:[%s3760_s7 + $0xca0] sm:$0xff]  ;;  %v1314_v35 = vld [vmem:[%s3760_s7 + $0x328] sm:$0xff] }
 0x258   : > { %1881 = vmatpush.msrb.mxu3 %v1536_v42  ;;  %1840 = vmatpush.msrb.mxu1 %v1551_v50  ;;  %v1570_v36 = vld [vmem:[%s3760_s7 + $0xb28] sm:$0xff]  ;;  %v1345_v37 = vld [vmem:[%s3760_s7 + $0x420] sm:$0xff] }
 0x259   : > { %1862 = vmatpush.msrb.mxu2 %v1264_v47  ;;  %1821 = vmatpush.msrb.mxu0 %v1279_v53  ;;  %v1601_v38 = vld [vmem:[%s3760_s7 + $0xc20] sm:$0xff]  ;;  %v1298_v39 = vld [vmem:[%s3760_s7 + $0x2a8] sm:$0xff] }
 0x25a   : > { %1882 = vmatpush.msrb.mxu3 %v1520_v48  ;;  %1841 = vmatpush.msrb.mxu1 %v1535_v54  ;;  %v1554_v40 = vld [vmem:[%s3760_s7 + $0xaa8] sm:$0xff]  ;;  %v1329_v41 = vld [vmem:[%s3760_s7 + $0x3a0] sm:$0xff] }
 0x25b   : > { %1863 = vmatpush.msrb.mxu2 %v1248_v51  ;;  %1746 = vmatmul.f32.vlgmr.msra.gmra.mxu0 %v3871_v43  ;;  %v1585_v42 = vld [vmem:[%s3760_s7 + $0xba0] sm:$0xff]  ;;  %v1282_v45 = vld [vmem:[%s3760_s7 + $0x228] sm:$0xff] }
 0x25c   : > { %1883 = vmatpush.msrb.mxu3 %v1504_v52  ;;  %1766 = vmatmul.f32.vlgmr.msra.gmra.mxu1 %v3873_v44  ;;  %v1538_v46 = vld [vmem:[%s3760_s7 + $0xa28] sm:$0xff]  ;;  %v1313_v47 = vld [vmem:[%s3760_s7 + $0x320] sm:$0xff] }
 0x25d   : > { %1864 = vmatpush.msrb.mxu2 %v1232_v55  ;;  %1822 = vmatpush.msrb.mxu0 %v1263_v57  ;;  %v1569_v48 = vld [vmem:[%s3760_s7 + $0xb20] sm:$0xff]  ;;  %v1266_v49 = vld [vmem:[%s3760_s7 + $0x1a8] sm:$0xff] }
 0x25e   : > { %1884 = vmatpush.msrb.mxu3 %v1488_v56  ;;  %1842 = vmatpush.msrb.mxu1 %v1519_v58  ;;  %v1522_v50 = vld [vmem:[%s3760_s7 + $0x9a8] sm:$0xff]  ;;  %v1297_v51 = vld [vmem:[%s3760_s7 + $0x2a0] sm:$0xff] }
 0x25f   : > { %1865 = vmatpush.msrb.mxu2 %v1216_v59  ;;  %1823 = vmatpush.msrb.mxu0 %v1247_v63  ;;  %v1553_v52 = vld [vmem:[%s3760_s7 + $0xaa0] sm:$0xff]  ;;  %v1250_v53 = vld [vmem:[%s3760_s7 + $0x128] sm:$0xff]  ;;  %v1460_v63 = vld [vmem:[%s3760_s7 + $0x7b8] sm:$0xff] }
 0x260   : > { %1885 = vmatpush.msrb.mxu3 %v1472_v60  ;;  %1866 = vmatmul.f32.vlgmr.msrb.gmra.mxu2 %v3871_v43  ;;  %v1506_v54 = vld [vmem:[%s3760_s7 + $0x928] sm:$0xff]  ;;  %v1281_v55 = vld [vmem:[%s3760_s7 + $0x220] sm:$0xff] }
 0x261   : > { %1886 = vmatmul.f32.vlgmr.msrb.gmra.mxu3 %v3873_v44  ;;  %1930 = vmatpush.msra.mxu2 %v1458_v61  ;;  %v1537_v56 = vld [vmem:[%s3760_s7 + $0xa20] sm:$0xff]  ;;  %v1234_v57 = vld [vmem:[%s3760_s7 + $0xa8] sm:$0xff] }
 0x262   : > { %1950 = vmatpush.msra.mxu3 %v1714_v62  ;;  %1843 = vmatpush.msrb.mxu1 %v1503_v0  ;;  %v1490_v58 = vld [vmem:[%s3760_s7 + $0x8a8] sm:$0xff]  ;;  %v1265_v59 = vld [vmem:[%s3760_s7 + $0x1a0] sm:$0xff]  ;;  %v1716_v0 = vld [vmem:[%s3760_s7 + $0xfb8] sm:$0xff] }
 0x263   : > { %1931 = vmatpush.msra.mxu2 %v1442_v1  ;;  %1824 = vmatpush.msrb.mxu0 %v1231_v3  ;;  %v1521_v60 = vld [vmem:[%s3760_s7 + $0x9a0] sm:$0xff]  ;;  %v1218_v61 = vld [vmem:[%s3760_s7 + $0x28] sm:$0xff]  ;;  %v1444_v3 = vld [vmem:[%s3760_s7 + $0x738] sm:$0xff] }
 0x264   : > { %1951 = vmatpush.msra.mxu3 %v1698_v2  ;;  %1844 = vmatpush.msrb.mxu1 %v1487_v4  ;;  %v1474_v62 = vld [vmem:[%s3760_s7 + $0x828] sm:$0xff]  ;;  %v1249_v1 = vld [vmem:[%s3760_s7 + $0x120] sm:$0xff]  ;;  %v1700_v4 = vld [vmem:[%s3760_s7 + $0xf38] sm:$0xff] }
 0x265   : > { %1932 = vmatpush.msra.mxu2 %v1426_v5  ;;  %1825 = vmatpush.msrb.mxu0 %v1215_v7  ;;  %v1505_v2 = vld [vmem:[%s3760_s7 + $0x920] sm:$0xff]  ;;  %v1428_v7 = vld [vmem:[%s3760_s7 + $0x6b8] sm:$0xff] }
 0x266   : > { %1952 = vmatpush.msra.mxu3 %v1682_v6  ;;  %1845 = vmatpush.msrb.mxu1 %v1471_v8  ;;  %v1233_v5 = vld [vmem:[%s3760_s7 + $0xa0] sm:$0xff]  ;;  %v1684_v8 = vld [vmem:[%s3760_s7 + $0xeb8] sm:$0xff] }
 0x267   : > { %1826 = vmatmul.f32.vlgmr.msrb.gmra.mxu0 %v3871_v43  ;;  %1846 = vmatmul.f32.vlgmr.msrb.gmra.mxu1 %v3873_v44  ;;  %v1489_v6 = vld [vmem:[%s3760_s7 + $0x8a0] sm:$0xff] }
 0x268   : > { %1890 = vmatpush.msra.mxu0 %v1457_v9  ;;  %1910 = vmatpush.msra.mxu1 %v1713_v10  ;;  %v1217_v9 = vld [vmem:[%s3760_s7 + $0x20] sm:$0xff] }
 0x269   : > { %1933 = vmatpush.msra.mxu2 %v1410_v11  ;;  %1953 = vmatpush.msra.mxu3 %v1666_v12  ;;  %v1473_v10 = vld [vmem:[%s3760_s7 + $0x820] sm:$0xff]  ;;  %v1459_v11 = vld [vmem:[%s3760_s7 + $0x7b0] sm:$0xff] }
 0x26a   : > { %1891 = vmatpush.msra.mxu0 %v1441_v13  ;;  %1911 = vmatpush.msra.mxu1 %v1697_v14  ;;  %v1715_v12 = vld [vmem:[%s3760_s7 + $0xfb0] sm:$0xff]  ;;  %v1412_v13 = vld [vmem:[%s3760_s7 + $0x638] sm:$0xff] }
 0x26b   : > { %1934 = vmatpush.msra.mxu2 %v1394_v15  ;;  %1954 = vmatpush.msra.mxu3 %v1650_v16  ;;  %v1668_v14 = vld [vmem:[%s3760_s7 + $0xe38] sm:$0xff]  ;;  %v1443_v15 = vld [vmem:[%s3760_s7 + $0x730] sm:$0xff] }
 0x26c   : > { %1892 = vmatpush.msra.mxu0 %v1425_v17  ;;  %1912 = vmatpush.msra.mxu1 %v1681_v18  ;;  %v1699_v16 = vld [vmem:[%s3760_s7 + $0xf30] sm:$0xff]  ;;  %v1396_v17 = vld [vmem:[%s3760_s7 + $0x5b8] sm:$0xff] }
 0x26d   : > { %1935 = vmatpush.msra.mxu2 %v1378_v19  ;;  %1955 = vmatpush.msra.mxu3 %v1634_v20  ;;  %v1652_v18 = vld [vmem:[%s3760_s7 + $0xdb8] sm:$0xff]  ;;  %v1427_v19 = vld [vmem:[%s3760_s7 + $0x6b0] sm:$0xff] }
 0x26e   : > { %1893 = vmatpush.msra.mxu0 %v1409_v21  ;;  %1913 = vmatpush.msra.mxu1 %v1665_v22  ;;  %v1683_v20 = vld [vmem:[%s3760_s7 + $0xeb0] sm:$0xff]  ;;  %v1380_v21 = vld [vmem:[%s3760_s7 + $0x538] sm:$0xff] }
 0x26f   : > { %1936 = vmatpush.msra.mxu2 %v1362_v23  ;;  %1956 = vmatpush.msra.mxu3 %v1618_v24  ;;  %v1636_v22 = vld [vmem:[%s3760_s7 + $0xd38] sm:$0xff]  ;;  %v1411_v23 = vld [vmem:[%s3760_s7 + $0x630] sm:$0xff] }
 0x270   : > { %1894 = vmatpush.msra.mxu0 %v1393_v25  ;;  %1914 = vmatpush.msra.mxu1 %v1649_v26  ;;  %v1667_v24 = vld [vmem:[%s3760_s7 + $0xe30] sm:$0xff]  ;;  %v1364_v25 = vld [vmem:[%s3760_s7 + $0x4b8] sm:$0xff] }
 0x271   : > { %1937 = vmatpush.msra.mxu2 %v1346_v27  ;;  %1957 = vmatpush.msra.mxu3 %v1602_v28  ;;  %v1620_v26 = vld [vmem:[%s3760_s7 + $0xcb8] sm:$0xff]  ;;  %v1395_v27 = vld [vmem:[%s3760_s7 + $0x5b0] sm:$0xff] }
 0x272   : > { %1895 = vmatpush.msra.mxu0 %v1377_v29  ;;  %1915 = vmatpush.msra.mxu1 %v1633_v30  ;;  %v1651_v28 = vld [vmem:[%s3760_s7 + $0xdb0] sm:$0xff]  ;;  %v1348_v29 = vld [vmem:[%s3760_s7 + $0x438] sm:$0xff] }
 0x273   : > { %1938 = vmatpush.msra.mxu2 %v1330_v31  ;;  %1958 = vmatpush.msra.mxu3 %v1586_v32  ;;  %v1604_v30 = vld [vmem:[%s3760_s7 + $0xc38] sm:$0xff]  ;;  %v1379_v31 = vld [vmem:[%s3760_s7 + $0x530] sm:$0xff] }
 0x274   : > { %1896 = vmatpush.msra.mxu0 %v1361_v33  ;;  %1916 = vmatpush.msra.mxu1 %v1617_v34  ;;  %v1635_v32 = vld [vmem:[%s3760_s7 + $0xd30] sm:$0xff]  ;;  %v1332_v33 = vld [vmem:[%s3760_s7 + $0x3b8] sm:$0xff] }
 0x275   : > { %1939 = vmatpush.msra.mxu2 %v1314_v35  ;;  %1959 = vmatpush.msra.mxu3 %v1570_v36  ;;  %v1588_v34 = vld [vmem:[%s3760_s7 + $0xbb8] sm:$0xff]  ;;  %v1363_v35 = vld [vmem:[%s3760_s7 + $0x4b0] sm:$0xff] }
 0x276   : > { %1897 = vmatpush.msra.mxu0 %v1345_v37  ;;  %1917 = vmatpush.msra.mxu1 %v1601_v38  ;;  %v1619_v36 = vld [vmem:[%s3760_s7 + $0xcb0] sm:$0xff]  ;;  %v1316_v37 = vld [vmem:[%s3760_s7 + $0x338] sm:$0xff] }
 0x277   : > { %1940 = vmatpush.msra.mxu2 %v1298_v39  ;;  %1960 = vmatpush.msra.mxu3 %v1554_v40  ;;  %v1572_v38 = vld [vmem:[%s3760_s7 + $0xb38] sm:$0xff]  ;;  %v1347_v39 = vld [vmem:[%s3760_s7 + $0x430] sm:$0xff] }
 0x278   : > { %1898 = vmatpush.msra.mxu0 %v1329_v41  ;;  %1918 = vmatpush.msra.mxu1 %v1585_v42  ;;  %v1603_v40 = vld [vmem:[%s3760_s7 + $0xc30] sm:$0xff]  ;;  %v1300_v41 = vld [vmem:[%s3760_s7 + $0x2b8] sm:$0xff] }
 0x279   : > { %1941 = vmatpush.msra.mxu2 %v1282_v45  ;;  %1961 = vmatpush.msra.mxu3 %v1538_v46  ;;  %v1556_v42 = vld [vmem:[%s3760_s7 + $0xab8] sm:$0xff]  ;;  %v1331_v45 = vld [vmem:[%s3760_s7 + $0x3b0] sm:$0xff] }
 0x27a   : > { %1899 = vmatpush.msra.mxu0 %v1313_v47  ;;  %1919 = vmatpush.msra.mxu1 %v1569_v48  ;;  %v1587_v46 = vld [vmem:[%s3760_s7 + $0xbb0] sm:$0xff]  ;;  %v1284_v47 = vld [vmem:[%s3760_s7 + $0x238] sm:$0xff] }
 0x27b   : > { %1942 = vmatpush.msra.mxu2 %v1266_v49  ;;  %1962 = vmatpush.msra.mxu3 %v1522_v50  ;;  %v1540_v48 = vld [vmem:[%s3760_s7 + $0xa38] sm:$0xff]  ;;  %v1315_v49 = vld [vmem:[%s3760_s7 + $0x330] sm:$0xff] }
 0x27c   : > { %1900 = vmatpush.msra.mxu0 %v1297_v51  ;;  %1920 = vmatpush.msra.mxu1 %v1553_v52  ;;  %v1571_v50 = vld [vmem:[%s3760_s7 + $0xb30] sm:$0xff]  ;;  %v1268_v51 = vld [vmem:[%s3760_s7 + $0x1b8] sm:$0xff] }
 0x27d   : > { %1943 = vmatpush.msra.mxu2 %v1250_v53  ;;  %1963 = vmatpush.msra.mxu3 %v1506_v54  ;;  %v1524_v52 = vld [vmem:[%s3760_s7 + $0x9b8] sm:$0xff]  ;;  %v1299_v53 = vld [vmem:[%s3760_s7 + $0x2b0] sm:$0xff] }
 0x27e   : > { %1901 = vmatpush.msra.mxu0 %v1281_v55  ;;  %1921 = vmatpush.msra.mxu1 %v1537_v56  ;;  %v1555_v54 = vld [vmem:[%s3760_s7 + $0xab0] sm:$0xff]  ;;  %v1252_v55 = vld [vmem:[%s3760_s7 + $0x138] sm:$0xff] }
 0x27f   : > { %1944 = vmatpush.msra.mxu2 %v1234_v57  ;;  %1964 = vmatpush.msra.mxu3 %v1490_v58  ;;  %v1508_v56 = vld [vmem:[%s3760_s7 + $0x938] sm:$0xff]  ;;  %v1283_v57 = vld [vmem:[%s3760_s7 + $0x230] sm:$0xff] }
 0x280   : > { %1902 = vmatpush.msra.mxu0 %v1265_v59  ;;  %1922 = vmatpush.msra.mxu1 %v1521_v60  ;;  %v1539_v58 = vld [vmem:[%s3760_s7 + $0xa30] sm:$0xff]  ;;  %v1236_v59 = vld [vmem:[%s3760_s7 + $0xb8] sm:$0xff] }
 0x281   : > { %1945 = vmatpush.msra.mxu2 %v1218_v61  ;;  %1965 = vmatpush.msra.mxu3 %v1474_v62  ;;  %v1492_v60 = vld [vmem:[%s3760_s7 + $0x8b8] sm:$0xff]  ;;  %v1267_v61 = vld [vmem:[%s3760_s7 + $0x1b0] sm:$0xff] }
 0x282   : > { %1903 = vmatpush.msra.mxu0 %v1249_v1  ;;  %1923 = vmatpush.msra.mxu1 %v1505_v2  ;;  %v1523_v62 = vld [vmem:[%s3760_s7 + $0x9b0] sm:$0xff]  ;;  %v1462_v1 = vld [vmem:[%s3760_s7 + $0x7c8] sm:$0xff] }
 0x283   : > { %2010 = vmatpush.msrb.mxu2 %v1460_v63  ;;  %2030 = vmatpush.msrb.mxu3 %v1716_v0  ;;  %v1220_v63 = vld [vmem:[%s3760_s7 + $0x38] sm:$0xff]  ;;  %v1718_v2 = vld [vmem:[%s3760_s7 + $0xfc8] sm:$0xff] }
 0x284   : > { %1904 = vmatpush.msra.mxu0 %v1233_v5  ;;  %1924 = vmatpush.msra.mxu1 %v1489_v6  ;;  %v1476_v0 = vld [vmem:[%s3760_s7 + $0x838] sm:$0xff]  ;;  %v1446_v5 = vld [vmem:[%s3760_s7 + $0x748] sm:$0xff] }
 0x285   : > { %2011 = vmatpush.msrb.mxu2 %v1444_v3  ;;  %2031 = vmatpush.msrb.mxu3 %v1700_v4  ;;  %v1251_v3 = vld [vmem:[%s3760_s7 + $0x130] sm:$0xff]  ;;  %v1702_v6 = vld [vmem:[%s3760_s7 + $0xf48] sm:$0xff] }
 0x286   : > { %1905 = vmatpush.msra.mxu0 %v1217_v9  ;;  %1925 = vmatpush.msra.mxu1 %v1473_v10  ;;  %v1507_v4 = vld [vmem:[%s3760_s7 + $0x930] sm:$0xff]  ;;  %v1430_v9 = vld [vmem:[%s3760_s7 + $0x6c8] sm:$0xff] }
 0x287   : > { %2012 = vmatpush.msrb.mxu2 %v1428_v7  ;;  %2032 = vmatpush.msrb.mxu3 %v1684_v8  ;;  %v1235_v7 = vld [vmem:[%s3760_s7 + $0xb0] sm:$0xff]  ;;  %v1686_v10 = vld [vmem:[%s3760_s7 + $0xec8] sm:$0xff] }
 0x288   : > { %1970 = vmatpush.msrb.mxu0 %v1459_v11  ;;  %1990 = vmatpush.msrb.mxu1 %v1715_v12  ;;  %v1491_v8 = vld [vmem:[%s3760_s7 + $0x8b0] sm:$0xff] }
 0x289   : > { %2013 = vmatpush.msrb.mxu2 %v1412_v13  ;;  %2033 = vmatpush.msrb.mxu3 %v1668_v14  ;;  %v1219_v11 = vld [vmem:[%s3760_s7 + $0x30] sm:$0xff]  ;;  %v1461_v13 = vld [vmem:[%s3760_s7 + $0x7c0] sm:$0xff] }
 0x28a   : > { %1971 = vmatpush.msrb.mxu0 %v1443_v15  ;;  %1991 = vmatpush.msrb.mxu1 %v1699_v16  ;;  %v1475_v12 = vld [vmem:[%s3760_s7 + $0x830] sm:$0xff]  ;;  %v1717_v14 = vld [vmem:[%s3760_s7 + $0xfc0] sm:$0xff]  ;;  %v1414_v15 = vld [vmem:[%s3760_s7 + $0x648] sm:$0xff] }
 0x28b   : > { %2014 = vmatpush.msrb.mxu2 %v1396_v17  ;;  %2034 = vmatpush.msrb.mxu3 %v1652_v18  ;;  %v1670_v16 = vld [vmem:[%s3760_s7 + $0xe48] sm:$0xff]  ;;  %v1445_v17 = vld [vmem:[%s3760_s7 + $0x740] sm:$0xff] }
 0x28c   : > { %1972 = vmatpush.msrb.mxu0 %v1427_v19  ;;  %1992 = vmatpush.msrb.mxu1 %v1683_v20  ;;  %v1701_v18 = vld [vmem:[%s3760_s7 + $0xf40] sm:$0xff]  ;;  %v1398_v19 = vld [vmem:[%s3760_s7 + $0x5c8] sm:$0xff] }
 0x28d   : > { %2015 = vmatpush.msrb.mxu2 %v1380_v21  ;;  %2035 = vmatpush.msrb.mxu3 %v1636_v22  ;;  %v1654_v20 = vld [vmem:[%s3760_s7 + $0xdc8] sm:$0xff]  ;;  %v1429_v21 = vld [vmem:[%s3760_s7 + $0x6c0] sm:$0xff] }
 0x28e   : > { %1973 = vmatpush.msrb.mxu0 %v1411_v23  ;;  %1993 = vmatpush.msrb.mxu1 %v1667_v24  ;;  %v1685_v22 = vld [vmem:[%s3760_s7 + $0xec0] sm:$0xff]  ;;  %v1382_v23 = vld [vmem:[%s3760_s7 + $0x548] sm:$0xff] }
 0x28f   : > { %2016 = vmatpush.msrb.mxu2 %v1364_v25  ;;  %2036 = vmatpush.msrb.mxu3 %v1620_v26  ;;  %v1638_v24 = vld [vmem:[%s3760_s7 + $0xd48] sm:$0xff]  ;;  %v1413_v25 = vld [vmem:[%s3760_s7 + $0x640] sm:$0xff] }
 0x290   : > { %1974 = vmatpush.msrb.mxu0 %v1395_v27  ;;  %1994 = vmatpush.msrb.mxu1 %v1651_v28  ;;  %v1669_v26 = vld [vmem:[%s3760_s7 + $0xe40] sm:$0xff]  ;;  %v1366_v27 = vld [vmem:[%s3760_s7 + $0x4c8] sm:$0xff] }
 0x291   : > { %2017 = vmatpush.msrb.mxu2 %v1348_v29  ;;  %2037 = vmatpush.msrb.mxu3 %v1604_v30  ;;  %v1622_v28 = vld [vmem:[%s3760_s7 + $0xcc8] sm:$0xff]  ;;  %v1397_v29 = vld [vmem:[%s3760_s7 + $0x5c0] sm:$0xff] }
 0x292   : > { %1975 = vmatpush.msrb.mxu0 %v1379_v31  ;;  %1995 = vmatpush.msrb.mxu1 %v1635_v32  ;;  %v1653_v30 = vld [vmem:[%s3760_s7 + $0xdc0] sm:$0xff]  ;;  %v1350_v31 = vld [vmem:[%s3760_s7 + $0x448] sm:$0xff] }
 0x293   : > { %2018 = vmatpush.msrb.mxu2 %v1332_v33  ;;  %2038 = vmatpush.msrb.mxu3 %v1588_v34  ;;  %v1606_v32 = vld [vmem:[%s3760_s7 + $0xc48] sm:$0xff]  ;;  %v1381_v33 = vld [vmem:[%s3760_s7 + $0x540] sm:$0xff] }
 0x294   : > { %1976 = vmatpush.msrb.mxu0 %v1363_v35  ;;  %1996 = vmatpush.msrb.mxu1 %v1619_v36  ;;  %v1637_v34 = vld [vmem:[%s3760_s7 + $0xd40] sm:$0xff]  ;;  %v1334_v35 = vld [vmem:[%s3760_s7 + $0x3c8] sm:$0xff] }
 0x295   : > { %2019 = vmatpush.msrb.mxu2 %v1316_v37  ;;  %2039 = vmatpush.msrb.mxu3 %v1572_v38  ;;  %v1590_v36 = vld [vmem:[%s3760_s7 + $0xbc8] sm:$0xff]  ;;  %v1365_v37 = vld [vmem:[%s3760_s7 + $0x4c0] sm:$0xff] }
 0x296   : > { %1977 = vmatpush.msrb.mxu0 %v1347_v39  ;;  %1997 = vmatpush.msrb.mxu1 %v1603_v40  ;;  %v1621_v38 = vld [vmem:[%s3760_s7 + $0xcc0] sm:$0xff]  ;;  %v1318_v39 = vld [vmem:[%s3760_s7 + $0x348] sm:$0xff] }
 0x297   : > { %2020 = vmatpush.msrb.mxu2 %v1300_v41  ;;  %2040 = vmatpush.msrb.mxu3 %v1556_v42  ;;  %v1574_v40 = vld [vmem:[%s3760_s7 + $0xb48] sm:$0xff]  ;;  %v1349_v41 = vld [vmem:[%s3760_s7 + $0x440] sm:$0xff] }
 0x298   : > { %1978 = vmatpush.msrb.mxu0 %v1331_v45  ;;  %1998 = vmatpush.msrb.mxu1 %v1587_v46  ;;  %v1605_v42 = vld [vmem:[%s3760_s7 + $0xc40] sm:$0xff]  ;;  %v1302_v45 = vld [vmem:[%s3760_s7 + $0x2c8] sm:$0xff] }
 0x299   : > { %2021 = vmatpush.msrb.mxu2 %v1284_v47  ;;  %2041 = vmatpush.msrb.mxu3 %v1540_v48  ;;  %v1558_v46 = vld [vmem:[%s3760_s7 + $0xac8] sm:$0xff]  ;;  %v1333_v47 = vld [vmem:[%s3760_s7 + $0x3c0] sm:$0xff] }
 0x29a   : > { %1946 = vmatmul.f32.vlgmr.msra.gmra.mxu2 %v3871_v43  ;;  %1966 = vmatmul.f32.vlgmr.msra.gmra.mxu3 %v3873_v44  ;;  %v1589_v48 = vld [vmem:[%s3760_s7 + $0xbc0] sm:$0xff] }
 0x29b   : > { %1979 = vmatpush.msrb.mxu0 %v1315_v49  ;;  %1999 = vmatpush.msrb.mxu1 %v1571_v50  ;;  %v1286_v49 = vld [vmem:[%s3760_s7 + $0x248] sm:$0xff] }
 0x29c   : > { %2022 = vmatpush.msrb.mxu2 %v1268_v51  ;;  %2042 = vmatpush.msrb.mxu3 %v1524_v52  ;;  %v1542_v50 = vld [vmem:[%s3760_s7 + $0xa48] sm:$0xff]  ;;  %v1317_v51 = vld [vmem:[%s3760_s7 + $0x340] sm:$0xff] }
 0x29d   : > { %1980 = vmatpush.msrb.mxu0 %v1299_v53  ;;  %2000 = vmatpush.msrb.mxu1 %v1555_v54  ;;  %v1573_v52 = vld [vmem:[%s3760_s7 + $0xb40] sm:$0xff]  ;;  %v1270_v53 = vld [vmem:[%s3760_s7 + $0x1c8] sm:$0xff] }
 0x29e   : > { %2023 = vmatpush.msrb.mxu2 %v1252_v55  ;;  %2043 = vmatpush.msrb.mxu3 %v1508_v56  ;;  %v1526_v54 = vld [vmem:[%s3760_s7 + $0x9c8] sm:$0xff]  ;;  %v1301_v55 = vld [vmem:[%s3760_s7 + $0x2c0] sm:$0xff] }
 0x29f   : > { %1981 = vmatpush.msrb.mxu0 %v1283_v57  ;;  %2001 = vmatpush.msrb.mxu1 %v1539_v58  ;;  %v1557_v56 = vld [vmem:[%s3760_s7 + $0xac0] sm:$0xff]  ;;  %v1254_v57 = vld [vmem:[%s3760_s7 + $0x148] sm:$0xff] }
 0x2a0   : > { %2024 = vmatpush.msrb.mxu2 %v1236_v59  ;;  %2044 = vmatpush.msrb.mxu3 %v1492_v60  ;;  %v1510_v58 = vld [vmem:[%s3760_s7 + $0x948] sm:$0xff]  ;;  %v1285_v59 = vld [vmem:[%s3760_s7 + $0x240] sm:$0xff] }
 0x2a1   : > { %1906 = vmatmul.f32.vlgmr.msra.gmra.mxu0 %v3871_v43  ;;  %1926 = vmatmul.f32.vlgmr.msra.gmra.mxu1 %v3873_v44  ;;  %v1541_v60 = vld [vmem:[%s3760_s7 + $0xa40] sm:$0xff] }
 0x2a2   : > { %1982 = vmatpush.msrb.mxu0 %v1267_v61  ;;  %2002 = vmatpush.msrb.mxu1 %v1523_v62  ;;  %v1238_v61 = vld [vmem:[%s3760_s7 + $0xc8] sm:$0xff] }
 0x2a3   : > { %2025 = vmatpush.msrb.mxu2 %v1220_v63  ;;  %2045 = vmatpush.msrb.mxu3 %v1476_v0  ;;  %v1494_v62 = vld [vmem:[%s3760_s7 + $0x8c8] sm:$0xff]  ;;  %v1269_v63 = vld [vmem:[%s3760_s7 + $0x1c0] sm:$0xff] }
 0x2a4   : > { %2026 = vmatmul.f32.vlgmr.msrb.gmra.mxu2 %v3871_v43  ;;  %2046 = vmatmul.f32.vlgmr.msrb.gmra.mxu3 %v3873_v44  ;;  %v1525_v0 = vld [vmem:[%s3760_s7 + $0x9c0] sm:$0xff] }
 0x2a5   : > { %2090 = vmatpush.msra.mxu2 %v1462_v1  ;;  %2110 = vmatpush.msra.mxu3 %v1718_v2  ;;  %v1222_v1 = vld [vmem:[%s3760_s7 + $0x48] sm:$0xff] }
 0x2a6   : > { %1983 = vmatpush.msrb.mxu0 %v1251_v3  ;;  %2003 = vmatpush.msrb.mxu1 %v1507_v4  ;;  %v1478_v2 = vld [vmem:[%s3760_s7 + $0x848] sm:$0xff]  ;;  %v1464_v3 = vld [vmem:[%s3760_s7 + $0x7d8] sm:$0xff] }
 0x2a7   : > { %2091 = vmatpush.msra.mxu2 %v1446_v5  ;;  %2111 = vmatpush.msra.mxu3 %v1702_v6  ;;  %v1720_v4 = vld [vmem:[%s3760_s7 + $0xfd8] sm:$0xff]  ;;  %v1253_v5 = vld [vmem:[%s3760_s7 + $0x140] sm:$0xff] }
 0x2a8   : > { %1984 = vmatpush.msrb.mxu0 %v1235_v7  ;;  %2004 = vmatpush.msrb.mxu1 %v1491_v8  ;;  %v1509_v6 = vld [vmem:[%s3760_s7 + $0x940] sm:$0xff]  ;;  %v1448_v7 = vld [vmem:[%s3760_s7 + $0x758] sm:$0xff] }
 0x2a9   : > { %2092 = vmatpush.msra.mxu2 %v1430_v9  ;;  %2112 = vmatpush.msra.mxu3 %v1686_v10  ;;  %v1704_v8 = vld [vmem:[%s3760_s7 + $0xf58] sm:$0xff]  ;;  %v1237_v9 = vld [vmem:[%s3760_s7 + $0xc0] sm:$0xff] }
 0x2aa   : > { %1985 = vmatpush.msrb.mxu0 %v1219_v11  ;;  %2005 = vmatpush.msrb.mxu1 %v1475_v12  ;;  %v1493_v10 = vld [vmem:[%s3760_s7 + $0x8c0] sm:$0xff]  ;;  %v1432_v11 = vld [vmem:[%s3760_s7 + $0x6d8] sm:$0xff] }
 0x2ab   : > { %1986 = vmatmul.f32.vlgmr.msrb.gmra.mxu0 %v3871_v43  ;;  %2006 = vmatmul.f32.vlgmr.msrb.gmra.mxu1 %v3873_v44  ;;  %v1688_v12 = vld [vmem:[%s3760_s7 + $0xed8] sm:$0xff] }
 0x2ac   : > { %2050 = vmatpush.msra.mxu0 %v1461_v13  ;;  %2070 = vmatpush.msra.mxu1 %v1717_v14  ;;  %v1221_v13 = vld [vmem:[%s3760_s7 + $0x40] sm:$0xff] }
 0x2ad   : > { %2093 = vmatpush.msra.mxu2 %v1414_v15  ;;  %2113 = vmatpush.msra.mxu3 %v1670_v16  ;;  %v1477_v14 = vld [vmem:[%s3760_s7 + $0x840] sm:$0xff]  ;;  %v1463_v15 = vld [vmem:[%s3760_s7 + $0x7d0] sm:$0xff] }
 0x2ae   : > { %2051 = vmatpush.msra.mxu0 %v1445_v17  ;;  %2071 = vmatpush.msra.mxu1 %v1701_v18  ;;  %v1719_v16 = vld [vmem:[%s3760_s7 + $0xfd0] sm:$0xff]  ;;  %v1416_v17 = vld [vmem:[%s3760_s7 + $0x658] sm:$0xff] }
 0x2af   : > { %2094 = vmatpush.msra.mxu2 %v1398_v19  ;;  %2114 = vmatpush.msra.mxu3 %v1654_v20  ;;  %v1672_v18 = vld [vmem:[%s3760_s7 + $0xe58] sm:$0xff]  ;;  %v1447_v19 = vld [vmem:[%s3760_s7 + $0x750] sm:$0xff] }
 0x2b0   : > { %2052 = vmatpush.msra.mxu0 %v1429_v21  ;;  %2072 = vmatpush.msra.mxu1 %v1685_v22  ;;  %v1703_v20 = vld [vmem:[%s3760_s7 + $0xf50] sm:$0xff]  ;;  %v1400_v21 = vld [vmem:[%s3760_s7 + $0x5d8] sm:$0xff] }
 0x2b1   : > { %2095 = vmatpush.msra.mxu2 %v1382_v23  ;;  %2115 = vmatpush.msra.mxu3 %v1638_v24  ;;  %v1656_v22 = vld [vmem:[%s3760_s7 + $0xdd8] sm:$0xff]  ;;  %v1431_v23 = vld [vmem:[%s3760_s7 + $0x6d0] sm:$0xff] }
 0x2b2   : > { %2053 = vmatpush.msra.mxu0 %v1413_v25  ;;  %2073 = vmatpush.msra.mxu1 %v1669_v26  ;;  %v1687_v24 = vld [vmem:[%s3760_s7 + $0xed0] sm:$0xff]  ;;  %v1384_v25 = vld [vmem:[%s3760_s7 + $0x558] sm:$0xff] }
 0x2b3   : > { %2096 = vmatpush.msra.mxu2 %v1366_v27  ;;  %2116 = vmatpush.msra.mxu3 %v1622_v28  ;;  %v1640_v26 = vld [vmem:[%s3760_s7 + $0xd58] sm:$0xff]  ;;  %v1415_v27 = vld [vmem:[%s3760_s7 + $0x650] sm:$0xff] }
 0x2b4   : > { %2054 = vmatpush.msra.mxu0 %v1397_v29  ;;  %2074 = vmatpush.msra.mxu1 %v1653_v30  ;;  %v1671_v28 = vld [vmem:[%s3760_s7 + $0xe50] sm:$0xff]  ;;  %v1368_v29 = vld [vmem:[%s3760_s7 + $0x4d8] sm:$0xff] }
 0x2b5   : > { %2097 = vmatpush.msra.mxu2 %v1350_v31  ;;  %2117 = vmatpush.msra.mxu3 %v1606_v32  ;;  %v1624_v30 = vld [vmem:[%s3760_s7 + $0xcd8] sm:$0xff]  ;;  %v1399_v31 = vld [vmem:[%s3760_s7 + $0x5d0] sm:$0xff] }
 0x2b6   : > { %2055 = vmatpush.msra.mxu0 %v1381_v33  ;;  %2075 = vmatpush.msra.mxu1 %v1637_v34  ;;  %v1655_v32 = vld [vmem:[%s3760_s7 + $0xdd0] sm:$0xff]  ;;  %v1352_v33 = vld [vmem:[%s3760_s7 + $0x458] sm:$0xff] }
 0x2b7   : > { %2098 = vmatpush.msra.mxu2 %v1334_v35  ;;  %2118 = vmatpush.msra.mxu3 %v1590_v36  ;;  %v1608_v34 = vld [vmem:[%s3760_s7 + $0xc58] sm:$0xff]  ;;  %v1383_v35 = vld [vmem:[%s3760_s7 + $0x550] sm:$0xff] }
 0x2b8   : > { %2056 = vmatpush.msra.mxu0 %v1365_v37  ;;  %2076 = vmatpush.msra.mxu1 %v1621_v38  ;;  %v1639_v36 = vld [vmem:[%s3760_s7 + $0xd50] sm:$0xff]  ;;  %v1336_v37 = vld [vmem:[%s3760_s7 + $0x3d8] sm:$0xff] }
 0x2b9   : > { %2099 = vmatpush.msra.mxu2 %v1318_v39  ;;  %2119 = vmatpush.msra.mxu3 %v1574_v40  ;;  %v1592_v38 = vld [vmem:[%s3760_s7 + $0xbd8] sm:$0xff]  ;;  %v1367_v39 = vld [vmem:[%s3760_s7 + $0x4d0] sm:$0xff] }
 0x2ba   : > { %2057 = vmatpush.msra.mxu0 %v1349_v41  ;;  %2077 = vmatpush.msra.mxu1 %v1605_v42  ;;  %v1623_v40 = vld [vmem:[%s3760_s7 + $0xcd0] sm:$0xff]  ;;  %v1320_v41 = vld [vmem:[%s3760_s7 + $0x358] sm:$0xff] }
 0x2bb   : > { %2100 = vmatpush.msra.mxu2 %v1302_v45  ;;  %2120 = vmatpush.msra.mxu3 %v1558_v46  ;;  %v1576_v42 = vld [vmem:[%s3760_s7 + $0xb58] sm:$0xff]  ;;  %v1351_v45 = vld [vmem:[%s3760_s7 + $0x450] sm:$0xff] }
 0x2bc   : > { %2058 = vmatpush.msra.mxu0 %v1333_v47  ;;  %2078 = vmatpush.msra.mxu1 %v1589_v48  ;;  %v1607_v46 = vld [vmem:[%s3760_s7 + $0xc50] sm:$0xff]  ;;  %v1304_v47 = vld [vmem:[%s3760_s7 + $0x2d8] sm:$0xff] }
 0x2bd   : > { %2101 = vmatpush.msra.mxu2 %v1286_v49  ;;  %2121 = vmatpush.msra.mxu3 %v1542_v50  ;;  %v1560_v48 = vld [vmem:[%s3760_s7 + $0xad8] sm:$0xff]  ;;  %v1335_v49 = vld [vmem:[%s3760_s7 + $0x3d0] sm:$0xff] }
 0x2be   : > { %2059 = vmatpush.msra.mxu0 %v1317_v51  ;;  %2079 = vmatpush.msra.mxu1 %v1573_v52  ;;  %v1591_v50 = vld [vmem:[%s3760_s7 + $0xbd0] sm:$0xff]  ;;  %v1288_v51 = vld [vmem:[%s3760_s7 + $0x258] sm:$0xff] }
 0x2bf   : > { %2102 = vmatpush.msra.mxu2 %v1270_v53  ;;  %2122 = vmatpush.msra.mxu3 %v1526_v54  ;;  %v1544_v52 = vld [vmem:[%s3760_s7 + $0xa58] sm:$0xff]  ;;  %v1319_v53 = vld [vmem:[%s3760_s7 + $0x350] sm:$0xff] }
 0x2c0   : > { %2060 = vmatpush.msra.mxu0 %v1301_v55  ;;  %2080 = vmatpush.msra.mxu1 %v1557_v56  ;;  %v1575_v54 = vld [vmem:[%s3760_s7 + $0xb50] sm:$0xff]  ;;  %v1272_v55 = vld [vmem:[%s3760_s7 + $0x1d8] sm:$0xff] }
 0x2c1   : > { %2103 = vmatpush.msra.mxu2 %v1254_v57  ;;  %2123 = vmatpush.msra.mxu3 %v1510_v58  ;;  %v1528_v56 = vld [vmem:[%s3760_s7 + $0x9d8] sm:$0xff]  ;;  %v1303_v57 = vld [vmem:[%s3760_s7 + $0x2d0] sm:$0xff] }
 0x2c2   : > { %2061 = vmatpush.msra.mxu0 %v1285_v59  ;;  %2081 = vmatpush.msra.mxu1 %v1541_v60  ;;  %v1559_v58 = vld [vmem:[%s3760_s7 + $0xad0] sm:$0xff]  ;;  %v1256_v59 = vld [vmem:[%s3760_s7 + $0x158] sm:$0xff] }
 0x2c3   : > { %2104 = vmatpush.msra.mxu2 %v1238_v61  ;;  %2124 = vmatpush.msra.mxu3 %v1494_v62  ;;  %v1512_v60 = vld [vmem:[%s3760_s7 + $0x958] sm:$0xff]  ;;  %v1287_v61 = vld [vmem:[%s3760_s7 + $0x250] sm:$0xff] }
 0x2c4   : > { %2062 = vmatpush.msra.mxu0 %v1269_v63  ;;  %2082 = vmatpush.msra.mxu1 %v1525_v0  ;;  %v1543_v62 = vld [vmem:[%s3760_s7 + $0xa50] sm:$0xff]  ;;  %v1240_v63 = vld [vmem:[%s3760_s7 + $0xd8] sm:$0xff] }
 0x2c5   : > { %2105 = vmatpush.msra.mxu2 %v1222_v1  ;;  %2125 = vmatpush.msra.mxu3 %v1478_v2  ;;  %v1496_v0 = vld [vmem:[%s3760_s7 + $0x8d8] sm:$0xff]  ;;  %v1271_v1 = vld [vmem:[%s3760_s7 + $0x1d0] sm:$0xff] }
 0x2c6   : > { %2063 = vmatpush.msra.mxu0 %v1253_v5  ;;  %2083 = vmatpush.msra.mxu1 %v1509_v6  ;;  %v1527_v2 = vld [vmem:[%s3760_s7 + $0x9d0] sm:$0xff]  ;;  %v1466_v5 = vld [vmem:[%s3760_s7 + $0x7e8] sm:$0xff] }
 0x2c7   : > { %2170 = vmatpush.msrb.mxu2 %v1464_v3  ;;  %2190 = vmatpush.msrb.mxu3 %v1720_v4  ;;  %v1224_v3 = vld [vmem:[%s3760_s7 + $0x58] sm:$0xff]  ;;  %v1722_v6 = vld [vmem:[%s3760_s7 + $0xfe8] sm:$0xff] }
 0x2c8   : > { %2064 = vmatpush.msra.mxu0 %v1237_v9  ;;  %2084 = vmatpush.msra.mxu1 %v1493_v10  ;;  %v1480_v4 = vld [vmem:[%s3760_s7 + $0x858] sm:$0xff]  ;;  %v1450_v9 = vld [vmem:[%s3760_s7 + $0x768] sm:$0xff] }
 0x2c9   : > { %2171 = vmatpush.msrb.mxu2 %v1448_v7  ;;  %2191 = vmatpush.msrb.mxu3 %v1704_v8  ;;  %v1255_v7 = vld [vmem:[%s3760_s7 + $0x150] sm:$0xff]  ;;  %v1706_v10 = vld [vmem:[%s3760_s7 + $0xf68] sm:$0xff] }
 0x2ca   : > { %2065 = vmatpush.msra.mxu0 %v1221_v13  ;;  %2085 = vmatpush.msra.mxu1 %v1477_v14  ;;  %v1511_v8 = vld [vmem:[%s3760_s7 + $0x950] sm:$0xff]  ;;  %v1434_v13 = vld [vmem:[%s3760_s7 + $0x6e8] sm:$0xff] }
 0x2cb   : > { %2172 = vmatpush.msrb.mxu2 %v1432_v11  ;;  %2192 = vmatpush.msrb.mxu3 %v1688_v12  ;;  %v1239_v11 = vld [vmem:[%s3760_s7 + $0xd0] sm:$0xff]  ;;  %v1690_v14 = vld [vmem:[%s3760_s7 + $0xee8] sm:$0xff] }
 0x2cc   : > { %2130 = vmatpush.msrb.mxu0 %v1463_v15  ;;  %2150 = vmatpush.msrb.mxu1 %v1719_v16  ;;  %v1495_v12 = vld [vmem:[%s3760_s7 + $0x8d0] sm:$0xff] }
 0x2cd   : > { %2173 = vmatpush.msrb.mxu2 %v1416_v17  ;;  %2193 = vmatpush.msrb.mxu3 %v1672_v18  ;;  %v1223_v15 = vld [vmem:[%s3760_s7 + $0x50] sm:$0xff]  ;;  %v1465_v17 = vld [vmem:[%s3760_s7 + $0x7e0] sm:$0xff] }
 0x2ce   : > { %2131 = vmatpush.msrb.mxu0 %v1447_v19  ;;  %2151 = vmatpush.msrb.mxu1 %v1703_v20  ;;  %v1479_v16 = vld [vmem:[%s3760_s7 + $0x850] sm:$0xff]  ;;  %v1721_v18 = vld [vmem:[%s3760_s7 + $0xfe0] sm:$0xff]  ;;  %v1418_v19 = vld [vmem:[%s3760_s7 + $0x668] sm:$0xff] }
 0x2cf   : > { %2174 = vmatpush.msrb.mxu2 %v1400_v21  ;;  %2194 = vmatpush.msrb.mxu3 %v1656_v22  ;;  %v1674_v20 = vld [vmem:[%s3760_s7 + $0xe68] sm:$0xff]  ;;  %v1449_v21 = vld [vmem:[%s3760_s7 + $0x760] sm:$0xff] }
 0x2d0   : > { %2132 = vmatpush.msrb.mxu0 %v1431_v23  ;;  %2152 = vmatpush.msrb.mxu1 %v1687_v24  ;;  %v1705_v22 = vld [vmem:[%s3760_s7 + $0xf60] sm:$0xff]  ;;  %v1402_v23 = vld [vmem:[%s3760_s7 + $0x5e8] sm:$0xff] }
 0x2d1   : > { %2175 = vmatpush.msrb.mxu2 %v1384_v25  ;;  %2195 = vmatpush.msrb.mxu3 %v1640_v26  ;;  %v1658_v24 = vld [vmem:[%s3760_s7 + $0xde8] sm:$0xff]  ;;  %v1433_v25 = vld [vmem:[%s3760_s7 + $0x6e0] sm:$0xff] }
 0x2d2   : > { %2133 = vmatpush.msrb.mxu0 %v1415_v27  ;;  %2153 = vmatpush.msrb.mxu1 %v1671_v28  ;;  %v1689_v26 = vld [vmem:[%s3760_s7 + $0xee0] sm:$0xff]  ;;  %v1386_v27 = vld [vmem:[%s3760_s7 + $0x568] sm:$0xff] }
 0x2d3   : > { %2176 = vmatpush.msrb.mxu2 %v1368_v29  ;;  %2196 = vmatpush.msrb.mxu3 %v1624_v30  ;;  %v1642_v28 = vld [vmem:[%s3760_s7 + $0xd68] sm:$0xff]  ;;  %v1417_v29 = vld [vmem:[%s3760_s7 + $0x660] sm:$0xff] }
 0x2d4   : > { %2134 = vmatpush.msrb.mxu0 %v1399_v31  ;;  %2154 = vmatpush.msrb.mxu1 %v1655_v32  ;;  %v1673_v30 = vld [vmem:[%s3760_s7 + $0xe60] sm:$0xff]  ;;  %v1370_v31 = vld [vmem:[%s3760_s7 + $0x4e8] sm:$0xff] }
 0x2d5   : > { %2177 = vmatpush.msrb.mxu2 %v1352_v33  ;;  %2197 = vmatpush.msrb.mxu3 %v1608_v34  ;;  %v1626_v32 = vld [vmem:[%s3760_s7 + $0xce8] sm:$0xff]  ;;  %v1401_v33 = vld [vmem:[%s3760_s7 + $0x5e0] sm:$0xff] }
 0x2d6   : > { %2135 = vmatpush.msrb.mxu0 %v1383_v35  ;;  %2155 = vmatpush.msrb.mxu1 %v1639_v36  ;;  %v1657_v34 = vld [vmem:[%s3760_s7 + $0xde0] sm:$0xff]  ;;  %v1354_v35 = vld [vmem:[%s3760_s7 + $0x468] sm:$0xff] }
 0x2d7   : > { %2178 = vmatpush.msrb.mxu2 %v1336_v37  ;;  %2198 = vmatpush.msrb.mxu3 %v1592_v38  ;;  %v1610_v36 = vld [vmem:[%s3760_s7 + $0xc68] sm:$0xff]  ;;  %v1385_v37 = vld [vmem:[%s3760_s7 + $0x560] sm:$0xff] }
 0x2d8   : > { %2136 = vmatpush.msrb.mxu0 %v1367_v39  ;;  %2156 = vmatpush.msrb.mxu1 %v1623_v40  ;;  %v1641_v38 = vld [vmem:[%s3760_s7 + $0xd60] sm:$0xff]  ;;  %v1338_v39 = vld [vmem:[%s3760_s7 + $0x3e8] sm:$0xff] }
 0x2d9   : > { %2179 = vmatpush.msrb.mxu2 %v1320_v41  ;;  %2199 = vmatpush.msrb.mxu3 %v1576_v42  ;;  %v1594_v40 = vld [vmem:[%s3760_s7 + $0xbe8] sm:$0xff]  ;;  %v1369_v41 = vld [vmem:[%s3760_s7 + $0x4e0] sm:$0xff] }
 0x2da   : > { %2137 = vmatpush.msrb.mxu0 %v1351_v45  ;;  %2157 = vmatpush.msrb.mxu1 %v1607_v46  ;;  %v1625_v42 = vld [vmem:[%s3760_s7 + $0xce0] sm:$0xff]  ;;  %v1322_v45 = vld [vmem:[%s3760_s7 + $0x368] sm:$0xff] }
 0x2db   : > { %2180 = vmatpush.msrb.mxu2 %v1304_v47  ;;  %2200 = vmatpush.msrb.mxu3 %v1560_v48  ;;  %v1578_v46 = vld [vmem:[%s3760_s7 + $0xb68] sm:$0xff]  ;;  %v1353_v47 = vld [vmem:[%s3760_s7 + $0x460] sm:$0xff] }
 0x2dc   : > { %2138 = vmatpush.msrb.mxu0 %v1335_v49  ;;  %2158 = vmatpush.msrb.mxu1 %v1591_v50  ;;  %v1609_v48 = vld [vmem:[%s3760_s7 + $0xc60] sm:$0xff]  ;;  %v1306_v49 = vld [vmem:[%s3760_s7 + $0x2e8] sm:$0xff] }
 0x2dd   : > { %2181 = vmatpush.msrb.mxu2 %v1288_v51  ;;  %2201 = vmatpush.msrb.mxu3 %v1544_v52  ;;  %v1562_v50 = vld [vmem:[%s3760_s7 + $0xae8] sm:$0xff]  ;;  %v1337_v51 = vld [vmem:[%s3760_s7 + $0x3e0] sm:$0xff] }
 0x2de   : > { %2106 = vmatmul.f32.vlgmr.msra.gmra.mxu2 %v3871_v43  ;;  %2126 = vmatmul.f32.vlgmr.msra.gmra.mxu3 %v3873_v44  ;;  %v1593_v52 = vld [vmem:[%s3760_s7 + $0xbe0] sm:$0xff] }
 0x2df   : > { %2139 = vmatpush.msrb.mxu0 %v1319_v53  ;;  %2159 = vmatpush.msrb.mxu1 %v1575_v54  ;;  %v1290_v53 = vld [vmem:[%s3760_s7 + $0x268] sm:$0xff] }
 0x2e0   : > { %2182 = vmatpush.msrb.mxu2 %v1272_v55  ;;  %2202 = vmatpush.msrb.mxu3 %v1528_v56  ;;  %v1546_v54 = vld [vmem:[%s3760_s7 + $0xa68] sm:$0xff]  ;;  %v1321_v55 = vld [vmem:[%s3760_s7 + $0x360] sm:$0xff] }
 0x2e1   : > { %2140 = vmatpush.msrb.mxu0 %v1303_v57  ;;  %2160 = vmatpush.msrb.mxu1 %v1559_v58  ;;  %v1577_v56 = vld [vmem:[%s3760_s7 + $0xb60] sm:$0xff]  ;;  %v1274_v57 = vld [vmem:[%s3760_s7 + $0x1e8] sm:$0xff] }
 0x2e2   : > { %2183 = vmatpush.msrb.mxu2 %v1256_v59  ;;  %2203 = vmatpush.msrb.mxu3 %v1512_v60  ;;  %v1530_v58 = vld [vmem:[%s3760_s7 + $0x9e8] sm:$0xff]  ;;  %v1305_v59 = vld [vmem:[%s3760_s7 + $0x2e0] sm:$0xff] }
 0x2e3   : > { %2141 = vmatpush.msrb.mxu0 %v1287_v61  ;;  %2161 = vmatpush.msrb.mxu1 %v1543_v62  ;;  %v1561_v60 = vld [vmem:[%s3760_s7 + $0xae0] sm:$0xff]  ;;  %v1258_v61 = vld [vmem:[%s3760_s7 + $0x168] sm:$0xff] }
 0x2e4   : > { %2184 = vmatpush.msrb.mxu2 %v1240_v63  ;;  %2204 = vmatpush.msrb.mxu3 %v1496_v0  ;;  %v1514_v62 = vld [vmem:[%s3760_s7 + $0x968] sm:$0xff]  ;;  %v1289_v63 = vld [vmem:[%s3760_s7 + $0x260] sm:$0xff] }
 0x2e5   : > { %2066 = vmatmul.f32.vlgmr.msra.gmra.mxu0 %v3871_v43  ;;  %2086 = vmatmul.f32.vlgmr.msra.gmra.mxu1 %v3873_v44  ;;  %v1545_v0 = vld [vmem:[%s3760_s7 + $0xa60] sm:$0xff] }
 0x2e6   : > { %2142 = vmatpush.msrb.mxu0 %v1271_v1  ;;  %2162 = vmatpush.msrb.mxu1 %v1527_v2  ;;  %v1242_v1 = vld [vmem:[%s3760_s7 + $0xe8] sm:$0xff] }
 0x2e7   : > { %2185 = vmatpush.msrb.mxu2 %v1224_v3  ;;  %2205 = vmatpush.msrb.mxu3 %v1480_v4  ;;  %v1498_v2 = vld [vmem:[%s3760_s7 + $0x8e8] sm:$0xff]  ;;  %v1273_v3 = vld [vmem:[%s3760_s7 + $0x1e0] sm:$0xff] }
 0x2e8   : > { %2186 = vmatmul.f32.vlgmr.msrb.gmra.mxu2 %v3871_v43  ;;  %2206 = vmatmul.f32.vlgmr.msrb.gmra.mxu3 %v3873_v44  ;;  %v1529_v4 = vld [vmem:[%s3760_s7 + $0x9e0] sm:$0xff] }
 0x2e9   : > { %2250 = vmatpush.msra.mxu2 %v1466_v5  ;;  %2270 = vmatpush.msra.mxu3 %v1722_v6  ;;  %v1226_v5 = vld [vmem:[%s3760_s7 + $0x68] sm:$0xff] }
 0x2ea   : > { %2143 = vmatpush.msrb.mxu0 %v1255_v7  ;;  %2163 = vmatpush.msrb.mxu1 %v1511_v8  ;;  %v1482_v6 = vld [vmem:[%s3760_s7 + $0x868] sm:$0xff]  ;;  %v1468_v7 = vld [vmem:[%s3760_s7 + $0x7f8] sm:$0xff] }
 0x2eb   : > { %2251 = vmatpush.msra.mxu2 %v1450_v9  ;;  %2271 = vmatpush.msra.mxu3 %v1706_v10  ;;  %v1724_v8 = vld [vmem:[%s3760_s7 + $0xff8] sm:$0xff]  ;;  %v1257_v9 = vld [vmem:[%s3760_s7 + $0x160] sm:$0xff] }
 0x2ec   : > { %2144 = vmatpush.msrb.mxu0 %v1239_v11  ;;  %2164 = vmatpush.msrb.mxu1 %v1495_v12  ;;  %v1513_v10 = vld [vmem:[%s3760_s7 + $0x960] sm:$0xff]  ;;  %v1452_v11 = vld [vmem:[%s3760_s7 + $0x778] sm:$0xff] }
 0x2ed   : > { %2252 = vmatpush.msra.mxu2 %v1434_v13  ;;  %2272 = vmatpush.msra.mxu3 %v1690_v14  ;;  %v1708_v12 = vld [vmem:[%s3760_s7 + $0xf78] sm:$0xff]  ;;  %v1241_v13 = vld [vmem:[%s3760_s7 + $0xe0] sm:$0xff] }
 0x2ee   : > { %2145 = vmatpush.msrb.mxu0 %v1223_v15  ;;  %2165 = vmatpush.msrb.mxu1 %v1479_v16  ;;  %v1497_v14 = vld [vmem:[%s3760_s7 + $0x8e0] sm:$0xff]  ;;  %v4243_v15 = vpop.f32.mrf.mxu2  ;;  %v4245_v16 = vpop.f32.mrf.mxu3 }
 0x2ef   : > { %2146 = vmatmul.f32.vlgmr.msrb.gmra.mxu0 %v3871_v43  ;;  %2166 = vmatmul.f32.vlgmr.msrb.gmra.mxu1 %v3873_v44 }
 0x2f0   : > { %2210 = vmatpush.msra.mxu0 %v1465_v17  ;;  %2230 = vmatpush.msra.mxu1 %v1721_v18  ;;  %v1436_v17 = vld [vmem:[%s3760_s7 + $0x6f8] sm:$0xff] }
 0x2f1   : > { %2253 = vmatpush.msra.mxu2 %v1418_v19  ;;  %2273 = vmatpush.msra.mxu3 %v1674_v20  ;;  %v1692_v18 = vld [vmem:[%s3760_s7 + $0xef8] sm:$0xff]  ;;  %v4249_v19 = vpop.f32.mrf.mxu0  ;;  %v4251_v20 = vpop.f32.mrf.mxu1 }
 0x2f2   : > { %2211 = vmatpush.msra.mxu0 %v1449_v21  ;;  %2231 = vmatpush.msra.mxu1 %v1705_v22  ;;  %v1225_v21 = vld [vmem:[%s3760_s7 + $0x60] sm:$0xff] }
 0x2f3   : > { %2254 = vmatpush.msra.mxu2 %v1402_v23  ;;  %2274 = vmatpush.msra.mxu3 %v1658_v24  ;;  %v1481_v22 = vld [vmem:[%s3760_s7 + $0x860] sm:$0xff]  ;;  %v1467_v23 = vld [vmem:[%s3760_s7 + $0x7f0] sm:$0xff] }
 0x2f4   : > { %2212 = vmatpush.msra.mxu0 %v1433_v25  ;;  %2232 = vmatpush.msra.mxu1 %v1689_v26  ;;  %v1723_v24 = vld [vmem:[%s3760_s7 + $0xff0] sm:$0xff]  ;;  %v1420_v25 = vld [vmem:[%s3760_s7 + $0x678] sm:$0xff] }
 0x2f5   : > { %2255 = vmatpush.msra.mxu2 %v1386_v27  ;;  %2275 = vmatpush.msra.mxu3 %v1642_v28  ;;  %v1676_v26 = vld [vmem:[%s3760_s7 + $0xe78] sm:$0xff]  ;;  %v1451_v27 = vld [vmem:[%s3760_s7 + $0x770] sm:$0xff] }
 0x2f6   : > { %2213 = vmatpush.msra.mxu0 %v1417_v29  ;;  %2233 = vmatpush.msra.mxu1 %v1673_v30  ;;  %v1707_v28 = vld [vmem:[%s3760_s7 + $0xf70] sm:$0xff]  ;;  %v1404_v29 = vld [vmem:[%s3760_s7 + $0x5f8] sm:$0xff] }
 0x2f7   : > { %2256 = vmatpush.msra.mxu2 %v1370_v31  ;;  %2276 = vmatpush.msra.mxu3 %v1626_v32  ;;  %v1660_v30 = vld [vmem:[%s3760_s7 + $0xdf8] sm:$0xff]  ;;  %v1435_v31 = vld [vmem:[%s3760_s7 + $0x6f0] sm:$0xff] }
 0x2f8   : > { %2214 = vmatpush.msra.mxu0 %v1401_v33  ;;  %2234 = vmatpush.msra.mxu1 %v1657_v34  ;;  %v1691_v32 = vld [vmem:[%s3760_s7 + $0xef0] sm:$0xff]  ;;  %v1388_v33 = vld [vmem:[%s3760_s7 + $0x578] sm:$0xff] }
 0x2f9   : > { %2257 = vmatpush.msra.mxu2 %v1354_v35  ;;  %2277 = vmatpush.msra.mxu3 %v1610_v36  ;;  %v1644_v34 = vld [vmem:[%s3760_s7 + $0xd78] sm:$0xff]  ;;  %v1419_v35 = vld [vmem:[%s3760_s7 + $0x670] sm:$0xff] }
 0x2fa   : > { %2215 = vmatpush.msra.mxu0 %v1385_v37  ;;  %2235 = vmatpush.msra.mxu1 %v1641_v38  ;;  %v1675_v36 = vld [vmem:[%s3760_s7 + $0xe70] sm:$0xff]  ;;  %v1372_v37 = vld [vmem:[%s3760_s7 + $0x4f8] sm:$0xff] }
 0x2fb   : > { %2258 = vmatpush.msra.mxu2 %v1338_v39  ;;  %2278 = vmatpush.msra.mxu3 %v1594_v40  ;;  %v1628_v38 = vld [vmem:[%s3760_s7 + $0xcf8] sm:$0xff]  ;;  %v1867_v39 = vpop.f32.mrf.mxu2  ;;  %v1887_v40 = vpop.f32.mrf.mxu3 }
 0x2fc   : > { %2216 = vmatpush.msra.mxu0 %v1369_v41  ;;  %2236 = vmatpush.msra.mxu1 %v1625_v42  ;;  %v1403_v41 = vld [vmem:[%s3760_s7 + $0x5f0] sm:$0xff] }
 0x2fd   : > { %2259 = vmatpush.msra.mxu2 %v1322_v45  ;;  %2279 = vmatpush.msra.mxu3 %v1578_v46  ;;  %v1659_v42 = vld [vmem:[%s3760_s7 + $0xdf0] sm:$0xff]  ;;  %v1827_v45 = vpop.f32.mrf.mxu0  ;;  %v1847_v46 = vpop.f32.mrf.mxu1 }
 0x2fe   : > { %2217 = vmatpush.msra.mxu0 %v1353_v47  ;;  %2237 = vmatpush.msra.mxu1 %v1609_v48  ;;  %v1356_v47 = vld [vmem:[%s3760_s7 + $0x478] sm:$0xff] }
 0x2ff   : > { %2260 = vmatpush.msra.mxu2 %v1306_v49  ;;  %2280 = vmatpush.msra.mxu3 %v1562_v50  ;;  %v1612_v48 = vld [vmem:[%s3760_s7 + $0xc78] sm:$0xff]  ;;  %v1387_v49 = vld [vmem:[%s3760_s7 + $0x570] sm:$0xff] }
 0x300   : > { %2218 = vmatpush.msra.mxu0 %v1337_v51  ;;  %2238 = vmatpush.msra.mxu1 %v1593_v52  ;;  %v1643_v50 = vld [vmem:[%s3760_s7 + $0xd70] sm:$0xff]  ;;  %v1340_v51 = vld [vmem:[%s3760_s7 + $0x3f8] sm:$0xff] }
 0x301   : > { %2261 = vmatpush.msra.mxu2 %v1290_v53  ;;  %2281 = vmatpush.msra.mxu3 %v1546_v54  ;;  %v1596_v52 = vld [vmem:[%s3760_s7 + $0xbf8] sm:$0xff]  ;;  %v1371_v53 = vld [vmem:[%s3760_s7 + $0x4f0] sm:$0xff] }
 0x302   : > { %2219 = vmatpush.msra.mxu0 %v1321_v55  ;;  %2239 = vmatpush.msra.mxu1 %v1577_v56  ;;  %v1627_v54 = vld [vmem:[%s3760_s7 + $0xcf0] sm:$0xff]  ;;  %v1324_v55 = vld [vmem:[%s3760_s7 + $0x378] sm:$0xff] }
 0x303   : > { %2262 = vmatpush.msra.mxu2 %v1274_v57  ;;  %2282 = vmatpush.msra.mxu3 %v1530_v58  ;;  %v1580_v56 = vld [vmem:[%s3760_s7 + $0xb78] sm:$0xff]  ;;  %v1355_v57 = vld [vmem:[%s3760_s7 + $0x470] sm:$0xff] }
 0x304   : > { %2220 = vmatpush.msra.mxu0 %v1305_v59  ;;  %2240 = vmatpush.msra.mxu1 %v1561_v60  ;;  %v1611_v58 = vld [vmem:[%s3760_s7 + $0xc70] sm:$0xff]  ;;  %v1308_v59 = vld [vmem:[%s3760_s7 + $0x2f8] sm:$0xff] }
 0x305   : > { %2263 = vmatpush.msra.mxu2 %v1258_v61  ;;  %2283 = vmatpush.msra.mxu3 %v1514_v62  ;;  %v1564_v60 = vld [vmem:[%s3760_s7 + $0xaf8] sm:$0xff]  ;;  %v1339_v61 = vld [vmem:[%s3760_s7 + $0x3f0] sm:$0xff] }
 0x306   : > { %2221 = vmatpush.msra.mxu0 %v1289_v63  ;;  %2241 = vmatpush.msra.mxu1 %v1545_v0  ;;  %v1595_v62 = vld [vmem:[%s3760_s7 + $0xbf0] sm:$0xff] }
 0x307   : > { %2264 = vmatpush.msra.mxu2 %v1242_v1  ;;  %2284 = vmatpush.msra.mxu3 %v1498_v2  ;;  %v1292_v1 = vld [vmem:[%s3760_s7 + $0x278] sm:$0xff] }
 0x308   : > { %2222 = vmatpush.msra.mxu0 %v1273_v3  ;;  %2242 = vmatpush.msra.mxu1 %v1529_v4  ;;  %v1548_v2 = vld [vmem:[%s3760_s7 + $0xa78] sm:$0xff] }
 0x309   : > { %2265 = vmatpush.msra.mxu2 %v1226_v5  ;;  %2285 = vmatpush.msra.mxu3 %v1482_v6  ;;  %v1888_v5 = vadd.f32 %v1887_v40, %v1867_v39  ;;  %v1323_v6 = vld [vmem:[%s3760_s7 + $0x370] sm:$0xff] }
 0x30a   : > { %2223 = vmatpush.msra.mxu0 %v1257_v9  ;;  %2243 = vmatpush.msra.mxu1 %v1513_v10  ;;  %v1276_v9 = vld [vmem:[%s3760_s7 + $0x1f8] sm:$0xff] }
 0x30b   : > { %2330 = vmatpush.msrb.mxu2 %v1468_v7  ;;  %2350 = vmatpush.msrb.mxu3 %v1724_v8  ;;  %v1579_v7 = vld [vmem:[%s3760_s7 + $0xb70] sm:$0xff]  ;;  %v1848_v8 = vadd.f32 %v1847_v46, %v1827_v45  ;;  %v1532_v10 = vld [vmem:[%s3760_s7 + $0x9f8] sm:$0xff] }
 0x30c   : > { %2224 = vmatpush.msra.mxu0 %v1241_v13  ;;  %2244 = vmatpush.msra.mxu1 %v1497_v14  ;;  %v1307_v13 = vld [vmem:[%s3760_s7 + $0x2f0] sm:$0xff] }
 0x30d   : > { %2331 = vmatpush.msrb.mxu2 %v1452_v11  ;;  %2351 = vmatpush.msrb.mxu3 %v1708_v12  ;;  %v1563_v14 = vld [vmem:[%s3760_s7 + $0xaf0] sm:$0xff] }
 0x30e   : > { %2225 = vmatpush.msra.mxu0 %v1225_v21  ;;  %2245 = vmatpush.msra.mxu1 %v1481_v22  ;;  %v1516_v21 = vld [vmem:[%s3760_s7 + $0x978] sm:$0xff]  ;;  %v2373_v22 = vmax.f32 %v1888_v5, 0.0  ;;  %v1515_v45 = vld [vmem:[%s3760_s7 + $0x970] sm:$0xff] }
 0x30f   : > { %2332 = vmatpush.msrb.mxu2 %v1436_v17  ;;  %2352 = vmatpush.msrb.mxu3 %v1692_v18  ;;  %v1808_v17 = vadd.f32 %v4245_v16, %v4243_v15  ;;  %v1260_v18 = vld [vmem:[%s3760_s7 + $0x178] sm:$0xff] }
 0x310   : > { %2290 = vmatpush.msrb.mxu0 %v1467_v23  ;;  %2310 = vmatpush.msrb.mxu1 %v1723_v24  ;;  %v1291_v23 = vld [vmem:[%s3760_s7 + $0x270] sm:$0xff]  ;;  %v1244_v15 = vld [vmem:[%s3760_s7 + $0xf8] sm:$0xff] }
 0x311   : > { %2333 = vmatpush.msrb.mxu2 %v1420_v25  ;;  %2353 = vmatpush.msrb.mxu3 %v1676_v26  ;;  %v1547_v24 = vld [vmem:[%s3760_s7 + $0xa70] sm:$0xff]  ;;  %v2372_v25 = vmax.f32 %v1848_v8, 0.0  ;;  %v1500_v16 = vld [vmem:[%s3760_s7 + $0x8f8] sm:$0xff] }
 0x312   : > { %2291 = vmatpush.msrb.mxu0 %v1451_v27  ;;  %2311 = vmatpush.msrb.mxu1 %v1707_v28  ;;  %v1768_v28 = vadd.f32 %v4251_v20, %v4249_v19 }
 0x313   : > { %2334 = vmatpush.msrb.mxu2 %v1404_v29  ;;  %2354 = vmatpush.msrb.mxu3 %v1660_v30  ;;  %v2371_v29 = vmax.f32 %v1808_v17, 0.0  ;;  %v1275_v30 = vld [vmem:[%s3760_s7 + $0x1f0] sm:$0xff]  ;;  %v2403_v20 = vrot.slane %v2372_v25, 6 }
 0x314   : > { %2292 = vmatpush.msrb.mxu0 %v1435_v31  ;;  %2312 = vmatpush.msrb.mxu1 %v1691_v32  ;;  %v1531_v31 = vld [vmem:[%s3760_s7 + $0x9f0] sm:$0xff] }
 0x315   : > { %2335 = vmatpush.msrb.mxu2 %v1388_v33  ;;  %2355 = vmatpush.msrb.mxu3 %v1644_v34  ;;  %v2404_v34 = vrot.slane %v2373_v22, 5 }
 0x316   : > { %2293 = vmatpush.msrb.mxu0 %v1419_v35  ;;  %2313 = vmatpush.msrb.mxu1 %v1675_v36  ;;  %v1228_v35 = vld [vmem:[%s3760_s7 + $0x78] sm:$0xff] }
 0x317   : > { %2336 = vmatpush.msrb.mxu2 %v1372_v37  ;;  %2356 = vmatpush.msrb.mxu3 %v1628_v38  ;;  %v1484_v36 = vld [vmem:[%s3760_s7 + $0x878] sm:$0xff] }
 0x318   : > { %2294 = vmatpush.msrb.mxu0 %v1403_v41  ;;  %2314 = vmatpush.msrb.mxu1 %v1659_v42  ;;  %v1259_v42 = vld [vmem:[%s3760_s7 + $0x170] sm:$0xff] }
 0x319   : > { %2337 = vmatpush.msrb.mxu2 %v1356_v47  ;;  %2357 = vmatpush.msrb.mxu3 %v1612_v48  ;;  %v2370_v47 = vmax.f32 %v1768_v28, 0.0  ;;  %v2402_v48 = vrot.slane %v2371_v29, 7 }
 0x31a   : > { %2295 = vmatpush.msrb.mxu0 %v1387_v49  ;;  %2315 = vmatpush.msrb.mxu1 %v1643_v50  ;;  %v1243_v50 = vld [vmem:[%s3760_s7 + $0xf0] sm:$0xff] }
 0x31b   : > { %2338 = vmatpush.msrb.mxu2 %v1340_v51  ;;  %2358 = vmatpush.msrb.mxu3 %v1596_v52  ;;  %v1499_v51 = vld [vmem:[%s3760_s7 + $0x8f0] sm:$0xff] }
 0x31c   : > { %2296 = vmatpush.msrb.mxu0 %v1371_v53  ;;  %2316 = vmatpush.msrb.mxu1 %v1627_v54  ;;  %v2419_v53 = vsel %vm2418_vm0, %v2403_v20, %v2404_v34 }
 0x31d   : > { %2339 = vmatpush.msrb.mxu2 %v1324_v55  ;;  %2359 = vmatpush.msrb.mxu3 %v1580_v56  ;;  %v1947_v63 = vpop.f32.mrf.mxu2  ;;  %v1967_v0 = vpop.f32.mrf.mxu3  ;;  %v1227_v56 = vld [vmem:[%s3760_s7 + $0x70] sm:$0xff] }
 0x31e   : > { %2297 = vmatpush.msrb.mxu0 %v1355_v57  ;;  %2317 = vmatpush.msrb.mxu1 %v1611_v58  ;;  %v1907_v3 = vpop.f32.mrf.mxu0  ;;  %v1927_v4 = vpop.f32.mrf.mxu1  ;;  %v1968_v12 = vadd.f32 %v1967_v0, %v1947_v63  ;;  %v1483_v57 = vld [vmem:[%s3760_s7 + $0x870] sm:$0xff]  ;;  %v2417_v58 = vsel %vm2416_vm2, %v2370_v47, %v2402_v48 }
 0x31f   : > { %2340 = vmatpush.msrb.mxu2 %v1308_v59  ;;  %2360 = vmatpush.msrb.mxu3 %v1564_v60  ;;  %v1928_v11 = vadd.f32 %v1927_v4, %v1907_v3  ;;  %v2421_v60 = vsel %vm2420_vm3, %v2417_v58, %v2419_v53 }
 0x320   : > { %2298 = vmatpush.msrb.mxu0 %v1339_v61  ;;  %2318 = vmatpush.msrb.mxu1 %v1595_v62  ;;  %v2375_v27 = vmax.f32 %v1968_v12, 0.0 }
 0x321   : > { %2341 = vmatpush.msrb.mxu2 %v1292_v1  ;;  %2361 = vmatpush.msrb.mxu3 %v1548_v2  ;;  %v2374_v26 = vmax.f32 %v1928_v11, 0.0 }
 0x322   : > { %2266 = vmatmul.f32.vlgmr.msra.gmra.mxu2 %v3871_v43  ;;  %2286 = vmatmul.f32.vlgmr.msra.gmra.mxu3 %v3873_v44  ;;  %v2406_v40 = vrot.slane %v2375_v27, 3 }
 0x323   : > { %2299 = vmatpush.msrb.mxu0 %v1323_v6  ;;  %2319 = vmatpush.msrb.mxu1 %v1579_v7  ;;  %v2405_v39 = vrot.slane %v2374_v26, 4 }
 0x324   : > { %2342 = vmatpush.msrb.mxu2 %v1276_v9  ;;  %2362 = vmatpush.msrb.mxu3 %v1532_v10 }
 0x325   : > { %2300 = vmatpush.msrb.mxu0 %v1307_v13  ;;  %2320 = vmatpush.msrb.mxu1 %v1563_v14  ;;  %v2423_v54 = vsel %vm2422_vm1, %v2405_v39, %v2406_v40 }
 0x326   : > { %2343 = vmatpush.msrb.mxu2 %v1260_v18  ;;  %2363 = vmatpush.msrb.mxu3 %v1516_v21 }
 0x327   : > { %2301 = vmatpush.msrb.mxu0 %v1291_v23  ;;  %2321 = vmatpush.msrb.mxu1 %v1547_v24  ;;  %v2027_v32 = vpop.f32.mrf.mxu2  ;;  %v2047_v33 = vpop.f32.mrf.mxu3 }
 0x328   : > { %2344 = vmatpush.msrb.mxu2 %v1244_v15  ;;  %2364 = vmatpush.msrb.mxu3 %v1500_v16  ;;  %v1987_v37 = vpop.f32.mrf.mxu0  ;;  %v2007_v38 = vpop.f32.mrf.mxu1  ;;  %v2048_v19 = vadd.f32 %v2047_v33, %v2027_v32 }
 0x329   : > { %2226 = vmatmul.f32.vlgmr.msra.gmra.mxu0 %v3871_v43  ;;  %2246 = vmatmul.f32.vlgmr.msra.gmra.mxu1 %v3873_v44  ;;  %v2008_v41 = vadd.f32 %v2007_v38, %v1987_v37 }
 0x32a   : > { %2302 = vmatpush.msrb.mxu0 %v1275_v30  ;;  %2322 = vmatpush.msrb.mxu1 %v1531_v31  ;;  %v2377_v46 = vmax.f32 %v2048_v19, 0.0 }
 0x32b   : > { %2345 = vmatpush.msrb.mxu2 %v1228_v35  ;;  %2365 = vmatpush.msrb.mxu3 %v1484_v36  ;;  %v2376_v49 = vmax.f32 %v2008_v41, 0.0 }
 0x32c   : > { %2346 = vmatmul.f32.vlgmr.msrb.gmra.mxu2 %v3871_v43  ;;  %2366 = vmatmul.f32.vlgmr.msrb.gmra.mxu3 %v3873_v44  ;;  %v2408_v52 = vrot.slane %v2377_v46, 1 }
 0x32d   : > { %2303 = vmatpush.msrb.mxu0 %v1259_v42  ;;  %2323 = vmatpush.msrb.mxu1 %v1515_v45  ;;  %v2407_v55 = vrot.slane %v2376_v49, 2 }
 0x32f   : > { %2304 = vmatpush.msrb.mxu0 %v1243_v50  ;;  %2324 = vmatpush.msrb.mxu1 %v1499_v51  ;;  %v2425_v59 = vsel %vm2424_vm4, %v2407_v55, %v2408_v52 }
 0x330   : > { %v2427_v61 = vsel %vm2426_vm5, %v2423_v54, %v2425_v59 }
 0x331   : > { %2305 = vmatpush.msrb.mxu0 %v1227_v56  ;;  %2325 = vmatpush.msrb.mxu1 %v1483_v57  ;;  %v2429_v62 = vsel %vm2428_vm6, %v2421_v60, %v2427_v61 }
 0x332   : > { %2306 = vmatmul.f32.vlgmr.msrb.gmra.mxu0 %v3871_v43  ;;  %2326 = vmatmul.f32.vlgmr.msrb.gmra.mxu1 %v3873_v44  ;;  %2439 = vst [vmem:[%s4347_s23] sm:$0xff] %v2429_v62 }
 0x361   : > { %v2107_v63 = vpop.f32.mrf.mxu2  ;;  %v2127_v0 = vpop.f32.mrf.mxu3 }
 0x362   : > { %v2067_v1 = vpop.f32.mrf.mxu0  ;;  %v2087_v2 = vpop.f32.mrf.mxu1  ;;  %v2128_v13 = vadd.f32 %v2127_v0, %v2107_v63 }
 0x363   : > { %v2088_v18 = vadd.f32 %v2087_v2, %v2067_v1 }
 0x364   : > { %v2379_v21 = vmax.f32 %v2128_v13, 0.0 }
 0x365   : > { %v2378_v30 = vmax.f32 %v2088_v18, 0.0 }
 0x366   : > { %v2409_v32 = vrot.slane %v2379_v21, 7 }
 0x368   : > { %v2430_v19 = vsel %vm2416_vm2, %v2378_v30, %v2409_v32 }
 0x36b   : > { %v2187_v3 = vpop.f32.mrf.mxu2  ;;  %v2207_v4 = vpop.f32.mrf.mxu3 }
 0x36c   : > { %v2147_v5 = vpop.f32.mrf.mxu0  ;;  %v2167_v6 = vpop.f32.mrf.mxu1  ;;  %v2208_v12 = vadd.f32 %v2207_v4, %v2187_v3 }
 0x36d   : > { %v2168_v11 = vadd.f32 %v2167_v6, %v2147_v5 }
 0x36e   : > { %v2381_v44 = vmax.f32 %v2208_v12, 0.0 }
 0x36f   : > { %v2380_v17 = vmax.f32 %v2168_v11, 0.0 }
 0x370   : > { %v2411_v28 = vrot.slane %v2381_v44, 5 }
 0x371   : > { %v2410_v27 = vrot.slane %v2380_v17, 6 }
 0x373   : > { %v2431_v37 = vsel %vm2418_vm0, %v2410_v27, %v2411_v28 }
 0x374   : > { %v2432_v40 = vsel %vm2420_vm3, %v2430_v19, %v2431_v37 }
 0x3a5   : > { %v2267_v7 = vpop.f32.mrf.mxu2  ;;  %v2287_v8 = vpop.f32.mrf.mxu3 }
 0x3a6   : > { %v2227_v9 = vpop.f32.mrf.mxu0  ;;  %v2247_v10 = vpop.f32.mrf.mxu1  ;;  %v2288_v43 = vadd.f32 %v2287_v8, %v2267_v7 }
 0x3a7   : > { %v2248_v14 = vadd.f32 %v2247_v10, %v2227_v9 }
 0x3a8   : > { %v2383_v23 = vmax.f32 %v2288_v43, 0.0 }
 0x3a9   : > { %v2382_v22 = vmax.f32 %v2248_v14, 0.0 }
 0x3aa   : > { %v2413_v34 = vrot.slane %v2383_v23, 3 }
 0x3ab   : > { %v2412_v33 = vrot.slane %v2382_v22, 4 }
 0x3ad   : > { %v2433_v20 = vsel %vm2422_vm1, %v2412_v33, %v2413_v34 }
 0x3af   : > { %v2307_v24 = vpop.f32.mrf.mxu0  ;;  %v2327_v25 = vpop.f32.mrf.mxu1 }
 0x3b0   : > { %v2328_v15 = vadd.f32 %v2327_v25, %v2307_v24  ;;  %v2347_v16 = vpop.f32.mrf.mxu2  ;;  %v2367_v26 = vpop.f32.mrf.mxu3 }
 0x3b1   : > { %v2368_v29 = vadd.f32 %v2367_v26, %v2347_v16 }
 0x3b2   : > { %v2384_v31 = vmax.f32 %v2328_v15, 0.0 }
 0x3b3   : > { %v2385_v35 = vmax.f32 %v2368_v29, 0.0 }
 0x3b4   : > { %v2414_v36 = vrot.slane %v2384_v31, 2 }
 0x3b5   : > { %v2415_v38 = vrot.slane %v2385_v35, 1 }
 0x3b7   : > { %v2434_v39 = vsel %vm2424_vm4, %v2414_v36, %v2415_v38 }
 0x3b8   : > { %v2435_v41 = vsel %vm2426_vm5, %v2433_v20, %v2434_v39 }
 0x3b9   : > { %v2436_v42 = vsel %vm2428_vm6, %v2432_v40, %v2435_v41 }
 0x3ba   : > { %2440 = vst [vmem:[%s4347_s23 + $0x8] sm:$0xff] %v2436_v42 }
 0x3bb PF: > { %s12_s15 = sadd.s32 1, %s2652_s15   ;;  %s4389_s9 = smov %s2632_s10 }
 0x3bc   : > { %p9_p12 = scmp.ge.s32.totalorder %s12_s15, 6   ;;  %s4390_s10 = smov %s2720_s22 }
 0x3bd   : > { %s4391_s11 = smov %s2644_s13  ;;  %s4392_s12 = smov %s2648_s14 }
 0x3be   : > { %s4393_s13 = smov %s4396_s16  ;;  %s4394_s14 = smov %s4400_s17 }
 0x3bf   :  { %11 = sbr.rel (!%p9_p12) target bundleno = 4 (0x4), region = 86 }

// kernel: dinsdale_domain_pred_forward.3
= control target key start
LH: loop header
LB: loop body
LE: loop exit
PB: predicated region body
PF: predicated region fallthrough
CT: control target
= control target key end

     0   :  { %s9361_s0 = inlined_call_operand.vmem [shape: f32[2,512], index: 0, kind: input, shape index: {}]   ;;  %s9362_s1 = inlined_call_operand.vmem [shape: f32[2,5832], index: 1, kind: input, shape index: {}]   ;;  %s9363_s2 = inlined_call_operand.vmem [shape: f32[512,256], index: 2, kind: input, shape index: {}]   ;;  %s9364_s3 = inlined_call_operand.vmem [shape: f32[1,256], index: 3, kind: input, shape index: {}]   ;;  %s9365_s4 = inlined_call_operand.vmem [shape: f32[5832,256], index: 4, kind: input, shape index: {}]   ;;  %s9366_s5 = inlined_call_operand.vmem [shape: f32[1,256], index: 5, kind: input, shape index: {}]   ;;  %s9367_s6 = inlined_call_operand.vmem [shape: f32[256,124], index: 6, kind: input, shape index: {}]   ;;  %s9368_s7 = inlined_call_operand.vmem [shape: f32[256,124], index: 7, kind: input, shape index: {}]   ;;  %s9369_s8 = inlined_call_operand.vmem [shape: f32[1,124], index: 8, kind: input, shape index: {}]   ;;  %s9370_s9 = inlined_call_operand.vmem [shape: f32[124,2], index: 9, kind: input, shape index: {}]   ;;  %s9371_s10 = inlined_call_operand.vmem [shape: f32[1,2], index: 10, kind: input, shape index: {}]   ;;  %s9372_s11 = inlined_call_operand.hbm [shape: f32[2,2], index: 11, kind: output, shape index: {}]  }
   0x1   :  { %v70_v0 = vld [vmem:[%s9363_s2 + $0xf0] sm:$0xff]  ;;  %v68_v4 = vld [vmem:[%s9363_s2 + $0xe0] sm:$0xff] }
   0x2   :  { %v102_v1 = vld [vmem:[%s9363_s2 + $0x1f0] sm:$0xff]  ;;  %184 = vmatpush.msra.mxu0 %v70_v0  ;;  %v100_v5 = vld [vmem:[%s9363_s2 + $0x1e0] sm:$0xff]  ;;  %v71_v0 = vld [vmem:[%s9363_s2 + $0xf8] sm:$0xff] }
   0x3   :  { %v134_v2 = vld [vmem:[%s9363_s2 + $0x2f0] sm:$0xff]  ;;  %204 = vmatpush.msra.mxu1 %v102_v1  ;;  %v132_v6 = vld [vmem:[%s9363_s2 + $0x2e0] sm:$0xff]  ;;  %v103_v1 = vld [vmem:[%s9363_s2 + $0x1f8] sm:$0xff] }
   0x4   :  { %v166_v3 = vld [vmem:[%s9363_s2 + $0x3f0] sm:$0xff]  ;;  %224 = vmatpush.msra.mxu2 %v134_v2  ;;  %v164_v7 = vld [vmem:[%s9363_s2 + $0x3e0] sm:$0xff]  ;;  %185 = vmatpush.msra.mxu0 %v68_v4  ;;  %v135_v2 = vld [vmem:[%s9363_s2 + $0x2f8] sm:$0xff] }
   0x5   :  { %244 = vmatpush.msra.mxu3 %v166_v3  ;;  %v66_v8 = vld [vmem:[%s9363_s2 + $0xd0] sm:$0xff]  ;;  %205 = vmatpush.msra.mxu1 %v100_v5  ;;  %v64_v12 = vld [vmem:[%s9363_s2 + $0xc0] sm:$0xff]  ;;  %v167_v3 = vld [vmem:[%s9363_s2 + $0x3f8] sm:$0xff] }
   0x6   :  { %v98_v9 = vld [vmem:[%s9363_s2 + $0x1d0] sm:$0xff]  ;;  %225 = vmatpush.msra.mxu2 %v132_v6  ;;  %v96_v13 = vld [vmem:[%s9363_s2 + $0x1c0] sm:$0xff]  ;;  %186 = vmatpush.msra.mxu0 %v66_v8  ;;  %v69_v4 = vld [vmem:[%s9363_s2 + $0xe8] sm:$0xff] }
   0x7   :  { %v130_v10 = vld [vmem:[%s9363_s2 + $0x2d0] sm:$0xff]  ;;  %245 = vmatpush.msra.mxu3 %v164_v7  ;;  %206 = vmatpush.msra.mxu1 %v98_v9  ;;  %v128_v14 = vld [vmem:[%s9363_s2 + $0x2c0] sm:$0xff]  ;;  %v101_v5 = vld [vmem:[%s9363_s2 + $0x1e8] sm:$0xff] }
   0x8   :  { %v162_v11 = vld [vmem:[%s9363_s2 + $0x3d0] sm:$0xff]  ;;  %v160_v15 = vld [vmem:[%s9363_s2 + $0x3c0] sm:$0xff]  ;;  %226 = vmatpush.msra.mxu2 %v130_v10  ;;  %187 = vmatpush.msra.mxu0 %v64_v12  ;;  %v133_v6 = vld [vmem:[%s9363_s2 + $0x2e8] sm:$0xff] }
   0x9   :  { %246 = vmatpush.msra.mxu3 %v162_v11  ;;  %v62_v16 = vld [vmem:[%s9363_s2 + $0xb0] sm:$0xff]  ;;  %207 = vmatpush.msra.mxu1 %v96_v13  ;;  %v60_v20 = vld [vmem:[%s9363_s2 + $0xa0] sm:$0xff]  ;;  %v165_v7 = vld [vmem:[%s9363_s2 + $0x3e8] sm:$0xff] }
   0xa   :  { %v94_v17 = vld [vmem:[%s9363_s2 + $0x1b0] sm:$0xff]  ;;  %227 = vmatpush.msra.mxu2 %v128_v14  ;;  %v92_v21 = vld [vmem:[%s9363_s2 + $0x1a0] sm:$0xff]  ;;  %188 = vmatpush.msra.mxu0 %v62_v16  ;;  %v67_v8 = vld [vmem:[%s9363_s2 + $0xd8] sm:$0xff] }
   0xb   :  { %v126_v18 = vld [vmem:[%s9363_s2 + $0x2b0] sm:$0xff]  ;;  %247 = vmatpush.msra.mxu3 %v160_v15  ;;  %208 = vmatpush.msra.mxu1 %v94_v17  ;;  %v124_v22 = vld [vmem:[%s9363_s2 + $0x2a0] sm:$0xff]  ;;  %v99_v9 = vld [vmem:[%s9363_s2 + $0x1d8] sm:$0xff] }
   0xc   :  { %v158_v19 = vld [vmem:[%s9363_s2 + $0x3b0] sm:$0xff]  ;;  %v156_v23 = vld [vmem:[%s9363_s2 + $0x3a0] sm:$0xff]  ;;  %228 = vmatpush.msra.mxu2 %v126_v18  ;;  %189 = vmatpush.msra.mxu0 %v60_v20  ;;  %v131_v10 = vld [vmem:[%s9363_s2 + $0x2d8] sm:$0xff] }
   0xd   :  { %248 = vmatpush.msra.mxu3 %v158_v19  ;;  %v58_v24 = vld [vmem:[%s9363_s2 + $0x90] sm:$0xff]  ;;  %209 = vmatpush.msra.mxu1 %v92_v21  ;;  %v56_v28 = vld [vmem:[%s9363_s2 + $0x80] sm:$0xff]  ;;  %v163_v11 = vld [vmem:[%s9363_s2 + $0x3d8] sm:$0xff] }
   0xe   :  { %v90_v25 = vld [vmem:[%s9363_s2 + $0x190] sm:$0xff]  ;;  %229 = vmatpush.msra.mxu2 %v124_v22  ;;  %v88_v29 = vld [vmem:[%s9363_s2 + $0x180] sm:$0xff]  ;;  %190 = vmatpush.msra.mxu0 %v58_v24  ;;  %v65_v12 = vld [vmem:[%s9363_s2 + $0xc8] sm:$0xff] }
   0xf   :  { %v122_v26 = vld [vmem:[%s9363_s2 + $0x290] sm:$0xff]  ;;  %249 = vmatpush.msra.mxu3 %v156_v23  ;;  %210 = vmatpush.msra.mxu1 %v90_v25  ;;  %v120_v30 = vld [vmem:[%s9363_s2 + $0x280] sm:$0xff]  ;;  %v97_v13 = vld [vmem:[%s9363_s2 + $0x1c8] sm:$0xff] }
  0x10   :  { %v154_v27 = vld [vmem:[%s9363_s2 + $0x390] sm:$0xff]  ;;  %v152_v31 = vld [vmem:[%s9363_s2 + $0x380] sm:$0xff]  ;;  %230 = vmatpush.msra.mxu2 %v122_v26  ;;  %191 = vmatpush.msra.mxu0 %v56_v28  ;;  %v129_v14 = vld [vmem:[%s9363_s2 + $0x2c8] sm:$0xff] }
  0x11   :  { %250 = vmatpush.msra.mxu3 %v154_v27  ;;  %v54_v32 = vld [vmem:[%s9363_s2 + $0x70] sm:$0xff]  ;;  %211 = vmatpush.msra.mxu1 %v88_v29  ;;  %v52_v36 = vld [vmem:[%s9363_s2 + $0x60] sm:$0xff]  ;;  %v161_v15 = vld [vmem:[%s9363_s2 + $0x3c8] sm:$0xff] }
  0x12   :  { %v86_v33 = vld [vmem:[%s9363_s2 + $0x170] sm:$0xff]  ;;  %231 = vmatpush.msra.mxu2 %v120_v30  ;;  %v84_v37 = vld [vmem:[%s9363_s2 + $0x160] sm:$0xff]  ;;  %192 = vmatpush.msra.mxu0 %v54_v32  ;;  %v63_v16 = vld [vmem:[%s9363_s2 + $0xb8] sm:$0xff] }
  0x13   :  { %v118_v34 = vld [vmem:[%s9363_s2 + $0x270] sm:$0xff]  ;;  %251 = vmatpush.msra.mxu3 %v152_v31  ;;  %212 = vmatpush.msra.mxu1 %v86_v33  ;;  %v116_v38 = vld [vmem:[%s9363_s2 + $0x260] sm:$0xff]  ;;  %v95_v17 = vld [vmem:[%s9363_s2 + $0x1b8] sm:$0xff] }
  0x14   :  { %v150_v35 = vld [vmem:[%s9363_s2 + $0x370] sm:$0xff]  ;;  %v148_v39 = vld [vmem:[%s9363_s2 + $0x360] sm:$0xff]  ;;  %232 = vmatpush.msra.mxu2 %v118_v34  ;;  %193 = vmatpush.msra.mxu0 %v52_v36  ;;  %v127_v18 = vld [vmem:[%s9363_s2 + $0x2b8] sm:$0xff] }
  0x15   :  { %252 = vmatpush.msra.mxu3 %v150_v35  ;;  %v50_v40 = vld [vmem:[%s9363_s2 + $0x50] sm:$0xff]  ;;  %213 = vmatpush.msra.mxu1 %v84_v37  ;;  %v48_v44 = vld [vmem:[%s9363_s2 + $0x40] sm:$0xff]  ;;  %v159_v19 = vld [vmem:[%s9363_s2 + $0x3b8] sm:$0xff] }
  0x16   :  { %v82_v41 = vld [vmem:[%s9363_s2 + $0x150] sm:$0xff]  ;;  %233 = vmatpush.msra.mxu2 %v116_v38  ;;  %v80_v45 = vld [vmem:[%s9363_s2 + $0x140] sm:$0xff]  ;;  %194 = vmatpush.msra.mxu0 %v50_v40  ;;  %v61_v20 = vld [vmem:[%s9363_s2 + $0xa8] sm:$0xff] }
  0x17   :  { %v114_v42 = vld [vmem:[%s9363_s2 + $0x250] sm:$0xff]  ;;  %253 = vmatpush.msra.mxu3 %v148_v39  ;;  %214 = vmatpush.msra.mxu1 %v82_v41  ;;  %v112_v46 = vld [vmem:[%s9363_s2 + $0x240] sm:$0xff]  ;;  %v93_v21 = vld [vmem:[%s9363_s2 + $0x1a8] sm:$0xff] }
  0x18   :  { %v146_v43 = vld [vmem:[%s9363_s2 + $0x350] sm:$0xff]  ;;  %v144_v47 = vld [vmem:[%s9363_s2 + $0x340] sm:$0xff]  ;;  %234 = vmatpush.msra.mxu2 %v114_v42  ;;  %195 = vmatpush.msra.mxu0 %v48_v44  ;;  %v125_v22 = vld [vmem:[%s9363_s2 + $0x2a8] sm:$0xff] }
  0x19   :  { %254 = vmatpush.msra.mxu3 %v146_v43  ;;  %v46_v48 = vld [vmem:[%s9363_s2 + $0x30] sm:$0xff]  ;;  %215 = vmatpush.msra.mxu1 %v80_v45  ;;  %v44_v52 = vld [vmem:[%s9363_s2 + $0x20] sm:$0xff]  ;;  %v157_v23 = vld [vmem:[%s9363_s2 + $0x3a8] sm:$0xff] }
  0x1a   :  { %v78_v49 = vld [vmem:[%s9363_s2 + $0x130] sm:$0xff]  ;;  %235 = vmatpush.msra.mxu2 %v112_v46  ;;  %v76_v53 = vld [vmem:[%s9363_s2 + $0x120] sm:$0xff]  ;;  %196 = vmatpush.msra.mxu0 %v46_v48  ;;  %v59_v25 = vld [vmem:[%s9363_s2 + $0x98] sm:$0xff] }
  0x1b   :  { %v110_v50 = vld [vmem:[%s9363_s2 + $0x230] sm:$0xff]  ;;  %255 = vmatpush.msra.mxu3 %v144_v47  ;;  %216 = vmatpush.msra.mxu1 %v78_v49  ;;  %v108_v54 = vld [vmem:[%s9363_s2 + $0x220] sm:$0xff]  ;;  %v91_v26 = vld [vmem:[%s9363_s2 + $0x198] sm:$0xff] }
  0x1c   :  { %v142_v51 = vld [vmem:[%s9363_s2 + $0x330] sm:$0xff]  ;;  %v140_v55 = vld [vmem:[%s9363_s2 + $0x320] sm:$0xff]  ;;  %236 = vmatpush.msra.mxu2 %v110_v50  ;;  %197 = vmatpush.msra.mxu0 %v44_v52  ;;  %v123_v27 = vld [vmem:[%s9363_s2 + $0x298] sm:$0xff] }
  0x1d   :  { %256 = vmatpush.msra.mxu3 %v142_v51  ;;  %v42_v56 = vld [vmem:[%s9363_s2 + $0x10] sm:$0xff]  ;;  %217 = vmatpush.msra.mxu1 %v76_v53  ;;  %v40_v60 = vld [vmem:[%s9363_s2] sm:$0xff]  ;;  %v155_v28 = vld [vmem:[%s9363_s2 + $0x398] sm:$0xff] }
  0x1e   :  { %v74_v57 = vld [vmem:[%s9363_s2 + $0x110] sm:$0xff]  ;;  %237 = vmatpush.msra.mxu2 %v108_v54  ;;  %v72_v61 = vld [vmem:[%s9363_s2 + $0x100] sm:$0xff]  ;;  %198 = vmatpush.msra.mxu0 %v42_v56  ;;  %v57_v29 = vld [vmem:[%s9363_s2 + $0x88] sm:$0xff] }
  0x1f   :  { %v106_v58 = vld [vmem:[%s9363_s2 + $0x210] sm:$0xff]  ;;  %257 = vmatpush.msra.mxu3 %v140_v55  ;;  %218 = vmatpush.msra.mxu1 %v74_v57  ;;  %v104_v62 = vld [vmem:[%s9363_s2 + $0x200] sm:$0xff]  ;;  %v89_v30 = vld [vmem:[%s9363_s2 + $0x188] sm:$0xff] }
  0x20   :  { %v138_v59 = vld [vmem:[%s9363_s2 + $0x310] sm:$0xff]  ;;  %v136_v63 = vld [vmem:[%s9363_s2 + $0x300] sm:$0xff]  ;;  %238 = vmatpush.msra.mxu2 %v106_v58  ;;  %199 = vmatpush.msra.mxu0 %v40_v60  ;;  %v121_v31 = vld [vmem:[%s9363_s2 + $0x288] sm:$0xff] }
  0x21   :  { %258 = vmatpush.msra.mxu3 %v138_v59  ;;  %219 = vmatpush.msra.mxu1 %v72_v61  ;;  %v39_v24 = vld [vmem:[%s9361_s0] sm:$0xff]  ;;  %v153_v32 = vld [vmem:[%s9363_s2 + $0x388] sm:$0xff]  ;;  %v55_v33 = vld [vmem:[%s9363_s2 + $0x78] sm:$0xff] }
  0x22   :  { %239 = vmatpush.msra.mxu2 %v104_v62  ;;  %264 = vmatpush.msrb.mxu0 %v71_v0  ;;  %175 = vst [vmem:[#allocation1] ss:$4 sm:$0xff] %v39_v24  ;;  %v87_v34 = vld [vmem:[%s9363_s2 + $0x178] sm:$0xff]  ;;  %v53_v37 = vld [vmem:[%s9363_s2 + $0x68] sm:$0xff]  ;;  %v346_v43 = vld [vmem:[%s9362_s1] sm:$0xff] }
  0x23   :  { %259 = vmatpush.msra.mxu3 %v136_v63  ;;  %284 = vmatpush.msrb.mxu1 %v103_v1  ;;  %v119_v35 = vld [vmem:[%s9363_s2 + $0x278] sm:$0xff]  ;;  %v85_v38 = vld [vmem:[%s9363_s2 + $0x168] sm:$0xff] }
  0x24   :  { %304 = vmatpush.msrb.mxu2 %v135_v2  ;;  %265 = vmatpush.msrb.mxu0 %v69_v4  ;;  %v151_v36 = vld [vmem:[%s9363_s2 + $0x378] sm:$0xff]  ;;  %v117_v39 = vld [vmem:[%s9363_s2 + $0x268] sm:$0xff] }
  0x25   :  { %324 = vmatpush.msrb.mxu3 %v167_v3  ;;  %285 = vmatpush.msrb.mxu1 %v101_v5  ;;  %v149_v40 = vld [vmem:[%s9363_s2 + $0x368] sm:$0xff]  ;;  %v51_v41 = vld [vmem:[%s9363_s2 + $0x58] sm:$0xff] }
  0x26   :  { %305 = vmatpush.msrb.mxu2 %v133_v6  ;;  %266 = vmatpush.msrb.mxu0 %v67_v8  ;;  %v83_v42 = vld [vmem:[%s9363_s2 + $0x158] sm:$0xff]  ;;  %v49_v50 = vld [vmem:[%s9363_s2 + $0x48] sm:$0xff]  ;;  %v388_v6 = vld [vmem:[%s9365_s4 + $0xf0] sm:$0xff] }
  0x27   :  { %325 = vmatpush.msrb.mxu3 %v165_v7  ;;  %286 = vmatpush.msrb.mxu1 %v99_v9  ;;  %v115_v48 = vld [vmem:[%s9363_s2 + $0x258] sm:$0xff]  ;;  %v81_v51 = vld [vmem:[%s9363_s2 + $0x148] sm:$0xff]  ;;  %v420_v7 = vld [vmem:[%s9365_s4 + $0x1f0] sm:$0xff] }
  0x28   :  { %306 = vmatpush.msrb.mxu2 %v131_v10  ;;  %267 = vmatpush.msrb.mxu0 %v65_v12  ;;  %v147_v49 = vld [vmem:[%s9363_s2 + $0x358] sm:$0xff]  ;;  %v113_v52 = vld [vmem:[%s9363_s2 + $0x248] sm:$0xff]  ;;  %v452_v8 = vld [vmem:[%s9365_s4 + $0x2f0] sm:$0xff] }
  0x29   :  { %326 = vmatpush.msrb.mxu3 %v163_v11  ;;  %287 = vmatpush.msrb.mxu1 %v97_v13  ;;  %v4424_v44 = vld.sshfl [vmem:[#allocation1 + $0x10] sm:$0xff pattern:$0x73625140]  ;;  %v4426_v45 = vld.sshfl [vmem:[#allocation1] sm:$0xff pattern:$0x73625140] }
  0x2a   :  { %307 = vmatpush.msrb.mxu2 %v129_v14  ;;  %268 = vmatpush.msrb.mxu0 %v63_v16  ;;  %v4428_v46 = vld.sshfl [vmem:[#allocation1 + $0x8] sm:$0xff pattern:$0x73625140]  ;;  %v4430_v47 = vld.sshfl [vmem:[#allocation1 + $0x18] sm:$0xff pattern:$0x73625140] }
  0x2b   :  { %327 = vmatpush.msrb.mxu3 %v161_v15  ;;  %288 = vmatpush.msrb.mxu1 %v95_v17  ;;  %1834 = vst [vmem:[#allocation1] ss:$4 sm:$0xff] %v346_v43  ;;  %v145_v53 = vld [vmem:[%s9363_s2 + $0x348] sm:$0xff]  ;;  %v47_v54 = vld [vmem:[%s9363_s2 + $0x38] sm:$0xff]  ;;  %v484_v9 = vld [vmem:[%s9365_s4 + $0x3f0] sm:$0xff] }
  0x2c   :  { %308 = vmatpush.msrb.mxu2 %v127_v18  ;;  %269 = vmatpush.msrb.mxu0 %v61_v20  ;;  %v79_v55 = vld [vmem:[%s9363_s2 + $0x138] sm:$0xff]  ;;  %v45_v58 = vld [vmem:[%s9363_s2 + $0x28] sm:$0xff]  ;;  %v386_v10 = vld [vmem:[%s9365_s4 + $0xe0] sm:$0xff] }
  0x2d   :  { %328 = vmatpush.msrb.mxu3 %v159_v19  ;;  %289 = vmatpush.msrb.mxu1 %v93_v21  ;;  %v111_v56 = vld [vmem:[%s9363_s2 + $0x238] sm:$0xff]  ;;  %v77_v59 = vld [vmem:[%s9363_s2 + $0x128] sm:$0xff]  ;;  %v418_v11 = vld [vmem:[%s9365_s4 + $0x1e0] sm:$0xff] }
  0x2e   :  { %309 = vmatpush.msrb.mxu2 %v125_v22  ;;  %270 = vmatpush.msrb.mxu0 %v59_v25  ;;  %v143_v57 = vld [vmem:[%s9363_s2 + $0x338] sm:$0xff]  ;;  %v109_v60 = vld [vmem:[%s9363_s2 + $0x228] sm:$0xff]  ;;  %v450_v12 = vld [vmem:[%s9365_s4 + $0x2e0] sm:$0xff] }
  0x2f   :  { %329 = vmatpush.msrb.mxu3 %v157_v23  ;;  %290 = vmatpush.msrb.mxu1 %v91_v26  ;;  %v141_v61 = vld [vmem:[%s9363_s2 + $0x328] sm:$0xff]  ;;  %v43_v62 = vld [vmem:[%s9363_s2 + $0x18] sm:$0xff]  ;;  %v482_v13 = vld [vmem:[%s9365_s4 + $0x3e0] sm:$0xff] }
  0x30   :  { %310 = vmatpush.msrb.mxu2 %v123_v27  ;;  %271 = vmatpush.msrb.mxu0 %v57_v29  ;;  %v75_v63 = vld [vmem:[%s9363_s2 + $0x118] sm:$0xff]  ;;  %v41_v2 = vld [vmem:[%s9363_s2 + $0x8] sm:$0xff] }
  0x31   :  { %330 = vmatpush.msrb.mxu3 %v155_v28  ;;  %291 = vmatpush.msrb.mxu1 %v89_v30  ;;  %v107_v0 = vld [vmem:[%s9363_s2 + $0x218] sm:$0xff]  ;;  %v73_v3 = vld [vmem:[%s9363_s2 + $0x108] sm:$0xff] }
  0x32   :  { %311 = vmatpush.msrb.mxu2 %v121_v31  ;;  %272 = vmatpush.msrb.mxu0 %v55_v33  ;;  %v139_v1 = vld [vmem:[%s9363_s2 + $0x318] sm:$0xff]  ;;  %v105_v4 = vld [vmem:[%s9363_s2 + $0x208] sm:$0xff] }
  0x33   :  { %331 = vmatpush.msrb.mxu3 %v153_v32  ;;  %292 = vmatpush.msrb.mxu1 %v87_v34  ;;  %v137_v5 = vld [vmem:[%s9363_s2 + $0x308] sm:$0xff] }
  0x34   :  { %312 = vmatpush.msrb.mxu2 %v119_v35  ;;  %273 = vmatpush.msrb.mxu0 %v53_v37 }
  0x35   :  { %332 = vmatpush.msrb.mxu3 %v151_v36  ;;  %293 = vmatpush.msrb.mxu1 %v85_v38 }
  0x36   :  { %313 = vmatpush.msrb.mxu2 %v117_v39  ;;  %274 = vmatpush.msrb.mxu0 %v51_v41 }
  0x37   :  { %333 = vmatpush.msrb.mxu3 %v149_v40  ;;  %294 = vmatpush.msrb.mxu1 %v83_v42 }
  0x38   :  { %314 = vmatpush.msrb.mxu2 %v115_v48  ;;  %275 = vmatpush.msrb.mxu0 %v49_v50 }
  0x39   :  { %334 = vmatpush.msrb.mxu3 %v147_v49  ;;  %295 = vmatpush.msrb.mxu1 %v81_v51 }
  0x3a   :  { %315 = vmatpush.msrb.mxu2 %v113_v52  ;;  %276 = vmatpush.msrb.mxu0 %v47_v54 }
  0x3b   :  { %335 = vmatpush.msrb.mxu3 %v145_v53  ;;  %296 = vmatpush.msrb.mxu1 %v79_v55 }
  0x3c   :  { %316 = vmatpush.msrb.mxu2 %v111_v56  ;;  %277 = vmatpush.msrb.mxu0 %v45_v58 }
  0x3d   :  { %336 = vmatpush.msrb.mxu3 %v143_v57  ;;  %297 = vmatpush.msrb.mxu1 %v77_v59 }
  0x3e   :  { %317 = vmatpush.msrb.mxu2 %v109_v60  ;;  %278 = vmatpush.msrb.mxu0 %v43_v62 }
  0x3f   :  { %337 = vmatpush.msrb.mxu3 %v141_v61  ;;  %298 = vmatpush.msrb.mxu1 %v75_v63 }
  0x40   :  { %318 = vmatpush.msrb.mxu2 %v107_v0  ;;  %279 = vmatpush.msrb.mxu0 %v41_v2 }
  0x41   :  { %338 = vmatpush.msrb.mxu3 %v139_v1  ;;  %240 = vmatmul.f32.vlgmr.msra.gmra.mxu2 %v4424_v44 }
  0x42   :  { %299 = vmatpush.msrb.mxu1 %v73_v3  ;;  %319 = vmatpush.msrb.mxu2 %v105_v4 }
  0x43   :  { %339 = vmatpush.msrb.mxu3 %v137_v5  ;;  %200 = vmatmul.f32.vlgmr.msra.gmra.mxu0 %v4426_v45 }
  0x44   :  { %220 = vmatmul.f32.vlgmr.msra.gmra.mxu1 %v4428_v46  ;;  %260 = vmatmul.f32.vlgmr.msra.gmra.mxu3 %v4430_v47 }
  0x45   :  { %1941 = vmatpush.msra.mxu0 %v388_v6  ;;  %1961 = vmatpush.msra.mxu1 %v420_v7 }
  0x46   :  { %16 = vsyncpa [#allocation3], 0  ;;  %1981 = vmatpush.msra.mxu2 %v452_v8  ;;  %2001 = vmatpush.msra.mxu3 %v484_v9  ;;  %v384_v14 = vld [vmem:[%s9365_s4 + $0xd0] sm:$0xff]  ;;  %v382_v18 = vld [vmem:[%s9365_s4 + $0xc0] sm:$0xff]  ;;  %vm1938_vm0 = vcmask 588800   ;;  %vm3957_vm1 = vcmask 1043456  }
  0x47   :  { %v416_v15 = vld [vmem:[%s9365_s4 + $0x1d0] sm:$0xff]  ;;  %1942 = vmatpush.msra.mxu0 %v386_v10  ;;  %1962 = vmatpush.msra.mxu1 %v418_v11  ;;  %v414_v19 = vld [vmem:[%s9365_s4 + $0x1c0] sm:$0xff]  ;;  %vm3953_vm2 = vcmask 1014784   ;;  %vm3981_vm3 = vcmask 9216  }
  0x48   :  { %v448_v16 = vld [vmem:[%s9365_s4 + $0x2d0] sm:$0xff]  ;;  %1982 = vmatpush.msra.mxu2 %v450_v12  ;;  %2002 = vmatpush.msra.mxu3 %v482_v13  ;;  %v446_v20 = vld [vmem:[%s9365_s4 + $0x2c0] sm:$0xff] }
  0x49   :  { %v480_v17 = vld [vmem:[%s9365_s4 + $0x3d0] sm:$0xff]  ;;  %1943 = vmatpush.msra.mxu0 %v384_v14  ;;  %1963 = vmatpush.msra.mxu1 %v416_v15  ;;  %v478_v21 = vld [vmem:[%s9365_s4 + $0x3c0] sm:$0xff] }
  0x4a   :  { %1983 = vmatpush.msra.mxu2 %v448_v16  ;;  %2003 = vmatpush.msra.mxu3 %v480_v17  ;;  %v380_v22 = vld [vmem:[%s9365_s4 + $0xb0] sm:$0xff]  ;;  %v378_v26 = vld [vmem:[%s9365_s4 + $0xa0] sm:$0xff] }
  0x4b   :  { %v412_v23 = vld [vmem:[%s9365_s4 + $0x1b0] sm:$0xff]  ;;  %1944 = vmatpush.msra.mxu0 %v382_v18  ;;  %1964 = vmatpush.msra.mxu1 %v414_v19  ;;  %v410_v27 = vld [vmem:[%s9365_s4 + $0x1a0] sm:$0xff]  ;;  %v4729_v19 = vld.sshfl [vmem:[#allocation1 + $0x8] sm:$0xff pattern:$0x73625140] }
  0x4c   :  { %v444_v24 = vld [vmem:[%s9365_s4 + $0x2b0] sm:$0xff]  ;;  %1984 = vmatpush.msra.mxu2 %v446_v20  ;;  %2004 = vmatpush.msra.mxu3 %v478_v21  ;;  %v442_v28 = vld [vmem:[%s9365_s4 + $0x2a0] sm:$0xff]  ;;  %v4737_v20 = vld.sshfl [vmem:[#allocation1 + $0x18] sm:$0xff pattern:$0x73625140] }
  0x4d   :  { %v476_v25 = vld [vmem:[%s9365_s4 + $0x3b0] sm:$0xff]  ;;  %1945 = vmatpush.msra.mxu0 %v380_v22  ;;  %1965 = vmatpush.msra.mxu1 %v412_v23  ;;  %v474_v29 = vld [vmem:[%s9365_s4 + $0x3a0] sm:$0xff] }
  0x4e   :  { %1985 = vmatpush.msra.mxu2 %v444_v24  ;;  %2005 = vmatpush.msra.mxu3 %v476_v25  ;;  %v376_v30 = vld [vmem:[%s9365_s4 + $0x90] sm:$0xff]  ;;  %v374_v34 = vld [vmem:[%s9365_s4 + $0x80] sm:$0xff]  ;;  %v347_v25 = vld [vmem:[%s9362_s1 + $0x8] sm:$0xff] }
  0x4f   :  { %v408_v31 = vld [vmem:[%s9365_s4 + $0x190] sm:$0xff]  ;;  %1946 = vmatpush.msra.mxu0 %v378_v26  ;;  %1966 = vmatpush.msra.mxu1 %v410_v27  ;;  %v406_v35 = vld [vmem:[%s9365_s4 + $0x180] sm:$0xff]  ;;  %1836 = vst [vmem:[#allocation1 + $0x20] ss:$4 sm:$0xff] %v347_v25 }
  0x50   :  { %v440_v32 = vld [vmem:[%s9365_s4 + $0x290] sm:$0xff]  ;;  %1986 = vmatpush.msra.mxu2 %v442_v28  ;;  %2006 = vmatpush.msra.mxu3 %v474_v29  ;;  %v438_v36 = vld [vmem:[%s9365_s4 + $0x280] sm:$0xff] }
  0x51   :  { %v472_v33 = vld [vmem:[%s9365_s4 + $0x390] sm:$0xff]  ;;  %1947 = vmatpush.msra.mxu0 %v376_v30  ;;  %1967 = vmatpush.msra.mxu1 %v408_v31  ;;  %v470_v37 = vld [vmem:[%s9365_s4 + $0x380] sm:$0xff] }
  0x52   :  { %1987 = vmatpush.msra.mxu2 %v440_v32  ;;  %2007 = vmatpush.msra.mxu3 %v472_v33  ;;  %v372_v38 = vld [vmem:[%s9365_s4 + $0x70] sm:$0xff]  ;;  %v370_v42 = vld [vmem:[%s9365_s4 + $0x60] sm:$0xff] }
  0x53   :  { %v404_v39 = vld [vmem:[%s9365_s4 + $0x170] sm:$0xff]  ;;  %1948 = vmatpush.msra.mxu0 %v374_v34  ;;  %1968 = vmatpush.msra.mxu1 %v406_v35  ;;  %v402_v43 = vld [vmem:[%s9365_s4 + $0x160] sm:$0xff] }
  0x54   :  { %v436_v40 = vld [vmem:[%s9365_s4 + $0x270] sm:$0xff]  ;;  %1988 = vmatpush.msra.mxu2 %v438_v36  ;;  %2008 = vmatpush.msra.mxu3 %v470_v37  ;;  %v434_v48 = vld [vmem:[%s9365_s4 + $0x260] sm:$0xff] }
  0x55   :  { %v468_v41 = vld [vmem:[%s9365_s4 + $0x370] sm:$0xff]  ;;  %1949 = vmatpush.msra.mxu0 %v372_v38  ;;  %1969 = vmatpush.msra.mxu1 %v404_v39  ;;  %v466_v49 = vld [vmem:[%s9365_s4 + $0x360] sm:$0xff] }
  0x56   :  { %1989 = vmatpush.msra.mxu2 %v436_v40  ;;  %2009 = vmatpush.msra.mxu3 %v468_v41  ;;  %v368_v50 = vld [vmem:[%s9365_s4 + $0x50] sm:$0xff]  ;;  %v366_v54 = vld [vmem:[%s9365_s4 + $0x40] sm:$0xff] }
  0x57   :  { %v400_v51 = vld [vmem:[%s9365_s4 + $0x150] sm:$0xff]  ;;  %1950 = vmatpush.msra.mxu0 %v370_v42  ;;  %1970 = vmatpush.msra.mxu1 %v402_v43  ;;  %v398_v55 = vld [vmem:[%s9365_s4 + $0x140] sm:$0xff] }
  0x58   :  { %v432_v52 = vld [vmem:[%s9365_s4 + $0x250] sm:$0xff]  ;;  %1990 = vmatpush.msra.mxu2 %v434_v48  ;;  %2010 = vmatpush.msra.mxu3 %v466_v49  ;;  %v430_v56 = vld [vmem:[%s9365_s4 + $0x240] sm:$0xff] }
  0x59   :  { %v464_v53 = vld [vmem:[%s9365_s4 + $0x350] sm:$0xff]  ;;  %1951 = vmatpush.msra.mxu0 %v368_v50  ;;  %1971 = vmatpush.msra.mxu1 %v400_v51  ;;  %v462_v57 = vld [vmem:[%s9365_s4 + $0x340] sm:$0xff] }
  0x5a   :  { %1991 = vmatpush.msra.mxu2 %v432_v52  ;;  %2011 = vmatpush.msra.mxu3 %v464_v53  ;;  %v364_v58 = vld [vmem:[%s9365_s4 + $0x30] sm:$0xff]  ;;  %v362_v62 = vld [vmem:[%s9365_s4 + $0x20] sm:$0xff] }
  0x5b   :  { %v396_v59 = vld [vmem:[%s9365_s4 + $0x130] sm:$0xff]  ;;  %1952 = vmatpush.msra.mxu0 %v366_v54  ;;  %1972 = vmatpush.msra.mxu1 %v398_v55  ;;  %v394_v63 = vld [vmem:[%s9365_s4 + $0x120] sm:$0xff]  ;;  %v349_v54 = vld [vmem:[%s9362_s1 + $0x18] sm:$0xff] }
  0x5c   :  { %v428_v60 = vld [vmem:[%s9365_s4 + $0x230] sm:$0xff]  ;;  %1992 = vmatpush.msra.mxu2 %v430_v56  ;;  %2012 = vmatpush.msra.mxu3 %v462_v57  ;;  %v426_v0 = vld [vmem:[%s9365_s4 + $0x220] sm:$0xff]  ;;  %v4827_v55 = vld.sshfl [vmem:[#allocation1 + $0x38] sm:$0xff pattern:$0x73625140] }
  0x5d   :  { %v460_v61 = vld [vmem:[%s9365_s4 + $0x330] sm:$0xff]  ;;  %1953 = vmatpush.msra.mxu0 %v364_v58  ;;  %1973 = vmatpush.msra.mxu1 %v396_v59  ;;  %v458_v1 = vld [vmem:[%s9365_s4 + $0x320] sm:$0xff]  ;;  %v4829_v56 = vld.sshfl [vmem:[#allocation1 + $0x28] sm:$0xff pattern:$0x73625140] }
  0x5e   :  { %1993 = vmatpush.msra.mxu2 %v428_v60  ;;  %2013 = vmatpush.msra.mxu3 %v460_v61  ;;  %v360_v2 = vld [vmem:[%s9365_s4 + $0x10] sm:$0xff]  ;;  %v358_v6 = vld [vmem:[%s9365_s4] sm:$0xff] }
  0x5f   :  { %v392_v3 = vld [vmem:[%s9365_s4 + $0x110] sm:$0xff]  ;;  %1954 = vmatpush.msra.mxu0 %v362_v62  ;;  %1974 = vmatpush.msra.mxu1 %v394_v63  ;;  %v390_v7 = vld [vmem:[%s9365_s4 + $0x100] sm:$0xff] }
  0x60   :  { %v424_v4 = vld [vmem:[%s9365_s4 + $0x210] sm:$0xff]  ;;  %1994 = vmatpush.msra.mxu2 %v426_v0  ;;  %2014 = vmatpush.msra.mxu3 %v458_v1  ;;  %v422_v8 = vld [vmem:[%s9365_s4 + $0x200] sm:$0xff] }
  0x61   :  { %v456_v5 = vld [vmem:[%s9365_s4 + $0x310] sm:$0xff]  ;;  %1955 = vmatpush.msra.mxu0 %v360_v2  ;;  %1975 = vmatpush.msra.mxu1 %v392_v3  ;;  %v454_v9 = vld [vmem:[%s9365_s4 + $0x300] sm:$0xff] }
  0x62   :  { %1995 = vmatpush.msra.mxu2 %v424_v4  ;;  %2015 = vmatpush.msra.mxu3 %v456_v5  ;;  %v516_v10 = vld [vmem:[%s9365_s4 + $0x4f0] sm:$0xff]  ;;  %v546_v14 = vld [vmem:[%s9365_s4 + $0x5e0] sm:$0xff] }
  0x63   :  { %320 = vmatmul.f32.vlgmr.msrb.gmra.mxu2 %v4424_v44  ;;  %1956 = vmatpush.msra.mxu0 %v358_v6  ;;  %v548_v11 = vld [vmem:[%s9365_s4 + $0x5f0] sm:$0xff]  ;;  %v514_v44 = vld [vmem:[%s9365_s4 + $0x4e0] sm:$0xff] }
  0x64   :  { %1976 = vmatpush.msra.mxu1 %v390_v7  ;;  %1996 = vmatpush.msra.mxu2 %v422_v8  ;;  %v580_v12 = vld [vmem:[%s9365_s4 + $0x6f0] sm:$0xff]  ;;  %v578_v15 = vld [vmem:[%s9365_s4 + $0x6e0] sm:$0xff] }
  0x65   :  { %v612_v13 = vld [vmem:[%s9365_s4 + $0x7f0] sm:$0xff]  ;;  %2016 = vmatpush.msra.mxu3 %v454_v9  ;;  %280 = vmatmul.f32.vlgmr.msrb.gmra.mxu0 %v4426_v45  ;;  %v610_v45 = vld [vmem:[%s9365_s4 + $0x7e0] sm:$0xff] }
  0x66   :  { %300 = vmatmul.f32.vlgmr.msrb.gmra.mxu1 %v4428_v46  ;;  %340 = vmatmul.f32.vlgmr.msrb.gmra.mxu3 %v4430_v47  ;;  %v512_v16 = vld [vmem:[%s9365_s4 + $0x4d0] sm:$0xff]  ;;  %v4727_v18 = vld.sshfl [vmem:[#allocation1] sm:$0xff pattern:$0x73625140] }
  0x67   :  { %v4725_v17 = vld.sshfl [vmem:[#allocation1 + $0x10] sm:$0xff pattern:$0x73625140]  ;;  %2021 = vmatpush.msrb.mxu0 %v516_v10  ;;  %2041 = vmatpush.msrb.mxu1 %v548_v11  ;;  %v510_v23 = vld [vmem:[%s9365_s4 + $0x4c0] sm:$0xff] }
  0x68   :  { %2061 = vmatpush.msrb.mxu2 %v580_v12  ;;  %2081 = vmatpush.msrb.mxu3 %v612_v13  ;;  %v544_v46 = vld [vmem:[%s9365_s4 + $0x5d0] sm:$0xff]  ;;  %v542_v24 = vld [vmem:[%s9365_s4 + $0x5c0] sm:$0xff] }
  0x69   :  { %v348_v47 = vld [vmem:[%s9362_s1 + $0x10] sm:$0xff]  ;;  %2022 = vmatpush.msrb.mxu0 %v514_v44  ;;  %2042 = vmatpush.msrb.mxu1 %v546_v14  ;;  %v574_v26 = vld [vmem:[%s9365_s4 + $0x6c0] sm:$0xff] }
  0x6a   :  { %v576_v21 = vld [vmem:[%s9365_s4 + $0x6d0] sm:$0xff]  ;;  %1845 = vst [vmem:[#allocation1] ss:$4 sm:$0xff] %v348_v47  ;;  %2062 = vmatpush.msrb.mxu2 %v578_v15  ;;  %2082 = vmatpush.msrb.mxu3 %v610_v45  ;;  %v606_v27 = vld [vmem:[%s9365_s4 + $0x7c0] sm:$0xff] }
  0x6b   :  { %v608_v22 = vld [vmem:[%s9365_s4 + $0x7d0] sm:$0xff]  ;;  %2023 = vmatpush.msrb.mxu0 %v512_v16  ;;  %2043 = vmatpush.msrb.mxu1 %v544_v46  ;;  %v506_v32 = vld [vmem:[%s9365_s4 + $0x4a0] sm:$0xff] }
  0x6c   :  { %2063 = vmatpush.msrb.mxu2 %v576_v21  ;;  %2083 = vmatpush.msrb.mxu3 %v608_v22  ;;  %v508_v28 = vld [vmem:[%s9365_s4 + $0x4b0] sm:$0xff]  ;;  %v538_v33 = vld [vmem:[%s9365_s4 + $0x5a0] sm:$0xff] }
  0x6d   :  { %v540_v29 = vld [vmem:[%s9365_s4 + $0x5b0] sm:$0xff]  ;;  %2024 = vmatpush.msrb.mxu0 %v510_v23  ;;  %2044 = vmatpush.msrb.mxu1 %v542_v24  ;;  %v570_v34 = vld [vmem:[%s9365_s4 + $0x6a0] sm:$0xff] }
  0x6e   :  { %v572_v30 = vld [vmem:[%s9365_s4 + $0x6b0] sm:$0xff]  ;;  %2064 = vmatpush.msrb.mxu2 %v574_v26  ;;  %2084 = vmatpush.msrb.mxu3 %v606_v27  ;;  %v602_v35 = vld [vmem:[%s9365_s4 + $0x7a0] sm:$0xff] }
  0x6f   :  { %v604_v31 = vld [vmem:[%s9365_s4 + $0x7b0] sm:$0xff]  ;;  %2025 = vmatpush.msrb.mxu0 %v508_v28  ;;  %2045 = vmatpush.msrb.mxu1 %v540_v29  ;;  %v502_v40 = vld [vmem:[%s9365_s4 + $0x480] sm:$0xff] }
  0x70   :  { %2065 = vmatpush.msrb.mxu2 %v572_v30  ;;  %2085 = vmatpush.msrb.mxu3 %v604_v31  ;;  %v504_v36 = vld [vmem:[%s9365_s4 + $0x490] sm:$0xff]  ;;  %v534_v41 = vld [vmem:[%s9365_s4 + $0x580] sm:$0xff] }
  0x71   :  { %v536_v37 = vld [vmem:[%s9365_s4 + $0x590] sm:$0xff]  ;;  %2026 = vmatpush.msrb.mxu0 %v506_v32  ;;  %2046 = vmatpush.msrb.mxu1 %v538_v33  ;;  %v566_v42 = vld [vmem:[%s9365_s4 + $0x680] sm:$0xff] }
  0x72   :  { %v568_v38 = vld [vmem:[%s9365_s4 + $0x690] sm:$0xff]  ;;  %2066 = vmatpush.msrb.mxu2 %v570_v34  ;;  %2086 = vmatpush.msrb.mxu3 %v602_v35  ;;  %v598_v43 = vld [vmem:[%s9365_s4 + $0x780] sm:$0xff] }
  0x73   :  { %v600_v39 = vld [vmem:[%s9365_s4 + $0x790] sm:$0xff]  ;;  %2027 = vmatpush.msrb.mxu0 %v504_v36  ;;  %2047 = vmatpush.msrb.mxu1 %v536_v37  ;;  %v4822_v53 = vld.sshfl [vmem:[#allocation1 + $0x20] sm:$0xff pattern:$0x73625140] }
  0x74   :  { %v500_v48 = vld [vmem:[%s9365_s4 + $0x470] sm:$0xff]  ;;  %2067 = vmatpush.msrb.mxu2 %v568_v38  ;;  %2087 = vmatpush.msrb.mxu3 %v600_v39  ;;  %v498_v57 = vld [vmem:[%s9365_s4 + $0x460] sm:$0xff] }
  0x75   :  { %v532_v49 = vld [vmem:[%s9365_s4 + $0x570] sm:$0xff]  ;;  %2028 = vmatpush.msrb.mxu0 %v502_v40  ;;  %2048 = vmatpush.msrb.mxu1 %v534_v41  ;;  %v530_v58 = vld [vmem:[%s9365_s4 + $0x560] sm:$0xff] }
  0x76   :  { %v564_v50 = vld [vmem:[%s9365_s4 + $0x670] sm:$0xff]  ;;  %2068 = vmatpush.msrb.mxu2 %v566_v42  ;;  %2088 = vmatpush.msrb.mxu3 %v598_v43  ;;  %v562_v59 = vld [vmem:[%s9365_s4 + $0x660] sm:$0xff] }
  0x77   :  { %v4817_v51 = vld.sshfl [vmem:[#allocation1 + $0x30] sm:$0xff pattern:$0x73625140]  ;;  %2029 = vmatpush.msrb.mxu0 %v500_v48  ;;  %2049 = vmatpush.msrb.mxu1 %v532_v49  ;;  %v594_v60 = vld [vmem:[%s9365_s4 + $0x760] sm:$0xff] }
  0x78   :  { %v596_v52 = vld [vmem:[%s9365_s4 + $0x770] sm:$0xff]  ;;  %1846 = vst [vmem:[#allocation1 + $0x20] ss:$4 sm:$0xff] %v349_v54  ;;  %2069 = vmatpush.msrb.mxu2 %v564_v50  ;;  %v494_v1 = vld [vmem:[%s9365_s4 + $0x440] sm:$0xff]  ;;  %1957 = vmatmul.f32.vlgmr.msra.gmra.mxu0 %v4727_v18 }
  0x79   :  { %2089 = vmatpush.msrb.mxu3 %v596_v52  ;;  %v496_v61 = vld [vmem:[%s9365_s4 + $0x450] sm:$0xff]  ;;  %2030 = vmatpush.msrb.mxu0 %v498_v57  ;;  %v526_v2 = vld [vmem:[%s9365_s4 + $0x540] sm:$0xff] }
  0x7a   :  { %v528_v62 = vld [vmem:[%s9365_s4 + $0x550] sm:$0xff]  ;;  %2050 = vmatpush.msrb.mxu1 %v530_v58  ;;  %2070 = vmatpush.msrb.mxu2 %v562_v59  ;;  %v558_v3 = vld [vmem:[%s9365_s4 + $0x640] sm:$0xff] }
  0x7b   :  { %v560_v63 = vld [vmem:[%s9365_s4 + $0x650] sm:$0xff]  ;;  %2090 = vmatpush.msrb.mxu3 %v594_v60  ;;  %2031 = vmatpush.msrb.mxu0 %v496_v61  ;;  %v590_v4 = vld [vmem:[%s9365_s4 + $0x740] sm:$0xff] }
  0x7c   :  { %v592_v0 = vld [vmem:[%s9365_s4 + $0x750] sm:$0xff]  ;;  %2051 = vmatpush.msrb.mxu1 %v528_v62  ;;  %2071 = vmatpush.msrb.mxu2 %v560_v63  ;;  %v490_v9 = vld [vmem:[%s9365_s4 + $0x420] sm:$0xff] }
  0x7d   :  { %2091 = vmatpush.msrb.mxu3 %v592_v0  ;;  %v492_v5 = vld [vmem:[%s9365_s4 + $0x430] sm:$0xff]  ;;  %2032 = vmatpush.msrb.mxu0 %v494_v1  ;;  %v522_v10 = vld [vmem:[%s9365_s4 + $0x520] sm:$0xff] }
  0x7e   :  { %v524_v6 = vld [vmem:[%s9365_s4 + $0x530] sm:$0xff]  ;;  %2052 = vmatpush.msrb.mxu1 %v526_v2  ;;  %2072 = vmatpush.msrb.mxu2 %v558_v3  ;;  %v554_v11 = vld [vmem:[%s9365_s4 + $0x620] sm:$0xff] }
  0x7f   :  { %v556_v7 = vld [vmem:[%s9365_s4 + $0x630] sm:$0xff]  ;;  %2092 = vmatpush.msrb.mxu3 %v590_v4  ;;  %2033 = vmatpush.msrb.mxu0 %v492_v5  ;;  %v586_v12 = vld [vmem:[%s9365_s4 + $0x720] sm:$0xff] }
  0x80   :  { %v588_v8 = vld [vmem:[%s9365_s4 + $0x730] sm:$0xff]  ;;  %2053 = vmatpush.msrb.mxu1 %v524_v6  ;;  %2073 = vmatpush.msrb.mxu2 %v556_v7  ;;  %v486_v45 = vld [vmem:[%s9365_s4 + $0x400] sm:$0xff] }
  0x81   :  { %2093 = vmatpush.msrb.mxu3 %v588_v8  ;;  %v488_v13 = vld [vmem:[%s9365_s4 + $0x410] sm:$0xff]  ;;  %2034 = vmatpush.msrb.mxu0 %v490_v9  ;;  %v518_v16 = vld [vmem:[%s9365_s4 + $0x500] sm:$0xff] }
  0x82   :  { %v520_v44 = vld [vmem:[%s9365_s4 + $0x510] sm:$0xff]  ;;  %2054 = vmatpush.msrb.mxu1 %v522_v10  ;;  %2074 = vmatpush.msrb.mxu2 %v554_v11  ;;  %v550_v46 = vld [vmem:[%s9365_s4 + $0x600] sm:$0xff] }
  0x83   :  { %v552_v14 = vld [vmem:[%s9365_s4 + $0x610] sm:$0xff]  ;;  %2094 = vmatpush.msrb.mxu3 %v586_v12  ;;  %2035 = vmatpush.msrb.mxu0 %v488_v13  ;;  %v582_v47 = vld [vmem:[%s9365_s4 + $0x700] sm:$0xff] }
  0x84   :  { %v584_v15 = vld [vmem:[%s9365_s4 + $0x710] sm:$0xff]  ;;  %2055 = vmatpush.msrb.mxu1 %v520_v44  ;;  %2075 = vmatpush.msrb.mxu2 %v552_v14  ;;  %v642_v25 = vld [vmem:[%s9365_s4 + $0x8e0] sm:$0xff] }
  0x85   :  { %2095 = vmatpush.msrb.mxu3 %v584_v15  ;;  %1997 = vmatmul.f32.vlgmr.msra.gmra.mxu2 %v4725_v17  ;;  %v644_v21 = vld [vmem:[%s9365_s4 + $0x8f0] sm:$0xff]  ;;  %v674_v26 = vld [vmem:[%s9365_s4 + $0x9e0] sm:$0xff] }
  0x86   :  { %2036 = vmatpush.msrb.mxu0 %v486_v45  ;;  %2056 = vmatpush.msrb.mxu1 %v518_v16  ;;  %v676_v22 = vld [vmem:[%s9365_s4 + $0x9f0] sm:$0xff]  ;;  %v706_v27 = vld [vmem:[%s9365_s4 + $0xae0] sm:$0xff] }
  0x87   :  { %2076 = vmatpush.msrb.mxu2 %v550_v46  ;;  %2096 = vmatpush.msrb.mxu3 %v582_v47  ;;  %v708_v23 = vld [vmem:[%s9365_s4 + $0xaf0] sm:$0xff]  ;;  %v738_v28 = vld [vmem:[%s9365_s4 + $0xbe0] sm:$0xff] }
  0x88   :  { %v740_v24 = vld [vmem:[%s9365_s4 + $0xbf0] sm:$0xff]  ;;  %1977 = vmatmul.f32.vlgmr.msra.gmra.mxu1 %v4729_v19  ;;  %2017 = vmatmul.f32.vlgmr.msra.gmra.mxu3 %v4737_v20  ;;  %v638_v33 = vld [vmem:[%s9365_s4 + $0x8c0] sm:$0xff] }
  0x89   :  { %2101 = vmatpush.msra.mxu0 %v644_v21  ;;  %2121 = vmatpush.msra.mxu1 %v676_v22  ;;  %v640_v29 = vld [vmem:[%s9365_s4 + $0x8d0] sm:$0xff]  ;;  %v670_v34 = vld [vmem:[%s9365_s4 + $0x9c0] sm:$0xff] }
  0x8a   :  { %2141 = vmatpush.msra.mxu2 %v708_v23  ;;  %2161 = vmatpush.msra.mxu3 %v740_v24  ;;  %v672_v30 = vld [vmem:[%s9365_s4 + $0x9d0] sm:$0xff]  ;;  %v702_v35 = vld [vmem:[%s9365_s4 + $0xac0] sm:$0xff] }
  0x8b   :  { %2102 = vmatpush.msra.mxu0 %v642_v25  ;;  %2122 = vmatpush.msra.mxu1 %v674_v26  ;;  %v704_v31 = vld [vmem:[%s9365_s4 + $0xad0] sm:$0xff]  ;;  %v734_v36 = vld [vmem:[%s9365_s4 + $0xbc0] sm:$0xff] }
  0x8c   :  { %v736_v32 = vld [vmem:[%s9365_s4 + $0xbd0] sm:$0xff]  ;;  %2142 = vmatpush.msra.mxu2 %v706_v27  ;;  %2162 = vmatpush.msra.mxu3 %v738_v28  ;;  %v634_v41 = vld [vmem:[%s9365_s4 + $0x8a0] sm:$0xff] }
  0x8d   :  { %2103 = vmatpush.msra.mxu0 %v640_v29  ;;  %2123 = vmatpush.msra.mxu1 %v672_v30  ;;  %v636_v37 = vld [vmem:[%s9365_s4 + $0x8b0] sm:$0xff]  ;;  %v666_v42 = vld [vmem:[%s9365_s4 + $0x9a0] sm:$0xff] }
  0x8e   :  { %2143 = vmatpush.msra.mxu2 %v704_v31  ;;  %2163 = vmatpush.msra.mxu3 %v736_v32  ;;  %v668_v38 = vld [vmem:[%s9365_s4 + $0x9b0] sm:$0xff]  ;;  %v698_v43 = vld [vmem:[%s9365_s4 + $0xaa0] sm:$0xff] }
  0x8f   :  { %2077 = vmatmul.f32.vlgmr.msrb.gmra.mxu2 %v4817_v51  ;;  %2104 = vmatpush.msra.mxu0 %v638_v33  ;;  %v700_v39 = vld [vmem:[%s9365_s4 + $0xab0] sm:$0xff]  ;;  %v730_v48 = vld [vmem:[%s9365_s4 + $0xba0] sm:$0xff] }
  0x90   :  { %2124 = vmatpush.msra.mxu1 %v670_v34  ;;  %2144 = vmatpush.msra.mxu2 %v702_v35  ;;  %v732_v40 = vld [vmem:[%s9365_s4 + $0xbb0] sm:$0xff]  ;;  %v630_v57 = vld [vmem:[%s9365_s4 + $0x880] sm:$0xff]  ;;  %v5131_v35 = vld.sshfl [vmem:[#allocation1 + $0x8] sm:$0xff pattern:$0x73625140] }
  0x91   :  { %2164 = vmatpush.msra.mxu3 %v734_v36  ;;  %2037 = vmatmul.f32.vlgmr.msrb.gmra.mxu0 %v4822_v53  ;;  %v632_v49 = vld [vmem:[%s9365_s4 + $0x890] sm:$0xff]  ;;  %v662_v58 = vld [vmem:[%s9365_s4 + $0x980] sm:$0xff]  ;;  %v5135_v36 = vld.sshfl [vmem:[#allocation1 + $0x18] sm:$0xff pattern:$0x73625140] }
  0x92   :  { %2097 = vmatmul.f32.vlgmr.msrb.gmra.mxu3 %v4827_v55  ;;  %2105 = vmatpush.msra.mxu0 %v636_v37  ;;  %v664_v50 = vld [vmem:[%s9365_s4 + $0x990] sm:$0xff]  ;;  %v694_v59 = vld [vmem:[%s9365_s4 + $0xa80] sm:$0xff] }
  0x93   :  { %2125 = vmatpush.msra.mxu1 %v668_v38  ;;  %2145 = vmatpush.msra.mxu2 %v700_v39  ;;  %v696_v52 = vld [vmem:[%s9365_s4 + $0xa90] sm:$0xff]  ;;  %v726_v60 = vld [vmem:[%s9365_s4 + $0xb80] sm:$0xff] }
  0x94   :  { %2165 = vmatpush.msra.mxu3 %v732_v40  ;;  %2057 = vmatmul.f32.vlgmr.msrb.gmra.mxu1 %v4829_v56  ;;  %v728_v54 = vld [vmem:[%s9365_s4 + $0xb90] sm:$0xff]  ;;  %v626_v1 = vld [vmem:[%s9365_s4 + $0x860] sm:$0xff] }
  0x95   :  { %2106 = vmatpush.msra.mxu0 %v634_v41  ;;  %2126 = vmatpush.msra.mxu1 %v666_v42  ;;  %v628_v61 = vld [vmem:[%s9365_s4 + $0x870] sm:$0xff]  ;;  %v658_v2 = vld [vmem:[%s9365_s4 + $0x960] sm:$0xff] }
  0x96   :  { %2146 = vmatpush.msra.mxu2 %v698_v43  ;;  %2166 = vmatpush.msra.mxu3 %v730_v48  ;;  %v660_v62 = vld [vmem:[%s9365_s4 + $0x970] sm:$0xff]  ;;  %v690_v3 = vld [vmem:[%s9365_s4 + $0xa60] sm:$0xff] }
  0x97   :  { %2107 = vmatpush.msra.mxu0 %v632_v49  ;;  %2127 = vmatpush.msra.mxu1 %v664_v50  ;;  %v692_v63 = vld [vmem:[%s9365_s4 + $0xa70] sm:$0xff]  ;;  %v722_v4 = vld [vmem:[%s9365_s4 + $0xb60] sm:$0xff] }
  0x98   :  { %2147 = vmatpush.msra.mxu2 %v696_v52  ;;  %2167 = vmatpush.msra.mxu3 %v728_v54  ;;  %v724_v0 = vld [vmem:[%s9365_s4 + $0xb70] sm:$0xff]  ;;  %v622_v9 = vld [vmem:[%s9365_s4 + $0x840] sm:$0xff]  ;;  %v5170_v54 = vld.sshfl [vmem:[#allocation1 + $0x28] sm:$0xff pattern:$0x73625140] }
  0x99   :  { %2108 = vmatpush.msra.mxu0 %v630_v57  ;;  %2128 = vmatpush.msra.mxu1 %v662_v58  ;;  %v624_v5 = vld [vmem:[%s9365_s4 + $0x850] sm:$0xff]  ;;  %v654_v10 = vld [vmem:[%s9365_s4 + $0x940] sm:$0xff]  ;;  %v351_v58 = vld [vmem:[%s9362_s1 + $0x28] sm:$0xff] }
  0x9a   :  { %2148 = vmatpush.msra.mxu2 %v694_v59  ;;  %2168 = vmatpush.msra.mxu3 %v726_v60  ;;  %v656_v6 = vld [vmem:[%s9365_s4 + $0x950] sm:$0xff]  ;;  %v686_v11 = vld [vmem:[%s9365_s4 + $0xa40] sm:$0xff]  ;;  %v5178_v59 = vld.sshfl [vmem:[#allocation1 + $0x38] sm:$0xff pattern:$0x73625140] }
  0x9b   :  { %2109 = vmatpush.msra.mxu0 %v628_v61  ;;  %2129 = vmatpush.msra.mxu1 %v660_v62  ;;  %v688_v7 = vld [vmem:[%s9365_s4 + $0xa50] sm:$0xff]  ;;  %v718_v12 = vld [vmem:[%s9365_s4 + $0xb40] sm:$0xff] }
  0x9c   :  { %2149 = vmatpush.msra.mxu2 %v692_v63  ;;  %2169 = vmatpush.msra.mxu3 %v724_v0  ;;  %v720_v8 = vld [vmem:[%s9365_s4 + $0xb50] sm:$0xff]  ;;  %v618_v45 = vld [vmem:[%s9365_s4 + $0x820] sm:$0xff] }
  0x9d   :  { %2110 = vmatpush.msra.mxu0 %v626_v1  ;;  %2130 = vmatpush.msra.mxu1 %v658_v2  ;;  %v620_v13 = vld [vmem:[%s9365_s4 + $0x830] sm:$0xff]  ;;  %v650_v16 = vld [vmem:[%s9365_s4 + $0x920] sm:$0xff] }
  0x9e   :  { %2150 = vmatpush.msra.mxu2 %v690_v3  ;;  %2170 = vmatpush.msra.mxu3 %v722_v4  ;;  %v652_v44 = vld [vmem:[%s9365_s4 + $0x930] sm:$0xff]  ;;  %v682_v46 = vld [vmem:[%s9365_s4 + $0xa20] sm:$0xff] }
  0x9f   :  { %2111 = vmatpush.msra.mxu0 %v624_v5  ;;  %2131 = vmatpush.msra.mxu1 %v656_v6  ;;  %v684_v14 = vld [vmem:[%s9365_s4 + $0xa30] sm:$0xff]  ;;  %v714_v47 = vld [vmem:[%s9365_s4 + $0xb20] sm:$0xff] }
  0xa0   :  { %2151 = vmatpush.msra.mxu2 %v688_v7  ;;  %2171 = vmatpush.msra.mxu3 %v720_v8  ;;  %v716_v15 = vld [vmem:[%s9365_s4 + $0xb30] sm:$0xff]  ;;  %v614_v25 = vld [vmem:[%s9365_s4 + $0x800] sm:$0xff] }
  0xa1   :  { %2112 = vmatpush.msra.mxu0 %v622_v9  ;;  %2132 = vmatpush.msra.mxu1 %v654_v10  ;;  %v616_v21 = vld [vmem:[%s9365_s4 + $0x810] sm:$0xff]  ;;  %v646_v26 = vld [vmem:[%s9365_s4 + $0x900] sm:$0xff] }
  0xa2   :  { %2152 = vmatpush.msra.mxu2 %v686_v11  ;;  %2172 = vmatpush.msra.mxu3 %v718_v12  ;;  %v648_v22 = vld [vmem:[%s9365_s4 + $0x910] sm:$0xff]  ;;  %v678_v27 = vld [vmem:[%s9365_s4 + $0xa00] sm:$0xff] }
  0xa3   :  { %2113 = vmatpush.msra.mxu0 %v620_v13  ;;  %2133 = vmatpush.msra.mxu1 %v652_v44  ;;  %v680_v23 = vld [vmem:[%s9365_s4 + $0xa10] sm:$0xff]  ;;  %v710_v28 = vld [vmem:[%s9365_s4 + $0xb00] sm:$0xff] }
  0xa4   :  { %2153 = vmatpush.msra.mxu2 %v684_v14  ;;  %2173 = vmatpush.msra.mxu3 %v716_v15  ;;  %v712_v24 = vld [vmem:[%s9365_s4 + $0xb10] sm:$0xff]  ;;  %v5115_v29 = vld.sshfl [vmem:[#allocation1] sm:$0xff pattern:$0x73625140] }
  0xa5   :  { %2114 = vmatpush.msra.mxu0 %v618_v45  ;;  %2134 = vmatpush.msra.mxu1 %v650_v16  ;;  %v5117_v30 = vld.sshfl [vmem:[#allocation1 + $0x10] sm:$0xff pattern:$0x73625140]  ;;  %v770_v37 = vld [vmem:[%s9365_s4 + $0xce0] sm:$0xff] }
  0xa6   :  { %2154 = vmatpush.msra.mxu2 %v682_v46  ;;  %2174 = vmatpush.msra.mxu3 %v714_v47  ;;  %v772_v31 = vld [vmem:[%s9365_s4 + $0xcf0] sm:$0xff]  ;;  %v802_v38 = vld [vmem:[%s9365_s4 + $0xde0] sm:$0xff] }
  0xa7   :  { %2115 = vmatpush.msra.mxu0 %v616_v21  ;;  %2135 = vmatpush.msra.mxu1 %v648_v22  ;;  %v804_v32 = vld [vmem:[%s9365_s4 + $0xdf0] sm:$0xff]  ;;  %v834_v39 = vld [vmem:[%s9365_s4 + $0xee0] sm:$0xff] }
  0xa8   :  { %2155 = vmatpush.msra.mxu2 %v680_v23  ;;  %2175 = vmatpush.msra.mxu3 %v712_v24  ;;  %v836_v33 = vld [vmem:[%s9365_s4 + $0xef0] sm:$0xff]  ;;  %v866_v40 = vld [vmem:[%s9365_s4 + $0xfe0] sm:$0xff] }
  0xa9   :  { %2116 = vmatpush.msra.mxu0 %v614_v25  ;;  %2136 = vmatpush.msra.mxu1 %v646_v26  ;;  %v868_v34 = vld [vmem:[%s9365_s4 + $0xff0] sm:$0xff]  ;;  %v766_v49 = vld [vmem:[%s9365_s4 + $0xcc0] sm:$0xff] }
  0xaa   :  { %2156 = vmatpush.msra.mxu2 %v678_v27  ;;  %2176 = vmatpush.msra.mxu3 %v710_v28  ;;  %v768_v41 = vld [vmem:[%s9365_s4 + $0xcd0] sm:$0xff]  ;;  %v5166_v50 = vld.sshfl [vmem:[#allocation1 + $0x20] sm:$0xff pattern:$0x73625140] }
  0xab   :  { %2117 = vmatmul.f32.vlgmr.msra.gmra.mxu0 %v5115_v29  ;;  %2157 = vmatmul.f32.vlgmr.msra.gmra.mxu2 %v5117_v30  ;;  %v800_v42 = vld [vmem:[%s9365_s4 + $0xdd0] sm:$0xff]  ;;  %v798_v57 = vld [vmem:[%s9365_s4 + $0xdc0] sm:$0xff] }
  0xac   :  { %2181 = vmatpush.msrb.mxu0 %v772_v31  ;;  %2201 = vmatpush.msrb.mxu1 %v804_v32  ;;  %v832_v43 = vld [vmem:[%s9365_s4 + $0xed0] sm:$0xff]  ;;  %v830_v60 = vld [vmem:[%s9365_s4 + $0xec0] sm:$0xff] }
  0xad   :  { %2221 = vmatpush.msrb.mxu2 %v836_v33  ;;  %2241 = vmatpush.msrb.mxu3 %v868_v34  ;;  %v864_v48 = vld [vmem:[%s9365_s4 + $0xfd0] sm:$0xff]  ;;  %v862_v61 = vld [vmem:[%s9365_s4 + $0xfc0] sm:$0xff] }
  0xae   :  { %2137 = vmatmul.f32.vlgmr.msra.gmra.mxu1 %v5131_v35  ;;  %2177 = vmatmul.f32.vlgmr.msra.gmra.mxu3 %v5135_v36  ;;  %v5168_v52 = vld.sshfl [vmem:[#allocation1 + $0x30] sm:$0xff pattern:$0x73625140]  ;;  %v762_v2 = vld [vmem:[%s9365_s4 + $0xca0] sm:$0xff] }
  0xaf   :  { %2182 = vmatpush.msrb.mxu0 %v770_v37  ;;  %2202 = vmatpush.msrb.mxu1 %v802_v38  ;;  %1856 = vst [vmem:[#allocation1 + $0x20] ss:$4 sm:$0xff] %v351_v58  ;;  %v764_v62 = vld [vmem:[%s9365_s4 + $0xcb0] sm:$0xff]  ;;  %v794_v3 = vld [vmem:[%s9365_s4 + $0xda0] sm:$0xff] }
  0xb0   :  { %2222 = vmatpush.msrb.mxu2 %v834_v39  ;;  %2242 = vmatpush.msrb.mxu3 %v866_v40  ;;  %v796_v63 = vld [vmem:[%s9365_s4 + $0xdb0] sm:$0xff]  ;;  %v826_v4 = vld [vmem:[%s9365_s4 + $0xea0] sm:$0xff] }
  0xb1   :  { %2183 = vmatpush.msrb.mxu0 %v768_v41  ;;  %2203 = vmatpush.msrb.mxu1 %v800_v42  ;;  %v828_v0 = vld [vmem:[%s9365_s4 + $0xeb0] sm:$0xff]  ;;  %v858_v5 = vld [vmem:[%s9365_s4 + $0xfa0] sm:$0xff] }
  0xb2   :  { %2223 = vmatpush.msrb.mxu2 %v832_v43  ;;  %2243 = vmatpush.msrb.mxu3 %v864_v48  ;;  %v860_v1 = vld [vmem:[%s9365_s4 + $0xfb0] sm:$0xff]  ;;  %v758_v10 = vld [vmem:[%s9365_s4 + $0xc80] sm:$0xff] }
  0xb3   :  { %2184 = vmatpush.msrb.mxu0 %v766_v49  ;;  %2204 = vmatpush.msrb.mxu1 %v798_v57  ;;  %v760_v6 = vld [vmem:[%s9365_s4 + $0xc90] sm:$0xff]  ;;  %v790_v11 = vld [vmem:[%s9365_s4 + $0xd80] sm:$0xff] }
  0xb4   :  { %2224 = vmatpush.msrb.mxu2 %v830_v60  ;;  %2244 = vmatpush.msrb.mxu3 %v862_v61  ;;  %v792_v7 = vld [vmem:[%s9365_s4 + $0xd90] sm:$0xff]  ;;  %v822_v12 = vld [vmem:[%s9365_s4 + $0xe80] sm:$0xff] }
  0xb5   :  { %2185 = vmatpush.msrb.mxu0 %v764_v62  ;;  %2205 = vmatpush.msrb.mxu1 %v796_v63  ;;  %v824_v8 = vld [vmem:[%s9365_s4 + $0xe90] sm:$0xff]  ;;  %v854_v13 = vld [vmem:[%s9365_s4 + $0xf80] sm:$0xff] }
  0xb6   :  { %2225 = vmatpush.msrb.mxu2 %v828_v0  ;;  %2245 = vmatpush.msrb.mxu3 %v860_v1  ;;  %v856_v9 = vld [vmem:[%s9365_s4 + $0xf90] sm:$0xff]  ;;  %v754_v16 = vld [vmem:[%s9365_s4 + $0xc60] sm:$0xff] }
  0xb7   :  { %2186 = vmatpush.msrb.mxu0 %v762_v2  ;;  %2206 = vmatpush.msrb.mxu1 %v794_v3  ;;  %v756_v44 = vld [vmem:[%s9365_s4 + $0xc70] sm:$0xff]  ;;  %v786_v46 = vld [vmem:[%s9365_s4 + $0xd60] sm:$0xff] }
  0xb8   :  { %2226 = vmatpush.msrb.mxu2 %v826_v4  ;;  %2246 = vmatpush.msrb.mxu3 %v858_v5  ;;  %v788_v14 = vld [vmem:[%s9365_s4 + $0xd70] sm:$0xff]  ;;  %v818_v47 = vld [vmem:[%s9365_s4 + $0xe60] sm:$0xff] }
  0xb9   :  { %2187 = vmatpush.msrb.mxu0 %v760_v6  ;;  %2207 = vmatpush.msrb.mxu1 %v792_v7  ;;  %v820_v15 = vld [vmem:[%s9365_s4 + $0xe70] sm:$0xff]  ;;  %v850_v21 = vld [vmem:[%s9365_s4 + $0xf60] sm:$0xff] }
  0xba   :  { %2227 = vmatpush.msrb.mxu2 %v824_v8  ;;  %2247 = vmatpush.msrb.mxu3 %v856_v9  ;;  %v852_v45 = vld [vmem:[%s9365_s4 + $0xf70] sm:$0xff]  ;;  %v750_v26 = vld [vmem:[%s9365_s4 + $0xc40] sm:$0xff] }
  0xbb   :  { %2188 = vmatpush.msrb.mxu0 %v758_v10  ;;  %2208 = vmatpush.msrb.mxu1 %v790_v11  ;;  %v752_v22 = vld [vmem:[%s9365_s4 + $0xc50] sm:$0xff]  ;;  %v782_v27 = vld [vmem:[%s9365_s4 + $0xd40] sm:$0xff] }
  0xbc   :  { %2228 = vmatpush.msrb.mxu2 %v822_v12  ;;  %2248 = vmatpush.msrb.mxu3 %v854_v13  ;;  %v784_v23 = vld [vmem:[%s9365_s4 + $0xd50] sm:$0xff]  ;;  %v814_v28 = vld [vmem:[%s9365_s4 + $0xe40] sm:$0xff] }
  0xbd   :  { %2189 = vmatpush.msrb.mxu0 %v756_v44  ;;  %2209 = vmatpush.msrb.mxu1 %v788_v14  ;;  %v816_v24 = vld [vmem:[%s9365_s4 + $0xe50] sm:$0xff]  ;;  %v846_v31 = vld [vmem:[%s9365_s4 + $0xf40] sm:$0xff] }
  0xbe   :  { %2229 = vmatpush.msrb.mxu2 %v820_v15  ;;  %2249 = vmatpush.msrb.mxu3 %v852_v45  ;;  %v848_v25 = vld [vmem:[%s9365_s4 + $0xf50] sm:$0xff]  ;;  %v746_v38 = vld [vmem:[%s9365_s4 + $0xc20] sm:$0xff] }
  0xbf   :  { %2190 = vmatpush.msrb.mxu0 %v754_v16  ;;  %2210 = vmatpush.msrb.mxu1 %v786_v46  ;;  %v748_v32 = vld [vmem:[%s9365_s4 + $0xc30] sm:$0xff]  ;;  %v778_v39 = vld [vmem:[%s9365_s4 + $0xd20] sm:$0xff] }
  0xc0   :  { %2230 = vmatpush.msrb.mxu2 %v818_v47  ;;  %2250 = vmatpush.msrb.mxu3 %v850_v21  ;;  %v780_v33 = vld [vmem:[%s9365_s4 + $0xd30] sm:$0xff]  ;;  %v810_v40 = vld [vmem:[%s9365_s4 + $0xe20] sm:$0xff] }
  0xc1   :  { %2191 = vmatpush.msrb.mxu0 %v752_v22  ;;  %2211 = vmatpush.msrb.mxu1 %v784_v23  ;;  %v812_v34 = vld [vmem:[%s9365_s4 + $0xe30] sm:$0xff]  ;;  %v842_v41 = vld [vmem:[%s9365_s4 + $0xf20] sm:$0xff] }
  0xc2   :  { %2231 = vmatpush.msrb.mxu2 %v816_v24  ;;  %2251 = vmatpush.msrb.mxu3 %v848_v25  ;;  %v844_v37 = vld [vmem:[%s9365_s4 + $0xf30] sm:$0xff]  ;;  %v350_v48 = vld [vmem:[%s9362_s1 + $0x20] sm:$0xff] }
  0xc3   :  { %2192 = vmatpush.msrb.mxu0 %v750_v26  ;;  %2212 = vmatpush.msrb.mxu1 %v782_v27  ;;  %v744_v42 = vld [vmem:[%s9365_s4 + $0xc10] sm:$0xff]  ;;  %1855 = vst [vmem:[#allocation1] ss:$4 sm:$0xff] %v350_v48  ;;  %v742_v58 = vld [vmem:[%s9365_s4 + $0xc00] sm:$0xff] }
  0xc4   :  { %2232 = vmatpush.msrb.mxu2 %v814_v28  ;;  %2252 = vmatpush.msrb.mxu3 %v846_v31  ;;  %v776_v43 = vld [vmem:[%s9365_s4 + $0xd10] sm:$0xff]  ;;  %v774_v60 = vld [vmem:[%s9365_s4 + $0xd00] sm:$0xff] }
  0xc5   :  { %2193 = vmatpush.msrb.mxu0 %v748_v32  ;;  %2213 = vmatpush.msrb.mxu1 %v780_v33  ;;  %v808_v49 = vld [vmem:[%s9365_s4 + $0xe10] sm:$0xff]  ;;  %v806_v61 = vld [vmem:[%s9365_s4 + $0xe00] sm:$0xff] }
  0xc6   :  { %2233 = vmatpush.msrb.mxu2 %v812_v34  ;;  %2253 = vmatpush.msrb.mxu3 %v844_v37  ;;  %v840_v57 = vld [vmem:[%s9365_s4 + $0xf10] sm:$0xff]  ;;  %v838_v62 = vld [vmem:[%s9365_s4 + $0xf00] sm:$0xff] }
  0xc7   :  { %2194 = vmatpush.msrb.mxu0 %v746_v38  ;;  %2214 = vmatpush.msrb.mxu1 %v778_v39  ;;  %v900_v63 = vld [vmem:[%s9365_s4 + $0x10f0] sm:$0xff]  ;;  %v898_v3 = vld [vmem:[%s9365_s4 + $0x10e0] sm:$0xff] }
  0xc8   :  { %2234 = vmatpush.msrb.mxu2 %v810_v40  ;;  %2254 = vmatpush.msrb.mxu3 %v842_v41  ;;  %v932_v0 = vld [vmem:[%s9365_s4 + $0x11f0] sm:$0xff]  ;;  %v930_v4 = vld [vmem:[%s9365_s4 + $0x11e0] sm:$0xff] }
  0xc9   :  { %2195 = vmatpush.msrb.mxu0 %v744_v42  ;;  %2215 = vmatpush.msrb.mxu1 %v776_v43  ;;  %v964_v1 = vld [vmem:[%s9365_s4 + $0x12f0] sm:$0xff]  ;;  %v962_v5 = vld [vmem:[%s9365_s4 + $0x12e0] sm:$0xff] }
  0xca   :  { %2235 = vmatpush.msrb.mxu2 %v808_v49  ;;  %2255 = vmatpush.msrb.mxu3 %v840_v57  ;;  %v996_v2 = vld [vmem:[%s9365_s4 + $0x13f0] sm:$0xff]  ;;  %v994_v6 = vld [vmem:[%s9365_s4 + $0x13e0] sm:$0xff] }
  0xcb   :  { %2196 = vmatpush.msrb.mxu0 %v742_v58  ;;  %2216 = vmatpush.msrb.mxu1 %v774_v60  ;;  %v896_v7 = vld [vmem:[%s9365_s4 + $0x10d0] sm:$0xff]  ;;  %v894_v11 = vld [vmem:[%s9365_s4 + $0x10c0] sm:$0xff] }
  0xcc   :  { %2236 = vmatpush.msrb.mxu2 %v806_v61  ;;  %2256 = vmatpush.msrb.mxu3 %v838_v62  ;;  %v928_v8 = vld [vmem:[%s9365_s4 + $0x11d0] sm:$0xff]  ;;  %v926_v12 = vld [vmem:[%s9365_s4 + $0x11c0] sm:$0xff] }
  0xcd   :  { %2197 = vmatmul.f32.vlgmr.msrb.gmra.mxu0 %v5166_v50  ;;  %2237 = vmatmul.f32.vlgmr.msrb.gmra.mxu2 %v5168_v52  ;;  %v960_v9 = vld [vmem:[%s9365_s4 + $0x12d0] sm:$0xff]  ;;  %v958_v13 = vld [vmem:[%s9365_s4 + $0x12c0] sm:$0xff] }
  0xce   :  { %2261 = vmatpush.msra.mxu0 %v900_v63  ;;  %2281 = vmatpush.msra.mxu1 %v932_v0  ;;  %v992_v10 = vld [vmem:[%s9365_s4 + $0x13d0] sm:$0xff]  ;;  %v990_v44 = vld [vmem:[%s9365_s4 + $0x13c0] sm:$0xff] }
  0xcf   :  { %2301 = vmatpush.msra.mxu2 %v964_v1  ;;  %2321 = vmatpush.msra.mxu3 %v996_v2  ;;  %v892_v14 = vld [vmem:[%s9365_s4 + $0x10b0] sm:$0xff]  ;;  %v890_v46 = vld [vmem:[%s9365_s4 + $0x10a0] sm:$0xff] }
  0xd0   :  { %2217 = vmatmul.f32.vlgmr.msrb.gmra.mxu1 %v5170_v54  ;;  %2257 = vmatmul.f32.vlgmr.msrb.gmra.mxu3 %v5178_v59  ;;  %v924_v15 = vld [vmem:[%s9365_s4 + $0x11b0] sm:$0xff]  ;;  %v922_v47 = vld [vmem:[%s9365_s4 + $0x11a0] sm:$0xff] }
  0xd1   :  { %2262 = vmatpush.msra.mxu0 %v898_v3  ;;  %2282 = vmatpush.msra.mxu1 %v930_v4  ;;  %v956_v45 = vld [vmem:[%s9365_s4 + $0x12b0] sm:$0xff]  ;;  %v954_v21 = vld [vmem:[%s9365_s4 + $0x12a0] sm:$0xff] }
  0xd2   :  { %2302 = vmatpush.msra.mxu2 %v962_v5  ;;  %2322 = vmatpush.msra.mxu3 %v994_v6  ;;  %v988_v16 = vld [vmem:[%s9365_s4 + $0x13b0] sm:$0xff]  ;;  %v986_v22 = vld [vmem:[%s9365_s4 + $0x13a0] sm:$0xff] }
  0xd3   :  { %2263 = vmatpush.msra.mxu0 %v896_v7  ;;  %2283 = vmatpush.msra.mxu1 %v928_v8  ;;  %v888_v23 = vld [vmem:[%s9365_s4 + $0x1090] sm:$0xff]  ;;  %v886_v27 = vld [vmem:[%s9365_s4 + $0x1080] sm:$0xff] }
  0xd4   :  { %2303 = vmatpush.msra.mxu2 %v960_v9  ;;  %2323 = vmatpush.msra.mxu3 %v992_v10  ;;  %v920_v24 = vld [vmem:[%s9365_s4 + $0x1190] sm:$0xff]  ;;  %v918_v28 = vld [vmem:[%s9365_s4 + $0x1180] sm:$0xff] }
  0xd5   :  { %2264 = vmatpush.msra.mxu0 %v894_v11  ;;  %2284 = vmatpush.msra.mxu1 %v926_v12  ;;  %v952_v25 = vld [vmem:[%s9365_s4 + $0x1290] sm:$0xff]  ;;  %v950_v31 = vld [vmem:[%s9365_s4 + $0x1280] sm:$0xff] }
  0xd6   :  { %2304 = vmatpush.msra.mxu2 %v958_v13  ;;  %2324 = vmatpush.msra.mxu3 %v990_v44  ;;  %v984_v26 = vld [vmem:[%s9365_s4 + $0x1390] sm:$0xff]  ;;  %v982_v32 = vld [vmem:[%s9365_s4 + $0x1380] sm:$0xff] }
  0xd7   :  { %2265 = vmatpush.msra.mxu0 %v892_v14  ;;  %2285 = vmatpush.msra.mxu1 %v924_v15  ;;  %v884_v33 = vld [vmem:[%s9365_s4 + $0x1070] sm:$0xff]  ;;  %v882_v39 = vld [vmem:[%s9365_s4 + $0x1060] sm:$0xff] }
  0xd8   :  { %2305 = vmatpush.msra.mxu2 %v956_v45  ;;  %2325 = vmatpush.msra.mxu3 %v988_v16  ;;  %v916_v34 = vld [vmem:[%s9365_s4 + $0x1170] sm:$0xff]  ;;  %v914_v40 = vld [vmem:[%s9365_s4 + $0x1160] sm:$0xff] }
  0xd9   :  { %2266 = vmatpush.msra.mxu0 %v890_v46  ;;  %2286 = vmatpush.msra.mxu1 %v922_v47  ;;  %v948_v37 = vld [vmem:[%s9365_s4 + $0x1270] sm:$0xff]  ;;  %v946_v41 = vld [vmem:[%s9365_s4 + $0x1260] sm:$0xff] }
  0xda   :  { %2306 = vmatpush.msra.mxu2 %v954_v21  ;;  %2326 = vmatpush.msra.mxu3 %v986_v22  ;;  %v980_v38 = vld [vmem:[%s9365_s4 + $0x1370] sm:$0xff]  ;;  %v978_v42 = vld [vmem:[%s9365_s4 + $0x1360] sm:$0xff]  ;;  %v5547_v21 = vld.sshfl [vmem:[#allocation1 + $0x8] sm:$0xff pattern:$0x73625140] }
  0xdb   :  { %2267 = vmatpush.msra.mxu0 %v888_v23  ;;  %2287 = vmatpush.msra.mxu1 %v920_v24  ;;  %v880_v43 = vld [vmem:[%s9365_s4 + $0x1050] sm:$0xff]  ;;  %v878_v58 = vld [vmem:[%s9365_s4 + $0x1040] sm:$0xff]  ;;  %v5549_v22 = vld.sshfl [vmem:[#allocation1 + $0x18] sm:$0xff pattern:$0x73625140] }
  0xdc   :  { %2307 = vmatpush.msra.mxu2 %v952_v25  ;;  %2327 = vmatpush.msra.mxu3 %v984_v26  ;;  %v912_v48 = vld [vmem:[%s9365_s4 + $0x1150] sm:$0xff]  ;;  %v910_v60 = vld [vmem:[%s9365_s4 + $0x1140] sm:$0xff] }
  0xdd   :  { %2268 = vmatpush.msra.mxu0 %v886_v27  ;;  %2288 = vmatpush.msra.mxu1 %v918_v28  ;;  %v944_v49 = vld [vmem:[%s9365_s4 + $0x1250] sm:$0xff]  ;;  %v942_v61 = vld [vmem:[%s9365_s4 + $0x1240] sm:$0xff] }
  0xde   :  { %2308 = vmatpush.msra.mxu2 %v950_v31  ;;  %2328 = vmatpush.msra.mxu3 %v982_v32  ;;  %v976_v57 = vld [vmem:[%s9365_s4 + $0x1350] sm:$0xff]  ;;  %v974_v62 = vld [vmem:[%s9365_s4 + $0x1340] sm:$0xff] }
  0xdf   :  { %2269 = vmatpush.msra.mxu0 %v884_v33  ;;  %2289 = vmatpush.msra.mxu1 %v916_v34  ;;  %v876_v63 = vld [vmem:[%s9365_s4 + $0x1030] sm:$0xff]  ;;  %v874_v3 = vld [vmem:[%s9365_s4 + $0x1020] sm:$0xff] }
  0xe0   :  { %2309 = vmatpush.msra.mxu2 %v948_v37  ;;  %2329 = vmatpush.msra.mxu3 %v980_v38  ;;  %v908_v0 = vld [vmem:[%s9365_s4 + $0x1130] sm:$0xff]  ;;  %v906_v4 = vld [vmem:[%s9365_s4 + $0x1120] sm:$0xff] }
  0xe1   :  { %2270 = vmatpush.msra.mxu0 %v882_v39  ;;  %2290 = vmatpush.msra.mxu1 %v914_v40  ;;  %v940_v1 = vld [vmem:[%s9365_s4 + $0x1230] sm:$0xff]  ;;  %v938_v5 = vld [vmem:[%s9365_s4 + $0x1220] sm:$0xff] }
  0xe2   :  { %2310 = vmatpush.msra.mxu2 %v946_v41  ;;  %2330 = vmatpush.msra.mxu3 %v978_v42  ;;  %v972_v2 = vld [vmem:[%s9365_s4 + $0x1330] sm:$0xff]  ;;  %v970_v6 = vld [vmem:[%s9365_s4 + $0x1320] sm:$0xff] }
  0xe3   :  { %2271 = vmatpush.msra.mxu0 %v880_v43  ;;  %2291 = vmatpush.msra.mxu1 %v912_v48  ;;  %v872_v7 = vld [vmem:[%s9365_s4 + $0x1010] sm:$0xff]  ;;  %v870_v11 = vld [vmem:[%s9365_s4 + $0x1000] sm:$0xff] }
  0xe4   :  { %2311 = vmatpush.msra.mxu2 %v944_v49  ;;  %2331 = vmatpush.msra.mxu3 %v976_v57  ;;  %v904_v8 = vld [vmem:[%s9365_s4 + $0x1110] sm:$0xff]  ;;  %v902_v12 = vld [vmem:[%s9365_s4 + $0x1100] sm:$0xff] }
  0xe5   :  { %2272 = vmatpush.msra.mxu0 %v878_v58  ;;  %2292 = vmatpush.msra.mxu1 %v910_v60  ;;  %v936_v9 = vld [vmem:[%s9365_s4 + $0x1210] sm:$0xff]  ;;  %v934_v13 = vld [vmem:[%s9365_s4 + $0x1200] sm:$0xff] }
  0xe6   :  { %2312 = vmatpush.msra.mxu2 %v942_v61  ;;  %2332 = vmatpush.msra.mxu3 %v974_v62  ;;  %v968_v10 = vld [vmem:[%s9365_s4 + $0x1310] sm:$0xff]  ;;  %v966_v44 = vld [vmem:[%s9365_s4 + $0x1300] sm:$0xff] }
  0xe7   :  { %2273 = vmatpush.msra.mxu0 %v876_v63  ;;  %2293 = vmatpush.msra.mxu1 %v908_v0  ;;  %v5529_v14 = vld.sshfl [vmem:[#allocation1] sm:$0xff pattern:$0x73625140]  ;;  %v5531_v15 = vld.sshfl [vmem:[#allocation1 + $0x10] sm:$0xff pattern:$0x73625140] }
  0xe8   :  { %2313 = vmatpush.msra.mxu2 %v940_v1  ;;  %2333 = vmatpush.msra.mxu3 %v972_v2  ;;  %v1028_v45 = vld [vmem:[%s9365_s4 + $0x14f0] sm:$0xff]  ;;  %v1026_v23 = vld [vmem:[%s9365_s4 + $0x14e0] sm:$0xff] }
  0xe9   :  { %2274 = vmatpush.msra.mxu0 %v874_v3  ;;  %2294 = vmatpush.msra.mxu1 %v906_v4  ;;  %v1060_v16 = vld [vmem:[%s9365_s4 + $0x15f0] sm:$0xff]  ;;  %v1058_v24 = vld [vmem:[%s9365_s4 + $0x15e0] sm:$0xff] }
  0xea   :  { %2314 = vmatpush.msra.mxu2 %v938_v5  ;;  %2334 = vmatpush.msra.mxu3 %v970_v6  ;;  %v1092_v46 = vld [vmem:[%s9365_s4 + $0x16f0] sm:$0xff]  ;;  %v1090_v25 = vld [vmem:[%s9365_s4 + $0x16e0] sm:$0xff] }
  0xeb   :  { %2275 = vmatpush.msra.mxu0 %v872_v7  ;;  %2295 = vmatpush.msra.mxu1 %v904_v8  ;;  %v1124_v47 = vld [vmem:[%s9365_s4 + $0x17f0] sm:$0xff]  ;;  %v1122_v26 = vld [vmem:[%s9365_s4 + $0x17e0] sm:$0xff] }
  0xec   :  { %2315 = vmatpush.msra.mxu2 %v936_v9  ;;  %2335 = vmatpush.msra.mxu3 %v968_v10  ;;  %v1024_v27 = vld [vmem:[%s9365_s4 + $0x14d0] sm:$0xff]  ;;  %v1022_v33 = vld [vmem:[%s9365_s4 + $0x14c0] sm:$0xff] }
  0xed   :  { %2276 = vmatpush.msra.mxu0 %v870_v11  ;;  %2296 = vmatpush.msra.mxu1 %v902_v12  ;;  %v1056_v28 = vld [vmem:[%s9365_s4 + $0x15d0] sm:$0xff]  ;;  %v1054_v34 = vld [vmem:[%s9365_s4 + $0x15c0] sm:$0xff] }
  0xee   :  { %2316 = vmatpush.msra.mxu2 %v934_v13  ;;  %2336 = vmatpush.msra.mxu3 %v966_v44  ;;  %v1088_v31 = vld [vmem:[%s9365_s4 + $0x16d0] sm:$0xff]  ;;  %v1086_v37 = vld [vmem:[%s9365_s4 + $0x16c0] sm:$0xff] }
  0xef   :  { %2277 = vmatmul.f32.vlgmr.msra.gmra.mxu0 %v5529_v14  ;;  %2317 = vmatmul.f32.vlgmr.msra.gmra.mxu2 %v5531_v15  ;;  %v1120_v32 = vld [vmem:[%s9365_s4 + $0x17d0] sm:$0xff]  ;;  %v1118_v38 = vld [vmem:[%s9365_s4 + $0x17c0] sm:$0xff] }
  0xf0   :  { %2341 = vmatpush.msrb.mxu0 %v1028_v45  ;;  %2361 = vmatpush.msrb.mxu1 %v1060_v16  ;;  %v1020_v39 = vld [vmem:[%s9365_s4 + $0x14b0] sm:$0xff]  ;;  %v1018_v43 = vld [vmem:[%s9365_s4 + $0x14a0] sm:$0xff] }
  0xf1   :  { %2381 = vmatpush.msrb.mxu2 %v1092_v46  ;;  %2401 = vmatpush.msrb.mxu3 %v1124_v47  ;;  %v1052_v40 = vld [vmem:[%s9365_s4 + $0x15b0] sm:$0xff]  ;;  %v1050_v48 = vld [vmem:[%s9365_s4 + $0x15a0] sm:$0xff] }
  0xf2   :  { %2297 = vmatmul.f32.vlgmr.msra.gmra.mxu1 %v5547_v21  ;;  %2337 = vmatmul.f32.vlgmr.msra.gmra.mxu3 %v5549_v22  ;;  %v1084_v41 = vld [vmem:[%s9365_s4 + $0x16b0] sm:$0xff]  ;;  %v1082_v49 = vld [vmem:[%s9365_s4 + $0x16a0] sm:$0xff] }
  0xf3   :  { %2342 = vmatpush.msrb.mxu0 %v1026_v23  ;;  %2362 = vmatpush.msrb.mxu1 %v1058_v24  ;;  %v1116_v42 = vld [vmem:[%s9365_s4 + $0x17b0] sm:$0xff]  ;;  %v1114_v57 = vld [vmem:[%s9365_s4 + $0x17a0] sm:$0xff] }
  0xf4   :  { %2382 = vmatpush.msrb.mxu2 %v1090_v25  ;;  %2402 = vmatpush.msrb.mxu3 %v1122_v26  ;;  %v1016_v58 = vld [vmem:[%s9365_s4 + $0x1490] sm:$0xff]  ;;  %v1014_v63 = vld [vmem:[%s9365_s4 + $0x1480] sm:$0xff] }
  0xf5   :  { %2343 = vmatpush.msrb.mxu0 %v1024_v27  ;;  %2363 = vmatpush.msrb.mxu1 %v1056_v28  ;;  %v1048_v60 = vld [vmem:[%s9365_s4 + $0x1590] sm:$0xff]  ;;  %v1046_v0 = vld [vmem:[%s9365_s4 + $0x1580] sm:$0xff] }
  0xf6   :  { %2383 = vmatpush.msrb.mxu2 %v1088_v31  ;;  %2403 = vmatpush.msrb.mxu3 %v1120_v32  ;;  %v1080_v61 = vld [vmem:[%s9365_s4 + $0x1690] sm:$0xff]  ;;  %v1078_v1 = vld [vmem:[%s9365_s4 + $0x1680] sm:$0xff] }
  0xf7   :  { %2344 = vmatpush.msrb.mxu0 %v1022_v33  ;;  %2364 = vmatpush.msrb.mxu1 %v1054_v34  ;;  %v1112_v62 = vld [vmem:[%s9365_s4 + $0x1790] sm:$0xff]  ;;  %v1110_v2 = vld [vmem:[%s9365_s4 + $0x1780] sm:$0xff] }
  0xf8   :  { %2384 = vmatpush.msrb.mxu2 %v1086_v37  ;;  %2404 = vmatpush.msrb.mxu3 %v1118_v38  ;;  %v1012_v3 = vld [vmem:[%s9365_s4 + $0x1470] sm:$0xff]  ;;  %v1010_v7 = vld [vmem:[%s9365_s4 + $0x1460] sm:$0xff] }
  0xf9   :  { %2345 = vmatpush.msrb.mxu0 %v1020_v39  ;;  %2365 = vmatpush.msrb.mxu1 %v1052_v40  ;;  %v1044_v4 = vld [vmem:[%s9365_s4 + $0x1570] sm:$0xff]  ;;  %v1042_v8 = vld [vmem:[%s9365_s4 + $0x1560] sm:$0xff] }
  0xfa   :  { %2385 = vmatpush.msrb.mxu2 %v1084_v41  ;;  %2405 = vmatpush.msrb.mxu3 %v1116_v42  ;;  %v1076_v5 = vld [vmem:[%s9365_s4 + $0x1670] sm:$0xff]  ;;  %v1074_v9 = vld [vmem:[%s9365_s4 + $0x1660] sm:$0xff] }
  0xfb   :  { %2346 = vmatpush.msrb.mxu0 %v1018_v43  ;;  %2366 = vmatpush.msrb.mxu1 %v1050_v48  ;;  %v1108_v6 = vld [vmem:[%s9365_s4 + $0x1770] sm:$0xff]  ;;  %v1106_v10 = vld [vmem:[%s9365_s4 + $0x1760] sm:$0xff] }
  0xfc   :  { %2386 = vmatpush.msrb.mxu2 %v1082_v49  ;;  %2406 = vmatpush.msrb.mxu3 %v1114_v57  ;;  %v1008_v11 = vld [vmem:[%s9365_s4 + $0x1450] sm:$0xff]  ;;  %v1006_v45 = vld [vmem:[%s9365_s4 + $0x1440] sm:$0xff] }
  0xfd   :  { %2347 = vmatpush.msrb.mxu0 %v1016_v58  ;;  %2367 = vmatpush.msrb.mxu1 %v1048_v60  ;;  %v1040_v12 = vld [vmem:[%s9365_s4 + $0x1550] sm:$0xff]  ;;  %v1038_v16 = vld [vmem:[%s9365_s4 + $0x1540] sm:$0xff] }
  0xfe   :  { %2387 = vmatpush.msrb.mxu2 %v1080_v61  ;;  %2407 = vmatpush.msrb.mxu3 %v1112_v62  ;;  %v1072_v13 = vld [vmem:[%s9365_s4 + $0x1650] sm:$0xff]  ;;  %v1070_v46 = vld [vmem:[%s9365_s4 + $0x1640] sm:$0xff]  ;;  %v5754_v62 = vld.sshfl [vmem:[#allocation1 + $0x28] sm:$0xff pattern:$0x73625140] }
  0xff   :  { %2348 = vmatpush.msrb.mxu0 %v1014_v63  ;;  %2368 = vmatpush.msrb.mxu1 %v1046_v0  ;;  %v1104_v44 = vld [vmem:[%s9365_s4 + $0x1750] sm:$0xff]  ;;  %v1102_v47 = vld [vmem:[%s9365_s4 + $0x1740] sm:$0xff]  ;;  %v5756_v63 = vld.sshfl [vmem:[#allocation1 + $0x38] sm:$0xff pattern:$0x73625140] }
 0x100   :  { %2388 = vmatpush.msrb.mxu2 %v1078_v1  ;;  %2408 = vmatpush.msrb.mxu3 %v1110_v2  ;;  %v1004_v23 = vld [vmem:[%s9365_s4 + $0x1430] sm:$0xff]  ;;  %v1002_v27 = vld [vmem:[%s9365_s4 + $0x1420] sm:$0xff] }
 0x101   :  { %2349 = vmatpush.msrb.mxu0 %v1012_v3  ;;  %2369 = vmatpush.msrb.mxu1 %v1044_v4  ;;  %v1036_v24 = vld [vmem:[%s9365_s4 + $0x1530] sm:$0xff]  ;;  %v1034_v28 = vld [vmem:[%s9365_s4 + $0x1520] sm:$0xff] }
 0x102   :  { %2389 = vmatpush.msrb.mxu2 %v1076_v5  ;;  %2409 = vmatpush.msrb.mxu3 %v1108_v6  ;;  %v1068_v25 = vld [vmem:[%s9365_s4 + $0x1630] sm:$0xff]  ;;  %v1066_v31 = vld [vmem:[%s9365_s4 + $0x1620] sm:$0xff] }
 0x103   :  { %2350 = vmatpush.msrb.mxu0 %v1010_v7  ;;  %2370 = vmatpush.msrb.mxu1 %v1042_v8  ;;  %v1100_v26 = vld [vmem:[%s9365_s4 + $0x1730] sm:$0xff]  ;;  %v1098_v32 = vld [vmem:[%s9365_s4 + $0x1720] sm:$0xff] }
 0x104   :  { %2390 = vmatpush.msrb.mxu2 %v1074_v9  ;;  %2410 = vmatpush.msrb.mxu3 %v1106_v10  ;;  %v1000_v33 = vld [vmem:[%s9365_s4 + $0x1410] sm:$0xff]  ;;  %v998_v40 = vld [vmem:[%s9365_s4 + $0x1400] sm:$0xff] }
 0x105   :  { %2351 = vmatpush.msrb.mxu0 %v1008_v11  ;;  %2371 = vmatpush.msrb.mxu1 %v1040_v12  ;;  %v1032_v34 = vld [vmem:[%s9365_s4 + $0x1510] sm:$0xff]  ;;  %v1030_v41 = vld [vmem:[%s9365_s4 + $0x1500] sm:$0xff] }
 0x106   :  { %2391 = vmatpush.msrb.mxu2 %v1072_v13  ;;  %2411 = vmatpush.msrb.mxu3 %v1104_v44  ;;  %v352_v37 = vld [vmem:[%s9362_s1 + $0x30] sm:$0xff]  ;;  %v1062_v42 = vld [vmem:[%s9365_s4 + $0x1600] sm:$0xff] }
 0x107   :  { %2352 = vmatpush.msrb.mxu0 %v1006_v45  ;;  %2372 = vmatpush.msrb.mxu1 %v1038_v16  ;;  %v1064_v38 = vld [vmem:[%s9365_s4 + $0x1610] sm:$0xff]  ;;  %1865 = vst [vmem:[#allocation1] ss:$4 sm:$0xff] %v352_v37  ;;  %v1094_v43 = vld [vmem:[%s9365_s4 + $0x1700] sm:$0xff] }
 0x108   :  { %2392 = vmatpush.msrb.mxu2 %v1070_v46  ;;  %2412 = vmatpush.msrb.mxu3 %v1102_v47  ;;  %v1096_v39 = vld [vmem:[%s9365_s4 + $0x1710] sm:$0xff]  ;;  %v5736_v48 = vld.sshfl [vmem:[#allocation1 + $0x20] sm:$0xff pattern:$0x73625140] }
 0x109   :  { %2353 = vmatpush.msrb.mxu0 %v1004_v23  ;;  %2373 = vmatpush.msrb.mxu1 %v1036_v24  ;;  %v5738_v49 = vld.sshfl [vmem:[#allocation1 + $0x30] sm:$0xff pattern:$0x73625140]  ;;  %v1154_v0 = vld [vmem:[%s9365_s4 + $0x18e0] sm:$0xff] }
 0x10a   :  { %2393 = vmatpush.msrb.mxu2 %v1068_v25  ;;  %2413 = vmatpush.msrb.mxu3 %v1100_v26  ;;  %v1156_v57 = vld [vmem:[%s9365_s4 + $0x18f0] sm:$0xff]  ;;  %v1186_v1 = vld [vmem:[%s9365_s4 + $0x19e0] sm:$0xff] }
 0x10b   :  { %2354 = vmatpush.msrb.mxu0 %v1002_v27  ;;  %2374 = vmatpush.msrb.mxu1 %v1034_v28  ;;  %v1188_v58 = vld [vmem:[%s9365_s4 + $0x19f0] sm:$0xff]  ;;  %v1218_v2 = vld [vmem:[%s9365_s4 + $0x1ae0] sm:$0xff] }
 0x10c   :  { %2394 = vmatpush.msrb.mxu2 %v1066_v31  ;;  %2414 = vmatpush.msrb.mxu3 %v1098_v32  ;;  %v1220_v60 = vld [vmem:[%s9365_s4 + $0x1af0] sm:$0xff]  ;;  %v1250_v3 = vld [vmem:[%s9365_s4 + $0x1be0] sm:$0xff] }
 0x10d   :  { %2355 = vmatpush.msrb.mxu0 %v1000_v33  ;;  %2375 = vmatpush.msrb.mxu1 %v1032_v34  ;;  %v1252_v61 = vld [vmem:[%s9365_s4 + $0x1bf0] sm:$0xff]  ;;  %v1150_v8 = vld [vmem:[%s9365_s4 + $0x18c0] sm:$0xff] }
 0x10e   :  { %2395 = vmatpush.msrb.mxu2 %v1064_v38  ;;  %2415 = vmatpush.msrb.mxu3 %v1096_v39  ;;  %v1152_v4 = vld [vmem:[%s9365_s4 + $0x18d0] sm:$0xff]  ;;  %v1182_v9 = vld [vmem:[%s9365_s4 + $0x19c0] sm:$0xff] }
 0x10f   :  { %2356 = vmatpush.msrb.mxu0 %v998_v40  ;;  %2376 = vmatpush.msrb.mxu1 %v1030_v41  ;;  %v1184_v5 = vld [vmem:[%s9365_s4 + $0x19d0] sm:$0xff]  ;;  %v1214_v10 = vld [vmem:[%s9365_s4 + $0x1ac0] sm:$0xff] }
 0x110   :  { %2396 = vmatpush.msrb.mxu2 %v1062_v42  ;;  %2416 = vmatpush.msrb.mxu3 %v1094_v43  ;;  %v1216_v6 = vld [vmem:[%s9365_s4 + $0x1ad0] sm:$0xff]  ;;  %v1246_v11 = vld [vmem:[%s9365_s4 + $0x1bc0] sm:$0xff] }
 0x111   :  { %2357 = vmatmul.f32.vlgmr.msrb.gmra.mxu0 %v5736_v48  ;;  %2397 = vmatmul.f32.vlgmr.msrb.gmra.mxu2 %v5738_v49  ;;  %v1248_v7 = vld [vmem:[%s9365_s4 + $0x1bd0] sm:$0xff]  ;;  %v1146_v16 = vld [vmem:[%s9365_s4 + $0x18a0] sm:$0xff] }
 0x112   :  { %2421 = vmatpush.msra.mxu0 %v1156_v57  ;;  %2441 = vmatpush.msra.mxu1 %v1188_v58  ;;  %v1148_v12 = vld [vmem:[%s9365_s4 + $0x18b0] sm:$0xff]  ;;  %v1178_v46 = vld [vmem:[%s9365_s4 + $0x19a0] sm:$0xff] }
 0x113   :  { %2461 = vmatpush.msra.mxu2 %v1220_v60  ;;  %2481 = vmatpush.msra.mxu3 %v1252_v61  ;;  %v1180_v13 = vld [vmem:[%s9365_s4 + $0x19b0] sm:$0xff]  ;;  %v1210_v47 = vld [vmem:[%s9365_s4 + $0x1aa0] sm:$0xff] }
 0x114   :  { %2377 = vmatmul.f32.vlgmr.msrb.gmra.mxu1 %v5754_v62  ;;  %2417 = vmatmul.f32.vlgmr.msrb.gmra.mxu3 %v5756_v63  ;;  %v1212_v44 = vld [vmem:[%s9365_s4 + $0x1ab0] sm:$0xff]  ;;  %v1242_v23 = vld [vmem:[%s9365_s4 + $0x1ba0] sm:$0xff] }
 0x115   :  { %2422 = vmatpush.msra.mxu0 %v1154_v0  ;;  %2442 = vmatpush.msra.mxu1 %v1186_v1  ;;  %v1244_v45 = vld [vmem:[%s9365_s4 + $0x1bb0] sm:$0xff]  ;;  %v1142_v28 = vld [vmem:[%s9365_s4 + $0x1880] sm:$0xff] }
 0x116   :  { %2462 = vmatpush.msra.mxu2 %v1218_v2  ;;  %2482 = vmatpush.msra.mxu3 %v1250_v3  ;;  %v1144_v24 = vld [vmem:[%s9365_s4 + $0x1890] sm:$0xff]  ;;  %v1174_v31 = vld [vmem:[%s9365_s4 + $0x1980] sm:$0xff] }
 0x117   :  { %2423 = vmatpush.msra.mxu0 %v1152_v4  ;;  %2443 = vmatpush.msra.mxu1 %v1184_v5  ;;  %v1176_v25 = vld [vmem:[%s9365_s4 + $0x1990] sm:$0xff]  ;;  %v1206_v32 = vld [vmem:[%s9365_s4 + $0x1a80] sm:$0xff] }
 0x118   :  { %2463 = vmatpush.msra.mxu2 %v1216_v6  ;;  %2483 = vmatpush.msra.mxu3 %v1248_v7  ;;  %v1208_v26 = vld [vmem:[%s9365_s4 + $0x1a90] sm:$0xff]  ;;  %v1238_v33 = vld [vmem:[%s9365_s4 + $0x1b80] sm:$0xff] }
 0x119   :  { %2424 = vmatpush.msra.mxu0 %v1150_v8  ;;  %2444 = vmatpush.msra.mxu1 %v1182_v9  ;;  %v1240_v27 = vld [vmem:[%s9365_s4 + $0x1b90] sm:$0xff]  ;;  %v1138_v40 = vld [vmem:[%s9365_s4 + $0x1860] sm:$0xff] }
 0x11a   :  { %2464 = vmatpush.msra.mxu2 %v1214_v10  ;;  %2484 = vmatpush.msra.mxu3 %v1246_v11  ;;  %v1140_v34 = vld [vmem:[%s9365_s4 + $0x1870] sm:$0xff]  ;;  %v1170_v41 = vld [vmem:[%s9365_s4 + $0x1960] sm:$0xff] }
 0x11b   :  { %2425 = vmatpush.msra.mxu0 %v1148_v12  ;;  %2445 = vmatpush.msra.mxu1 %v1180_v13  ;;  %v1172_v37 = vld [vmem:[%s9365_s4 + $0x1970] sm:$0xff]  ;;  %v1202_v42 = vld [vmem:[%s9365_s4 + $0x1a60] sm:$0xff] }
 0x11c   :  { %2465 = vmatpush.msra.mxu2 %v1212_v44  ;;  %2485 = vmatpush.msra.mxu3 %v1244_v45  ;;  %v1204_v38 = vld [vmem:[%s9365_s4 + $0x1a70] sm:$0xff]  ;;  %v1234_v43 = vld [vmem:[%s9365_s4 + $0x1b60] sm:$0xff]  ;;  %v353_v44 = vld [vmem:[%s9362_s1 + $0x38] sm:$0xff] }
 0x11d   :  { %2426 = vmatpush.msra.mxu0 %v1146_v16  ;;  %2446 = vmatpush.msra.mxu1 %v1178_v46  ;;  %v1236_v39 = vld [vmem:[%s9365_s4 + $0x1b70] sm:$0xff]  ;;  %v1134_v0 = vld [vmem:[%s9365_s4 + $0x1840] sm:$0xff]  ;;  %1866 = vst [vmem:[#allocation1 + $0x20] ss:$4 sm:$0xff] %v353_v44 }
 0x11e   :  { %2466 = vmatpush.msra.mxu2 %v1210_v47  ;;  %2486 = vmatpush.msra.mxu3 %v1242_v23  ;;  %v1136_v57 = vld [vmem:[%s9365_s4 + $0x1850] sm:$0xff]  ;;  %v1166_v1 = vld [vmem:[%s9365_s4 + $0x1940] sm:$0xff] }
 0x11f   :  { %2427 = vmatpush.msra.mxu0 %v1144_v24  ;;  %2447 = vmatpush.msra.mxu1 %v1176_v25  ;;  %v1168_v58 = vld [vmem:[%s9365_s4 + $0x1950] sm:$0xff]  ;;  %v1198_v2 = vld [vmem:[%s9365_s4 + $0x1a40] sm:$0xff] }
 0x120   :  { %2467 = vmatpush.msra.mxu2 %v1208_v26  ;;  %2487 = vmatpush.msra.mxu3 %v1240_v27  ;;  %v1200_v60 = vld [vmem:[%s9365_s4 + $0x1a50] sm:$0xff]  ;;  %v1230_v3 = vld [vmem:[%s9365_s4 + $0x1b40] sm:$0xff] }
 0x121   :  { %2428 = vmatpush.msra.mxu0 %v1142_v28  ;;  %2448 = vmatpush.msra.mxu1 %v1174_v31  ;;  %v1232_v61 = vld [vmem:[%s9365_s4 + $0x1b50] sm:$0xff]  ;;  %v1130_v8 = vld [vmem:[%s9365_s4 + $0x1820] sm:$0xff] }
 0x122   :  { %2468 = vmatpush.msra.mxu2 %v1206_v32  ;;  %2488 = vmatpush.msra.mxu3 %v1238_v33  ;;  %v1132_v4 = vld [vmem:[%s9365_s4 + $0x1830] sm:$0xff]  ;;  %v1162_v9 = vld [vmem:[%s9365_s4 + $0x1920] sm:$0xff]  ;;  %v5961_v33 = vld.sshfl [vmem:[#allocation1 + $0x8] sm:$0xff pattern:$0x73625140] }
 0x123   :  { %2429 = vmatpush.msra.mxu0 %v1140_v34  ;;  %2449 = vmatpush.msra.mxu1 %v1172_v37  ;;  %v1164_v5 = vld [vmem:[%s9365_s4 + $0x1930] sm:$0xff]  ;;  %v1194_v10 = vld [vmem:[%s9365_s4 + $0x1a20] sm:$0xff]  ;;  %v5963_v34 = vld.sshfl [vmem:[#allocation1 + $0x18] sm:$0xff pattern:$0x73625140] }
 0x124   :  { %2469 = vmatpush.msra.mxu2 %v1204_v38  ;;  %2489 = vmatpush.msra.mxu3 %v1236_v39  ;;  %v1196_v6 = vld [vmem:[%s9365_s4 + $0x1a30] sm:$0xff]  ;;  %v1226_v11 = vld [vmem:[%s9365_s4 + $0x1b20] sm:$0xff] }
 0x125   :  { %2430 = vmatpush.msra.mxu0 %v1138_v40  ;;  %2450 = vmatpush.msra.mxu1 %v1170_v41  ;;  %v1228_v7 = vld [vmem:[%s9365_s4 + $0x1b30] sm:$0xff]  ;;  %v1126_v46 = vld [vmem:[%s9365_s4 + $0x1800] sm:$0xff] }
 0x126   :  { %2470 = vmatpush.msra.mxu2 %v1202_v42  ;;  %2490 = vmatpush.msra.mxu3 %v1234_v43  ;;  %v1128_v12 = vld [vmem:[%s9365_s4 + $0x1810] sm:$0xff]  ;;  %v1158_v47 = vld [vmem:[%s9365_s4 + $0x1900] sm:$0xff] }
 0x127   :  { %2431 = vmatpush.msra.mxu0 %v1136_v57  ;;  %2451 = vmatpush.msra.mxu1 %v1168_v58  ;;  %v1160_v13 = vld [vmem:[%s9365_s4 + $0x1910] sm:$0xff]  ;;  %v1190_v23 = vld [vmem:[%s9365_s4 + $0x1a00] sm:$0xff] }
 0x128   :  { %2471 = vmatpush.msra.mxu2 %v1200_v60  ;;  %2491 = vmatpush.msra.mxu3 %v1232_v61  ;;  %v1192_v45 = vld [vmem:[%s9365_s4 + $0x1a10] sm:$0xff]  ;;  %v1222_v24 = vld [vmem:[%s9365_s4 + $0x1b00] sm:$0xff] }
 0x129   :  { %2432 = vmatpush.msra.mxu0 %v1134_v0  ;;  %2452 = vmatpush.msra.mxu1 %v1166_v1  ;;  %v1224_v16 = vld [vmem:[%s9365_s4 + $0x1b10] sm:$0xff]  ;;  %v5943_v25 = vld.sshfl [vmem:[#allocation1] sm:$0xff pattern:$0x73625140] }
 0x12a   :  { %2472 = vmatpush.msra.mxu2 %v1198_v2  ;;  %2492 = vmatpush.msra.mxu3 %v1230_v3  ;;  %v5945_v26 = vld.sshfl [vmem:[#allocation1 + $0x10] sm:$0xff pattern:$0x73625140]  ;;  %v1282_v37 = vld [vmem:[%s9365_s4 + $0x1ce0] sm:$0xff] }
 0x12b   :  { %2433 = vmatpush.msra.mxu0 %v1132_v4  ;;  %2453 = vmatpush.msra.mxu1 %v1164_v5  ;;  %v1284_v27 = vld [vmem:[%s9365_s4 + $0x1cf0] sm:$0xff]  ;;  %v1314_v38 = vld [vmem:[%s9365_s4 + $0x1de0] sm:$0xff] }
 0x12c   :  { %2473 = vmatpush.msra.mxu2 %v1196_v6  ;;  %2493 = vmatpush.msra.mxu3 %v1228_v7  ;;  %v1316_v28 = vld [vmem:[%s9365_s4 + $0x1df0] sm:$0xff]  ;;  %v1346_v39 = vld [vmem:[%s9365_s4 + $0x1ee0] sm:$0xff] }
 0x12d   :  { %2434 = vmatpush.msra.mxu0 %v1130_v8  ;;  %2454 = vmatpush.msra.mxu1 %v1162_v9  ;;  %v1348_v31 = vld [vmem:[%s9365_s4 + $0x1ef0] sm:$0xff]  ;;  %v1378_v40 = vld [vmem:[%s9365_s4 + $0x1fe0] sm:$0xff] }
 0x12e   :  { %2474 = vmatpush.msra.mxu2 %v1194_v10  ;;  %2494 = vmatpush.msra.mxu3 %v1226_v11  ;;  %v1380_v32 = vld [vmem:[%s9365_s4 + $0x1ff0] sm:$0xff]  ;;  %v1278_v58 = vld [vmem:[%s9365_s4 + $0x1cc0] sm:$0xff] }
 0x12f   :  { %2435 = vmatpush.msra.mxu0 %v1128_v12  ;;  %2455 = vmatpush.msra.mxu1 %v1160_v13  ;;  %v1280_v41 = vld [vmem:[%s9365_s4 + $0x1cd0] sm:$0xff]  ;;  %v1310_v60 = vld [vmem:[%s9365_s4 + $0x1dc0] sm:$0xff] }
 0x130   :  { %2475 = vmatpush.msra.mxu2 %v1192_v45  ;;  %2495 = vmatpush.msra.mxu3 %v1224_v16  ;;  %v1312_v42 = vld [vmem:[%s9365_s4 + $0x1dd0] sm:$0xff]  ;;  %v1342_v61 = vld [vmem:[%s9365_s4 + $0x1ec0] sm:$0xff] }
 0x131   :  { %2436 = vmatpush.msra.mxu0 %v1126_v46  ;;  %2456 = vmatpush.msra.mxu1 %v1158_v47  ;;  %v1344_v43 = vld [vmem:[%s9365_s4 + $0x1ed0] sm:$0xff]  ;;  %v1374_v0 = vld [vmem:[%s9365_s4 + $0x1fc0] sm:$0xff] }
 0x132   :  { %2476 = vmatpush.msra.mxu2 %v1190_v23  ;;  %2496 = vmatpush.msra.mxu3 %v1222_v24  ;;  %v1376_v57 = vld [vmem:[%s9365_s4 + $0x1fd0] sm:$0xff]  ;;  %v1274_v5 = vld [vmem:[%s9365_s4 + $0x1ca0] sm:$0xff] }
 0x133   :  { %2437 = vmatmul.f32.vlgmr.msra.gmra.mxu0 %v5943_v25  ;;  %2477 = vmatmul.f32.vlgmr.msra.gmra.mxu2 %v5945_v26  ;;  %v1276_v1 = vld [vmem:[%s9365_s4 + $0x1cb0] sm:$0xff]  ;;  %v1306_v6 = vld [vmem:[%s9365_s4 + $0x1da0] sm:$0xff] }
 0x134   :  { %2501 = vmatpush.msrb.mxu0 %v1284_v27  ;;  %2521 = vmatpush.msrb.mxu1 %v1316_v28  ;;  %v1308_v2 = vld [vmem:[%s9365_s4 + $0x1db0] sm:$0xff]  ;;  %v1338_v7 = vld [vmem:[%s9365_s4 + $0x1ea0] sm:$0xff] }
 0x135   :  { %2541 = vmatpush.msrb.mxu2 %v1348_v31  ;;  %2561 = vmatpush.msrb.mxu3 %v1380_v32  ;;  %v1340_v3 = vld [vmem:[%s9365_s4 + $0x1eb0] sm:$0xff]  ;;  %v1370_v8 = vld [vmem:[%s9365_s4 + $0x1fa0] sm:$0xff] }
 0x136   :  { %2457 = vmatmul.f32.vlgmr.msra.gmra.mxu1 %v5961_v33  ;;  %2497 = vmatmul.f32.vlgmr.msra.gmra.mxu3 %v5963_v34  ;;  %v1372_v4 = vld [vmem:[%s9365_s4 + $0x1fb0] sm:$0xff]  ;;  %v1270_v13 = vld [vmem:[%s9365_s4 + $0x1c80] sm:$0xff] }
 0x137   :  { %2502 = vmatpush.msrb.mxu0 %v1282_v37  ;;  %2522 = vmatpush.msrb.mxu1 %v1314_v38  ;;  %v1272_v9 = vld [vmem:[%s9365_s4 + $0x1c90] sm:$0xff]  ;;  %v1302_v44 = vld [vmem:[%s9365_s4 + $0x1d80] sm:$0xff] }
 0x138   :  { %2542 = vmatpush.msrb.mxu2 %v1346_v39  ;;  %2562 = vmatpush.msrb.mxu3 %v1378_v40  ;;  %v1304_v10 = vld [vmem:[%s9365_s4 + $0x1d90] sm:$0xff]  ;;  %v1334_v45 = vld [vmem:[%s9365_s4 + $0x1e80] sm:$0xff] }
 0x139   :  { %2503 = vmatpush.msrb.mxu0 %v1280_v41  ;;  %2523 = vmatpush.msrb.mxu1 %v1312_v42  ;;  %v1336_v11 = vld [vmem:[%s9365_s4 + $0x1e90] sm:$0xff]  ;;  %v1366_v16 = vld [vmem:[%s9365_s4 + $0x1f80] sm:$0xff] }
 0x13a   :  { %2543 = vmatpush.msrb.mxu2 %v1344_v43  ;;  %2563 = vmatpush.msrb.mxu3 %v1376_v57  ;;  %v1368_v12 = vld [vmem:[%s9365_s4 + $0x1f90] sm:$0xff]  ;;  %v1266_v27 = vld [vmem:[%s9365_s4 + $0x1c60] sm:$0xff] }
 0x13b   :  { %2504 = vmatpush.msrb.mxu0 %v1278_v58  ;;  %2524 = vmatpush.msrb.mxu1 %v1310_v60  ;;  %v1268_v46 = vld [vmem:[%s9365_s4 + $0x1c70] sm:$0xff]  ;;  %v1298_v28 = vld [vmem:[%s9365_s4 + $0x1d60] sm:$0xff] }
 0x13c   :  { %2544 = vmatpush.msrb.mxu2 %v1342_v61  ;;  %2564 = vmatpush.msrb.mxu3 %v1374_v0  ;;  %v1300_v47 = vld [vmem:[%s9365_s4 + $0x1d70] sm:$0xff]  ;;  %v1330_v31 = vld [vmem:[%s9365_s4 + $0x1e60] sm:$0xff] }
 0x13d   :  { %2505 = vmatpush.msrb.mxu0 %v1276_v1  ;;  %2525 = vmatpush.msrb.mxu1 %v1308_v2  ;;  %v1332_v23 = vld [vmem:[%s9365_s4 + $0x1e70] sm:$0xff]  ;;  %v1362_v32 = vld [vmem:[%s9365_s4 + $0x1f60] sm:$0xff] }
 0x13e   :  { %2545 = vmatpush.msrb.mxu2 %v1340_v3  ;;  %2565 = vmatpush.msrb.mxu3 %v1372_v4  ;;  %v1364_v24 = vld [vmem:[%s9365_s4 + $0x1f70] sm:$0xff]  ;;  %v1262_v41 = vld [vmem:[%s9365_s4 + $0x1c40] sm:$0xff] }
 0x13f   :  { %2506 = vmatpush.msrb.mxu0 %v1274_v5  ;;  %2526 = vmatpush.msrb.mxu1 %v1306_v6  ;;  %v1264_v37 = vld [vmem:[%s9365_s4 + $0x1c50] sm:$0xff]  ;;  %v1294_v42 = vld [vmem:[%s9365_s4 + $0x1d40] sm:$0xff] }
 0x140   :  { %2546 = vmatpush.msrb.mxu2 %v1338_v7  ;;  %2566 = vmatpush.msrb.mxu3 %v1370_v8  ;;  %v1296_v38 = vld [vmem:[%s9365_s4 + $0x1d50] sm:$0xff]  ;;  %v1326_v43 = vld [vmem:[%s9365_s4 + $0x1e40] sm:$0xff] }
 0x141   :  { %2507 = vmatpush.msrb.mxu0 %v1272_v9  ;;  %2527 = vmatpush.msrb.mxu1 %v1304_v10  ;;  %v1328_v39 = vld [vmem:[%s9365_s4 + $0x1e50] sm:$0xff]  ;;  %v1358_v57 = vld [vmem:[%s9365_s4 + $0x1f40] sm:$0xff] }
 0x142   :  { %2547 = vmatpush.msrb.mxu2 %v1336_v11  ;;  %2567 = vmatpush.msrb.mxu3 %v1368_v12  ;;  %v1360_v40 = vld [vmem:[%s9365_s4 + $0x1f50] sm:$0xff]  ;;  %v1258_v1 = vld [vmem:[%s9365_s4 + $0x1c20] sm:$0xff] }
 0x143   :  { %2508 = vmatpush.msrb.mxu0 %v1270_v13  ;;  %2528 = vmatpush.msrb.mxu1 %v1302_v44  ;;  %v1260_v58 = vld [vmem:[%s9365_s4 + $0x1c30] sm:$0xff]  ;;  %v1290_v2 = vld [vmem:[%s9365_s4 + $0x1d20] sm:$0xff] }
 0x144   :  { %2548 = vmatpush.msrb.mxu2 %v1334_v45  ;;  %2568 = vmatpush.msrb.mxu3 %v1366_v16  ;;  %v1292_v60 = vld [vmem:[%s9365_s4 + $0x1d30] sm:$0xff]  ;;  %v1322_v3 = vld [vmem:[%s9365_s4 + $0x1e20] sm:$0xff] }
 0x145   :  { %2509 = vmatpush.msrb.mxu0 %v1268_v46  ;;  %2529 = vmatpush.msrb.mxu1 %v1300_v47  ;;  %v1324_v61 = vld [vmem:[%s9365_s4 + $0x1e30] sm:$0xff]  ;;  %v1354_v4 = vld [vmem:[%s9365_s4 + $0x1f20] sm:$0xff] }
 0x146   :  { %2549 = vmatpush.msrb.mxu2 %v1332_v23  ;;  %2569 = vmatpush.msrb.mxu3 %v1364_v24  ;;  %v1356_v0 = vld [vmem:[%s9365_s4 + $0x1f30] sm:$0xff]  ;;  %v354_v7 = vld [vmem:[%s9362_s1 + $0x40] sm:$0xff]  ;;  %v6168_v24 = vld.sshfl [vmem:[#allocation1 + $0x28] sm:$0xff pattern:$0x73625140] }
 0x147   :  { %2510 = vmatpush.msrb.mxu0 %v1266_v27  ;;  %2530 = vmatpush.msrb.mxu1 %v1298_v28  ;;  %v1256_v5 = vld [vmem:[%s9365_s4 + $0x1c10] sm:$0xff]  ;;  %1875 = vst [vmem:[#allocation1] ss:$4 sm:$0xff] %v354_v7  ;;  %v1254_v10 = vld [vmem:[%s9365_s4 + $0x1c00] sm:$0xff] }
 0x148   :  { %2550 = vmatpush.msrb.mxu2 %v1330_v31  ;;  %2570 = vmatpush.msrb.mxu3 %v1362_v32  ;;  %v1288_v6 = vld [vmem:[%s9365_s4 + $0x1d10] sm:$0xff]  ;;  %v1286_v11 = vld [vmem:[%s9365_s4 + $0x1d00] sm:$0xff]  ;;  %v6170_v27 = vld.sshfl [vmem:[#allocation1 + $0x38] sm:$0xff pattern:$0x73625140] }
 0x149   :  { %2511 = vmatpush.msrb.mxu0 %v1264_v37  ;;  %2531 = vmatpush.msrb.mxu1 %v1296_v38  ;;  %v1320_v8 = vld [vmem:[%s9365_s4 + $0x1e10] sm:$0xff]  ;;  %v1318_v12 = vld [vmem:[%s9365_s4 + $0x1e00] sm:$0xff] }
 0x14a   :  { %2551 = vmatpush.msrb.mxu2 %v1328_v39  ;;  %2571 = vmatpush.msrb.mxu3 %v1360_v40  ;;  %v1352_v9 = vld [vmem:[%s9365_s4 + $0x1f10] sm:$0xff]  ;;  %v1350_v13 = vld [vmem:[%s9365_s4 + $0x1f00] sm:$0xff] }
 0x14b   :  { %2512 = vmatpush.msrb.mxu0 %v1262_v41  ;;  %2532 = vmatpush.msrb.mxu1 %v1294_v42  ;;  %v6150_v44 = vld.sshfl [vmem:[#allocation1 + $0x20] sm:$0xff pattern:$0x73625140]  ;;  %v6152_v45 = vld.sshfl [vmem:[#allocation1 + $0x30] sm:$0xff pattern:$0x73625140] }
 0x14c   :  { %2552 = vmatpush.msrb.mxu2 %v1326_v43  ;;  %2572 = vmatpush.msrb.mxu3 %v1358_v57  ;;  %v1412_v16 = vld [vmem:[%s9365_s4 + $0x20f0] sm:$0xff]  ;;  %v1410_v28 = vld [vmem:[%s9365_s4 + $0x20e0] sm:$0xff] }
 0x14d   :  { %2513 = vmatpush.msrb.mxu0 %v1260_v58  ;;  %2533 = vmatpush.msrb.mxu1 %v1292_v60  ;;  %v1444_v46 = vld [vmem:[%s9365_s4 + $0x21f0] sm:$0xff]  ;;  %v1442_v31 = vld [vmem:[%s9365_s4 + $0x21e0] sm:$0xff] }
 0x14e   :  { %2553 = vmatpush.msrb.mxu2 %v1324_v61  ;;  %2573 = vmatpush.msrb.mxu3 %v1356_v0  ;;  %v1476_v47 = vld [vmem:[%s9365_s4 + $0x22f0] sm:$0xff]  ;;  %v1474_v32 = vld [vmem:[%s9365_s4 + $0x22e0] sm:$0xff] }
 0x14f   :  { %2514 = vmatpush.msrb.mxu0 %v1258_v1  ;;  %2534 = vmatpush.msrb.mxu1 %v1290_v2  ;;  %v1508_v23 = vld [vmem:[%s9365_s4 + $0x23f0] sm:$0xff]  ;;  %v1506_v37 = vld [vmem:[%s9365_s4 + $0x23e0] sm:$0xff] }
 0x150   :  { %2554 = vmatpush.msrb.mxu2 %v1322_v3  ;;  %2574 = vmatpush.msrb.mxu3 %v1354_v4  ;;  %v1408_v38 = vld [vmem:[%s9365_s4 + $0x20d0] sm:$0xff]  ;;  %v1406_v42 = vld [vmem:[%s9365_s4 + $0x20c0] sm:$0xff] }
 0x151   :  { %2515 = vmatpush.msrb.mxu0 %v1256_v5  ;;  %2535 = vmatpush.msrb.mxu1 %v1288_v6  ;;  %v1440_v39 = vld [vmem:[%s9365_s4 + $0x21d0] sm:$0xff]  ;;  %v1438_v43 = vld [vmem:[%s9365_s4 + $0x21c0] sm:$0xff] }
 0x152   :  { %2555 = vmatpush.msrb.mxu2 %v1320_v8  ;;  %2575 = vmatpush.msrb.mxu3 %v1352_v9  ;;  %v1472_v40 = vld [vmem:[%s9365_s4 + $0x22d0] sm:$0xff]  ;;  %v1470_v57 = vld [vmem:[%s9365_s4 + $0x22c0] sm:$0xff] }
 0x153   :  { %2516 = vmatpush.msrb.mxu0 %v1254_v10  ;;  %2536 = vmatpush.msrb.mxu1 %v1286_v11  ;;  %v1504_v41 = vld [vmem:[%s9365_s4 + $0x23d0] sm:$0xff]  ;;  %v1502_v58 = vld [vmem:[%s9365_s4 + $0x23c0] sm:$0xff] }
 0x154   :  { %2556 = vmatpush.msrb.mxu2 %v1318_v12  ;;  %2576 = vmatpush.msrb.mxu3 %v1350_v13  ;;  %v1404_v60 = vld [vmem:[%s9365_s4 + $0x20b0] sm:$0xff]  ;;  %v1402_v2 = vld [vmem:[%s9365_s4 + $0x20a0] sm:$0xff] }
 0x155   :  { %2517 = vmatmul.f32.vlgmr.msrb.gmra.mxu0 %v6150_v44  ;;  %2557 = vmatmul.f32.vlgmr.msrb.gmra.mxu2 %v6152_v45  ;;  %v1436_v61 = vld [vmem:[%s9365_s4 + $0x21b0] sm:$0xff]  ;;  %v1434_v3 = vld [vmem:[%s9365_s4 + $0x21a0] sm:$0xff] }
 0x156   :  { %2581 = vmatpush.msra.mxu0 %v1412_v16  ;;  %2601 = vmatpush.msra.mxu1 %v1444_v46  ;;  %v1468_v0 = vld [vmem:[%s9365_s4 + $0x22b0] sm:$0xff]  ;;  %v1466_v4 = vld [vmem:[%s9365_s4 + $0x22a0] sm:$0xff] }
 0x157   :  { %2621 = vmatpush.msra.mxu2 %v1476_v47  ;;  %2641 = vmatpush.msra.mxu3 %v1508_v23  ;;  %v1500_v1 = vld [vmem:[%s9365_s4 + $0x23b0] sm:$0xff]  ;;  %v1498_v5 = vld [vmem:[%s9365_s4 + $0x23a0] sm:$0xff] }
 0x158   :  { %2537 = vmatmul.f32.vlgmr.msrb.gmra.mxu1 %v6168_v24  ;;  %2577 = vmatmul.f32.vlgmr.msrb.gmra.mxu3 %v6170_v27  ;;  %v1400_v6 = vld [vmem:[%s9365_s4 + $0x2090] sm:$0xff]  ;;  %v1398_v10 = vld [vmem:[%s9365_s4 + $0x2080] sm:$0xff] }
 0x159   :  { %2582 = vmatpush.msra.mxu0 %v1410_v28  ;;  %2602 = vmatpush.msra.mxu1 %v1442_v31  ;;  %v1432_v7 = vld [vmem:[%s9365_s4 + $0x2190] sm:$0xff]  ;;  %v1430_v11 = vld [vmem:[%s9365_s4 + $0x2180] sm:$0xff] }
 0x15a   :  { %2622 = vmatpush.msra.mxu2 %v1474_v32  ;;  %2642 = vmatpush.msra.mxu3 %v1506_v37  ;;  %v1464_v8 = vld [vmem:[%s9365_s4 + $0x2290] sm:$0xff]  ;;  %v1462_v12 = vld [vmem:[%s9365_s4 + $0x2280] sm:$0xff] }
 0x15b   :  { %2583 = vmatpush.msra.mxu0 %v1408_v38  ;;  %2603 = vmatpush.msra.mxu1 %v1440_v39  ;;  %v1496_v9 = vld [vmem:[%s9365_s4 + $0x2390] sm:$0xff]  ;;  %v1494_v13 = vld [vmem:[%s9365_s4 + $0x2380] sm:$0xff] }
 0x15c   :  { %2623 = vmatpush.msra.mxu2 %v1472_v40  ;;  %2643 = vmatpush.msra.mxu3 %v1504_v41  ;;  %v1396_v16 = vld [vmem:[%s9365_s4 + $0x2070] sm:$0xff]  ;;  %v1394_v28 = vld [vmem:[%s9365_s4 + $0x2060] sm:$0xff] }
 0x15d   :  { %2584 = vmatpush.msra.mxu0 %v1406_v42  ;;  %2604 = vmatpush.msra.mxu1 %v1438_v43  ;;  %v1428_v46 = vld [vmem:[%s9365_s4 + $0x2170] sm:$0xff]  ;;  %v1426_v31 = vld [vmem:[%s9365_s4 + $0x2160] sm:$0xff] }
 0x15e   :  { %2624 = vmatpush.msra.mxu2 %v1470_v57  ;;  %2644 = vmatpush.msra.mxu3 %v1502_v58  ;;  %v1460_v47 = vld [vmem:[%s9365_s4 + $0x2270] sm:$0xff]  ;;  %v1458_v32 = vld [vmem:[%s9365_s4 + $0x2260] sm:$0xff] }
 0x15f   :  { %2585 = vmatpush.msra.mxu0 %v1404_v60  ;;  %2605 = vmatpush.msra.mxu1 %v1436_v61  ;;  %v1492_v23 = vld [vmem:[%s9365_s4 + $0x2370] sm:$0xff]  ;;  %v1490_v37 = vld [vmem:[%s9365_s4 + $0x2360] sm:$0xff] }
 0x160   :  { %2625 = vmatpush.msra.mxu2 %v1468_v0  ;;  %2645 = vmatpush.msra.mxu3 %v1500_v1  ;;  %v1392_v38 = vld [vmem:[%s9365_s4 + $0x2050] sm:$0xff]  ;;  %v1390_v42 = vld [vmem:[%s9365_s4 + $0x2040] sm:$0xff] }
 0x161   :  { %2586 = vmatpush.msra.mxu0 %v1402_v2  ;;  %2606 = vmatpush.msra.mxu1 %v1434_v3  ;;  %v1424_v39 = vld [vmem:[%s9365_s4 + $0x2150] sm:$0xff]  ;;  %v1422_v43 = vld [vmem:[%s9365_s4 + $0x2140] sm:$0xff] }
 0x162   :  { %2626 = vmatpush.msra.mxu2 %v1466_v4  ;;  %2646 = vmatpush.msra.mxu3 %v1498_v5  ;;  %v1456_v40 = vld [vmem:[%s9365_s4 + $0x2250] sm:$0xff]  ;;  %v1454_v57 = vld [vmem:[%s9365_s4 + $0x2240] sm:$0xff] }
 0x163   :  { %2587 = vmatpush.msra.mxu0 %v1400_v6  ;;  %2607 = vmatpush.msra.mxu1 %v1432_v7  ;;  %v1488_v41 = vld [vmem:[%s9365_s4 + $0x2350] sm:$0xff]  ;;  %v1486_v58 = vld [vmem:[%s9365_s4 + $0x2340] sm:$0xff] }
 0x164   :  { %2627 = vmatpush.msra.mxu2 %v1464_v8  ;;  %2647 = vmatpush.msra.mxu3 %v1496_v9  ;;  %v1388_v60 = vld [vmem:[%s9365_s4 + $0x2030] sm:$0xff]  ;;  %v1386_v2 = vld [vmem:[%s9365_s4 + $0x2020] sm:$0xff]  ;;  %v355_v8 = vld [vmem:[%s9362_s1 + $0x48] sm:$0xff] }
 0x165   :  { %2588 = vmatpush.msra.mxu0 %v1398_v10  ;;  %2608 = vmatpush.msra.mxu1 %v1430_v11  ;;  %v1420_v61 = vld [vmem:[%s9365_s4 + $0x2130] sm:$0xff]  ;;  %v1418_v3 = vld [vmem:[%s9365_s4 + $0x2120] sm:$0xff]  ;;  %1876 = vst [vmem:[#allocation1 + $0x20] ss:$4 sm:$0xff] %v355_v8 }
 0x166   :  { %2628 = vmatpush.msra.mxu2 %v1462_v12  ;;  %2648 = vmatpush.msra.mxu3 %v1494_v13  ;;  %v1452_v0 = vld [vmem:[%s9365_s4 + $0x2230] sm:$0xff]  ;;  %v1450_v4 = vld [vmem:[%s9365_s4 + $0x2220] sm:$0xff] }
 0x167   :  { %2589 = vmatpush.msra.mxu0 %v1396_v16  ;;  %2609 = vmatpush.msra.mxu1 %v1428_v46  ;;  %v1484_v1 = vld [vmem:[%s9365_s4 + $0x2330] sm:$0xff]  ;;  %v1482_v5 = vld [vmem:[%s9365_s4 + $0x2320] sm:$0xff] }
 0x168   :  { %2629 = vmatpush.msra.mxu2 %v1460_v47  ;;  %2649 = vmatpush.msra.mxu3 %v1492_v23  ;;  %v1384_v6 = vld [vmem:[%s9365_s4 + $0x2010] sm:$0xff]  ;;  %v1382_v11 = vld [vmem:[%s9365_s4 + $0x2000] sm:$0xff] }
 0x169   :  { %2590 = vmatpush.msra.mxu0 %v1394_v28  ;;  %2610 = vmatpush.msra.mxu1 %v1426_v31  ;;  %v1416_v7 = vld [vmem:[%s9365_s4 + $0x2110] sm:$0xff]  ;;  %v1414_v12 = vld [vmem:[%s9365_s4 + $0x2100] sm:$0xff] }
 0x16a   :  { %2630 = vmatpush.msra.mxu2 %v1458_v32  ;;  %2650 = vmatpush.msra.mxu3 %v1490_v37  ;;  %v1448_v9 = vld [vmem:[%s9365_s4 + $0x2210] sm:$0xff]  ;;  %v1446_v13 = vld [vmem:[%s9365_s4 + $0x2200] sm:$0xff]  ;;  %v6375_v37 = vld.sshfl [vmem:[#allocation1 + $0x8] sm:$0xff pattern:$0x73625140] }
 0x16b   :  { %2591 = vmatpush.msra.mxu0 %v1392_v38  ;;  %2611 = vmatpush.msra.mxu1 %v1424_v39  ;;  %v1480_v10 = vld [vmem:[%s9365_s4 + $0x2310] sm:$0xff]  ;;  %v1478_v16 = vld [vmem:[%s9365_s4 + $0x2300] sm:$0xff]  ;;  %v6377_v38 = vld.sshfl [vmem:[#allocation1 + $0x18] sm:$0xff pattern:$0x73625140] }
 0x16c   :  { %2631 = vmatpush.msra.mxu2 %v1456_v40  ;;  %2651 = vmatpush.msra.mxu3 %v1488_v41  ;;  %v6357_v46 = vld.sshfl [vmem:[#allocation1] sm:$0xff pattern:$0x73625140]  ;;  %v6359_v47 = vld.sshfl [vmem:[#allocation1 + $0x10] sm:$0xff pattern:$0x73625140] }
 0x16d   :  { %2592 = vmatpush.msra.mxu0 %v1390_v42  ;;  %2612 = vmatpush.msra.mxu1 %v1422_v43  ;;  %v1540_v23 = vld [vmem:[%s9365_s4 + $0x24f0] sm:$0xff]  ;;  %v1538_v39 = vld [vmem:[%s9365_s4 + $0x24e0] sm:$0xff] }
 0x16e   :  { %2632 = vmatpush.msra.mxu2 %v1454_v57  ;;  %2652 = vmatpush.msra.mxu3 %v1486_v58  ;;  %v1572_v28 = vld [vmem:[%s9365_s4 + $0x25f0] sm:$0xff]  ;;  %v1570_v40 = vld [vmem:[%s9365_s4 + $0x25e0] sm:$0xff] }
 0x16f   :  { %2593 = vmatpush.msra.mxu0 %v1388_v60  ;;  %2613 = vmatpush.msra.mxu1 %v1420_v61  ;;  %v1604_v31 = vld [vmem:[%s9365_s4 + $0x26f0] sm:$0xff]  ;;  %v1602_v41 = vld [vmem:[%s9365_s4 + $0x26e0] sm:$0xff] }
 0x170   :  { %2633 = vmatpush.msra.mxu2 %v1452_v0  ;;  %2653 = vmatpush.msra.mxu3 %v1484_v1  ;;  %v1636_v32 = vld [vmem:[%s9365_s4 + $0x27f0] sm:$0xff]  ;;  %v1634_v42 = vld [vmem:[%s9365_s4 + $0x27e0] sm:$0xff] }
 0x171   :  { %2594 = vmatpush.msra.mxu0 %v1386_v2  ;;  %2614 = vmatpush.msra.mxu1 %v1418_v3  ;;  %v1536_v43 = vld [vmem:[%s9365_s4 + $0x24d0] sm:$0xff]  ;;  %v1534_v61 = vld [vmem:[%s9365_s4 + $0x24c0] sm:$0xff] }
 0x172   :  { %2634 = vmatpush.msra.mxu2 %v1450_v4  ;;  %2654 = vmatpush.msra.mxu3 %v1482_v5  ;;  %v1568_v57 = vld [vmem:[%s9365_s4 + $0x25d0] sm:$0xff]  ;;  %v1566_v0 = vld [vmem:[%s9365_s4 + $0x25c0] sm:$0xff] }
 0x173   :  { %2595 = vmatpush.msra.mxu0 %v1384_v6  ;;  %2615 = vmatpush.msra.mxu1 %v1416_v7  ;;  %v1600_v58 = vld [vmem:[%s9365_s4 + $0x26d0] sm:$0xff]  ;;  %v1598_v1 = vld [vmem:[%s9365_s4 + $0x26c0] sm:$0xff] }
 0x174   :  { %2635 = vmatpush.msra.mxu2 %v1448_v9  ;;  %2655 = vmatpush.msra.mxu3 %v1480_v10  ;;  %v1632_v60 = vld [vmem:[%s9365_s4 + $0x27d0] sm:$0xff]  ;;  %v1630_v2 = vld [vmem:[%s9365_s4 + $0x27c0] sm:$0xff] }
 0x175   :  { %2596 = vmatpush.msra.mxu0 %v1382_v11  ;;  %2616 = vmatpush.msra.mxu1 %v1414_v12  ;;  %v1532_v3 = vld [vmem:[%s9365_s4 + $0x24b0] sm:$0xff]  ;;  %v1530_v7 = vld [vmem:[%s9365_s4 + $0x24a0] sm:$0xff] }
 0x176   :  { %2636 = vmatpush.msra.mxu2 %v1446_v13  ;;  %2656 = vmatpush.msra.mxu3 %v1478_v16  ;;  %v1564_v4 = vld [vmem:[%s9365_s4 + $0x25b0] sm:$0xff]  ;;  %v1562_v8 = vld [vmem:[%s9365_s4 + $0x25a0] sm:$0xff] }
 0x177   :  { %2597 = vmatmul.f32.vlgmr.msra.gmra.mxu0 %v6357_v46  ;;  %2637 = vmatmul.f32.vlgmr.msra.gmra.mxu2 %v6359_v47  ;;  %v1596_v5 = vld [vmem:[%s9365_s4 + $0x26b0] sm:$0xff]  ;;  %v1594_v9 = vld [vmem:[%s9365_s4 + $0x26a0] sm:$0xff] }
 0x178   :  { %2661 = vmatpush.msrb.mxu0 %v1540_v23  ;;  %2681 = vmatpush.msrb.mxu1 %v1572_v28  ;;  %v1628_v6 = vld [vmem:[%s9365_s4 + $0x27b0] sm:$0xff]  ;;  %v1626_v10 = vld [vmem:[%s9365_s4 + $0x27a0] sm:$0xff] }
 0x179   :  { %2701 = vmatpush.msrb.mxu2 %v1604_v31  ;;  %2721 = vmatpush.msrb.mxu3 %v1636_v32  ;;  %v1528_v11 = vld [vmem:[%s9365_s4 + $0x2490] sm:$0xff]  ;;  %v1526_v23 = vld [vmem:[%s9365_s4 + $0x2480] sm:$0xff] }
 0x17a   :  { %2617 = vmatmul.f32.vlgmr.msra.gmra.mxu1 %v6375_v37  ;;  %2657 = vmatmul.f32.vlgmr.msra.gmra.mxu3 %v6377_v38  ;;  %v1560_v12 = vld [vmem:[%s9365_s4 + $0x2590] sm:$0xff]  ;;  %v1558_v28 = vld [vmem:[%s9365_s4 + $0x2580] sm:$0xff] }
 0x17b   :  { %2662 = vmatpush.msrb.mxu0 %v1538_v39  ;;  %2682 = vmatpush.msrb.mxu1 %v1570_v40  ;;  %v1592_v13 = vld [vmem:[%s9365_s4 + $0x2690] sm:$0xff]  ;;  %v1590_v31 = vld [vmem:[%s9365_s4 + $0x2680] sm:$0xff] }
 0x17c   :  { %2702 = vmatpush.msrb.mxu2 %v1602_v41  ;;  %2722 = vmatpush.msrb.mxu3 %v1634_v42  ;;  %v1624_v16 = vld [vmem:[%s9365_s4 + $0x2790] sm:$0xff]  ;;  %v1622_v32 = vld [vmem:[%s9365_s4 + $0x2780] sm:$0xff] }
 0x17d   :  { %2663 = vmatpush.msrb.mxu0 %v1536_v43  ;;  %2683 = vmatpush.msrb.mxu1 %v1568_v57  ;;  %v1524_v39 = vld [vmem:[%s9365_s4 + $0x2470] sm:$0xff]  ;;  %v1522_v43 = vld [vmem:[%s9365_s4 + $0x2460] sm:$0xff] }
 0x17e   :  { %2703 = vmatpush.msrb.mxu2 %v1600_v58  ;;  %2723 = vmatpush.msrb.mxu3 %v1632_v60  ;;  %v1556_v40 = vld [vmem:[%s9365_s4 + $0x2570] sm:$0xff]  ;;  %v1554_v57 = vld [vmem:[%s9365_s4 + $0x2560] sm:$0xff] }
 0x17f   :  { %2664 = vmatpush.msrb.mxu0 %v1534_v61  ;;  %2684 = vmatpush.msrb.mxu1 %v1566_v0  ;;  %v1588_v41 = vld [vmem:[%s9365_s4 + $0x2670] sm:$0xff]  ;;  %v1586_v58 = vld [vmem:[%s9365_s4 + $0x2660] sm:$0xff] }
 0x180   :  { %2704 = vmatpush.msrb.mxu2 %v1598_v1  ;;  %2724 = vmatpush.msrb.mxu3 %v1630_v2  ;;  %v1620_v42 = vld [vmem:[%s9365_s4 + $0x2770] sm:$0xff]  ;;  %v1618_v60 = vld [vmem:[%s9365_s4 + $0x2760] sm:$0xff] }
 0x181   :  { %2665 = vmatpush.msrb.mxu0 %v1532_v3  ;;  %2685 = vmatpush.msrb.mxu1 %v1564_v4  ;;  %v1520_v61 = vld [vmem:[%s9365_s4 + $0x2450] sm:$0xff]  ;;  %v1518_v3 = vld [vmem:[%s9365_s4 + $0x2440] sm:$0xff] }
 0x182   :  { %2705 = vmatpush.msrb.mxu2 %v1596_v5  ;;  %2725 = vmatpush.msrb.mxu3 %v1628_v6  ;;  %v1552_v0 = vld [vmem:[%s9365_s4 + $0x2550] sm:$0xff]  ;;  %v1550_v4 = vld [vmem:[%s9365_s4 + $0x2540] sm:$0xff] }
 0x183   :  { %2666 = vmatpush.msrb.mxu0 %v1530_v7  ;;  %2686 = vmatpush.msrb.mxu1 %v1562_v8  ;;  %v1584_v1 = vld [vmem:[%s9365_s4 + $0x2650] sm:$0xff]  ;;  %v1582_v5 = vld [vmem:[%s9365_s4 + $0x2640] sm:$0xff] }
 0x184   :  { %2706 = vmatpush.msrb.mxu2 %v1594_v9  ;;  %2726 = vmatpush.msrb.mxu3 %v1626_v10  ;;  %v1616_v2 = vld [vmem:[%s9365_s4 + $0x2750] sm:$0xff]  ;;  %v1614_v6 = vld [vmem:[%s9365_s4 + $0x2740] sm:$0xff] }
 0x185   :  { %2667 = vmatpush.msrb.mxu0 %v1528_v11  ;;  %2687 = vmatpush.msrb.mxu1 %v1560_v12  ;;  %v1516_v7 = vld [vmem:[%s9365_s4 + $0x2430] sm:$0xff]  ;;  %v1514_v11 = vld [vmem:[%s9365_s4 + $0x2420] sm:$0xff] }
 0x186   :  { %2707 = vmatpush.msrb.mxu2 %v1592_v13  ;;  %2727 = vmatpush.msrb.mxu3 %v1624_v16  ;;  %v1548_v8 = vld [vmem:[%s9365_s4 + $0x2530] sm:$0xff]  ;;  %v1546_v12 = vld [vmem:[%s9365_s4 + $0x2520] sm:$0xff] }
 0x187   :  { %2668 = vmatpush.msrb.mxu0 %v1526_v23  ;;  %2688 = vmatpush.msrb.mxu1 %v1558_v28  ;;  %v1580_v9 = vld [vmem:[%s9365_s4 + $0x2630] sm:$0xff]  ;;  %v1578_v13 = vld [vmem:[%s9365_s4 + $0x2620] sm:$0xff] }
 0x188   :  { %2708 = vmatpush.msrb.mxu2 %v1590_v31  ;;  %2728 = vmatpush.msrb.mxu3 %v1622_v32  ;;  %v1612_v10 = vld [vmem:[%s9365_s4 + $0x2730] sm:$0xff]  ;;  %v1610_v16 = vld [vmem:[%s9365_s4 + $0x2720] sm:$0xff] }
 0x189   :  { %2669 = vmatpush.msrb.mxu0 %v1524_v39  ;;  %2689 = vmatpush.msrb.mxu1 %v1556_v40  ;;  %v1512_v23 = vld [vmem:[%s9365_s4 + $0x2410] sm:$0xff]  ;;  %v1510_v40 = vld [vmem:[%s9365_s4 + $0x2400] sm:$0xff] }
 0x18a   :  { %2709 = vmatpush.msrb.mxu2 %v1588_v41  ;;  %2729 = vmatpush.msrb.mxu3 %v1620_v42  ;;  %v1544_v28 = vld [vmem:[%s9365_s4 + $0x2510] sm:$0xff]  ;;  %v1542_v41 = vld [vmem:[%s9365_s4 + $0x2500] sm:$0xff] }
 0x18b   :  { %2670 = vmatpush.msrb.mxu0 %v1522_v43  ;;  %2690 = vmatpush.msrb.mxu1 %v1554_v57  ;;  %v356_v31 = vld [vmem:[%s9362_s1 + $0x50] sm:$0xff]  ;;  %v1574_v42 = vld [vmem:[%s9365_s4 + $0x2600] sm:$0xff] }
 0x18c   :  { %2710 = vmatpush.msrb.mxu2 %v1586_v58  ;;  %2730 = vmatpush.msrb.mxu3 %v1618_v60  ;;  %v1576_v32 = vld [vmem:[%s9365_s4 + $0x2610] sm:$0xff]  ;;  %1885 = vst [vmem:[#allocation1] ss:$4 sm:$0xff] %v356_v31  ;;  %v1606_v43 = vld [vmem:[%s9365_s4 + $0x2700] sm:$0xff] }
 0x18d   :  { %2671 = vmatpush.msrb.mxu0 %v1520_v61  ;;  %2691 = vmatpush.msrb.mxu1 %v1552_v0  ;;  %v1608_v39 = vld [vmem:[%s9365_s4 + $0x2710] sm:$0xff]  ;;  %v6564_v57 = vld.sshfl [vmem:[#allocation1 + $0x20] sm:$0xff pattern:$0x73625140] }
 0x18e   :  { %2711 = vmatpush.msrb.mxu2 %v1584_v1  ;;  %2731 = vmatpush.msrb.mxu3 %v1616_v2  ;;  %v6566_v58 = vld.sshfl [vmem:[#allocation1 + $0x30] sm:$0xff pattern:$0x73625140]  ;;  %v6582_v2 = vld.sshfl [vmem:[#allocation1 + $0x28] sm:$0xff pattern:$0x73625140] }
 0x18f   :  { %2672 = vmatpush.msrb.mxu0 %v1518_v3  ;;  %2692 = vmatpush.msrb.mxu1 %v1550_v4  ;;  %v1668_v60 = vld [vmem:[%s9365_s4 + $0x28f0] sm:$0xff]  ;;  %v6584_v3 = vld.sshfl [vmem:[#allocation1 + $0x38] sm:$0xff pattern:$0x73625140]  ;;  %v1666_v4 = vld [vmem:[%s9365_s4 + $0x28e0] sm:$0xff] }
 0x190   :  { %2712 = vmatpush.msrb.mxu2 %v1582_v5  ;;  %2732 = vmatpush.msrb.mxu3 %v1614_v6  ;;  %v1700_v61 = vld [vmem:[%s9365_s4 + $0x29f0] sm:$0xff]  ;;  %v1698_v5 = vld [vmem:[%s9365_s4 + $0x29e0] sm:$0xff] }
 0x191   :  { %2673 = vmatpush.msrb.mxu0 %v1516_v7  ;;  %2693 = vmatpush.msrb.mxu1 %v1548_v8  ;;  %v1732_v0 = vld [vmem:[%s9365_s4 + $0x2af0] sm:$0xff]  ;;  %v1730_v6 = vld [vmem:[%s9365_s4 + $0x2ae0] sm:$0xff] }
 0x192   :  { %2713 = vmatpush.msrb.mxu2 %v1580_v9  ;;  %2733 = vmatpush.msrb.mxu3 %v1612_v10  ;;  %v1764_v1 = vld [vmem:[%s9365_s4 + $0x2bf0] sm:$0xff]  ;;  %v1762_v7 = vld [vmem:[%s9365_s4 + $0x2be0] sm:$0xff] }
 0x193   :  { %2674 = vmatpush.msrb.mxu0 %v1514_v11  ;;  %2694 = vmatpush.msrb.mxu1 %v1546_v12  ;;  %v1664_v8 = vld [vmem:[%s9365_s4 + $0x28d0] sm:$0xff]  ;;  %v1662_v12 = vld [vmem:[%s9365_s4 + $0x28c0] sm:$0xff] }
 0x194   :  { %2714 = vmatpush.msrb.mxu2 %v1578_v13  ;;  %2734 = vmatpush.msrb.mxu3 %v1610_v16  ;;  %v1696_v9 = vld [vmem:[%s9365_s4 + $0x29d0] sm:$0xff]  ;;  %v1694_v13 = vld [vmem:[%s9365_s4 + $0x29c0] sm:$0xff] }
 0x195   :  { %2675 = vmatpush.msrb.mxu0 %v1512_v23  ;;  %2695 = vmatpush.msrb.mxu1 %v1544_v28  ;;  %v1728_v10 = vld [vmem:[%s9365_s4 + $0x2ad0] sm:$0xff]  ;;  %v1726_v16 = vld [vmem:[%s9365_s4 + $0x2ac0] sm:$0xff] }
 0x196   :  { %2715 = vmatpush.msrb.mxu2 %v1576_v32  ;;  %2735 = vmatpush.msrb.mxu3 %v1608_v39  ;;  %v1760_v11 = vld [vmem:[%s9365_s4 + $0x2bd0] sm:$0xff]  ;;  %v1758_v23 = vld [vmem:[%s9365_s4 + $0x2bc0] sm:$0xff] }
 0x197   :  { %2676 = vmatpush.msrb.mxu0 %v1510_v40  ;;  %2696 = vmatpush.msrb.mxu1 %v1542_v41  ;;  %v1660_v28 = vld [vmem:[%s9365_s4 + $0x28b0] sm:$0xff]  ;;  %v1658_v40 = vld [vmem:[%s9365_s4 + $0x28a0] sm:$0xff] }
 0x198   :  { %2716 = vmatpush.msrb.mxu2 %v1574_v42  ;;  %2736 = vmatpush.msrb.mxu3 %v1606_v43  ;;  %v1692_v31 = vld [vmem:[%s9365_s4 + $0x29b0] sm:$0xff]  ;;  %v1690_v41 = vld [vmem:[%s9365_s4 + $0x29a0] sm:$0xff] }
 0x199   :  { %2677 = vmatmul.f32.vlgmr.msrb.gmra.mxu0 %v6564_v57  ;;  %2717 = vmatmul.f32.vlgmr.msrb.gmra.mxu2 %v6566_v58  ;;  %v1724_v32 = vld [vmem:[%s9365_s4 + $0x2ab0] sm:$0xff]  ;;  %v1722_v42 = vld [vmem:[%s9365_s4 + $0x2aa0] sm:$0xff] }
 0x19a   :  { %2741 = vmatpush.msra.mxu0 %v1668_v60  ;;  %2761 = vmatpush.msra.mxu1 %v1700_v61  ;;  %v1756_v39 = vld [vmem:[%s9365_s4 + $0x2bb0] sm:$0xff]  ;;  %v1754_v43 = vld [vmem:[%s9365_s4 + $0x2ba0] sm:$0xff] }
 0x19b   :  { %2781 = vmatpush.msra.mxu2 %v1732_v0  ;;  %2801 = vmatpush.msra.mxu3 %v1764_v1  ;;  %v1656_v60 = vld [vmem:[%s9365_s4 + $0x2890] sm:$0xff] }
 0x19c   :  { %2697 = vmatmul.f32.vlgmr.msrb.gmra.mxu1 %v6582_v2  ;;  %2737 = vmatmul.f32.vlgmr.msrb.gmra.mxu3 %v6584_v3  ;;  %v1688_v61 = vld [vmem:[%s9365_s4 + $0x2990] sm:$0xff] }
 0x19d   :  { %2742 = vmatpush.msra.mxu0 %v1666_v4  ;;  %2762 = vmatpush.msra.mxu1 %v1698_v5  ;;  %v1720_v0 = vld [vmem:[%s9365_s4 + $0x2a90] sm:$0xff]  ;;  %v1654_v4 = vld [vmem:[%s9365_s4 + $0x2880] sm:$0xff] }
 0x19e   :  { %2782 = vmatpush.msra.mxu2 %v1730_v6  ;;  %2802 = vmatpush.msra.mxu3 %v1762_v7  ;;  %v1752_v1 = vld [vmem:[%s9365_s4 + $0x2b90] sm:$0xff]  ;;  %v1686_v5 = vld [vmem:[%s9365_s4 + $0x2980] sm:$0xff] }
 0x19f   :  { %2743 = vmatpush.msra.mxu0 %v1664_v8  ;;  %2763 = vmatpush.msra.mxu1 %v1696_v9  ;;  %v1718_v6 = vld [vmem:[%s9365_s4 + $0x2a80] sm:$0xff]  ;;  %v1652_v8 = vld [vmem:[%s9365_s4 + $0x2870] sm:$0xff] }
 0x1a0   :  { %2783 = vmatpush.msra.mxu2 %v1728_v10  ;;  %2803 = vmatpush.msra.mxu3 %v1760_v11  ;;  %v1750_v7 = vld [vmem:[%s9365_s4 + $0x2b80] sm:$0xff]  ;;  %v1684_v9 = vld [vmem:[%s9365_s4 + $0x2970] sm:$0xff] }
 0x1a1   :  { %2744 = vmatpush.msra.mxu0 %v1662_v12  ;;  %2764 = vmatpush.msra.mxu1 %v1694_v13  ;;  %v1716_v10 = vld [vmem:[%s9365_s4 + $0x2a70] sm:$0xff]  ;;  %v1650_v12 = vld [vmem:[%s9365_s4 + $0x2860] sm:$0xff] }
 0x1a2   :  { %2784 = vmatpush.msra.mxu2 %v1726_v16  ;;  %2804 = vmatpush.msra.mxu3 %v1758_v23  ;;  %v1748_v11 = vld [vmem:[%s9365_s4 + $0x2b70] sm:$0xff]  ;;  %v1682_v13 = vld [vmem:[%s9365_s4 + $0x2960] sm:$0xff] }
 0x1a3   :  { %2745 = vmatpush.msra.mxu0 %v1660_v28  ;;  %2765 = vmatpush.msra.mxu1 %v1692_v31  ;;  %v1714_v16 = vld [vmem:[%s9365_s4 + $0x2a60] sm:$0xff]  ;;  %v1648_v28 = vld [vmem:[%s9365_s4 + $0x2850] sm:$0xff] }
 0x1a4   :  { %2785 = vmatpush.msra.mxu2 %v1724_v32  ;;  %2805 = vmatpush.msra.mxu3 %v1756_v39  ;;  %v1746_v23 = vld [vmem:[%s9365_s4 + $0x2b60] sm:$0xff]  ;;  %v1680_v31 = vld [vmem:[%s9365_s4 + $0x2950] sm:$0xff] }
 0x1a5   :  { %2746 = vmatpush.msra.mxu0 %v1658_v40  ;;  %2766 = vmatpush.msra.mxu1 %v1690_v41  ;;  %v1712_v32 = vld [vmem:[%s9365_s4 + $0x2a50] sm:$0xff]  ;;  %v1646_v40 = vld [vmem:[%s9365_s4 + $0x2840] sm:$0xff] }
 0x1a6   :  { %2786 = vmatpush.msra.mxu2 %v1722_v42  ;;  %2806 = vmatpush.msra.mxu3 %v1754_v43  ;;  %v1744_v39 = vld [vmem:[%s9365_s4 + $0x2b50] sm:$0xff]  ;;  %v1678_v41 = vld [vmem:[%s9365_s4 + $0x2940] sm:$0xff] }
 0x1a7   :  { %2747 = vmatpush.msra.mxu0 %v1656_v60  ;;  %2767 = vmatpush.msra.mxu1 %v1688_v61  ;;  %v1710_v42 = vld [vmem:[%s9365_s4 + $0x2a40] sm:$0xff]  ;;  %v1644_v60 = vld [vmem:[%s9365_s4 + $0x2830] sm:$0xff] }
 0x1a8   :  { %2787 = vmatpush.msra.mxu2 %v1720_v0  ;;  %2807 = vmatpush.msra.mxu3 %v1752_v1  ;;  %v1742_v43 = vld [vmem:[%s9365_s4 + $0x2b40] sm:$0xff]  ;;  %v1676_v61 = vld [vmem:[%s9365_s4 + $0x2930] sm:$0xff]  ;;  %v357_v0 = vld [vmem:[%s9362_s1 + $0x58] sm:$0xf] }
 0x1a9   :  { %2748 = vmatpush.msra.mxu0 %v1654_v4  ;;  %2768 = vmatpush.msra.mxu1 %v1686_v5  ;;  %v1708_v1 = vld [vmem:[%s9365_s4 + $0x2a30] sm:$0xff]  ;;  %1886 = vst [vmem:[#allocation1 + $0x20] ss:$4 sm:$0xff] %v357_v0  ;;  %v1642_v5 = vld [vmem:[%s9365_s4 + $0x2820] sm:$0xff] }
 0x1aa   :  { %2788 = vmatpush.msra.mxu2 %v1718_v6  ;;  %2808 = vmatpush.msra.mxu3 %v1750_v7  ;;  %v1740_v4 = vld [vmem:[%s9365_s4 + $0x2b30] sm:$0xff]  ;;  %v1674_v6 = vld [vmem:[%s9365_s4 + $0x2920] sm:$0xff] }
 0x1ab   :  { %2749 = vmatpush.msra.mxu0 %v1652_v8  ;;  %2769 = vmatpush.msra.mxu1 %v1684_v9  ;;  %v1706_v7 = vld [vmem:[%s9365_s4 + $0x2a20] sm:$0xff]  ;;  %v1640_v9 = vld [vmem:[%s9365_s4 + $0x2810] sm:$0xff] }
 0x1ac   :  { %2789 = vmatpush.msra.mxu2 %v1716_v10  ;;  %2809 = vmatpush.msra.mxu3 %v1748_v11  ;;  %v1738_v8 = vld [vmem:[%s9365_s4 + $0x2b20] sm:$0xff]  ;;  %v1672_v10 = vld [vmem:[%s9365_s4 + $0x2910] sm:$0xff] }
 0x1ad   :  { %2750 = vmatpush.msra.mxu0 %v1650_v12  ;;  %2770 = vmatpush.msra.mxu1 %v1682_v13  ;;  %v1704_v11 = vld [vmem:[%s9365_s4 + $0x2a10] sm:$0xff]  ;;  %v1638_v13 = vld [vmem:[%s9365_s4 + $0x2800] sm:$0xff] }
 0x1ae   :  { %2790 = vmatpush.msra.mxu2 %v1714_v16  ;;  %2810 = vmatpush.msra.mxu3 %v1746_v23  ;;  %v1736_v12 = vld [vmem:[%s9365_s4 + $0x2b10] sm:$0xff]  ;;  %v1670_v16 = vld [vmem:[%s9365_s4 + $0x2900] sm:$0xff] }
 0x1af   :  { %2751 = vmatpush.msra.mxu0 %v1648_v28  ;;  %2771 = vmatpush.msra.mxu1 %v1680_v31  ;;  %v1702_v23 = vld [vmem:[%s9365_s4 + $0x2a00] sm:$0xff]  ;;  %v1812_v0 = vld [vmem:[%s9365_s4 + $0x2d70] sm:$0xff] }
 0x1b0   :  { %2791 = vmatpush.msra.mxu2 %v1712_v32  ;;  %2811 = vmatpush.msra.mxu3 %v1744_v39  ;;  %v1734_v28 = vld [vmem:[%s9365_s4 + $0x2b00] sm:$0xff]  ;;  %v1889_v32 = vld.sshfl [vmem:[#allocation1 + $0x10] sm:$0xff pattern:$0x73625140] }
 0x1b1   :  { %2752 = vmatpush.msra.mxu0 %v1646_v40  ;;  %2772 = vmatpush.msra.mxu1 %v1678_v41  ;;  %v1887_v31 = vld.sshfl [vmem:[#allocation1] sm:$0xff pattern:$0x73625140]  ;;  %v1796_v39 = vld [vmem:[%s9365_s4 + $0x2cf0] sm:$0xff]  ;;  %v389_v41 = vld [vmem:[%s9365_s4 + $0xf8] sm:$0xff] }
 0x1b2   :  { %2792 = vmatpush.msra.mxu2 %v1710_v42  ;;  %2812 = vmatpush.msra.mxu3 %v1742_v43  ;;  %v1814_v40 = vld [vmem:[%s9365_s4 + $0x2d80] sm:$0xff]  ;;  %v453_v42 = vld [vmem:[%s9365_s4 + $0x2f8] sm:$0xff]  ;;  %v1888_v43 = vld.sshfl [vmem:[#allocation1 + $0x8] sm:$0xff pattern:$0x73625140] }
 0x1b3   :  { %2753 = vmatpush.msra.mxu0 %v1644_v60  ;;  %2773 = vmatpush.msra.mxu1 %v1676_v61  ;;  %v1890_v60 = vld.sshfl [vmem:[#allocation1 + $0x18] sm:$0xff pattern:$0x73625140]  ;;  %v1794_v61 = vld [vmem:[%s9365_s4 + $0x2ce0] sm:$0xff] }
 0x1b4   :  { %2793 = vmatpush.msra.mxu2 %v1708_v1  ;;  %2813 = vmatpush.msra.mxu3 %v1740_v4  ;;  %v387_v1 = vld [vmem:[%s9365_s4 + $0xe8] sm:$0xff] }
 0x1b5   :  { %2754 = vmatpush.msra.mxu0 %v1642_v5  ;;  %2774 = vmatpush.msra.mxu1 %v1674_v6  ;;  %v451_v4 = vld [vmem:[%s9365_s4 + $0x2e8] sm:$0xff]  ;;  %v1792_v5 = vld [vmem:[%s9365_s4 + $0x2cd0] sm:$0xff]  ;;  %v1810_v6 = vld [vmem:[%s9365_s4 + $0x2d60] sm:$0xff] }
 0x1b6   :  { %2794 = vmatpush.msra.mxu2 %v1706_v7  ;;  %2814 = vmatpush.msra.mxu3 %v1738_v8  ;;  %v385_v7 = vld [vmem:[%s9365_s4 + $0xd8] sm:$0xff] }
 0x1b7   :  { %2755 = vmatpush.msra.mxu0 %v1640_v9  ;;  %2775 = vmatpush.msra.mxu1 %v1672_v10  ;;  %v449_v8 = vld [vmem:[%s9365_s4 + $0x2d8] sm:$0xff]  ;;  %v1790_v9 = vld [vmem:[%s9365_s4 + $0x2cc0] sm:$0xff]  ;;  %v1808_v10 = vld [vmem:[%s9365_s4 + $0x2d50] sm:$0xff] }
 0x1b8   :  { %2795 = vmatpush.msra.mxu2 %v1704_v11  ;;  %2815 = vmatpush.msra.mxu3 %v1736_v12  ;;  %v383_v11 = vld [vmem:[%s9365_s4 + $0xc8] sm:$0xff] }
 0x1b9   :  { %2756 = vmatpush.msra.mxu0 %v1638_v13  ;;  %2776 = vmatpush.msra.mxu1 %v1670_v16  ;;  %v447_v12 = vld [vmem:[%s9365_s4 + $0x2c8] sm:$0xff]  ;;  %v1788_v13 = vld [vmem:[%s9365_s4 + $0x2cb0] sm:$0xff]  ;;  %v1806_v16 = vld [vmem:[%s9365_s4 + $0x2d40] sm:$0xff] }
 0x1ba   :  { %2796 = vmatpush.msra.mxu2 %v1702_v23  ;;  %2816 = vmatpush.msra.mxu3 %v1734_v28  ;;  %v381_v23 = vld [vmem:[%s9365_s4 + $0xb8] sm:$0xff] }
 0x1bb   :  { %2757 = vmatmul.f32.vlgmr.msra.gmra.mxu0 %v1887_v31  ;;  %2797 = vmatmul.f32.vlgmr.msra.gmra.mxu2 %v1889_v32  ;;  %v445_v28 = vld [vmem:[%s9365_s4 + $0x2b8] sm:$0xff]  ;;  %v1786_v31 = vld [vmem:[%s9365_s4 + $0x2ca0] sm:$0xff]  ;;  %v1804_v32 = vld [vmem:[%s9365_s4 + $0x2d30] sm:$0xff] }
 0x1bc   :  { %2821 = vmatpush.msrb.mxu0 %v1796_v39  ;;  %2848 = vmatpush.msrb.mxu3 %v1814_v40  ;;  %v379_v39 = vld [vmem:[%s9365_s4 + $0xa8] sm:$0xff] }
 0x1bd   :  { %2861 = vmatpush.msrb.mxu2 %v389_v41  ;;  %2901 = vmatpush.msrb.mxu1 %v453_v42  ;;  %v443_v40 = vld [vmem:[%s9365_s4 + $0x2a8] sm:$0xff]  ;;  %v1784_v41 = vld [vmem:[%s9365_s4 + $0x2c90] sm:$0xff]  ;;  %v1802_v42 = vld [vmem:[%s9365_s4 + $0x2d20] sm:$0xff] }
 0x1be   :  { %2777 = vmatmul.f32.vlgmr.msra.gmra.mxu1 %v1888_v43  ;;  %2817 = vmatmul.f32.vlgmr.msra.gmra.mxu3 %v1890_v60  ;;  %v377_v43 = vld [vmem:[%s9365_s4 + $0x98] sm:$0xff] }
 0x1bf   :  { %2822 = vmatpush.msrb.mxu0 %v1794_v61  ;;  %2849 = vmatpush.msrb.mxu3 %v1812_v0  ;;  %v441_v60 = vld [vmem:[%s9365_s4 + $0x298] sm:$0xff]  ;;  %v1782_v61 = vld [vmem:[%s9365_s4 + $0x2c80] sm:$0xff]  ;;  %v1800_v0 = vld [vmem:[%s9365_s4 + $0x2d10] sm:$0xff] }
 0x1c0   :  { %2862 = vmatpush.msrb.mxu2 %v387_v1  ;;  %2902 = vmatpush.msrb.mxu1 %v451_v4  ;;  %v375_v1 = vld [vmem:[%s9365_s4 + $0x88] sm:$0xff] }
 0x1c1   :  { %2823 = vmatpush.msrb.mxu0 %v1792_v5  ;;  %2850 = vmatpush.msrb.mxu3 %v1810_v6  ;;  %v439_v4 = vld [vmem:[%s9365_s4 + $0x288] sm:$0xff]  ;;  %v1780_v5 = vld [vmem:[%s9365_s4 + $0x2c70] sm:$0xff]  ;;  %v1798_v6 = vld [vmem:[%s9365_s4 + $0x2d00] sm:$0xff] }
 0x1c2   :  { %2863 = vmatpush.msrb.mxu2 %v385_v7  ;;  %2903 = vmatpush.msrb.mxu1 %v449_v8  ;;  %v373_v7 = vld [vmem:[%s9365_s4 + $0x78] sm:$0xff] }
 0x1c3   :  { %2824 = vmatpush.msrb.mxu0 %v1790_v9  ;;  %2851 = vmatpush.msrb.mxu3 %v1808_v10  ;;  %v437_v8 = vld [vmem:[%s9365_s4 + $0x278] sm:$0xff]  ;;  %v1778_v10 = vld [vmem:[%s9365_s4 + $0x2c60] sm:$0xff] }
 0x1c4   :  { %2864 = vmatpush.msrb.mxu2 %v383_v11  ;;  %2904 = vmatpush.msrb.mxu1 %v447_v12  ;;  %v421_v9 = vld [vmem:[%s9365_s4 + $0x1f8] sm:$0xff]  ;;  %v371_v11 = vld [vmem:[%s9365_s4 + $0x68] sm:$0xff] }
 0x1c5   :  { %2825 = vmatpush.msrb.mxu0 %v1788_v13  ;;  %2852 = vmatpush.msrb.mxu3 %v1806_v16  ;;  %v435_v12 = vld [vmem:[%s9365_s4 + $0x268] sm:$0xff]  ;;  %v1776_v16 = vld [vmem:[%s9365_s4 + $0x2c50] sm:$0xff] }
 0x1c6   :  { %2865 = vmatpush.msrb.mxu2 %v381_v23  ;;  %2905 = vmatpush.msrb.mxu1 %v445_v28  ;;  %v419_v13 = vld [vmem:[%s9365_s4 + $0x1e8] sm:$0xff]  ;;  %v369_v23 = vld [vmem:[%s9365_s4 + $0x58] sm:$0xff] }
 0x1c7   :  { %2826 = vmatpush.msrb.mxu0 %v1786_v31  ;;  %2853 = vmatpush.msrb.mxu3 %v1804_v32  ;;  %v433_v28 = vld [vmem:[%s9365_s4 + $0x258] sm:$0xff]  ;;  %v1774_v32 = vld [vmem:[%s9365_s4 + $0x2c40] sm:$0xff] }
 0x1c8   :  { %2866 = vmatpush.msrb.mxu2 %v379_v39  ;;  %2906 = vmatpush.msrb.mxu1 %v443_v40  ;;  %v417_v31 = vld [vmem:[%s9365_s4 + $0x1d8] sm:$0xff]  ;;  %v367_v39 = vld [vmem:[%s9365_s4 + $0x48] sm:$0xff] }
 0x1c9   :  { %2827 = vmatpush.msrb.mxu0 %v1784_v41  ;;  %2854 = vmatpush.msrb.mxu3 %v1802_v42  ;;  %v431_v40 = vld [vmem:[%s9365_s4 + $0x248] sm:$0xff]  ;;  %v1772_v42 = vld [vmem:[%s9365_s4 + $0x2c30] sm:$0xff] }
 0x1ca   :  { %2867 = vmatpush.msrb.mxu2 %v377_v43  ;;  %2907 = vmatpush.msrb.mxu1 %v441_v60  ;;  %v415_v41 = vld [vmem:[%s9365_s4 + $0x1c8] sm:$0xff]  ;;  %v365_v43 = vld [vmem:[%s9365_s4 + $0x38] sm:$0xff] }
 0x1cb   :  { %2828 = vmatpush.msrb.mxu0 %v1782_v61  ;;  %2855 = vmatpush.msrb.mxu3 %v1800_v0  ;;  %v429_v60 = vld [vmem:[%s9365_s4 + $0x238] sm:$0xff]  ;;  %v1770_v0 = vld [vmem:[%s9365_s4 + $0x2c20] sm:$0xff] }
 0x1cc   :  { %2868 = vmatpush.msrb.mxu2 %v375_v1  ;;  %2908 = vmatpush.msrb.mxu1 %v439_v4  ;;  %v413_v61 = vld [vmem:[%s9365_s4 + $0x1b8] sm:$0xff]  ;;  %v363_v1 = vld [vmem:[%s9365_s4 + $0x28] sm:$0xff] }
 0x1cd   :  { %2829 = vmatpush.msrb.mxu0 %v1780_v5  ;;  %2856 = vmatpush.msrb.mxu3 %v1798_v6  ;;  %v427_v4 = vld [vmem:[%s9365_s4 + $0x228] sm:$0xff]  ;;  %v1768_v6 = vld [vmem:[%s9365_s4 + $0x2c10] sm:$0xff] }
 0x1ce   :  { %2869 = vmatpush.msrb.mxu2 %v373_v7  ;;  %2909 = vmatpush.msrb.mxu1 %v437_v8  ;;  %v1892_v5 = vld.sshfl [vmem:[#allocation1 + $0x28] sm:$0xff pattern:$0x73625140]  ;;  %v361_v8 = vld [vmem:[%s9365_s4 + $0x18] sm:$0xff] }
 0x1cf   :  { %2881 = vmatpush.msra.mxu3 %v421_v9  ;;  %2830 = vmatpush.msrb.mxu0 %v1778_v10  ;;  %v411_v7 = vld [vmem:[%s9365_s4 + $0x1a8] sm:$0xff]  ;;  %v425_v9 = vld [vmem:[%s9365_s4 + $0x218] sm:$0xff]  ;;  %v1766_v10 = vld [vmem:[%s9365_s4 + $0x2c00] sm:$0xff] }
 0x1d0   :  { %2870 = vmatpush.msrb.mxu2 %v371_v11  ;;  %2910 = vmatpush.msrb.mxu1 %v435_v12  ;;  %v409_v11 = vld [vmem:[%s9365_s4 + $0x198] sm:$0xff]  ;;  %v359_v12 = vld [vmem:[%s9365_s4 + $0x8] sm:$0xff] }
 0x1d1   :  { %2882 = vmatpush.msra.mxu3 %v419_v13  ;;  %2831 = vmatpush.msrb.mxu0 %v1776_v16  ;;  %v423_v13 = vld [vmem:[%s9365_s4 + $0x208] sm:$0xff]  ;;  %v1891_v16 = vld.sshfl [vmem:[#allocation1 + $0x20] sm:$0xff pattern:$0x73625140] }
 0x1d2   :  { %2871 = vmatpush.msrb.mxu2 %v369_v23  ;;  %2911 = vmatpush.msrb.mxu1 %v433_v28  ;;  %v407_v23 = vld [vmem:[%s9365_s4 + $0x188] sm:$0xff]  ;;  %v485_v28 = vld [vmem:[%s9365_s4 + $0x3f8] sm:$0xff] }
 0x1d3   :  { %2883 = vmatpush.msra.mxu3 %v417_v31  ;;  %2832 = vmatpush.msrb.mxu0 %v1774_v32  ;;  %v517_v31 = vld [vmem:[%s9365_s4 + $0x4f8] sm:$0xff] }
 0x1d4   :  { %2872 = vmatpush.msrb.mxu2 %v367_v39  ;;  %2912 = vmatpush.msrb.mxu1 %v431_v40  ;;  %v581_v32 = vld [vmem:[%s9365_s4 + $0x6f8] sm:$0xff]  ;;  %v483_v40 = vld [vmem:[%s9365_s4 + $0x3e8] sm:$0xff] }
 0x1d5   :  { %2884 = vmatpush.msra.mxu3 %v415_v41  ;;  %2833 = vmatpush.msrb.mxu0 %v1772_v42  ;;  %v405_v39 = vld [vmem:[%s9365_s4 + $0x178] sm:$0xff]  ;;  %v515_v41 = vld [vmem:[%s9365_s4 + $0x4e8] sm:$0xff] }
 0x1d6   :  { %2873 = vmatpush.msrb.mxu2 %v365_v43  ;;  %2913 = vmatpush.msrb.mxu1 %v429_v60  ;;  %v579_v42 = vld [vmem:[%s9365_s4 + $0x6e8] sm:$0xff]  ;;  %v481_v60 = vld [vmem:[%s9365_s4 + $0x3d8] sm:$0xff] }
 0x1d7   :  { %2885 = vmatpush.msra.mxu3 %v413_v61  ;;  %2834 = vmatpush.msrb.mxu0 %v1770_v0  ;;  %v403_v43 = vld [vmem:[%s9365_s4 + $0x168] sm:$0xff]  ;;  %v513_v61 = vld [vmem:[%s9365_s4 + $0x4d8] sm:$0xff] }
 0x1d8   :  { %2874 = vmatpush.msrb.mxu2 %v363_v1  ;;  %2914 = vmatpush.msrb.mxu1 %v427_v4  ;;  %v577_v0 = vld [vmem:[%s9365_s4 + $0x6d8] sm:$0xff]  ;;  %v479_v4 = vld [vmem:[%s9365_s4 + $0x3c8] sm:$0xff] }
 0x1d9   :  { %3999 = vmatmul.msk.f32.vlgmr.msrb.gmra.mxu3 %vm1938_vm0, %v1892_v5  ;;  %2835 = vmatpush.msrb.mxu0 %v1768_v6  ;;  %v401_v1 = vld [vmem:[%s9365_s4 + $0x158] sm:$0xff]  ;;  %v511_v5 = vld [vmem:[%s9365_s4 + $0x4c8] sm:$0xff] }
 0x1da   :  { %2886 = vmatpush.msra.mxu3 %v411_v7  ;;  %2875 = vmatpush.msrb.mxu2 %v361_v8  ;;  %v575_v6 = vld [vmem:[%s9365_s4 + $0x6c8] sm:$0xff]  ;;  %v477_v8 = vld [vmem:[%s9365_s4 + $0x3b8] sm:$0xff] }
 0x1db   :  { %2915 = vmatpush.msrb.mxu1 %v425_v9  ;;  %2836 = vmatpush.msrb.mxu0 %v1766_v10  ;;  %v399_v7 = vld [vmem:[%s9365_s4 + $0x148] sm:$0xff]  ;;  %v509_v9 = vld [vmem:[%s9365_s4 + $0x4b8] sm:$0xff] }
 0x1dc   :  { %2887 = vmatpush.msra.mxu3 %v409_v11  ;;  %2876 = vmatpush.msrb.mxu2 %v359_v12  ;;  %v573_v10 = vld [vmem:[%s9365_s4 + $0x6b8] sm:$0xff]  ;;  %v475_v12 = vld [vmem:[%s9365_s4 + $0x3a8] sm:$0xff] }
 0x1dd   :  { %2916 = vmatpush.msrb.mxu1 %v423_v13  ;;  %2837 = vmatmul.f32.vlgmr.msrb.gmra.mxu0 %v1891_v16  ;;  %v397_v11 = vld [vmem:[%s9365_s4 + $0x138] sm:$0xff]  ;;  %v507_v13 = vld [vmem:[%s9365_s4 + $0x4a8] sm:$0xff] }
 0x1de   :  { %2888 = vmatpush.msra.mxu3 %v407_v23  ;;  %2921 = vmatpush.msra.mxu0 %v485_v28  ;;  %v571_v16 = vld [vmem:[%s9365_s4 + $0x6a8] sm:$0xff]  ;;  %v473_v28 = vld [vmem:[%s9365_s4 + $0x398] sm:$0xff] }
 0x1df   :  { %2941 = vmatpush.msra.mxu2 %v517_v31  ;;  %2981 = vmatpush.msra.mxu1 %v581_v32  ;;  %v395_v23 = vld [vmem:[%s9365_s4 + $0x128] sm:$0xff]  ;;  %v505_v31 = vld [vmem:[%s9365_s4 + $0x498] sm:$0xff] }
 0x1e0   :  { %2889 = vmatpush.msra.mxu3 %v405_v39  ;;  %2922 = vmatpush.msra.mxu0 %v483_v40  ;;  %v569_v32 = vld [vmem:[%s9365_s4 + $0x698] sm:$0xff]  ;;  %v471_v40 = vld [vmem:[%s9365_s4 + $0x388] sm:$0xff] }
 0x1e1   :  { %2942 = vmatpush.msra.mxu2 %v515_v41  ;;  %2982 = vmatpush.msra.mxu1 %v579_v42  ;;  %v393_v39 = vld [vmem:[%s9365_s4 + $0x118] sm:$0xff]  ;;  %v503_v41 = vld [vmem:[%s9365_s4 + $0x488] sm:$0xff] }
 0x1e2   :  { %2890 = vmatpush.msra.mxu3 %v403_v43  ;;  %2923 = vmatpush.msra.mxu0 %v481_v60  ;;  %v567_v42 = vld [vmem:[%s9365_s4 + $0x688] sm:$0xff]  ;;  %v469_v60 = vld [vmem:[%s9365_s4 + $0x378] sm:$0xff] }
 0x1e3   :  { %2943 = vmatpush.msra.mxu2 %v513_v61  ;;  %2983 = vmatpush.msra.mxu1 %v577_v0  ;;  %v391_v43 = vld [vmem:[%s9365_s4 + $0x108] sm:$0xff]  ;;  %v501_v61 = vld [vmem:[%s9365_s4 + $0x478] sm:$0xff] }
 0x1e4   :  { %2891 = vmatpush.msra.mxu3 %v401_v1  ;;  %2924 = vmatpush.msra.mxu0 %v479_v4  ;;  %v565_v0 = vld [vmem:[%s9365_s4 + $0x678] sm:$0xff]  ;;  %v467_v4 = vld [vmem:[%s9365_s4 + $0x368] sm:$0xff] }
 0x1e5   :  { %2944 = vmatpush.msra.mxu2 %v511_v5  ;;  %2984 = vmatpush.msra.mxu1 %v575_v6  ;;  %v549_v1 = vld [vmem:[%s9365_s4 + $0x5f8] sm:$0xff]  ;;  %v499_v5 = vld [vmem:[%s9365_s4 + $0x468] sm:$0xff] }
 0x1e6   :  { %2892 = vmatpush.msra.mxu3 %v399_v7  ;;  %2925 = vmatpush.msra.mxu0 %v477_v8  ;;  %v563_v6 = vld [vmem:[%s9365_s4 + $0x668] sm:$0xff]  ;;  %v465_v8 = vld [vmem:[%s9365_s4 + $0x358] sm:$0xff] }
 0x1e7   :  { %2945 = vmatpush.msra.mxu2 %v509_v9  ;;  %2985 = vmatpush.msra.mxu1 %v573_v10  ;;  %v547_v7 = vld [vmem:[%s9365_s4 + $0x5e8] sm:$0xff]  ;;  %v497_v9 = vld [vmem:[%s9365_s4 + $0x458] sm:$0xff] }
 0x1e8   :  { %2893 = vmatpush.msra.mxu3 %v397_v11  ;;  %2926 = vmatpush.msra.mxu0 %v475_v12  ;;  %v561_v10 = vld [vmem:[%s9365_s4 + $0x658] sm:$0xff]  ;;  %v463_v12 = vld [vmem:[%s9365_s4 + $0x348] sm:$0xff] }
 0x1e9   :  { %2946 = vmatpush.msra.mxu2 %v507_v13  ;;  %2986 = vmatpush.msra.mxu1 %v571_v16  ;;  %v545_v11 = vld [vmem:[%s9365_s4 + $0x5d8] sm:$0xff]  ;;  %v495_v13 = vld [vmem:[%s9365_s4 + $0x448] sm:$0xff] }
 0x1ea   :  { %2894 = vmatpush.msra.mxu3 %v395_v23  ;;  %2927 = vmatpush.msra.mxu0 %v473_v28  ;;  %v559_v16 = vld [vmem:[%s9365_s4 + $0x648] sm:$0xff]  ;;  %v461_v28 = vld [vmem:[%s9365_s4 + $0x338] sm:$0xff] }
 0x1eb   :  { %2947 = vmatpush.msra.mxu2 %v505_v31  ;;  %2987 = vmatpush.msra.mxu1 %v569_v32  ;;  %v543_v23 = vld [vmem:[%s9365_s4 + $0x5c8] sm:$0xff]  ;;  %v493_v31 = vld [vmem:[%s9365_s4 + $0x438] sm:$0xff] }
 0x1ec   :  { %2895 = vmatpush.msra.mxu3 %v393_v39  ;;  %2928 = vmatpush.msra.mxu0 %v471_v40  ;;  %v557_v32 = vld [vmem:[%s9365_s4 + $0x638] sm:$0xff]  ;;  %v459_v40 = vld [vmem:[%s9365_s4 + $0x328] sm:$0xff] }
 0x1ed   :  { %2948 = vmatpush.msra.mxu2 %v503_v41  ;;  %2988 = vmatpush.msra.mxu1 %v567_v42  ;;  %v541_v39 = vld [vmem:[%s9365_s4 + $0x5b8] sm:$0xff]  ;;  %v491_v41 = vld [vmem:[%s9365_s4 + $0x428] sm:$0xff] }
 0x1ee   :  { %2896 = vmatpush.msra.mxu3 %v391_v43  ;;  %2929 = vmatpush.msra.mxu0 %v469_v60  ;;  %v555_v42 = vld [vmem:[%s9365_s4 + $0x628] sm:$0xff]  ;;  %v457_v60 = vld [vmem:[%s9365_s4 + $0x318] sm:$0xff] }
 0x1ef   :  { %2949 = vmatpush.msra.mxu2 %v501_v61  ;;  %2989 = vmatpush.msra.mxu1 %v565_v0  ;;  %v539_v43 = vld [vmem:[%s9365_s4 + $0x5a8] sm:$0xff]  ;;  %v489_v61 = vld [vmem:[%s9365_s4 + $0x418] sm:$0xff] }
 0x1f0   :  { %2961 = vmatpush.msrb.mxu3 %v549_v1  ;;  %2930 = vmatpush.msra.mxu0 %v467_v4  ;;  %v553_v0 = vld [vmem:[%s9365_s4 + $0x618] sm:$0xff]  ;;  %v455_v4 = vld [vmem:[%s9365_s4 + $0x308] sm:$0xff] }
 0x1f1   :  { %2950 = vmatpush.msra.mxu2 %v499_v5  ;;  %2990 = vmatpush.msra.mxu1 %v563_v6  ;;  %v537_v1 = vld [vmem:[%s9365_s4 + $0x598] sm:$0xff]  ;;  %v487_v5 = vld [vmem:[%s9365_s4 + $0x408] sm:$0xff] }
 0x1f2   :  { %2962 = vmatpush.msrb.mxu3 %v547_v7  ;;  %2931 = vmatpush.msra.mxu0 %v465_v8  ;;  %v551_v6 = vld [vmem:[%s9365_s4 + $0x608] sm:$0xff]  ;;  %v613_v8 = vld [vmem:[%s9365_s4 + $0x7f8] sm:$0xff] }
 0x1f3   :  { %2951 = vmatpush.msra.mxu2 %v497_v9  ;;  %2991 = vmatpush.msra.mxu1 %v561_v10  ;;  %v535_v7 = vld [vmem:[%s9365_s4 + $0x588] sm:$0xff]  ;;  %v645_v9 = vld [vmem:[%s9365_s4 + $0x8f8] sm:$0xff] }
 0x1f4   :  { %2963 = vmatpush.msrb.mxu3 %v545_v11  ;;  %2932 = vmatpush.msra.mxu0 %v463_v12  ;;  %v709_v10 = vld [vmem:[%s9365_s4 + $0xaf8] sm:$0xff]  ;;  %v611_v12 = vld [vmem:[%s9365_s4 + $0x7e8] sm:$0xff] }
 0x1f5   :  { %2952 = vmatpush.msra.mxu2 %v495_v13  ;;  %2992 = vmatpush.msra.mxu1 %v559_v16  ;;  %v533_v11 = vld [vmem:[%s9365_s4 + $0x578] sm:$0xff]  ;;  %v643_v13 = vld [vmem:[%s9365_s4 + $0x8e8] sm:$0xff] }
 0x1f6   :  { %2964 = vmatpush.msrb.mxu3 %v543_v23  ;;  %2933 = vmatpush.msra.mxu0 %v461_v28  ;;  %v531_v16 = vld [vmem:[%s9365_s4 + $0x568] sm:$0xff]  ;;  %v641_v23 = vld [vmem:[%s9365_s4 + $0x8d8] sm:$0xff] }
 0x1f7   :  { %2953 = vmatpush.msra.mxu2 %v493_v31  ;;  %2993 = vmatpush.msra.mxu1 %v557_v32  ;;  %v705_v28 = vld [vmem:[%s9365_s4 + $0xad8] sm:$0xff]  ;;  %v607_v31 = vld [vmem:[%s9365_s4 + $0x7c8] sm:$0xff] }
 0x1f8   :  { %2965 = vmatpush.msrb.mxu3 %v541_v39  ;;  %2934 = vmatpush.msra.mxu0 %v459_v40  ;;  %v529_v32 = vld [vmem:[%s9365_s4 + $0x558] sm:$0xff]  ;;  %v639_v39 = vld [vmem:[%s9365_s4 + $0x8c8] sm:$0xff] }
 0x1f9   :  { %2954 = vmatpush.msra.mxu2 %v491_v41  ;;  %2994 = vmatpush.msra.mxu1 %v555_v42  ;;  %v703_v40 = vld [vmem:[%s9365_s4 + $0xac8] sm:$0xff]  ;;  %v605_v41 = vld [vmem:[%s9365_s4 + $0x7b8] sm:$0xff] }
 0x1fa   :  { %2966 = vmatpush.msrb.mxu3 %v539_v43  ;;  %2935 = vmatpush.msra.mxu0 %v457_v60  ;;  %v637_v42 = vld [vmem:[%s9365_s4 + $0x8b8] sm:$0xff] }
 0x1fb   :  { %2955 = vmatpush.msra.mxu2 %v489_v61  ;;  %2995 = vmatpush.msra.mxu1 %v553_v0  ;;  %v701_v43 = vld [vmem:[%s9365_s4 + $0xab8] sm:$0xff]  ;;  %v603_v61 = vld [vmem:[%s9365_s4 + $0x7a8] sm:$0xff] }
 0x1fc   :  { %2967 = vmatpush.msrb.mxu3 %v537_v1  ;;  %2936 = vmatpush.msra.mxu0 %v455_v4  ;;  %v525_v60 = vld [vmem:[%s9365_s4 + $0x538] sm:$0xff]  ;;  %v635_v0 = vld [vmem:[%s9365_s4 + $0x8a8] sm:$0xff] }
 0x1fd   :  { %2956 = vmatpush.msra.mxu2 %v487_v5  ;;  %2996 = vmatpush.msra.mxu1 %v551_v6  ;;  %v699_v1 = vld [vmem:[%s9365_s4 + $0xaa8] sm:$0xff]  ;;  %v601_v5 = vld [vmem:[%s9365_s4 + $0x798] sm:$0xff] }
 0x1fe   :  { %2877 = vmatmul.f32.vlgmr.msrb.gmra.mxu2 %v4727_v18  ;;  %2917 = vmatmul.f32.vlgmr.msrb.gmra.mxu1 %v4725_v17  ;;  %v707_v18 = vld [vmem:[%s9365_s4 + $0xae8] sm:$0xff]  ;;  %v609_v17 = vld [vmem:[%s9365_s4 + $0x7d8] sm:$0xff] }
 0x1ff   :  { %2968 = vmatpush.msrb.mxu3 %v535_v7  ;;  %3001 = vmatpush.msrb.mxu0 %v613_v8  ;;  %v523_v4 = vld [vmem:[%s9365_s4 + $0x528] sm:$0xff]  ;;  %v633_v6 = vld [vmem:[%s9365_s4 + $0x898] sm:$0xff] }
 0x200   :  { %3021 = vmatpush.msrb.mxu2 %v645_v9  ;;  %3061 = vmatpush.msrb.mxu1 %v709_v10  ;;  %v697_v7 = vld [vmem:[%s9365_s4 + $0xa98] sm:$0xff]  ;;  %v599_v8 = vld [vmem:[%s9365_s4 + $0x788] sm:$0xff] }
 0x201   :  { %2969 = vmatpush.msrb.mxu3 %v533_v11  ;;  %3002 = vmatpush.msrb.mxu0 %v611_v12  ;;  %v631_v9 = vld [vmem:[%s9365_s4 + $0x888] sm:$0xff]  ;;  %v597_v12 = vld [vmem:[%s9365_s4 + $0x778] sm:$0xff] }
 0x202   :  { %3022 = vmatpush.msrb.mxu2 %v643_v13  ;;  %3062 = vmatpush.msrb.mxu1 %v707_v18  ;;  %v695_v10 = vld [vmem:[%s9365_s4 + $0xa88] sm:$0xff]  ;;  %v629_v13 = vld [vmem:[%s9365_s4 + $0x878] sm:$0xff] }
 0x203   :  { %2897 = vmatmul.f32.vlgmr.msra.gmra.mxu3 %v4729_v19  ;;  %3003 = vmatpush.msrb.mxu0 %v609_v17  ;;  %v527_v19 = vld [vmem:[%s9365_s4 + $0x548] sm:$0xff]  ;;  %v693_v18 = vld [vmem:[%s9365_s4 + $0xa78] sm:$0xff] }
 0x204   :  { %2970 = vmatpush.msrb.mxu3 %v531_v16  ;;  %3023 = vmatpush.msrb.mxu2 %v641_v23  ;;  %v519_v11 = vld [vmem:[%s9365_s4 + $0x508] sm:$0xff] }
 0x205   :  { %3063 = vmatpush.msrb.mxu1 %v705_v28  ;;  %3004 = vmatpush.msrb.mxu0 %v607_v31  ;;  %v595_v17 = vld [vmem:[%s9365_s4 + $0x768] sm:$0xff]  ;;  %v593_v31 = vld [vmem:[%s9365_s4 + $0x758] sm:$0xff] }
 0x206   :  { %2971 = vmatpush.msrb.mxu3 %v529_v32  ;;  %3024 = vmatpush.msrb.mxu2 %v639_v39  ;;  %v627_v16 = vld [vmem:[%s9365_s4 + $0x868] sm:$0xff]  ;;  %v625_v32 = vld [vmem:[%s9365_s4 + $0x858] sm:$0xff] }
 0x207   :  { %3064 = vmatpush.msrb.mxu1 %v703_v40  ;;  %3005 = vmatpush.msrb.mxu0 %v605_v41  ;;  %v691_v23 = vld [vmem:[%s9365_s4 + $0xa68] sm:$0xff]  ;;  %v689_v39 = vld [vmem:[%s9365_s4 + $0xa58] sm:$0xff] }
 0x208   :  { %2972 = vmatpush.msrb.mxu3 %v527_v19  ;;  %3025 = vmatpush.msrb.mxu2 %v637_v42  ;;  %v675_v28 = vld [vmem:[%s9365_s4 + $0x9e8] sm:$0xff] }
 0x209   :  { %3065 = vmatpush.msrb.mxu1 %v701_v43  ;;  %2957 = vmatmul.f32.vlgmr.msra.gmra.mxu2 %v4822_v53  ;;  %v521_v53 = vld [vmem:[%s9365_s4 + $0x518] sm:$0xff]  ;;  %v591_v40 = vld [vmem:[%s9365_s4 + $0x748] sm:$0xff] }
 0x20a   :  { %2973 = vmatpush.msrb.mxu3 %v525_v60  ;;  %3006 = vmatpush.msrb.mxu0 %v603_v61  ;;  %v623_v41 = vld [vmem:[%s9365_s4 + $0x848] sm:$0xff]  ;;  %v589_v43 = vld [vmem:[%s9365_s4 + $0x738] sm:$0xff] }
 0x20b   :  { %3026 = vmatpush.msrb.mxu2 %v635_v0  ;;  %3066 = vmatpush.msrb.mxu1 %v699_v1  ;;  %v687_v19 = vld [vmem:[%s9365_s4 + $0xa48] sm:$0xff]  ;;  %v621_v60 = vld [vmem:[%s9365_s4 + $0x838] sm:$0xff] }
 0x20c   :  { %2974 = vmatpush.msrb.mxu3 %v523_v4  ;;  %3007 = vmatpush.msrb.mxu0 %v601_v5  ;;  %v671_v42 = vld [vmem:[%s9365_s4 + $0x9c8] sm:$0xff]  ;;  %v685_v61 = vld [vmem:[%s9365_s4 + $0xa38] sm:$0xff] }
 0x20d   :  { %3027 = vmatpush.msrb.mxu2 %v633_v6  ;;  %3067 = vmatpush.msrb.mxu1 %v697_v7  ;;  %v669_v0 = vld [vmem:[%s9365_s4 + $0x9b8] sm:$0xff]  ;;  %v587_v1 = vld [vmem:[%s9365_s4 + $0x728] sm:$0xff] }
 0x20e   :  { %2937 = vmatmul.f32.vlgmr.msra.gmra.mxu0 %v4737_v20  ;;  %2975 = vmatpush.msrb.mxu3 %v521_v53  ;;  %v677_v20 = vld [vmem:[%s9365_s4 + $0x9f8] sm:$0xff]  ;;  %v619_v4 = vld [vmem:[%s9365_s4 + $0x828] sm:$0xff] }
 0x20f   :  { %3008 = vmatpush.msrb.mxu0 %v599_v8  ;;  %3028 = vmatpush.msrb.mxu2 %v631_v9  ;;  %v683_v5 = vld [vmem:[%s9365_s4 + $0xa28] sm:$0xff]  ;;  %v585_v7 = vld [vmem:[%s9365_s4 + $0x718] sm:$0xff] }
 0x210   :  { %3068 = vmatpush.msrb.mxu1 %v695_v10  ;;  %2976 = vmatpush.msrb.mxu3 %v519_v11  ;;  %v667_v6 = vld [vmem:[%s9365_s4 + $0x9a8] sm:$0xff]  ;;  %v617_v53 = vld [vmem:[%s9365_s4 + $0x818] sm:$0xff] }
 0x211   :  { %3009 = vmatpush.msrb.mxu0 %v597_v12  ;;  %3029 = vmatpush.msrb.mxu2 %v629_v13  ;;  %v681_v8 = vld [vmem:[%s9365_s4 + $0xa18] sm:$0xff]  ;;  %v615_v10 = vld [vmem:[%s9365_s4 + $0x808] sm:$0xff] }
 0x212   :  { %3069 = vmatpush.msrb.mxu1 %v693_v18  ;;  %2977 = vmatmul.f32.vlgmr.msrb.gmra.mxu3 %v4829_v56  ;;  %v673_v56 = vld [vmem:[%s9365_s4 + $0x9d8] sm:$0xff]  ;;  %v679_v11 = vld [vmem:[%s9365_s4 + $0xa08] sm:$0xff] }
 0x213   :  { %3041 = vmatpush.msra.mxu3 %v677_v20  ;;  %3010 = vmatpush.msrb.mxu0 %v595_v17  ;;  %v665_v9 = vld [vmem:[%s9365_s4 + $0x998] sm:$0xff]  ;;  %v663_v12 = vld [vmem:[%s9365_s4 + $0x988] sm:$0xff] }
 0x214   :  { %3030 = vmatpush.msrb.mxu2 %v627_v16  ;;  %3070 = vmatpush.msrb.mxu1 %v691_v23  ;;  %v741_v13 = vld [vmem:[%s9365_s4 + $0xbf8] sm:$0xff]  ;;  %v739_v16 = vld [vmem:[%s9365_s4 + $0xbe8] sm:$0xff] }
 0x215   :  { %3042 = vmatpush.msra.mxu3 %v675_v28  ;;  %3011 = vmatpush.msrb.mxu0 %v593_v31  ;;  %v773_v18 = vld [vmem:[%s9365_s4 + $0xcf8] sm:$0xff]  ;;  %v771_v23 = vld [vmem:[%s9365_s4 + $0xce8] sm:$0xff] }
 0x216   :  { %3031 = vmatpush.msrb.mxu2 %v625_v32  ;;  %3071 = vmatpush.msrb.mxu1 %v689_v39  ;;  %v837_v20 = vld [vmem:[%s9365_s4 + $0xef8] sm:$0xff]  ;;  %v659_v28 = vld [vmem:[%s9365_s4 + $0x968] sm:$0xff] }
 0x217   :  { %3043 = vmatpush.msra.mxu3 %v673_v56  ;;  %3012 = vmatpush.msrb.mxu0 %v591_v40  ;;  %v661_v17 = vld [vmem:[%s9365_s4 + $0x978] sm:$0xff]  ;;  %v735_v56 = vld [vmem:[%s9365_s4 + $0xbc8] sm:$0xff] }
 0x218   :  { %3032 = vmatpush.msrb.mxu2 %v623_v41  ;;  %3072 = vmatpush.msrb.mxu1 %v687_v19  ;;  %v769_v31 = vld [vmem:[%s9365_s4 + $0xcd8] sm:$0xff]  ;;  %v767_v40 = vld [vmem:[%s9365_s4 + $0xcc8] sm:$0xff] }
 0x219   :  { %3044 = vmatpush.msra.mxu3 %v671_v42  ;;  %3013 = vmatpush.msrb.mxu0 %v589_v43  ;;  %v833_v32 = vld [vmem:[%s9365_s4 + $0xed8] sm:$0xff]  ;;  %v831_v41 = vld [vmem:[%s9365_s4 + $0xec8] sm:$0xff] }
 0x21a   :  { %3033 = vmatpush.msrb.mxu2 %v621_v60  ;;  %3073 = vmatpush.msrb.mxu1 %v685_v61  ;;  %v657_v39 = vld [vmem:[%s9365_s4 + $0x958] sm:$0xff]  ;;  %v655_v19 = vld [vmem:[%s9365_s4 + $0x948] sm:$0xff] }
 0x21b   :  { %2997 = vmatmul.f32.vlgmr.msra.gmra.mxu1 %v4817_v51  ;;  %3045 = vmatpush.msra.mxu3 %v669_v0  ;;  %v583_v51 = vld [vmem:[%s9365_s4 + $0x708] sm:$0xff]  ;;  %v733_v42 = vld [vmem:[%s9365_s4 + $0xbb8] sm:$0xff] }
 0x21c   :  { %3014 = vmatpush.msrb.mxu0 %v587_v1  ;;  %3034 = vmatpush.msrb.mxu2 %v619_v4  ;;  %v765_v43 = vld [vmem:[%s9365_s4 + $0xcb8] sm:$0xff]  ;;  %v731_v0 = vld [vmem:[%s9365_s4 + $0xba8] sm:$0xff] }
 0x21d   :  { %3074 = vmatpush.msrb.mxu1 %v683_v5  ;;  %3046 = vmatpush.msra.mxu3 %v667_v6  ;;  %v829_v60 = vld [vmem:[%s9365_s4 + $0xeb8] sm:$0xff]  ;;  %v763_v1 = vld [vmem:[%s9365_s4 + $0xca8] sm:$0xff] }
 0x21e   :  { %3015 = vmatpush.msrb.mxu0 %v585_v7  ;;  %3035 = vmatpush.msrb.mxu2 %v617_v53  ;;  %v653_v61 = vld [vmem:[%s9365_s4 + $0x938] sm:$0xff]  ;;  %v827_v4 = vld [vmem:[%s9365_s4 + $0xea8] sm:$0xff] }
 0x21f   :  { %3075 = vmatpush.msrb.mxu1 %v681_v8  ;;  %3047 = vmatpush.msra.mxu3 %v665_v9  ;;  %v651_v5 = vld [vmem:[%s9365_s4 + $0x928] sm:$0xff]  ;;  %v729_v6 = vld [vmem:[%s9365_s4 + $0xb98] sm:$0xff] }
 0x220   :  { %3016 = vmatpush.msrb.mxu0 %v583_v51  ;;  %3036 = vmatpush.msrb.mxu2 %v615_v10  ;;  %v761_v7 = vld [vmem:[%s9365_s4 + $0xc98] sm:$0xff]  ;;  %v727_v9 = vld [vmem:[%s9365_s4 + $0xb88] sm:$0xff] }
 0x221   :  { %3076 = vmatpush.msrb.mxu1 %v679_v11  ;;  %3017 = vmatmul.f32.vlgmr.msrb.gmra.mxu0 %v4827_v55  ;;  %v835_v55 = vld [vmem:[%s9365_s4 + $0xee8] sm:$0xff]  ;;  %v825_v53 = vld [vmem:[%s9365_s4 + $0xe98] sm:$0xff] }
 0x222   :  { %3037 = vmatmul.f32.vlgmr.msrb.gmra.mxu2 %v5115_v29  ;;  %3048 = vmatpush.msra.mxu3 %v663_v12  ;;  %v737_v29 = vld [vmem:[%s9365_s4 + $0xbd8] sm:$0xff]  ;;  %v759_v51 = vld [vmem:[%s9365_s4 + $0xc88] sm:$0xff] }
 0x223   :  { %3081 = vmatpush.msra.mxu0 %v741_v13  ;;  %3101 = vmatpush.msra.mxu2 %v773_v18  ;;  %v649_v8 = vld [vmem:[%s9365_s4 + $0x918] sm:$0xff]  ;;  %v823_v10 = vld [vmem:[%s9365_s4 + $0xe88] sm:$0xff] }
 0x224   :  { %3141 = vmatpush.msra.mxu1 %v837_v20  ;;  %3049 = vmatpush.msra.mxu3 %v661_v17  ;;  %v647_v11 = vld [vmem:[%s9365_s4 + $0x908] sm:$0xff]  ;;  %v725_v12 = vld [vmem:[%s9365_s4 + $0xb78] sm:$0xff] }
 0x225   :  { %3082 = vmatpush.msra.mxu0 %v739_v16  ;;  %3102 = vmatpush.msra.mxu2 %v771_v23  ;;  %v757_v13 = vld [vmem:[%s9365_s4 + $0xc78] sm:$0xff]  ;;  %v723_v17 = vld [vmem:[%s9365_s4 + $0xb68] sm:$0xff] }
 0x226   :  { %3142 = vmatpush.msra.mxu1 %v835_v55  ;;  %3050 = vmatpush.msra.mxu3 %v659_v28  ;;  %v821_v18 = vld [vmem:[%s9365_s4 + $0xe78] sm:$0xff]  ;;  %v755_v16 = vld [vmem:[%s9365_s4 + $0xc68] sm:$0xff] }
 0x227   :  { %3083 = vmatpush.msra.mxu0 %v737_v29  ;;  %3103 = vmatpush.msra.mxu2 %v769_v31  ;;  %v805_v20 = vld [vmem:[%s9365_s4 + $0xdf8] sm:$0xff]  ;;  %v819_v23 = vld [vmem:[%s9365_s4 + $0xe68] sm:$0xff] }
 0x228   :  { %3143 = vmatpush.msra.mxu1 %v833_v32  ;;  %3051 = vmatpush.msra.mxu3 %v657_v39  ;;  %v803_v55 = vld [vmem:[%s9365_s4 + $0xde8] sm:$0xff]  ;;  %v721_v28 = vld [vmem:[%s9365_s4 + $0xb58] sm:$0xff] }
 0x229   :  { %3084 = vmatpush.msra.mxu0 %v735_v56  ;;  %3104 = vmatpush.msra.mxu2 %v767_v40  ;;  %v753_v29 = vld [vmem:[%s9365_s4 + $0xc58] sm:$0xff]  ;;  %v719_v32 = vld [vmem:[%s9365_s4 + $0xb48] sm:$0xff] }
 0x22a   :  { %3144 = vmatpush.msra.mxu1 %v831_v41  ;;  %3052 = vmatpush.msra.mxu3 %v655_v19  ;;  %v817_v31 = vld [vmem:[%s9365_s4 + $0xe58] sm:$0xff]  ;;  %v751_v39 = vld [vmem:[%s9365_s4 + $0xc48] sm:$0xff] }
 0x22b   :  { %3085 = vmatpush.msra.mxu0 %v733_v42  ;;  %3105 = vmatpush.msra.mxu2 %v765_v43  ;;  %v815_v56 = vld [vmem:[%s9365_s4 + $0xe48] sm:$0xff]  ;;  %v717_v41 = vld [vmem:[%s9365_s4 + $0xb38] sm:$0xff] }
 0x22c   :  { %3145 = vmatpush.msra.mxu1 %v829_v60  ;;  %3053 = vmatpush.msra.mxu3 %v653_v61  ;;  %v799_v40 = vld [vmem:[%s9365_s4 + $0xdc8] sm:$0xff]  ;;  %v749_v19 = vld [vmem:[%s9365_s4 + $0xc38] sm:$0xff] }
 0x22d   :  { %3086 = vmatpush.msra.mxu0 %v731_v0  ;;  %3106 = vmatpush.msra.mxu2 %v763_v1  ;;  %v813_v42 = vld [vmem:[%s9365_s4 + $0xe38] sm:$0xff]  ;;  %v715_v60 = vld [vmem:[%s9365_s4 + $0xb28] sm:$0xff] }
 0x22e   :  { %3146 = vmatpush.msra.mxu1 %v827_v4  ;;  %3054 = vmatpush.msra.mxu3 %v651_v5  ;;  %v797_v43 = vld [vmem:[%s9365_s4 + $0xdb8] sm:$0xff]  ;;  %v747_v61 = vld [vmem:[%s9365_s4 + $0xc28] sm:$0xff] }
 0x22f   :  { %3087 = vmatpush.msra.mxu0 %v729_v6  ;;  %3107 = vmatpush.msra.mxu2 %v761_v7  ;;  %v811_v0 = vld [vmem:[%s9365_s4 + $0xe28] sm:$0xff]  ;;  %v713_v4 = vld [vmem:[%s9365_s4 + $0xb18] sm:$0xff] }
 0x230   :  { %3147 = vmatpush.msra.mxu1 %v825_v53  ;;  %3055 = vmatpush.msra.mxu3 %v649_v8  ;;  %v795_v1 = vld [vmem:[%s9365_s4 + $0xda8] sm:$0xff]  ;;  %v745_v5 = vld [vmem:[%s9365_s4 + $0xc18] sm:$0xff] }
 0x231   :  { %3088 = vmatpush.msra.mxu0 %v727_v9  ;;  %3108 = vmatpush.msra.mxu2 %v759_v51  ;;  %v809_v6 = vld [vmem:[%s9365_s4 + $0xe18] sm:$0xff]  ;;  %v743_v53 = vld [vmem:[%s9365_s4 + $0xc08] sm:$0xff] }
 0x232   :  { %3148 = vmatpush.msra.mxu1 %v823_v10  ;;  %3056 = vmatpush.msra.mxu3 %v647_v11  ;;  %v793_v7 = vld [vmem:[%s9365_s4 + $0xd98] sm:$0xff]  ;;  %v807_v8 = vld [vmem:[%s9365_s4 + $0xe08] sm:$0xff] }
 0x233   :  { %3089 = vmatpush.msra.mxu0 %v725_v12  ;;  %3109 = vmatpush.msra.mxu2 %v757_v13  ;;  %v791_v9 = vld [vmem:[%s9365_s4 + $0xd88] sm:$0xff]  ;;  %v869_v51 = vld [vmem:[%s9365_s4 + $0xff8] sm:$0xff] }
 0x234   :  { %3149 = vmatpush.msra.mxu1 %v821_v18  ;;  %3057 = vmatmul.f32.vlgmr.msra.gmra.mxu3 %v5131_v35  ;;  %v801_v35 = vld [vmem:[%s9365_s4 + $0xdd8] sm:$0xff]  ;;  %v867_v13 = vld [vmem:[%s9365_s4 + $0xfe8] sm:$0xff] }
 0x235   :  { %3121 = vmatpush.msrb.mxu3 %v805_v20  ;;  %3090 = vmatpush.msra.mxu0 %v723_v17  ;;  %v901_v10 = vld [vmem:[%s9365_s4 + $0x10f8] sm:$0xff]  ;;  %v899_v18 = vld [vmem:[%s9365_s4 + $0x10e8] sm:$0xff] }
 0x236   :  { %3110 = vmatpush.msra.mxu2 %v755_v16  ;;  %3150 = vmatpush.msra.mxu1 %v819_v23  ;;  %v965_v11 = vld [vmem:[%s9365_s4 + $0x12f8] sm:$0xff]  ;;  %v787_v20 = vld [vmem:[%s9365_s4 + $0xd68] sm:$0xff] }
 0x237   :  { %3122 = vmatpush.msrb.mxu3 %v803_v55  ;;  %3091 = vmatpush.msra.mxu0 %v721_v28  ;;  %v789_v12 = vld [vmem:[%s9365_s4 + $0xd78] sm:$0xff]  ;;  %v863_v55 = vld [vmem:[%s9365_s4 + $0xfc8] sm:$0xff] }
 0x238   :  { %3111 = vmatpush.msra.mxu2 %v753_v29  ;;  %3151 = vmatpush.msra.mxu1 %v817_v31  ;;  %v897_v17 = vld [vmem:[%s9365_s4 + $0x10d8] sm:$0xff]  ;;  %v895_v28 = vld [vmem:[%s9365_s4 + $0x10c8] sm:$0xff] }
 0x239   :  { %3123 = vmatpush.msrb.mxu3 %v801_v35  ;;  %3092 = vmatpush.msra.mxu0 %v719_v32  ;;  %v961_v16 = vld [vmem:[%s9365_s4 + $0x12d8] sm:$0xff]  ;;  %v959_v29 = vld [vmem:[%s9365_s4 + $0x12c8] sm:$0xff] }
 0x23a   :  { %3112 = vmatpush.msra.mxu2 %v751_v39  ;;  %3152 = vmatpush.msra.mxu1 %v815_v56  ;;  %v785_v23 = vld [vmem:[%s9365_s4 + $0xd58] sm:$0xff]  ;;  %v783_v31 = vld [vmem:[%s9365_s4 + $0xd48] sm:$0xff] }
 0x23b   :  { %3124 = vmatpush.msrb.mxu3 %v799_v40  ;;  %3093 = vmatpush.msra.mxu0 %v717_v41  ;;  %v861_v35 = vld [vmem:[%s9365_s4 + $0xfb8] sm:$0xff]  ;;  %v859_v40 = vld [vmem:[%s9365_s4 + $0xfa8] sm:$0xff] }
 0x23c   :  { %3113 = vmatpush.msra.mxu2 %v749_v19  ;;  %3153 = vmatpush.msra.mxu1 %v813_v42  ;;  %v893_v32 = vld [vmem:[%s9365_s4 + $0x10b8] sm:$0xff]  ;;  %v891_v41 = vld [vmem:[%s9365_s4 + $0x10a8] sm:$0xff] }
 0x23d   :  { %3077 = vmatmul.f32.vlgmr.msrb.gmra.mxu1 %v5117_v30  ;;  %3125 = vmatpush.msrb.mxu3 %v797_v43  ;;  %v711_v30 = vld [vmem:[%s9365_s4 + $0xb08] sm:$0xff]  ;;  %v957_v39 = vld [vmem:[%s9365_s4 + $0x12b8] sm:$0xff] }
 0x23e   :  { %3094 = vmatpush.msra.mxu0 %v715_v60  ;;  %3114 = vmatpush.msra.mxu2 %v747_v61  ;;  %v781_v56 = vld [vmem:[%s9365_s4 + $0xd38] sm:$0xff]  ;;  %v955_v19 = vld [vmem:[%s9365_s4 + $0x12a8] sm:$0xff] }
 0x23f   :  { %3154 = vmatpush.msra.mxu1 %v811_v0  ;;  %3126 = vmatpush.msrb.mxu3 %v795_v1  ;;  %v779_v42 = vld [vmem:[%s9365_s4 + $0xd28] sm:$0xff]  ;;  %v857_v43 = vld [vmem:[%s9365_s4 + $0xf98] sm:$0xff] }
 0x240   :  { %3095 = vmatpush.msra.mxu0 %v713_v4  ;;  %3115 = vmatpush.msra.mxu2 %v745_v5  ;;  %v889_v60 = vld [vmem:[%s9365_s4 + $0x1098] sm:$0xff]  ;;  %v855_v1 = vld [vmem:[%s9365_s4 + $0xf88] sm:$0xff] }
 0x241   :  { %3155 = vmatpush.msra.mxu1 %v809_v6  ;;  %3127 = vmatpush.msrb.mxu3 %v793_v7  ;;  %v953_v61 = vld [vmem:[%s9365_s4 + $0x1298] sm:$0xff]  ;;  %v887_v4 = vld [vmem:[%s9365_s4 + $0x1088] sm:$0xff] }
 0x242   :  { %3096 = vmatpush.msra.mxu0 %v711_v30  ;;  %3116 = vmatpush.msra.mxu2 %v743_v53  ;;  %v777_v0 = vld [vmem:[%s9365_s4 + $0xd18] sm:$0xff]  ;;  %v951_v5 = vld [vmem:[%s9365_s4 + $0x1288] sm:$0xff] }
 0x243   :  { %3156 = vmatpush.msra.mxu1 %v807_v8  ;;  %3097 = vmatmul.f32.vlgmr.msra.gmra.mxu0 %v5135_v36  ;;  %v963_v36 = vld [vmem:[%s9365_s4 + $0x12e8] sm:$0xff]  ;;  %v853_v7 = vld [vmem:[%s9365_s4 + $0xf78] sm:$0xff] }
 0x244   :  { %3117 = vmatmul.f32.vlgmr.msra.gmra.mxu2 %v5166_v50  ;;  %3128 = vmatpush.msrb.mxu3 %v791_v9  ;;  %v865_v50 = vld [vmem:[%s9365_s4 + $0xfd8] sm:$0xff]  ;;  %v775_v6 = vld [vmem:[%s9365_s4 + $0xd08] sm:$0xff] }
 0x245   :  { %3161 = vmatpush.msrb.mxu0 %v869_v51  ;;  %3181 = vmatpush.msrb.mxu2 %v901_v10  ;;  %v885_v30 = vld [vmem:[%s9365_s4 + $0x1078] sm:$0xff]  ;;  %v851_v9 = vld [vmem:[%s9365_s4 + $0xf68] sm:$0xff] }
 0x246   :  { %3221 = vmatpush.msrb.mxu1 %v965_v11  ;;  %3129 = vmatpush.msrb.mxu3 %v789_v12  ;;  %v949_v53 = vld [vmem:[%s9365_s4 + $0x1278] sm:$0xff]  ;;  %v883_v51 = vld [vmem:[%s9365_s4 + $0x1068] sm:$0xff] }
 0x247   :  { %3162 = vmatpush.msrb.mxu0 %v867_v13  ;;  %3182 = vmatpush.msrb.mxu2 %v899_v18  ;;  %v933_v8 = vld [vmem:[%s9365_s4 + $0x11f8] sm:$0xff]  ;;  %v947_v10 = vld [vmem:[%s9365_s4 + $0x1268] sm:$0xff] }
 0x248   :  { %3222 = vmatpush.msrb.mxu1 %v963_v36  ;;  %3130 = vmatpush.msrb.mxu3 %v787_v20  ;;  %v931_v11 = vld [vmem:[%s9365_s4 + $0x11e8] sm:$0xff]  ;;  %v849_v12 = vld [vmem:[%s9365_s4 + $0xf58] sm:$0xff] }
 0x249   :  { %3163 = vmatpush.msrb.mxu0 %v865_v50  ;;  %3183 = vmatpush.msrb.mxu2 %v897_v17  ;;  %v881_v13 = vld [vmem:[%s9365_s4 + $0x1058] sm:$0xff]  ;;  %v847_v36 = vld [vmem:[%s9365_s4 + $0xf48] sm:$0xff] }
 0x24a   :  { %3223 = vmatpush.msrb.mxu1 %v961_v16  ;;  %3131 = vmatpush.msrb.mxu3 %v785_v23  ;;  %v945_v18 = vld [vmem:[%s9365_s4 + $0x1258] sm:$0xff]  ;;  %v879_v20 = vld [vmem:[%s9365_s4 + $0x1048] sm:$0xff] }
 0x24b   :  { %3164 = vmatpush.msrb.mxu0 %v863_v55  ;;  %3184 = vmatpush.msrb.mxu2 %v895_v28  ;;  %v943_v50 = vld [vmem:[%s9365_s4 + $0x1248] sm:$0xff]  ;;  %v845_v16 = vld [vmem:[%s9365_s4 + $0xf38] sm:$0xff] }
 0x24c   :  { %3224 = vmatpush.msrb.mxu1 %v959_v29  ;;  %3132 = vmatpush.msrb.mxu3 %v783_v31  ;;  %v927_v17 = vld [vmem:[%s9365_s4 + $0x11c8] sm:$0xff]  ;;  %v877_v23 = vld [vmem:[%s9365_s4 + $0x1038] sm:$0xff] }
 0x24d   :  { %3165 = vmatpush.msrb.mxu0 %v861_v35  ;;  %3185 = vmatpush.msrb.mxu2 %v893_v32  ;;  %v941_v55 = vld [vmem:[%s9365_s4 + $0x1238] sm:$0xff]  ;;  %v843_v29 = vld [vmem:[%s9365_s4 + $0xf28] sm:$0xff] }
 0x24e   :  { %3225 = vmatpush.msrb.mxu1 %v957_v39  ;;  %3133 = vmatpush.msrb.mxu3 %v781_v56  ;;  %v925_v28 = vld [vmem:[%s9365_s4 + $0x11b8] sm:$0xff]  ;;  %v875_v31 = vld [vmem:[%s9365_s4 + $0x1028] sm:$0xff] }
 0x24f   :  { %3166 = vmatpush.msrb.mxu0 %v859_v40  ;;  %3186 = vmatpush.msrb.mxu2 %v891_v41  ;;  %v939_v35 = vld [vmem:[%s9365_s4 + $0x1228] sm:$0xff]  ;;  %v841_v39 = vld [vmem:[%s9365_s4 + $0xf18] sm:$0xff] }
 0x250   :  { %3226 = vmatpush.msrb.mxu1 %v955_v19  ;;  %3134 = vmatpush.msrb.mxu3 %v779_v42  ;;  %v923_v32 = vld [vmem:[%s9365_s4 + $0x11a8] sm:$0xff]  ;;  %v873_v56 = vld [vmem:[%s9365_s4 + $0x1018] sm:$0xff] }
 0x251   :  { %3167 = vmatpush.msrb.mxu0 %v857_v43  ;;  %3187 = vmatpush.msrb.mxu2 %v889_v60  ;;  %v937_v40 = vld [vmem:[%s9365_s4 + $0x1218] sm:$0xff]  ;;  %v871_v19 = vld [vmem:[%s9365_s4 + $0x1008] sm:$0xff] }
 0x252   :  { %3227 = vmatpush.msrb.mxu1 %v953_v61  ;;  %3135 = vmatpush.msrb.mxu3 %v777_v0  ;;  %v921_v41 = vld [vmem:[%s9365_s4 + $0x1198] sm:$0xff]  ;;  %v935_v42 = vld [vmem:[%s9365_s4 + $0x1208] sm:$0xff] }
 0x253   :  { %3168 = vmatpush.msrb.mxu0 %v855_v1  ;;  %3188 = vmatpush.msrb.mxu2 %v887_v4  ;;  %v919_v43 = vld [vmem:[%s9365_s4 + $0x1188] sm:$0xff]  ;;  %v997_v60 = vld [vmem:[%s9365_s4 + $0x13f8] sm:$0xff] }
 0x254   :  { %3228 = vmatpush.msrb.mxu1 %v951_v5  ;;  %3136 = vmatpush.msrb.mxu3 %v775_v6  ;;  %v1029_v61 = vld [vmem:[%s9365_s4 + $0x14f8] sm:$0xff]  ;;  %v995_v4 = vld [vmem:[%s9365_s4 + $0x13e8] sm:$0xff] }
 0x255   :  { %3169 = vmatpush.msrb.mxu0 %v853_v7  ;;  %3189 = vmatpush.msrb.mxu2 %v885_v30  ;;  %v1093_v0 = vld [vmem:[%s9365_s4 + $0x16f8] sm:$0xff]  ;;  %v1027_v5 = vld [vmem:[%s9365_s4 + $0x14e8] sm:$0xff] }
 0x256   :  { %3229 = vmatpush.msrb.mxu1 %v949_v53  ;;  %3137 = vmatmul.f32.vlgmr.msrb.gmra.mxu3 %v5170_v54  ;;  %v929_v54 = vld [vmem:[%s9365_s4 + $0x11d8] sm:$0xff]  ;;  %v915_v6 = vld [vmem:[%s9365_s4 + $0x1168] sm:$0xff] }
 0x257   :  { %3201 = vmatpush.msra.mxu3 %v933_v8  ;;  %3170 = vmatpush.msrb.mxu0 %v851_v9  ;;  %v917_v1 = vld [vmem:[%s9365_s4 + $0x1178] sm:$0xff]  ;;  %v991_v8 = vld [vmem:[%s9365_s4 + $0x13c8] sm:$0xff] }
 0x258   :  { %3190 = vmatpush.msrb.mxu2 %v883_v51  ;;  %3230 = vmatpush.msrb.mxu1 %v947_v10  ;;  %v1025_v7 = vld [vmem:[%s9365_s4 + $0x14d8] sm:$0xff]  ;;  %v1023_v9 = vld [vmem:[%s9365_s4 + $0x14c8] sm:$0xff] }
 0x259   :  { %3202 = vmatpush.msra.mxu3 %v931_v11  ;;  %3171 = vmatpush.msrb.mxu0 %v849_v12  ;;  %v1089_v30 = vld [vmem:[%s9365_s4 + $0x16d8] sm:$0xff]  ;;  %v1087_v51 = vld [vmem:[%s9365_s4 + $0x16c8] sm:$0xff] }
 0x25a   :  { %3191 = vmatpush.msrb.mxu2 %v881_v13  ;;  %3231 = vmatpush.msrb.mxu1 %v945_v18  ;;  %v913_v53 = vld [vmem:[%s9365_s4 + $0x1158] sm:$0xff]  ;;  %v911_v10 = vld [vmem:[%s9365_s4 + $0x1148] sm:$0xff] }
 0x25b   :  { %3203 = vmatpush.msra.mxu3 %v929_v54  ;;  %3172 = vmatpush.msrb.mxu0 %v847_v36  ;;  %v989_v11 = vld [vmem:[%s9365_s4 + $0x13b8] sm:$0xff]  ;;  %v987_v54 = vld [vmem:[%s9365_s4 + $0x13a8] sm:$0xff] }
 0x25c   :  { %3192 = vmatpush.msrb.mxu2 %v879_v20  ;;  %3232 = vmatpush.msrb.mxu1 %v943_v50  ;;  %v1021_v12 = vld [vmem:[%s9365_s4 + $0x14b8] sm:$0xff]  ;;  %v1019_v36 = vld [vmem:[%s9365_s4 + $0x14a8] sm:$0xff] }
 0x25d   :  { %3204 = vmatpush.msra.mxu3 %v927_v17  ;;  %3173 = vmatpush.msrb.mxu0 %v845_v16  ;;  %v1085_v13 = vld [vmem:[%s9365_s4 + $0x16b8] sm:$0xff]  ;;  %v1083_v20 = vld [vmem:[%s9365_s4 + $0x16a8] sm:$0xff] }
 0x25e   :  { %3193 = vmatpush.msrb.mxu2 %v877_v23  ;;  %3233 = vmatpush.msrb.mxu1 %v941_v55  ;;  %v909_v18 = vld [vmem:[%s9365_s4 + $0x1138] sm:$0xff]  ;;  %v907_v50 = vld [vmem:[%s9365_s4 + $0x1128] sm:$0xff] }
 0x25f   :  { %3157 = vmatmul.f32.vlgmr.msra.gmra.mxu1 %v5168_v52  ;;  %3205 = vmatpush.msra.mxu3 %v925_v28  ;;  %v839_v52 = vld [vmem:[%s9365_s4 + $0xf08] sm:$0xff]  ;;  %v985_v17 = vld [vmem:[%s9365_s4 + $0x1398] sm:$0xff] }
 0x260   :  { %3174 = vmatpush.msrb.mxu0 %v843_v29  ;;  %3194 = vmatpush.msrb.mxu2 %v875_v31  ;;  %v1017_v16 = vld [vmem:[%s9365_s4 + $0x1498] sm:$0xff]  ;;  %v983_v28 = vld [vmem:[%s9365_s4 + $0x1388] sm:$0xff] }
 0x261   :  { %3234 = vmatpush.msrb.mxu1 %v939_v35  ;;  %3206 = vmatpush.msra.mxu3 %v923_v32  ;;  %v1081_v23 = vld [vmem:[%s9365_s4 + $0x1698] sm:$0xff]  ;;  %v1015_v29 = vld [vmem:[%s9365_s4 + $0x1488] sm:$0xff] }
 0x262   :  { %3175 = vmatpush.msrb.mxu0 %v841_v39  ;;  %3195 = vmatpush.msrb.mxu2 %v873_v56  ;;  %v905_v55 = vld [vmem:[%s9365_s4 + $0x1118] sm:$0xff]  ;;  %v1079_v31 = vld [vmem:[%s9365_s4 + $0x1688] sm:$0xff] }
 0x263   :  { %3235 = vmatpush.msrb.mxu1 %v937_v40  ;;  %3207 = vmatpush.msra.mxu3 %v921_v41  ;;  %v903_v35 = vld [vmem:[%s9365_s4 + $0x1108] sm:$0xff]  ;;  %v981_v32 = vld [vmem:[%s9365_s4 + $0x1378] sm:$0xff] }
 0x264   :  { %3176 = vmatpush.msrb.mxu0 %v839_v52  ;;  %3196 = vmatpush.msrb.mxu2 %v871_v19  ;;  %v1013_v39 = vld [vmem:[%s9365_s4 + $0x1478] sm:$0xff]  ;;  %v979_v41 = vld [vmem:[%s9365_s4 + $0x1368] sm:$0xff] }
 0x265   :  { %3236 = vmatpush.msrb.mxu1 %v935_v42  ;;  %3177 = vmatmul.f32.vlgmr.msrb.gmra.mxu0 %v5178_v59  ;;  %v1091_v59 = vld [vmem:[%s9365_s4 + $0x16e8] sm:$0xff]  ;;  %v1077_v56 = vld [vmem:[%s9365_s4 + $0x1678] sm:$0xff] }
 0x266   :  { %3197 = vmatmul.f32.vlgmr.msrb.gmra.mxu2 %v5529_v14  ;;  %3208 = vmatpush.msra.mxu3 %v919_v43  ;;  %v993_v14 = vld [vmem:[%s9365_s4 + $0x13d8] sm:$0xff]  ;;  %v1011_v52 = vld [vmem:[%s9365_s4 + $0x1468] sm:$0xff] }
 0x267   :  { %3241 = vmatpush.msra.mxu0 %v997_v60  ;;  %3261 = vmatpush.msra.mxu2 %v1029_v61  ;;  %v1061_v40 = vld [vmem:[%s9365_s4 + $0x15f8] sm:$0xff]  ;;  %v1075_v19 = vld [vmem:[%s9365_s4 + $0x1668] sm:$0xff] }
 0x268   :  { %3301 = vmatpush.msra.mxu1 %v1093_v0  ;;  %3209 = vmatpush.msra.mxu3 %v917_v1  ;;  %v1059_v42 = vld [vmem:[%s9365_s4 + $0x15e8] sm:$0xff]  ;;  %v977_v43 = vld [vmem:[%s9365_s4 + $0x1358] sm:$0xff] }
 0x269   :  { %3242 = vmatpush.msra.mxu0 %v995_v4  ;;  %3262 = vmatpush.msra.mxu2 %v1027_v5  ;;  %v1009_v60 = vld [vmem:[%s9365_s4 + $0x1458] sm:$0xff]  ;;  %v975_v0 = vld [vmem:[%s9365_s4 + $0x1348] sm:$0xff] }
 0x26a   :  { %3302 = vmatpush.msra.mxu1 %v1091_v59  ;;  %3210 = vmatpush.msra.mxu3 %v915_v6  ;;  %v1073_v61 = vld [vmem:[%s9365_s4 + $0x1658] sm:$0xff]  ;;  %v1007_v1 = vld [vmem:[%s9365_s4 + $0x1448] sm:$0xff] }
 0x26b   :  { %3243 = vmatpush.msra.mxu0 %v993_v14  ;;  %3263 = vmatpush.msra.mxu2 %v1025_v7  ;;  %v1071_v4 = vld [vmem:[%s9365_s4 + $0x1648] sm:$0xff]  ;;  %v973_v59 = vld [vmem:[%s9365_s4 + $0x1338] sm:$0xff] }
 0x26c   :  { %3303 = vmatpush.msra.mxu1 %v1089_v30  ;;  %3211 = vmatpush.msra.mxu3 %v913_v53  ;;  %v1055_v5 = vld [vmem:[%s9365_s4 + $0x15c8] sm:$0xff]  ;;  %v1005_v6 = vld [vmem:[%s9365_s4 + $0x1438] sm:$0xff] }
 0x26d   :  { %3244 = vmatpush.msra.mxu0 %v991_v8  ;;  %3264 = vmatpush.msra.mxu2 %v1023_v9  ;;  %v1069_v14 = vld [vmem:[%s9365_s4 + $0x1638] sm:$0xff]  ;;  %v971_v30 = vld [vmem:[%s9365_s4 + $0x1328] sm:$0xff] }
 0x26e   :  { %3304 = vmatpush.msra.mxu1 %v1087_v51  ;;  %3212 = vmatpush.msra.mxu3 %v911_v10  ;;  %v1053_v7 = vld [vmem:[%s9365_s4 + $0x15b8] sm:$0xff]  ;;  %v1003_v53 = vld [vmem:[%s9365_s4 + $0x1428] sm:$0xff] }
 0x26f   :  { %3245 = vmatpush.msra.mxu0 %v989_v11  ;;  %3265 = vmatpush.msra.mxu2 %v1021_v12  ;;  %v1067_v8 = vld [vmem:[%s9365_s4 + $0x1628] sm:$0xff]  ;;  %v969_v51 = vld [vmem:[%s9365_s4 + $0x1318] sm:$0xff] }
 0x270   :  { %3305 = vmatpush.msra.mxu1 %v1085_v13  ;;  %3213 = vmatpush.msra.mxu3 %v909_v18  ;;  %v1051_v9 = vld [vmem:[%s9365_s4 + $0x15a8] sm:$0xff]  ;;  %v1001_v10 = vld [vmem:[%s9365_s4 + $0x1418] sm:$0xff] }
 0x271   :  { %3246 = vmatpush.msra.mxu0 %v987_v54  ;;  %3266 = vmatpush.msra.mxu2 %v1019_v36  ;;  %v1065_v11 = vld [vmem:[%s9365_s4 + $0x1618] sm:$0xff]  ;;  %v999_v13 = vld [vmem:[%s9365_s4 + $0x1408] sm:$0xff] }
 0x272   :  { %3306 = vmatpush.msra.mxu1 %v1083_v20  ;;  %3214 = vmatpush.msra.mxu3 %v907_v50  ;;  %v1049_v12 = vld [vmem:[%s9365_s4 + $0x1598] sm:$0xff]  ;;  %v1063_v18 = vld [vmem:[%s9365_s4 + $0x1608] sm:$0xff] }
 0x273   :  { %3247 = vmatpush.msra.mxu0 %v985_v17  ;;  %3267 = vmatpush.msra.mxu2 %v1017_v16  ;;  %v1047_v54 = vld [vmem:[%s9365_s4 + $0x1588] sm:$0xff]  ;;  %v1125_v36 = vld [vmem:[%s9365_s4 + $0x17f8] sm:$0xff] }
 0x274   :  { %3307 = vmatpush.msra.mxu1 %v1081_v23  ;;  %3215 = vmatpush.msra.mxu3 %v905_v55  ;;  %v1157_v20 = vld [vmem:[%s9365_s4 + $0x18f8] sm:$0xff]  ;;  %v1123_v16 = vld [vmem:[%s9365_s4 + $0x17e8] sm:$0xff] }
 0x275   :  { %3248 = vmatpush.msra.mxu0 %v983_v28  ;;  %3268 = vmatpush.msra.mxu2 %v1015_v29  ;;  %v1221_v50 = vld [vmem:[%s9365_s4 + $0x1af8] sm:$0xff]  ;;  %v1155_v23 = vld [vmem:[%s9365_s4 + $0x18e8] sm:$0xff] }
 0x276   :  { %3308 = vmatpush.msra.mxu1 %v1079_v31  ;;  %3216 = vmatpush.msra.mxu3 %v903_v35  ;;  %v1045_v17 = vld [vmem:[%s9365_s4 + $0x1578] sm:$0xff]  ;;  %v1043_v55 = vld [vmem:[%s9365_s4 + $0x1568] sm:$0xff] }
 0x277   :  { %3249 = vmatpush.msra.mxu0 %v981_v32  ;;  %3269 = vmatpush.msra.mxu2 %v1013_v39  ;;  %v1153_v28 = vld [vmem:[%s9365_s4 + $0x18d8] sm:$0xff]  ;;  %v1119_v35 = vld [vmem:[%s9365_s4 + $0x17c8] sm:$0xff] }
 0x278   :  { %3309 = vmatpush.msra.mxu1 %v1077_v56  ;;  %3217 = vmatmul.f32.vlgmr.msra.gmra.mxu3 %v5547_v21  ;;  %v1057_v21 = vld [vmem:[%s9365_s4 + $0x15d8] sm:$0xff]  ;;  %v1151_v32 = vld [vmem:[%s9365_s4 + $0x18c8] sm:$0xff] }
 0x279   :  { %3281 = vmatpush.msrb.mxu3 %v1061_v40  ;;  %3250 = vmatpush.msra.mxu0 %v979_v41  ;;  %v1217_v29 = vld [vmem:[%s9365_s4 + $0x1ad8] sm:$0xff]  ;;  %v1215_v39 = vld [vmem:[%s9365_s4 + $0x1ac8] sm:$0xff] }
 0x27a   :  { %3270 = vmatpush.msra.mxu2 %v1011_v52  ;;  %3310 = vmatpush.msra.mxu1 %v1075_v19  ;;  %v1041_v31 = vld [vmem:[%s9365_s4 + $0x1558] sm:$0xff]  ;;  %v1039_v56 = vld [vmem:[%s9365_s4 + $0x1548] sm:$0xff] }
 0x27b   :  { %3282 = vmatpush.msrb.mxu3 %v1059_v42  ;;  %3251 = vmatpush.msra.mxu0 %v977_v43  ;;  %v1117_v40 = vld [vmem:[%s9365_s4 + $0x17b8] sm:$0xff]  ;;  %v1115_v42 = vld [vmem:[%s9365_s4 + $0x17a8] sm:$0xff] }
 0x27c   :  { %3271 = vmatpush.msra.mxu2 %v1009_v60  ;;  %3311 = vmatpush.msra.mxu1 %v1073_v61  ;;  %v1149_v41 = vld [vmem:[%s9365_s4 + $0x18b8] sm:$0xff]  ;;  %v1147_v43 = vld [vmem:[%s9365_s4 + $0x18a8] sm:$0xff] }
 0x27d   :  { %3283 = vmatpush.msrb.mxu3 %v1057_v21  ;;  %3252 = vmatpush.msra.mxu0 %v975_v0  ;;  %v1213_v52 = vld [vmem:[%s9365_s4 + $0x1ab8] sm:$0xff]  ;;  %v1211_v60 = vld [vmem:[%s9365_s4 + $0x1aa8] sm:$0xff] }
 0x27e   :  { %3272 = vmatpush.msra.mxu2 %v1007_v1  ;;  %3312 = vmatpush.msra.mxu1 %v1071_v4  ;;  %v1037_v19 = vld [vmem:[%s9365_s4 + $0x1538] sm:$0xff]  ;;  %v1035_v61 = vld [vmem:[%s9365_s4 + $0x1528] sm:$0xff] }
 0x27f   :  { %3284 = vmatpush.msrb.mxu3 %v1055_v5  ;;  %3253 = vmatpush.msra.mxu0 %v973_v59  ;;  %v1113_v21 = vld [vmem:[%s9365_s4 + $0x1798] sm:$0xff]  ;;  %v1111_v5 = vld [vmem:[%s9365_s4 + $0x1788] sm:$0xff] }
 0x280   :  { %3273 = vmatpush.msra.mxu2 %v1005_v6  ;;  %3313 = vmatpush.msra.mxu1 %v1069_v14  ;;  %v1145_v0 = vld [vmem:[%s9365_s4 + $0x1898] sm:$0xff]  ;;  %v1143_v59 = vld [vmem:[%s9365_s4 + $0x1888] sm:$0xff] }
 0x281   :  { %3237 = vmatmul.f32.vlgmr.msrb.gmra.mxu1 %v5531_v15  ;;  %3285 = vmatpush.msrb.mxu3 %v1053_v7  ;;  %v967_v15 = vld [vmem:[%s9365_s4 + $0x1308] sm:$0xff]  ;;  %v1209_v1 = vld [vmem:[%s9365_s4 + $0x1a98] sm:$0xff] }
 0x282   :  { %3254 = vmatpush.msra.mxu0 %v971_v30  ;;  %3274 = vmatpush.msra.mxu2 %v1003_v53  ;;  %v1033_v4 = vld [vmem:[%s9365_s4 + $0x1518] sm:$0xff]  ;;  %v1207_v6 = vld [vmem:[%s9365_s4 + $0x1a88] sm:$0xff] }
 0x283   :  { %3314 = vmatpush.msra.mxu1 %v1067_v8  ;;  %3286 = vmatpush.msrb.mxu3 %v1051_v9  ;;  %v1031_v14 = vld [vmem:[%s9365_s4 + $0x1508] sm:$0xff]  ;;  %v1109_v7 = vld [vmem:[%s9365_s4 + $0x1778] sm:$0xff] }
 0x284   :  { %3255 = vmatpush.msra.mxu0 %v969_v51  ;;  %3275 = vmatpush.msra.mxu2 %v1001_v10  ;;  %v1141_v30 = vld [vmem:[%s9365_s4 + $0x1878] sm:$0xff]  ;;  %v1107_v9 = vld [vmem:[%s9365_s4 + $0x1768] sm:$0xff] }
 0x285   :  { %3315 = vmatpush.msra.mxu1 %v1065_v11  ;;  %3287 = vmatpush.msrb.mxu3 %v1049_v12  ;;  %v1205_v53 = vld [vmem:[%s9365_s4 + $0x1a78] sm:$0xff]  ;;  %v1139_v51 = vld [vmem:[%s9365_s4 + $0x1868] sm:$0xff] }
 0x286   :  { %3256 = vmatpush.msra.mxu0 %v967_v15  ;;  %3276 = vmatpush.msra.mxu2 %v999_v13  ;;  %v1189_v8 = vld [vmem:[%s9365_s4 + $0x19f8] sm:$0xff]  ;;  %v1203_v10 = vld [vmem:[%s9365_s4 + $0x1a68] sm:$0xff] }
 0x287   :  { %3316 = vmatpush.msra.mxu1 %v1063_v18  ;;  %3257 = vmatmul.f32.vlgmr.msra.gmra.mxu0 %v5549_v22  ;;  %v1219_v22 = vld [vmem:[%s9365_s4 + $0x1ae8] sm:$0xff]  ;;  %v1105_v12 = vld [vmem:[%s9365_s4 + $0x1758] sm:$0xff] }
 0x288   :  { %3277 = vmatmul.f32.vlgmr.msra.gmra.mxu2 %v5736_v48  ;;  %3288 = vmatpush.msrb.mxu3 %v1047_v54  ;;  %v1121_v48 = vld [vmem:[%s9365_s4 + $0x17d8] sm:$0xff]  ;;  %v1187_v11 = vld [vmem:[%s9365_s4 + $0x19e8] sm:$0xff] }
 0x289   :  { %3321 = vmatpush.msrb.mxu0 %v1125_v36  ;;  %3341 = vmatpush.msrb.mxu2 %v1157_v20  ;;  %v1137_v15 = vld [vmem:[%s9365_s4 + $0x1858] sm:$0xff]  ;;  %v1103_v18 = vld [vmem:[%s9365_s4 + $0x1748] sm:$0xff] }
 0x28a   :  { %3381 = vmatpush.msrb.mxu1 %v1221_v50  ;;  %3289 = vmatpush.msrb.mxu3 %v1045_v17  ;;  %v1201_v13 = vld [vmem:[%s9365_s4 + $0x1a58] sm:$0xff]  ;;  %v1135_v54 = vld [vmem:[%s9365_s4 + $0x1848] sm:$0xff] }
 0x28b   :  { %3322 = vmatpush.msrb.mxu0 %v1123_v16  ;;  %3342 = vmatpush.msrb.mxu2 %v1155_v23  ;;  %v1199_v36 = vld [vmem:[%s9365_s4 + $0x1a48] sm:$0xff]  ;;  %v1101_v50 = vld [vmem:[%s9365_s4 + $0x1738] sm:$0xff] }
 0x28c   :  { %3382 = vmatpush.msrb.mxu1 %v1219_v22  ;;  %3290 = vmatpush.msrb.mxu3 %v1043_v55  ;;  %v1183_v20 = vld [vmem:[%s9365_s4 + $0x19c8] sm:$0xff]  ;;  %v1133_v17 = vld [vmem:[%s9365_s4 + $0x1838] sm:$0xff] }
 0x28d   :  { %3323 = vmatpush.msrb.mxu0 %v1121_v48  ;;  %3343 = vmatpush.msrb.mxu2 %v1153_v28  ;;  %v1197_v16 = vld [vmem:[%s9365_s4 + $0x1a38] sm:$0xff]  ;;  %v1099_v22 = vld [vmem:[%s9365_s4 + $0x1728] sm:$0xff] }
 0x28e   :  { %3383 = vmatpush.msrb.mxu1 %v1217_v29  ;;  %3291 = vmatpush.msrb.mxu3 %v1041_v31  ;;  %v1181_v23 = vld [vmem:[%s9365_s4 + $0x19b8] sm:$0xff]  ;;  %v1131_v55 = vld [vmem:[%s9365_s4 + $0x1828] sm:$0xff] }
 0x28f   :  { %3324 = vmatpush.msrb.mxu0 %v1119_v35  ;;  %3344 = vmatpush.msrb.mxu2 %v1151_v32  ;;  %v1195_v48 = vld [vmem:[%s9365_s4 + $0x1a28] sm:$0xff]  ;;  %v1097_v29 = vld [vmem:[%s9365_s4 + $0x1718] sm:$0xff] }
 0x290   :  { %3384 = vmatpush.msrb.mxu1 %v1215_v39  ;;  %3292 = vmatpush.msrb.mxu3 %v1039_v56  ;;  %v1179_v28 = vld [vmem:[%s9365_s4 + $0x19a8] sm:$0xff]  ;;  %v1129_v31 = vld [vmem:[%s9365_s4 + $0x1818] sm:$0xff] }
 0x291   :  { %3325 = vmatpush.msrb.mxu0 %v1117_v40  ;;  %3345 = vmatpush.msrb.mxu2 %v1149_v41  ;;  %v1193_v35 = vld [vmem:[%s9365_s4 + $0x1a18] sm:$0xff]  ;;  %v1127_v39 = vld [vmem:[%s9365_s4 + $0x1808] sm:$0xff] }
 0x292   :  { %3385 = vmatpush.msrb.mxu1 %v1213_v52  ;;  %3293 = vmatpush.msrb.mxu3 %v1037_v19  ;;  %v1177_v32 = vld [vmem:[%s9365_s4 + $0x1998] sm:$0xff]  ;;  %v1191_v56 = vld [vmem:[%s9365_s4 + $0x1a08] sm:$0xff] }
 0x293   :  { %3326 = vmatpush.msrb.mxu0 %v1115_v42  ;;  %3346 = vmatpush.msrb.mxu2 %v1147_v43  ;;  %v1175_v40 = vld [vmem:[%s9365_s4 + $0x1988] sm:$0xff]  ;;  %v1253_v41 = vld [vmem:[%s9365_s4 + $0x1bf8] sm:$0xff] }
 0x294   :  { %3386 = vmatpush.msrb.mxu1 %v1211_v60  ;;  %3294 = vmatpush.msrb.mxu3 %v1035_v61  ;;  %v1285_v52 = vld [vmem:[%s9365_s4 + $0x1cf8] sm:$0xff]  ;;  %v1251_v43 = vld [vmem:[%s9365_s4 + $0x1be8] sm:$0xff] }
 0x295   :  { %3327 = vmatpush.msrb.mxu0 %v1113_v21  ;;  %3347 = vmatpush.msrb.mxu2 %v1145_v0  ;;  %v1349_v19 = vld [vmem:[%s9365_s4 + $0x1ef8] sm:$0xff]  ;;  %v1283_v60 = vld [vmem:[%s9365_s4 + $0x1ce8] sm:$0xff] }
 0x296   :  { %3387 = vmatpush.msrb.mxu1 %v1209_v1  ;;  %3295 = vmatpush.msrb.mxu3 %v1033_v4  ;;  %v1173_v42 = vld [vmem:[%s9365_s4 + $0x1978] sm:$0xff]  ;;  %v1171_v61 = vld [vmem:[%s9365_s4 + $0x1968] sm:$0xff] }
 0x297   :  { %3328 = vmatpush.msrb.mxu0 %v1111_v5  ;;  %3348 = vmatpush.msrb.mxu2 %v1143_v59  ;;  %v1281_v21 = vld [vmem:[%s9365_s4 + $0x1cd8] sm:$0xff]  ;;  %v1247_v4 = vld [vmem:[%s9365_s4 + $0x1bc8] sm:$0xff] }
 0x298   :  { %3388 = vmatpush.msrb.mxu1 %v1207_v6  ;;  %3296 = vmatpush.msrb.mxu3 %v1031_v14  ;;  %v1345_v0 = vld [vmem:[%s9365_s4 + $0x1ed8] sm:$0xff]  ;;  %v1279_v5 = vld [vmem:[%s9365_s4 + $0x1cc8] sm:$0xff] }
 0x299   :  { %3329 = vmatpush.msrb.mxu0 %v1109_v7  ;;  %3349 = vmatpush.msrb.mxu2 %v1141_v30  ;;  %v1169_v1 = vld [vmem:[%s9365_s4 + $0x1958] sm:$0xff]  ;;  %v1343_v59 = vld [vmem:[%s9365_s4 + $0x1ec8] sm:$0xff] }
 0x29a   :  { %3389 = vmatpush.msrb.mxu1 %v1205_v53  ;;  %3297 = vmatmul.f32.vlgmr.msrb.gmra.mxu3 %v5754_v62  ;;  %v1185_v62 = vld [vmem:[%s9365_s4 + $0x19d8] sm:$0xff]  ;;  %v1167_v6 = vld [vmem:[%s9365_s4 + $0x1948] sm:$0xff] }
 0x29b   :  { %3361 = vmatpush.msra.mxu3 %v1189_v8  ;;  %3330 = vmatpush.msrb.mxu0 %v1107_v9  ;;  %v1245_v14 = vld [vmem:[%s9365_s4 + $0x1bb8] sm:$0xff]  ;;  %v1243_v8 = vld [vmem:[%s9365_s4 + $0x1ba8] sm:$0xff] }
 0x29c   :  { %3350 = vmatpush.msrb.mxu2 %v1139_v51  ;;  %3390 = vmatpush.msrb.mxu1 %v1203_v10  ;;  %v1277_v7 = vld [vmem:[%s9365_s4 + $0x1cb8] sm:$0xff]  ;;  %v1275_v9 = vld [vmem:[%s9365_s4 + $0x1ca8] sm:$0xff] }
 0x29d   :  { %3362 = vmatpush.msra.mxu3 %v1187_v11  ;;  %3331 = vmatpush.msrb.mxu0 %v1105_v12  ;;  %v1341_v30 = vld [vmem:[%s9365_s4 + $0x1eb8] sm:$0xff]  ;;  %v1339_v51 = vld [vmem:[%s9365_s4 + $0x1ea8] sm:$0xff] }
 0x29e   :  { %3351 = vmatpush.msrb.mxu2 %v1137_v15  ;;  %3391 = vmatpush.msrb.mxu1 %v1201_v13  ;;  %v1165_v53 = vld [vmem:[%s9365_s4 + $0x1938] sm:$0xff]  ;;  %v1163_v10 = vld [vmem:[%s9365_s4 + $0x1928] sm:$0xff] }
 0x29f   :  { %3363 = vmatpush.msra.mxu3 %v1185_v62  ;;  %3332 = vmatpush.msrb.mxu0 %v1103_v18  ;;  %v1241_v11 = vld [vmem:[%s9365_s4 + $0x1b98] sm:$0xff]  ;;  %v1239_v62 = vld [vmem:[%s9365_s4 + $0x1b88] sm:$0xff] }
 0x2a0   :  { %3352 = vmatpush.msrb.mxu2 %v1135_v54  ;;  %3392 = vmatpush.msrb.mxu1 %v1199_v36  ;;  %v1273_v12 = vld [vmem:[%s9365_s4 + $0x1c98] sm:$0xff]  ;;  %v1271_v18 = vld [vmem:[%s9365_s4 + $0x1c88] sm:$0xff] }
 0x2a1   :  { %3364 = vmatpush.msra.mxu3 %v1183_v20  ;;  %3333 = vmatpush.msrb.mxu0 %v1101_v50  ;;  %v1337_v15 = vld [vmem:[%s9365_s4 + $0x1e98] sm:$0xff]  ;;  %v1335_v54 = vld [vmem:[%s9365_s4 + $0x1e88] sm:$0xff] }
 0x2a2   :  { %3353 = vmatpush.msrb.mxu2 %v1133_v17  ;;  %3393 = vmatpush.msrb.mxu1 %v1197_v16  ;;  %v1161_v13 = vld [vmem:[%s9365_s4 + $0x1918] sm:$0xff]  ;;  %v1159_v36 = vld [vmem:[%s9365_s4 + $0x1908] sm:$0xff] }
 0x2a3   :  { %3317 = vmatmul.f32.vlgmr.msra.gmra.mxu1 %v5738_v49  ;;  %3365 = vmatpush.msra.mxu3 %v1181_v23  ;;  %v1095_v49 = vld [vmem:[%s9365_s4 + $0x1708] sm:$0xff]  ;;  %v1237_v20 = vld [vmem:[%s9365_s4 + $0x1b78] sm:$0xff] }
 0x2a4   :  { %3334 = vmatpush.msrb.mxu0 %v1099_v22  ;;  %3354 = vmatpush.msrb.mxu2 %v1131_v55  ;;  %v1269_v50 = vld [vmem:[%s9365_s4 + $0x1c78] sm:$0xff]  ;;  %v1235_v23 = vld [vmem:[%s9365_s4 + $0x1b68] sm:$0xff] }
 0x2a5   :  { %3394 = vmatpush.msrb.mxu1 %v1195_v48  ;;  %3366 = vmatpush.msra.mxu3 %v1179_v28  ;;  %v1333_v17 = vld [vmem:[%s9365_s4 + $0x1e78] sm:$0xff]  ;;  %v1267_v22 = vld [vmem:[%s9365_s4 + $0x1c68] sm:$0xff] }
 0x2a6   :  { %3335 = vmatpush.msrb.mxu0 %v1097_v29  ;;  %3355 = vmatpush.msrb.mxu2 %v1129_v31  ;;  %v1317_v16 = vld [vmem:[%s9365_s4 + $0x1df8] sm:$0xff]  ;;  %v1331_v55 = vld [vmem:[%s9365_s4 + $0x1e68] sm:$0xff] }
 0x2a7   :  { %3395 = vmatpush.msrb.mxu1 %v1193_v35  ;;  %3367 = vmatpush.msra.mxu3 %v1177_v32  ;;  %v1315_v48 = vld [vmem:[%s9365_s4 + $0x1de8] sm:$0xff]  ;;  %v1233_v28 = vld [vmem:[%s9365_s4 + $0x1b58] sm:$0xff] }
 0x2a8   :  { %3336 = vmatpush.msrb.mxu0 %v1095_v49  ;;  %3356 = vmatpush.msrb.mxu2 %v1127_v39  ;;  %v1265_v29 = vld [vmem:[%s9365_s4 + $0x1c58] sm:$0xff]  ;;  %v1231_v35 = vld [vmem:[%s9365_s4 + $0x1b48] sm:$0xff] }
 0x2a9   :  { %3396 = vmatpush.msrb.mxu1 %v1191_v56  ;;  %3337 = vmatmul.f32.vlgmr.msrb.gmra.mxu0 %v5756_v63  ;;  %v1347_v63 = vld [vmem:[%s9365_s4 + $0x1ee8] sm:$0xff]  ;;  %v1329_v31 = vld [vmem:[%s9365_s4 + $0x1e58] sm:$0xff] }
 0x2aa   :  { %3357 = vmatmul.f32.vlgmr.msrb.gmra.mxu2 %v5943_v25  ;;  %3368 = vmatpush.msra.mxu3 %v1175_v40  ;;  %v1249_v25 = vld [vmem:[%s9365_s4 + $0x1bd8] sm:$0xff]  ;;  %v1263_v32 = vld [vmem:[%s9365_s4 + $0x1c48] sm:$0xff] }
 0x2ab   :  { %3401 = vmatpush.msra.mxu0 %v1253_v41  ;;  %3421 = vmatpush.msra.mxu2 %v1285_v52  ;;  %v1327_v49 = vld [vmem:[%s9365_s4 + $0x1e48] sm:$0xff]  ;;  %v1229_v56 = vld [vmem:[%s9365_s4 + $0x1b38] sm:$0xff] }
 0x2ac   :  { %3461 = vmatpush.msra.mxu1 %v1349_v19  ;;  %3369 = vmatpush.msra.mxu3 %v1173_v42  ;;  %v1311_v39 = vld [vmem:[%s9365_s4 + $0x1dc8] sm:$0xff]  ;;  %v1261_v40 = vld [vmem:[%s9365_s4 + $0x1c38] sm:$0xff] }
 0x2ad   :  { %3402 = vmatpush.msra.mxu0 %v1251_v43  ;;  %3422 = vmatpush.msra.mxu2 %v1283_v60  ;;  %v1325_v41 = vld [vmem:[%s9365_s4 + $0x1e38] sm:$0xff]  ;;  %v1227_v19 = vld [vmem:[%s9365_s4 + $0x1b28] sm:$0xff] }
 0x2ae   :  { %3462 = vmatpush.msra.mxu1 %v1347_v63  ;;  %3370 = vmatpush.msra.mxu3 %v1171_v61  ;;  %v1309_v52 = vld [vmem:[%s9365_s4 + $0x1db8] sm:$0xff]  ;;  %v1259_v42 = vld [vmem:[%s9365_s4 + $0x1c28] sm:$0xff] }
 0x2af   :  { %3403 = vmatpush.msra.mxu0 %v1249_v25  ;;  %3423 = vmatpush.msra.mxu2 %v1281_v21  ;;  %v1323_v43 = vld [vmem:[%s9365_s4 + $0x1e28] sm:$0xff]  ;;  %v1225_v63 = vld [vmem:[%s9365_s4 + $0x1b18] sm:$0xff] }
 0x2b0   :  { %3463 = vmatpush.msra.mxu1 %v1345_v0  ;;  %3371 = vmatpush.msra.mxu3 %v1169_v1  ;;  %v1307_v60 = vld [vmem:[%s9365_s4 + $0x1da8] sm:$0xff]  ;;  %v1257_v61 = vld [vmem:[%s9365_s4 + $0x1c18] sm:$0xff] }
 0x2b1   :  { %3404 = vmatpush.msra.mxu0 %v1247_v4  ;;  %3424 = vmatpush.msra.mxu2 %v1279_v5  ;;  %v1321_v25 = vld [vmem:[%s9365_s4 + $0x1e18] sm:$0xff]  ;;  %v1255_v0 = vld [vmem:[%s9365_s4 + $0x1c08] sm:$0xff] }
 0x2b2   :  { %3464 = vmatpush.msra.mxu1 %v1343_v59  ;;  %3372 = vmatpush.msra.mxu3 %v1167_v6  ;;  %v1305_v21 = vld [vmem:[%s9365_s4 + $0x1d98] sm:$0xff]  ;;  %v1319_v1 = vld [vmem:[%s9365_s4 + $0x1e08] sm:$0xff] }
 0x2b3   :  { %3405 = vmatpush.msra.mxu0 %v1245_v14  ;;  %3425 = vmatpush.msra.mxu2 %v1277_v7  ;;  %v1303_v4 = vld [vmem:[%s9365_s4 + $0x1d88] sm:$0xff]  ;;  %v1381_v5 = vld [vmem:[%s9365_s4 + $0x1ff8] sm:$0xff] }
 0x2b4   :  { %3465 = vmatpush.msra.mxu1 %v1341_v30  ;;  %3373 = vmatpush.msra.mxu3 %v1165_v53  ;;  %v1413_v59 = vld [vmem:[%s9365_s4 + $0x20f8] sm:$0xff]  ;;  %v1379_v7 = vld [vmem:[%s9365_s4 + $0x1fe8] sm:$0xff] }
 0x2b5   :  { %3406 = vmatpush.msra.mxu0 %v1243_v8  ;;  %3426 = vmatpush.msra.mxu2 %v1275_v9  ;;  %v1477_v6 = vld [vmem:[%s9365_s4 + $0x22f8] sm:$0xff]  ;;  %v1411_v30 = vld [vmem:[%s9365_s4 + $0x20e8] sm:$0xff] }
 0x2b6   :  { %3466 = vmatpush.msra.mxu1 %v1339_v51  ;;  %3374 = vmatpush.msra.mxu3 %v1163_v10  ;;  %v1301_v14 = vld [vmem:[%s9365_s4 + $0x1d78] sm:$0xff]  ;;  %v1475_v53 = vld [vmem:[%s9365_s4 + $0x22e8] sm:$0xff] }
 0x2b7   :  { %3407 = vmatpush.msra.mxu0 %v1241_v11  ;;  %3427 = vmatpush.msra.mxu2 %v1273_v12  ;;  %v1377_v8 = vld [vmem:[%s9365_s4 + $0x1fd8] sm:$0xff]  ;;  %v1375_v11 = vld [vmem:[%s9365_s4 + $0x1fc8] sm:$0xff] }
 0x2b8   :  { %3467 = vmatpush.msra.mxu1 %v1337_v15  ;;  %3375 = vmatpush.msra.mxu3 %v1161_v13  ;;  %v1409_v9 = vld [vmem:[%s9365_s4 + $0x20d8] sm:$0xff]  ;;  %v1407_v12 = vld [vmem:[%s9365_s4 + $0x20c8] sm:$0xff]  ;;  %v8384_v15 = vpop.f32.mrf.mxu1 }
 0x2b9   :  { %3408 = vmatpush.msra.mxu0 %v1239_v62  ;;  %3428 = vmatpush.msra.mxu2 %v1271_v18  ;;  %v1473_v51 = vld [vmem:[%s9365_s4 + $0x22d8] sm:$0xff]  ;;  %v1471_v13 = vld [vmem:[%s9365_s4 + $0x22c8] sm:$0xff] }
 0x2ba   :  { %3468 = vmatpush.msra.mxu1 %v1335_v54  ;;  %3376 = vmatpush.msra.mxu3 %v1159_v36  ;;  %v1297_v10 = vld [vmem:[%s9365_s4 + $0x1d58] sm:$0xff]  ;;  %v1295_v62 = vld [vmem:[%s9365_s4 + $0x1d48] sm:$0xff] }
 0x2bb   :  { %3409 = vmatpush.msra.mxu0 %v1237_v20  ;;  %3429 = vmatpush.msra.mxu2 %v1269_v50  ;;  %v1373_v18 = vld [vmem:[%s9365_s4 + $0x1fb8] sm:$0xff]  ;;  %v1371_v50 = vld [vmem:[%s9365_s4 + $0x1fa8] sm:$0xff] }
 0x2bc   :  { %3469 = vmatpush.msra.mxu1 %v1333_v17  ;;  %3377 = vmatmul.f32.vlgmr.msra.gmra.mxu3 %v5961_v33  ;;  %v1313_v33 = vld [vmem:[%s9365_s4 + $0x1dd8] sm:$0xff]  ;;  %v1403_v17 = vld [vmem:[%s9365_s4 + $0x20a8] sm:$0xff] }
 0x2bd   :  { %3441 = vmatpush.msrb.mxu3 %v1317_v16  ;;  %3410 = vmatpush.msra.mxu0 %v1235_v23  ;;  %v1405_v54 = vld [vmem:[%s9365_s4 + $0x20b8] sm:$0xff]  ;;  %v8410_v16 = vpop.f32.mrf.mxu2 }
 0x2be   :  { %3430 = vmatpush.msra.mxu2 %v1267_v22  ;;  %3470 = vmatpush.msra.mxu1 %v1331_v55  ;;  %v1469_v36 = vld [vmem:[%s9365_s4 + $0x22b8] sm:$0xff]  ;;  %v1467_v22 = vld [vmem:[%s9365_s4 + $0x22a8] sm:$0xff] }
 0x2bf   :  { %3442 = vmatpush.msrb.mxu3 %v1315_v48  ;;  %3411 = vmatpush.msra.mxu0 %v1233_v28  ;;  %v1293_v20 = vld [vmem:[%s9365_s4 + $0x1d38] sm:$0xff]  ;;  %v1291_v55 = vld [vmem:[%s9365_s4 + $0x1d28] sm:$0xff] }
 0x2c0   :  { %3431 = vmatpush.msra.mxu2 %v1265_v29  ;;  %3471 = vmatpush.msra.mxu1 %v1329_v31  ;;  %v1369_v48 = vld [vmem:[%s9365_s4 + $0x1f98] sm:$0xff] }
 0x2c1   :  { %3443 = vmatpush.msrb.mxu3 %v1313_v33  ;;  %3412 = vmatpush.msra.mxu0 %v1231_v35  ;;  %v1401_v28 = vld [vmem:[%s9365_s4 + $0x2098] sm:$0xff]  ;;  %v1367_v33 = vld [vmem:[%s9365_s4 + $0x1f88] sm:$0xff] }
 0x2c2   :  { %3432 = vmatpush.msra.mxu2 %v1263_v32  ;;  %3472 = vmatpush.msra.mxu1 %v1327_v49  ;;  %v1465_v29 = vld [vmem:[%s9365_s4 + $0x2298] sm:$0xff]  ;;  %v1399_v35 = vld [vmem:[%s9365_s4 + $0x2088] sm:$0xff]  ;;  %v8438_v32 = vpop.f32.mrf.mxu3  ;;  %v8440_v49 = vpop.f32.mrf.mxu1 }
 0x2c3   :  { %3444 = vmatpush.msrb.mxu3 %v1311_v39  ;;  %3413 = vmatpush.msra.mxu0 %v1229_v56  ;;  %v1289_v31 = vld [vmem:[%s9365_s4 + $0x1d18] sm:$0xff]  ;;  %v1816_v39 = vld [vmem:[%s9366_s5] sm:$0x3]  ;;  %v1463_v56 = vld [vmem:[%s9365_s4 + $0x2288] sm:$0xff] }
 0x2c4   :  { %3433 = vmatpush.msra.mxu2 %v1261_v40  ;;  %3473 = vmatpush.msra.mxu1 %v1325_v41  ;;  %v1287_v40 = vld [vmem:[%s9365_s4 + $0x1d08] sm:$0xff]  ;;  %v1365_v41 = vld [vmem:[%s9365_s4 + $0x1f78] sm:$0xff] }
 0x2c5   :  { %3397 = vmatmul.f32.vlgmr.msrb.gmra.mxu1 %v5945_v26  ;;  %3445 = vmatpush.msrb.mxu3 %v1309_v52  ;;  %v1223_v26 = vld [vmem:[%s9365_s4 + $0x1b08] sm:$0xff]  ;;  %v1397_v52 = vld [vmem:[%s9365_s4 + $0x2078] sm:$0xff] }
 0x2c6   :  { %3414 = vmatpush.msra.mxu0 %v1227_v19  ;;  %3434 = vmatpush.msra.mxu2 %v1259_v42  ;;  %v1461_v19 = vld [vmem:[%s9365_s4 + $0x2278] sm:$0xff]  ;;  %v1818_v42 = vperm.slane %v1816_v39, 0 }
 0x2c7   :  { %3474 = vmatpush.msra.mxu1 %v1323_v43  ;;  %3446 = vmatpush.msrb.mxu3 %v1307_v60  ;;  %v1445_v43 = vld [vmem:[%s9365_s4 + $0x21f8] sm:$0xff]  ;;  %v1363_v60 = vld [vmem:[%s9365_s4 + $0x1f68] sm:$0xff] }
 0x2c8   :  { %3415 = vmatpush.msra.mxu0 %v1225_v63  ;;  %3435 = vmatpush.msra.mxu2 %v1257_v61  ;;  %v8466_v63 = vpop.f32.mrf.mxu2  ;;  %v1605_v39 = vld [vmem:[%s9365_s4 + $0x26f8] sm:$0xff] }
 0x2c9   :  { %3475 = vmatpush.msra.mxu1 %v1321_v25  ;;  %3447 = vmatpush.msrb.mxu3 %v1305_v21  ;;  %v1395_v25 = vld [vmem:[%s9365_s4 + $0x2068] sm:$0xff] }
 0x2ca   :  { %3416 = vmatpush.msra.mxu0 %v1223_v26  ;;  %3436 = vmatpush.msra.mxu2 %v1255_v0  ;;  %v1459_v21 = vld [vmem:[%s9365_s4 + $0x2268] sm:$0xff]  ;;  %v1361_v0 = vld [vmem:[%s9365_s4 + $0x1f58] sm:$0xff] }
 0x2cb   :  { %3476 = vmatpush.msra.mxu1 %v1319_v1  ;;  %3417 = vmatmul.f32.vlgmr.msra.gmra.mxu0 %v5963_v34  ;;  %v8358_v34 = vpop.f32.mrf.mxu0  ;;  %v1443_v26 = vld [vmem:[%s9365_s4 + $0x21e8] sm:$0xff]  ;;  %v1393_v1 = vld [vmem:[%s9365_s4 + $0x2058] sm:$0xff] }
 0x2cc   :  { %3437 = vmatmul.f32.vlgmr.msra.gmra.mxu2 %v6150_v44  ;;  %3448 = vmatpush.msrb.mxu3 %v1303_v4  ;;  %v1299_v44 = vld [vmem:[%s9365_s4 + $0x1d68] sm:$0xff]  ;;  %v1457_v4 = vld [vmem:[%s9365_s4 + $0x2258] sm:$0xff] }
 0x2cd   :  { %3481 = vmatpush.msrb.mxu0 %v1381_v5  ;;  %3501 = vmatpush.msrb.mxu2 %v1413_v59  ;;  %v1359_v59 = vld [vmem:[%s9365_s4 + $0x1f48] sm:$0xff] }
 0x2ce   :  { %3541 = vmatpush.msrb.mxu1 %v1477_v6  ;;  %3449 = vmatpush.msrb.mxu3 %v1301_v14  ;;  %v8493_v6 = vpop.f32.mrf.mxu3  ;;  %v1978_v14 = vpop.f32.mrf.mxu1 }
 0x2cf   :  { %3482 = vmatpush.msrb.mxu0 %v1379_v7  ;;  %3502 = vmatpush.msrb.mxu2 %v1411_v30  ;;  %v1391_v7 = vld [vmem:[%s9365_s4 + $0x2048] sm:$0xff] }
 0x2d0   :  { %3542 = vmatpush.msrb.mxu1 %v1475_v53  ;;  %3450 = vmatpush.msrb.mxu3 %v1299_v44  ;;  %v1455_v30 = vld [vmem:[%s9365_s4 + $0x2248] sm:$0xff]  ;;  %v1357_v44 = vld [vmem:[%s9365_s4 + $0x1f38] sm:$0xff] }
 0x2d1   :  { %3483 = vmatpush.msrb.mxu0 %v1377_v8  ;;  %3503 = vmatpush.msrb.mxu2 %v1409_v9  ;;  %v1439_v53 = vld [vmem:[%s9365_s4 + $0x21c8] sm:$0xff]  ;;  %v1389_v8 = vld [vmem:[%s9365_s4 + $0x2038] sm:$0xff] }
 0x2d2   :  { %3543 = vmatpush.msrb.mxu1 %v1473_v51  ;;  %3451 = vmatpush.msrb.mxu3 %v1297_v10  ;;  %v1453_v9 = vld [vmem:[%s9365_s4 + $0x2238] sm:$0xff] }
 0x2d3   :  { %3484 = vmatpush.msrb.mxu0 %v1375_v11  ;;  %3504 = vmatpush.msrb.mxu2 %v1407_v12  ;;  %v8412_v23 = vpop.f32.mrf.mxu0  ;;  %v1437_v10 = vld [vmem:[%s9365_s4 + $0x21b8] sm:$0xff]  ;;  %v1998_v11 = vpop.f32.mrf.mxu2  ;;  %v1355_v12 = vld [vmem:[%s9365_s4 + $0x1f28] sm:$0xff] }
 0x2d4   :  { %3544 = vmatpush.msrb.mxu1 %v1471_v13  ;;  %3452 = vmatpush.msrb.mxu3 %v1295_v62  ;;  %v1387_v13 = vld [vmem:[%s9365_s4 + $0x2028] sm:$0xff] }
 0x2d5   :  { %3485 = vmatpush.msrb.mxu0 %v1373_v18  ;;  %3505 = vmatpush.msrb.mxu2 %v1405_v54  ;;  %v1451_v62 = vld [vmem:[%s9365_s4 + $0x2228] sm:$0xff]  ;;  %v1353_v54 = vld [vmem:[%s9365_s4 + $0x1f18] sm:$0xff] }
 0x2d6   :  { %3545 = vmatpush.msrb.mxu1 %v1469_v36  ;;  %3453 = vmatpush.msrb.mxu3 %v1293_v20  ;;  %v1435_v18 = vld [vmem:[%s9365_s4 + $0x21a8] sm:$0xff]  ;;  %v1385_v36 = vld [vmem:[%s9365_s4 + $0x2018] sm:$0xff] }
 0x2d7   :  { %3486 = vmatpush.msrb.mxu0 %v1371_v50  ;;  %3506 = vmatpush.msrb.mxu2 %v1403_v17  ;;  %v1449_v50 = vld [vmem:[%s9365_s4 + $0x2218] sm:$0xff]  ;;  %v2018_v17 = vpop.f32.mrf.mxu3 }
 0x2d8   :  { %3546 = vmatpush.msrb.mxu1 %v1467_v22  ;;  %3454 = vmatpush.msrb.mxu3 %v1291_v55  ;;  %v1351_v22 = vld [vmem:[%s9365_s4 + $0x1f08] sm:$0xff] }
 0x2d9   :  { %3487 = vmatpush.msrb.mxu0 %v1369_v48  ;;  %3507 = vmatpush.msrb.mxu2 %v1401_v28  ;;  %v1383_v55 = vld [vmem:[%s9365_s4 + $0x2008] sm:$0xff] }
 0x2da   :  { %3547 = vmatpush.msrb.mxu1 %v1465_v29  ;;  %3455 = vmatpush.msrb.mxu3 %v1289_v31  ;;  %v1447_v48 = vld [vmem:[%s9365_s4 + $0x2208] sm:$0xff]  ;;  %v1509_v31 = vld [vmem:[%s9365_s4 + $0x23f8] sm:$0xff] }
 0x2db   :  { %3488 = vmatpush.msrb.mxu0 %v1367_v33  ;;  %3508 = vmatpush.msrb.mxu2 %v1399_v35  ;;  %v1958_v61 = vpop.f32.mrf.mxu0  ;;  %v1431_v28 = vld [vmem:[%s9365_s4 + $0x2188] sm:$0xff]  ;;  %v1541_v33 = vld [vmem:[%s9365_s4 + $0x24f8] sm:$0xff] }
 0x2dc   :  { %3548 = vmatpush.msrb.mxu1 %v1463_v56  ;;  %3456 = vmatpush.msrb.mxu3 %v1287_v40  ;;  %v1959_v5 = vadd.f32 %v1958_v61, %v1818_v42  ;;  %v1429_v56 = vld [vmem:[%s9365_s4 + $0x2178] sm:$0xff]  ;;  %v1507_v40 = vld [vmem:[%s9365_s4 + $0x23e8] sm:$0xff] }
 0x2dd   :  { %3489 = vmatpush.msrb.mxu0 %v1365_v41  ;;  %3509 = vmatpush.msrb.mxu2 %v1397_v52  ;;  %v1539_v41 = vld [vmem:[%s9365_s4 + $0x24e8] sm:$0xff]  ;;  %v1537_v42 = vld [vmem:[%s9365_s4 + $0x24d8] sm:$0xff] }
 0x2de   :  { %3549 = vmatpush.msrb.mxu1 %v1461_v19  ;;  %3457 = vmatmul.f32.vlgmr.msrb.gmra.mxu3 %v6168_v24  ;;  %v1441_v24 = vld [vmem:[%s9365_s4 + $0x21d8] sm:$0xff]  ;;  %v1979_v51 = vadd.f32 %v1978_v14, %v1959_v5  ;;  %v1427_v52 = vld [vmem:[%s9365_s4 + $0x2168] sm:$0xff] }
 0x2df   :  { %3521 = vmatpush.msra.mxu3 %v1445_v43  ;;  %3490 = vmatpush.msrb.mxu0 %v1363_v60  ;;  %v1505_v19 = vld [vmem:[%s9365_s4 + $0x23d8] sm:$0xff]  ;;  %v2058_v43 = vpop.f32.mrf.mxu1 }
 0x2e0   :  { %3510 = vmatpush.msrb.mxu2 %v1395_v25  ;;  %3550 = vmatpush.msrb.mxu1 %v1459_v21  ;;  %v1999_v20 = vadd.f32 %v1998_v11, %v1979_v51  ;;  %v1601_v60 = vld [vmem:[%s9365_s4 + $0x26d8] sm:$0xff]  ;;  %v1503_v25 = vld [vmem:[%s9365_s4 + $0x23c8] sm:$0xff] }
 0x2e1   :  { %3522 = vmatpush.msra.mxu3 %v1443_v26  ;;  %3491 = vmatpush.msrb.mxu0 %v1361_v0  ;;  %v1425_v61 = vld [vmem:[%s9365_s4 + $0x2158] sm:$0xff]  ;;  %v1535_v21 = vld [vmem:[%s9365_s4 + $0x24c8] sm:$0xff] }
 0x2e2   :  { %3511 = vmatpush.msrb.mxu2 %v1393_v1  ;;  %3551 = vmatpush.msrb.mxu1 %v1457_v4  ;;  %v2019_v29 = vadd.f32 %v2018_v17, %v1999_v20  ;;  %v1599_v26 = vld [vmem:[%s9365_s4 + $0x26c8] sm:$0xff]  ;;  %v1501_v4 = vld [vmem:[%s9365_s4 + $0x23b8] sm:$0xff] }
 0x2e3   :  { %3523 = vmatpush.msra.mxu3 %v1441_v24  ;;  %3492 = vmatpush.msrb.mxu0 %v1359_v59  ;;  %v2038_v35 = vpop.f32.mrf.mxu0  ;;  %v1423_v0 = vld [vmem:[%s9365_s4 + $0x2148] sm:$0xff]  ;;  %v1533_v5 = vld [vmem:[%s9365_s4 + $0x24b8] sm:$0xff]  ;;  %v2078_v24 = vpop.f32.mrf.mxu2 }
 0x2e4   :  { %3512 = vmatpush.msrb.mxu2 %v1391_v7  ;;  %3552 = vmatpush.msrb.mxu1 %v1455_v30  ;;  %v1597_v59 = vld [vmem:[%s9365_s4 + $0x26b8] sm:$0xff]  ;;  %v1499_v7 = vld [vmem:[%s9365_s4 + $0x23a8] sm:$0xff] }
 0x2e5   :  { %3524 = vmatpush.msra.mxu3 %v1439_v53  ;;  %3493 = vmatpush.msrb.mxu0 %v1357_v44  ;;  %v1421_v14 = vld [vmem:[%s9365_s4 + $0x2138] sm:$0xff]  ;;  %v1531_v30 = vld [vmem:[%s9365_s4 + $0x24a8] sm:$0xff] }
 0x2e6   :  { %3513 = vmatpush.msrb.mxu2 %v1389_v8  ;;  %3553 = vmatpush.msrb.mxu1 %v1453_v9  ;;  %v1595_v53 = vld [vmem:[%s9365_s4 + $0x26a8] sm:$0xff]  ;;  %v1497_v9 = vld [vmem:[%s9365_s4 + $0x2398] sm:$0xff] }
 0x2e7   :  { %3477 = vmatmul.f32.vlgmr.msra.gmra.mxu1 %v6152_v45  ;;  %3525 = vmatpush.msra.mxu3 %v1437_v10  ;;  %v1433_v45 = vld [vmem:[%s9365_s4 + $0x2198] sm:$0xff]  ;;  %v1419_v44 = vld [vmem:[%s9365_s4 + $0x2128] sm:$0xff]  ;;  %v2098_v10 = vpop.f32.mrf.mxu3 }
 0x2e8   :  { %3494 = vmatpush.msrb.mxu0 %v1355_v12  ;;  %3514 = vmatpush.msrb.mxu2 %v1387_v13  ;;  %v1529_v51 = vld [vmem:[%s9365_s4 + $0x2498] sm:$0xff]  ;;  %v1495_v13 = vld [vmem:[%s9365_s4 + $0x2388] sm:$0xff] }
 0x2e9   :  { %3554 = vmatpush.msrb.mxu1 %v1451_v62  ;;  %3526 = vmatpush.msra.mxu3 %v1435_v18  ;;  %v1593_v11 = vld [vmem:[%s9365_s4 + $0x2698] sm:$0xff]  ;;  %v1527_v62 = vld [vmem:[%s9365_s4 + $0x2488] sm:$0xff] }
 0x2ea   :  { %3495 = vmatpush.msrb.mxu0 %v1353_v54  ;;  %3515 = vmatpush.msrb.mxu2 %v1385_v36  ;;  %v1417_v12 = vld [vmem:[%s9365_s4 + $0x2118] sm:$0xff]  ;;  %v1591_v54 = vld [vmem:[%s9365_s4 + $0x2688] sm:$0xff] }
 0x2eb   :  { %3555 = vmatpush.msrb.mxu1 %v1449_v50  ;;  %3527 = vmatpush.msra.mxu3 %v1433_v45  ;;  %v2118_v18 = vpop.f32.mrf.mxu0  ;;  %v1415_v36 = vld [vmem:[%s9365_s4 + $0x2108] sm:$0xff]  ;;  %v1493_v50 = vld [vmem:[%s9365_s4 + $0x2378] sm:$0xff] }
 0x2ec   :  { %3496 = vmatpush.msrb.mxu0 %v1351_v22  ;;  %3516 = vmatpush.msrb.mxu2 %v1383_v55  ;;  %v1525_v45 = vld [vmem:[%s9365_s4 + $0x2478] sm:$0xff] }
 0x2ed   :  { %3556 = vmatpush.msrb.mxu1 %v1447_v48  ;;  %3497 = vmatmul.f32.vlgmr.msrb.gmra.mxu0 %v6170_v27  ;;  %v1603_v27 = vld [vmem:[%s9365_s4 + $0x26e8] sm:$0xff]  ;;  %v1589_v17 = vld [vmem:[%s9365_s4 + $0x2678] sm:$0xff] }
 0x2ee   :  { %3517 = vmatmul.f32.vlgmr.msrb.gmra.mxu2 %v6357_v46  ;;  %3528 = vmatpush.msra.mxu3 %v1431_v28  ;;  %v2039_v46 = vadd.f32 %v2038_v35, %v2019_v29  ;;  %v1573_v55 = vld [vmem:[%s9365_s4 + $0x25f8] sm:$0xff]  ;;  %v1491_v48 = vld [vmem:[%s9365_s4 + $0x2368] sm:$0xff]  ;;  %v2138_v28 = vpop.f32.mrf.mxu1 }
 0x2ef   :  { %3561 = vmatpush.msra.mxu0 %v1509_v31  ;;  %3581 = vmatpush.msra.mxu2 %v1541_v33  ;;  %v1523_v29 = vld [vmem:[%s9365_s4 + $0x2468] sm:$0xff]  ;;  %v1489_v35 = vld [vmem:[%s9365_s4 + $0x2358] sm:$0xff] }
 0x2f0   :  { %3621 = vmatpush.msra.mxu1 %v1605_v39  ;;  %3529 = vmatpush.msra.mxu3 %v1429_v56  ;;  %v2059_v1 = vadd.f32 %v2058_v43, %v2039_v46  ;;  %v1587_v31 = vld [vmem:[%s9365_s4 + $0x2668] sm:$0xff]  ;;  %v2158_v39 = vpop.f32.mrf.mxu2  ;;  %v1521_v56 = vld [vmem:[%s9365_s4 + $0x2458] sm:$0xff] }
 0x2f1   :  { %3562 = vmatpush.msra.mxu0 %v1507_v40  ;;  %3582 = vmatpush.msra.mxu2 %v1539_v41  ;;  %v1571_v33 = vld [vmem:[%s9365_s4 + $0x25e8] sm:$0xff]  ;;  %v1585_v40 = vld [vmem:[%s9365_s4 + $0x2658] sm:$0xff] }
 0x2f2   :  { %3622 = vmatpush.msra.mxu1 %v1603_v27  ;;  %3530 = vmatpush.msra.mxu3 %v1427_v52  ;;  %v2079_v8 = vadd.f32 %v2078_v24, %v2059_v1  ;;  %v1569_v41 = vld [vmem:[%s9365_s4 + $0x25d8] sm:$0xff]  ;;  %v1487_v27 = vld [vmem:[%s9365_s4 + $0x2348] sm:$0xff] }
 0x2f3   :  { %3563 = vmatpush.msra.mxu0 %v1505_v19  ;;  %3583 = vmatpush.msra.mxu2 %v1537_v42  ;;  %v1519_v52 = vld [vmem:[%s9365_s4 + $0x2448] sm:$0xff]  ;;  %v1485_v43 = vld [vmem:[%s9365_s4 + $0x2338] sm:$0xff] }
 0x2f4   :  { %3623 = vmatpush.msra.mxu1 %v1601_v60  ;;  %3531 = vmatpush.msra.mxu3 %v1425_v61  ;;  %v2099_v20 = vadd.f32 %v2098_v10, %v2079_v8  ;;  %v1583_v46 = vld [vmem:[%s9365_s4 + $0x2648] sm:$0xff]  ;;  %v2178_v60 = vpop.f32.mrf.mxu3  ;;  %v1517_v61 = vld [vmem:[%s9365_s4 + $0x2438] sm:$0xff] }
 0x2f5   :  { %3564 = vmatpush.msra.mxu0 %v1503_v25  ;;  %3584 = vmatpush.msra.mxu2 %v1535_v21  ;;  %v1567_v42 = vld [vmem:[%s9365_s4 + $0x25c8] sm:$0xff]  ;;  %v1581_v25 = vld [vmem:[%s9365_s4 + $0x2638] sm:$0xff] }
 0x2f6   :  { %3624 = vmatpush.msra.mxu1 %v1599_v26  ;;  %3532 = vmatpush.msra.mxu3 %v1423_v0  ;;  %v2119_v22 = vadd.f32 %v2118_v18, %v2099_v20  ;;  %v1565_v21 = vld [vmem:[%s9365_s4 + $0x25b8] sm:$0xff]  ;;  %v2198_v26 = vpop.f32.mrf.mxu0  ;;  %v1483_v0 = vld [vmem:[%s9365_s4 + $0x2328] sm:$0xff] }
 0x2f7   :  { %3565 = vmatpush.msra.mxu0 %v1501_v4  ;;  %3585 = vmatpush.msra.mxu2 %v1533_v5  ;;  %v1515_v1 = vld [vmem:[%s9365_s4 + $0x2428] sm:$0xff]  ;;  %v1557_v18 = vld [vmem:[%s9365_s4 + $0x2578] sm:$0xff] }
 0x2f8   :  { %3625 = vmatpush.msra.mxu1 %v1597_v59  ;;  %3533 = vmatpush.msra.mxu3 %v1421_v14  ;;  %v1579_v5 = vld [vmem:[%s9365_s4 + $0x2628] sm:$0xff]  ;;  %v1481_v59 = vld [vmem:[%s9365_s4 + $0x2318] sm:$0xff] }
 0x2f9   :  { %3566 = vmatpush.msra.mxu0 %v1499_v7  ;;  %3586 = vmatpush.msra.mxu2 %v1531_v30  ;;  %v1563_v24 = vld [vmem:[%s9365_s4 + $0x25a8] sm:$0xff]  ;;  %v1513_v14 = vld [vmem:[%s9365_s4 + $0x2418] sm:$0xff] }
 0x2fa   :  { %3626 = vmatpush.msra.mxu1 %v1595_v53  ;;  %3534 = vmatpush.msra.mxu3 %v1419_v44  ;;  %v1577_v30 = vld [vmem:[%s9365_s4 + $0x2618] sm:$0xff]  ;;  %v2218_v53 = vpop.f32.mrf.mxu1  ;;  %v1479_v44 = vld [vmem:[%s9365_s4 + $0x2308] sm:$0xff] }
 0x2fb   :  { %3567 = vmatpush.msra.mxu0 %v1497_v9  ;;  %3587 = vmatpush.msra.mxu2 %v1529_v51  ;;  %v1511_v8 = vld [vmem:[%s9365_s4 + $0x2408] sm:$0xff]  ;;  %v2238_v51 = vpop.f32.mrf.mxu2 }
 0x2fc   :  { %3627 = vmatpush.msra.mxu1 %v1593_v11  ;;  %3535 = vmatpush.msra.mxu3 %v1417_v12  ;;  %v1575_v9 = vld [vmem:[%s9365_s4 + $0x2608] sm:$0xff]  ;;  %v1637_v12 = vld [vmem:[%s9365_s4 + $0x27f8] sm:$0xff]  ;;  %v2258_v20 = vpop.f32.mrf.mxu3 }
 0x2fd   :  { %3568 = vmatpush.msra.mxu0 %v1495_v13  ;;  %3588 = vmatpush.msra.mxu2 %v1527_v62  ;;  %v1559_v10 = vld [vmem:[%s9365_s4 + $0x2588] sm:$0xff]  ;;  %v1669_v13 = vld [vmem:[%s9365_s4 + $0x28f8] sm:$0xff] }
 0x2fe   :  { %3628 = vmatpush.msra.mxu1 %v1591_v54  ;;  %3536 = vmatpush.msra.mxu3 %v1415_v36  ;;  %v1733_v62 = vld [vmem:[%s9365_s4 + $0x2af8] sm:$0xff]  ;;  %v1635_v36 = vld [vmem:[%s9365_s4 + $0x27e8] sm:$0xff] }
 0x2ff   :  { %3569 = vmatpush.msra.mxu0 %v1493_v50  ;;  %3589 = vmatpush.msra.mxu2 %v1525_v45  ;;  %v1731_v50 = vld [vmem:[%s9365_s4 + $0x2ae8] sm:$0xff]  ;;  %v1633_v45 = vld [vmem:[%s9365_s4 + $0x27d8] sm:$0xff] }
 0x300   :  { %3629 = vmatpush.msra.mxu1 %v1589_v17  ;;  %3537 = vmatmul.f32.vlgmr.msra.gmra.mxu3 %v6375_v37  ;;  %v2139_v37 = vadd.f32 %v2138_v28, %v2119_v22  ;;  %v1665_v17 = vld [vmem:[%s9365_s4 + $0x28d8] sm:$0xff]  ;;  %v2278_v22 = vpop.f32.mrf.mxu0 }
 0x301   :  { %3601 = vmatpush.msrb.mxu3 %v1573_v55  ;;  %3570 = vmatpush.msra.mxu0 %v1491_v48  ;;  %v1729_v55 = vld [vmem:[%s9365_s4 + $0x2ad8] sm:$0xff] }
 0x302   :  { %3590 = vmatpush.msra.mxu2 %v1523_v29  ;;  %3630 = vmatpush.msra.mxu1 %v1587_v31  ;;  %v2159_v19 = vadd.f32 %v2158_v39, %v2139_v37  ;;  %v1553_v48 = vld [vmem:[%s9365_s4 + $0x2558] sm:$0xff]  ;;  %v1631_v29 = vld [vmem:[%s9365_s4 + $0x27c8] sm:$0xff]  ;;  %v2298_v37 = vpop.f32.mrf.mxu1 }
 0x303   :  { %3602 = vmatpush.msrb.mxu3 %v1571_v33  ;;  %3571 = vmatpush.msra.mxu0 %v1489_v35  ;;  %v1663_v31 = vld [vmem:[%s9365_s4 + $0x28c8] sm:$0xff] }
 0x304   :  { %3591 = vmatpush.msra.mxu2 %v1521_v56  ;;  %3631 = vmatpush.msra.mxu1 %v1585_v40  ;;  %v2179_v4 = vadd.f32 %v2178_v60, %v2159_v19  ;;  %v1727_v33 = vld [vmem:[%s9365_s4 + $0x2ac8] sm:$0xff]  ;;  %v1629_v56 = vld [vmem:[%s9365_s4 + $0x27b8] sm:$0xff]  ;;  %v2318_v19 = vpop.f32.mrf.mxu2 }
 0x305   :  { %3603 = vmatpush.msrb.mxu3 %v1569_v41  ;;  %3572 = vmatpush.msra.mxu0 %v1487_v27  ;;  %v1551_v35 = vld [vmem:[%s9365_s4 + $0x2548] sm:$0xff]  ;;  %v1661_v40 = vld [vmem:[%s9365_s4 + $0x28b8] sm:$0xff] }
 0x306   :  { %3592 = vmatpush.msra.mxu2 %v1519_v52  ;;  %3632 = vmatpush.msra.mxu1 %v1583_v46  ;;  %v2199_v7 = vadd.f32 %v2198_v26, %v2179_v4  ;;  %v1725_v41 = vld [vmem:[%s9365_s4 + $0x2ab8] sm:$0xff]  ;;  %v1627_v52 = vld [vmem:[%s9365_s4 + $0x27a8] sm:$0xff] }
 0x307   :  { %3604 = vmatpush.msrb.mxu3 %v1567_v42  ;;  %3573 = vmatpush.msra.mxu0 %v1485_v43  ;;  %v1549_v27 = vld [vmem:[%s9365_s4 + $0x2538] sm:$0xff]  ;;  %v1659_v46 = vld [vmem:[%s9365_s4 + $0x28a8] sm:$0xff] }
 0x308   :  { %3593 = vmatpush.msra.mxu2 %v1517_v61  ;;  %3633 = vmatpush.msra.mxu1 %v1581_v25  ;;  %v2219_v11 = vadd.f32 %v2218_v53, %v2199_v7  ;;  %v1723_v42 = vld [vmem:[%s9365_s4 + $0x2aa8] sm:$0xff]  ;;  %v1625_v61 = vld [vmem:[%s9365_s4 + $0x2798] sm:$0xff] }
 0x309   :  { %3557 = vmatmul.f32.vlgmr.msrb.gmra.mxu1 %v6359_v47  ;;  %3605 = vmatpush.msrb.mxu3 %v1565_v21  ;;  %v1561_v47 = vld [vmem:[%s9365_s4 + $0x2598] sm:$0xff]  ;;  %v1547_v43 = vld [vmem:[%s9365_s4 + $0x2528] sm:$0xff] }
 0x30a   :  { %3574 = vmatpush.msra.mxu0 %v1483_v0  ;;  %3594 = vmatpush.msra.mxu2 %v1515_v1  ;;  %v2239_v54 = vadd.f32 %v2238_v51, %v2219_v11  ;;  %v1657_v25 = vld [vmem:[%s9365_s4 + $0x2898] sm:$0xff]  ;;  %v1623_v1 = vld [vmem:[%s9365_s4 + $0x2788] sm:$0xff] }
 0x30b   :  { %3634 = vmatpush.msra.mxu1 %v1579_v5  ;;  %3606 = vmatpush.msrb.mxu3 %v1563_v24  ;;  %v1721_v21 = vld [vmem:[%s9365_s4 + $0x2a98] sm:$0xff]  ;;  %v1655_v4 = vld [vmem:[%s9365_s4 + $0x2888] sm:$0xff]  ;;  %v2338_v5 = vpop.f32.mrf.mxu3 }
 0x30c   :  { %3575 = vmatpush.msra.mxu0 %v1481_v59  ;;  %3595 = vmatpush.msra.mxu2 %v1513_v14  ;;  %v2259_v28 = vadd.f32 %v2258_v20, %v2239_v54  ;;  %v1545_v26 = vld [vmem:[%s9365_s4 + $0x2518] sm:$0xff]  ;;  %v1719_v24 = vld [vmem:[%s9365_s4 + $0x2a88] sm:$0xff] }
 0x30d   :  { %3635 = vmatpush.msra.mxu1 %v1577_v30  ;;  %3607 = vmatpush.msrb.mxu3 %v1561_v47  ;;  %v1543_v59 = vld [vmem:[%s9365_s4 + $0x2508] sm:$0xff]  ;;  %v1621_v14 = vld [vmem:[%s9365_s4 + $0x2778] sm:$0xff]  ;;  %v2358_v30 = vpop.f32.mrf.mxu0 }
 0x30e   :  { %3576 = vmatpush.msra.mxu0 %v1479_v44  ;;  %3596 = vmatpush.msra.mxu2 %v1511_v8  ;;  %v2279_v39 = vadd.f32 %v2278_v22, %v2259_v28  ;;  %v1653_v7 = vld [vmem:[%s9365_s4 + $0x2878] sm:$0xff]  ;;  %v1619_v8 = vld [vmem:[%s9365_s4 + $0x2768] sm:$0xff] }
 0x30f   :  { %3636 = vmatpush.msra.mxu1 %v1575_v9  ;;  %3577 = vmatmul.f32.vlgmr.msra.gmra.mxu0 %v6377_v38  ;;  %v1667_v38 = vld [vmem:[%s9365_s4 + $0x28e8] sm:$0xff]  ;;  %v1717_v47 = vld [vmem:[%s9365_s4 + $0x2a78] sm:$0xff] }
 0x310   :  { %3597 = vmatmul.f32.vlgmr.msra.gmra.mxu2 %v6564_v57  ;;  %3608 = vmatpush.msrb.mxu3 %v1559_v10  ;;  %v1555_v57 = vld [vmem:[%s9365_s4 + $0x2568] sm:$0xff]  ;;  %v2299_v60 = vadd.f32 %v2298_v37, %v2279_v39  ;;  %v1701_v44 = vld [vmem:[%s9365_s4 + $0x29f8] sm:$0xff] }
 0x311   :  { %3641 = vmatpush.msrb.mxu0 %v1637_v12  ;;  %3661 = vmatpush.msrb.mxu2 %v1669_v13  ;;  %v1651_v9 = vld [vmem:[%s9365_s4 + $0x2868] sm:$0xff]  ;;  %v1617_v12 = vld [vmem:[%s9365_s4 + $0x2758] sm:$0xff]  ;;  %v2378_v13 = vpop.f32.mrf.mxu1 }
 0x312   :  { %3701 = vmatpush.msrb.mxu1 %v1733_v62  ;;  %3609 = vmatpush.msrb.mxu3 %v1557_v18  ;;  %v2319_v0 = vadd.f32 %v2318_v19, %v2299_v60  ;;  %v1715_v51 = vld [vmem:[%s9365_s4 + $0x2a68] sm:$0xff]  ;;  %v1649_v62 = vld [vmem:[%s9365_s4 + $0x2858] sm:$0xff] }
 0x313   :  { %3642 = vmatpush.msrb.mxu0 %v1635_v36  ;;  %3662 = vmatpush.msrb.mxu2 %v1667_v38  ;;  %v1699_v11 = vld [vmem:[%s9365_s4 + $0x29e8] sm:$0xff]  ;;  %v1713_v18 = vld [vmem:[%s9365_s4 + $0x2a58] sm:$0xff]  ;;  %v2398_v36 = vpop.f32.mrf.mxu2  ;;  %v2418_v28 = vpop.f32.mrf.mxu3 }
 0x314   :  { %3702 = vmatpush.msrb.mxu1 %v1731_v50  ;;  %3610 = vmatpush.msrb.mxu3 %v1555_v57  ;;  %v2339_v53 = vadd.f32 %v2338_v5, %v2319_v0  ;;  %v1615_v54 = vld [vmem:[%s9365_s4 + $0x2748] sm:$0xff]  ;;  %v1709_v22 = vld [vmem:[%s9365_s4 + $0x2a38] sm:$0xff]  ;;  %v3829_v5 = vld [vmem:[%s9368_s7 + $0x70] sm:$0xff] }
 0x315   :  { %3643 = vmatpush.msrb.mxu0 %v1633_v45  ;;  %3663 = vmatpush.msrb.mxu2 %v1665_v17  ;;  %v1647_v38 = vld [vmem:[%s9365_s4 + $0x2848] sm:$0xff]  ;;  %v1613_v45 = vld [vmem:[%s9365_s4 + $0x2738] sm:$0xff]  ;;  %v2438_v39 = vpop.f32.mrf.mxu0 }
 0x316   :  { %3703 = vmatpush.msrb.mxu1 %v1729_v55  ;;  %3611 = vmatpush.msrb.mxu3 %v1553_v48  ;;  %v2359_v10 = vadd.f32 %v2358_v30, %v2339_v53  ;;  %v1711_v20 = vld [vmem:[%s9365_s4 + $0x2a48] sm:$0xff]  ;;  %v1645_v17 = vld [vmem:[%s9365_s4 + $0x2838] sm:$0xff] }
 0x317   :  { %3644 = vmatpush.msrb.mxu0 %v1631_v29  ;;  %3664 = vmatpush.msrb.mxu2 %v1663_v31  ;;  %v1695_v57 = vld [vmem:[%s9365_s4 + $0x29c8] sm:$0xff]  ;;  %v1693_v48 = vld [vmem:[%s9365_s4 + $0x29b8] sm:$0xff] }
 0x318   :  { %3704 = vmatpush.msrb.mxu1 %v1727_v33  ;;  %3612 = vmatpush.msrb.mxu3 %v1551_v35  ;;  %v2379_v50 = vadd.f32 %v2378_v13, %v2359_v10  ;;  %v1611_v29 = vld [vmem:[%s9365_s4 + $0x2728] sm:$0xff]  ;;  %v1765_v60 = vld [vmem:[%s9365_s4 + $0x2bf8] sm:$0xff] }
 0x319   :  { %3645 = vmatpush.msrb.mxu0 %v1629_v56  ;;  %3665 = vmatpush.msrb.mxu2 %v1661_v40  ;;  %v1643_v31 = vld [vmem:[%s9365_s4 + $0x2828] sm:$0xff]  ;;  %v1609_v56 = vld [vmem:[%s9365_s4 + $0x2718] sm:$0xff] }
 0x31a   :  { %3705 = vmatpush.msrb.mxu1 %v1725_v41  ;;  %3613 = vmatpush.msrb.mxu3 %v1549_v27  ;;  %v2399_v55 = vadd.f32 %v2398_v36, %v2379_v50  ;;  %v1707_v33 = vld [vmem:[%s9365_s4 + $0x2a28] sm:$0xff]  ;;  %v1641_v40 = vld [vmem:[%s9365_s4 + $0x2818] sm:$0xff] }
 0x31b   :  { %3646 = vmatpush.msrb.mxu0 %v1627_v52  ;;  %3666 = vmatpush.msrb.mxu2 %v1659_v46  ;;  %v1691_v35 = vld [vmem:[%s9365_s4 + $0x29a8] sm:$0xff]  ;;  %v1705_v41 = vld [vmem:[%s9365_s4 + $0x2a18] sm:$0xff]  ;;  %v2498_v30 = vpop.f32.mrf.mxu3 }
 0x31c   :  { %3706 = vmatpush.msrb.mxu1 %v1723_v42  ;;  %3614 = vmatpush.msrb.mxu3 %v1547_v43  ;;  %v2419_v37 = vadd.f32 %v2418_v28, %v2399_v55  ;;  %v1607_v27 = vld [vmem:[%s9365_s4 + $0x2708] sm:$0xff]  ;;  %v2458_v42 = vpop.f32.mrf.mxu1  ;;  %v1681_v53 = vld [vmem:[%s9365_s4 + $0x2958] sm:$0xff] }
 0x31d   :  { %3647 = vmatpush.msrb.mxu0 %v1625_v61  ;;  %3667 = vmatpush.msrb.mxu2 %v1657_v25  ;;  %v1639_v52 = vld [vmem:[%s9365_s4 + $0x2808] sm:$0xff]  ;;  %v1797_v61 = vld [vmem:[%s9365_s4 + $0x2cf8] sm:$0xff]  ;;  %v2478_v25 = vpop.f32.mrf.mxu2 }
 0x31e   :  { %3707 = vmatpush.msrb.mxu1 %v1721_v21  ;;  %3615 = vmatpush.msrb.mxu3 %v1545_v26  ;;  %v2439_v46 = vadd.f32 %v2438_v39, %v2419_v37  ;;  %v1703_v19 = vld [vmem:[%s9365_s4 + $0x2a08] sm:$0xff]  ;;  %v3830_v21 = vld [vmem:[%s9368_s7 + $0x78] sm:$0xff]  ;;  %v3823_v39 = vld [vmem:[%s9368_s7 + $0x40] sm:$0xff] }
 0x31f   :  { %3648 = vmatpush.msrb.mxu0 %v1623_v1  ;;  %3668 = vmatpush.msrb.mxu2 %v1655_v4  ;;  %v1687_v43 = vld [vmem:[%s9365_s4 + $0x2988] sm:$0xff]  ;;  %v1685_v26 = vld [vmem:[%s9365_s4 + $0x2978] sm:$0xff]  ;;  %v4006_v1 = vld.sshfl [vmem:[#allocation1] sm:$0xff pattern:$0x73625140] }
 0x320   :  { %3708 = vmatpush.msrb.mxu1 %v1719_v24  ;;  %3616 = vmatpush.msrb.mxu3 %v1543_v59  ;;  %v2459_v0 = vadd.f32 %v2458_v42, %v2439_v46  ;;  %v1763_v4 = vld [vmem:[%s9365_s4 + $0x2be8] sm:$0xff]  ;;  %v1789_v13 = vld [vmem:[%s9365_s4 + $0x2cb8] sm:$0xff] }
 0x321   :  { %3649 = vmatpush.msrb.mxu0 %v1621_v14  ;;  %3669 = vmatpush.msrb.mxu2 %v1653_v7  ;;  %v1683_v24 = vld [vmem:[%s9365_s4 + $0x2968] sm:$0xff]  ;;  %v1761_v14 = vld [vmem:[%s9365_s4 + $0x2bd8] sm:$0xff] }
 0x322   :  { %3709 = vmatpush.msrb.mxu1 %v1717_v47  ;;  %3617 = vmatmul.f32.vlgmr.msrb.gmra.mxu3 %v6582_v2  ;;  %v1697_v2 = vld [vmem:[%s9365_s4 + $0x29d8] sm:$0xff]  ;;  %v2479_v59 = vadd.f32 %v2478_v25, %v2459_v0  ;;  %v3828_v47 = vld [vmem:[%s9368_s7 + $0x68] sm:$0xff] }
 0x323   :  { %3681 = vmatpush.msra.mxu3 %v1701_v44  ;;  %3650 = vmatpush.msrb.mxu0 %v1619_v8  ;;  %v1793_v7 = vld [vmem:[%s9365_s4 + $0x2cd8] sm:$0xff]  ;;  %v1759_v44 = vld [vmem:[%s9365_s4 + $0x2bc8] sm:$0xff]  ;;  %v2578_v55 = vpop.f32.mrf.mxu3 }
 0x324   :  { %3670 = vmatpush.msrb.mxu2 %v1651_v9  ;;  %3710 = vmatpush.msrb.mxu1 %v1715_v51  ;;  %v1791_v8 = vld [vmem:[%s9365_s4 + $0x2cc8] sm:$0xff]  ;;  %v2518_v9 = vpop.f32.mrf.mxu0  ;;  %v3827_v51 = vld [vmem:[%s9368_s7 + $0x60] sm:$0xff]  ;;  %v1673_v28 = vld [vmem:[%s9365_s4 + $0x2918] sm:$0xff] }
 0x325   :  { %3682 = vmatpush.msra.mxu3 %v1699_v11  ;;  %3651 = vmatpush.msrb.mxu0 %v1617_v12  ;;  %v1679_v10 = vld [vmem:[%s9365_s4 + $0x2948] sm:$0xff]  ;;  %v2499_v11 = vadd.f32 %v2498_v30, %v2479_v59  ;;  %v1757_v12 = vld [vmem:[%s9365_s4 + $0x2bb8] sm:$0xff] }
 0x326   :  { %3671 = vmatpush.msrb.mxu2 %v1649_v62  ;;  %3711 = vmatpush.msrb.mxu1 %v1713_v18  ;;  %v3826_v62 = vld [vmem:[%s9368_s7 + $0x58] sm:$0xff]  ;;  %v1787_v36 = vld [vmem:[%s9365_s4 + $0x2ca8] sm:$0xff] }
 0x327   :  { %3683 = vmatpush.msra.mxu3 %v1697_v2  ;;  %3652 = vmatpush.msrb.mxu0 %v1615_v54  ;;  %v1677_v18 = vld [vmem:[%s9365_s4 + $0x2938] sm:$0xff]  ;;  %v2519_v2 = vadd.f32 %v2518_v9, %v2499_v11  ;;  %v1755_v54 = vld [vmem:[%s9365_s4 + $0x2ba8] sm:$0xff] }
 0x328   :  { %3672 = vmatpush.msrb.mxu2 %v1647_v38  ;;  %3712 = vmatpush.msrb.mxu1 %v1711_v20  ;;  %v2538_v38 = vpop.f32.mrf.mxu1  ;;  %v3825_v20 = vld [vmem:[%s9368_s7 + $0x50] sm:$0xff]  ;;  %v1675_v50 = vld [vmem:[%s9365_s4 + $0x2928] sm:$0xff]  ;;  %v1749_v37 = vld [vmem:[%s9365_s4 + $0x2b78] sm:$0xff] }
 0x329   :  { %3684 = vmatpush.msra.mxu3 %v1695_v57  ;;  %3653 = vmatpush.msrb.mxu0 %v1613_v45  ;;  %v9021_v57 = vld [vmem:[%s9364_s3] sm:$0x3]  ;;  %v1753_v45 = vld [vmem:[%s9365_s4 + $0x2b98] sm:$0xff]  ;;  %v1779_v42 = vld [vmem:[%s9365_s4 + $0x2c68] sm:$0xff] }
 0x32a   :  { %3673 = vmatpush.msrb.mxu2 %v1645_v17  ;;  %3713 = vmatpush.msrb.mxu1 %v1709_v22  ;;  %v1785_v17 = vld [vmem:[%s9365_s4 + $0x2c98] sm:$0xff]  ;;  %v2558_v22 = vpop.f32.mrf.mxu2  ;;  %v3820_v0 = vld [vmem:[%s9368_s7 + $0x28] sm:$0xff] }
 0x32b   :  { %3637 = vmatmul.f32.vlgmr.msra.gmra.mxu1 %v6566_v58  ;;  %3685 = vmatpush.msra.mxu3 %v1693_v48  ;;  %v1689_v58 = vld [vmem:[%s9365_s4 + $0x2998] sm:$0xff]  ;;  %v3824_v48 = vld [vmem:[%s9368_s7 + $0x48] sm:$0xff] }
 0x32c   :  { %3654 = vmatpush.msrb.mxu0 %v1611_v29  ;;  %3674 = vmatpush.msrb.mxu2 %v1643_v31  ;;  %v2539_v29 = vadd.f32 %v2538_v38, %v2519_v2  ;;  %v1751_v31 = vld [vmem:[%s9365_s4 + $0x2b88] sm:$0xff]  ;;  %v1813_v25 = vld [vmem:[%s9365_s4 + $0x2d78] sm:$0xff] }
 0x32d   :  { %3714 = vmatpush.msrb.mxu1 %v1707_v33  ;;  %3686 = vmatpush.msra.mxu3 %v1691_v35  ;;  %v1783_v33 = vld [vmem:[%s9365_s4 + $0x2c88] sm:$0xff]  ;;  %v170_v35 = vperm.slane %v9021_v57, 0  ;;  %v1769_v2 = vld [vmem:[%s9365_s4 + $0x2c18] sm:$0xff] }
 0x32e   :  { %3655 = vmatpush.msrb.mxu0 %v1609_v56  ;;  %3675 = vmatpush.msrb.mxu2 %v1641_v40  ;;  %v1671_v56 = vld [vmem:[%s9365_s4 + $0x2908] sm:$0xff]  ;;  %v2559_v40 = vadd.f32 %v2558_v22, %v2539_v29  ;;  %v3815_v22 = vld [vmem:[%s9368_s7] sm:$0xff] }
 0x32f   :  { %3715 = vmatpush.msrb.mxu1 %v1705_v41  ;;  %3687 = vmatpush.msra.mxu3 %v1689_v58  ;;  %v1781_v41 = vld [vmem:[%s9365_s4 + $0x2c78] sm:$0xff]  ;;  %v202_v46 = vadd.f32 %v8358_v34, %v170_v35  ;;  %v1775_v59 = vld [vmem:[%s9365_s4 + $0x2c48] sm:$0xff] }
 0x330   :  { %3656 = vmatpush.msrb.mxu0 %v1607_v27  ;;  %3676 = vmatpush.msrb.mxu2 %v1639_v52  ;;  %v3822_v58 = vld [vmem:[%s9368_s7 + $0x38] sm:$0xff]  ;;  %v1815_v27 = vld [vmem:[%s9365_s4 + $0x2d88] sm:$0xff] }
 0x331   :  { %3716 = vmatpush.msrb.mxu1 %v1703_v19  ;;  %3657 = vmatmul.f32.vlgmr.msrb.gmra.mxu0 %v6584_v3  ;;  %v1795_v3 = vld [vmem:[%s9365_s4 + $0x2ce8] sm:$0xff]  ;;  %v2598_v19 = vpop.f32.mrf.mxu0  ;;  %v1745_v34 = vld [vmem:[%s9365_s4 + $0x2b58] sm:$0xff] }
 0x332   :  { %3677 = vmatmul.f32.vlgmr.msrb.gmra.mxu2 %v4006_v1  ;;  %3688 = vmatpush.msra.mxu3 %v1687_v43  ;;  %v1747_v52 = vld [vmem:[%s9365_s4 + $0x2b68] sm:$0xff]  ;;  %v3821_v43 = vld [vmem:[%s9368_s7 + $0x30] sm:$0xff]  ;;  %v2638_v30 = vpop.f32.mrf.mxu2 }
 0x333   :  { %3721 = vmatpush.msra.mxu0 %v1765_v60  ;;  %3741 = vmatpush.msra.mxu2 %v1797_v61  ;;  %v2579_v60 = vadd.f32 %v2578_v55, %v2559_v40  ;;  %v4007_v61 = vld.sshfl [vmem:[#allocation1 + $0x8] sm:$0xff pattern:$0x73625140] }
 0x334   :  { %3847 = vmatpush.msra.mxu1 %v3830_v21  ;;  %3689 = vmatpush.msra.mxu3 %v1685_v26  ;;  %v2658_v21 = vpop.f32.mrf.mxu3  ;;  %v1777_v26 = vld [vmem:[%s9365_s4 + $0x2c58] sm:$0xff]  ;;  %v1771_v11 = vld [vmem:[%s9365_s4 + $0x2c28] sm:$0xff] }
 0x335   :  { %3722 = vmatpush.msra.mxu0 %v1763_v4  ;;  %3742 = vmatpush.msra.mxu2 %v1795_v3  ;;  %v2599_v1 = vadd.f32 %v2598_v19, %v2579_v60  ;;  %v1811_v4 = vld [vmem:[%s9365_s4 + $0x2d68] sm:$0xff]  ;;  %v3795_v19 = vld [vmem:[%s9367_s6 + $0x60] sm:$0xff]  ;;  %v3794_v60 = vld [vmem:[%s9367_s6 + $0x58] sm:$0xff] }
 0x336   :  { %3848 = vmatpush.msra.mxu1 %v3829_v5  ;;  %3690 = vmatpush.msra.mxu3 %v1683_v24  ;;  %v1743_v3 = vld [vmem:[%s9365_s4 + $0x2b48] sm:$0xff]  ;;  %v222_v5 = vadd.f32 %v8384_v15, %v202_v46  ;;  %v2618_v24 = vpop.f32.mrf.mxu1  ;;  %v1741_v15 = vld [vmem:[%s9365_s4 + $0x2b38] sm:$0xff] }
 0x337   :  { %3723 = vmatpush.msra.mxu0 %v1761_v14  ;;  %3743 = vmatpush.msra.mxu2 %v1793_v7  ;;  %v3819_v14 = vld [vmem:[%s9368_s7 + $0x20] sm:$0xff]  ;;  %v1809_v7 = vld [vmem:[%s9365_s4 + $0x2d58] sm:$0xff]  ;;  %v1799_v35 = vld [vmem:[%s9365_s4 + $0x2d08] sm:$0xff] }
 0x338   :  { %3849 = vmatpush.msra.mxu1 %v3828_v47  ;;  %3691 = vmatpush.msra.mxu3 %v1681_v53  ;;  %v1773_v47 = vld [vmem:[%s9365_s4 + $0x2c38] sm:$0xff]  ;;  %v2619_v53 = vadd.f32 %v2618_v24, %v2599_v1  ;;  %v242_v9 = vadd.f32 %v8410_v16, %v222_v5  ;;  %v3841_v5 = vld [vmem:[%s9368_s7 + $0xd0] sm:$0xff]  ;;  %v4012_v24 = vld [vmem:[%s9366_s5] sm:$0x3] }
 0x339   :  { %3724 = vmatpush.msra.mxu0 %v1759_v44  ;;  %3744 = vmatpush.msra.mxu2 %v1791_v8  ;;  %v3818_v44 = vld [vmem:[%s9368_s7 + $0x18] sm:$0xff]  ;;  %v1807_v8 = vld [vmem:[%s9365_s4 + $0x2d48] sm:$0xff] }
 0x33a   :  { %3850 = vmatpush.msra.mxu1 %v3827_v51  ;;  %3692 = vmatpush.msra.mxu3 %v1679_v10  ;;  %v4008_v51 = vld.sshfl [vmem:[#allocation1 + $0x10] sm:$0xff pattern:$0x73625140]  ;;  %v1739_v10 = vld [vmem:[%s9365_s4 + $0x2b28] sm:$0xff]  ;;  %v1805_v16 = vld [vmem:[%s9365_s4 + $0x2d38] sm:$0xff]  ;;  %v262_v38 = vadd.f32 %v8438_v32, %v242_v9  ;;  %v2718_v55 = vpop.f32.mrf.mxu2 }
 0x33b   :  { %3725 = vmatpush.msra.mxu0 %v1757_v12  ;;  %3745 = vmatpush.msra.mxu2 %v1789_v13  ;;  %v2639_v12 = vadd.f32 %v2638_v30, %v2619_v53  ;;  %v3817_v13 = vld [vmem:[%s9368_s7 + $0x10] sm:$0xff]  ;;  %v1801_v32 = vld [vmem:[%s9365_s4 + $0x2d18] sm:$0xff] }
 0x33c   :  { %3851 = vmatpush.msra.mxu1 %v3826_v62  ;;  %3693 = vmatpush.msra.mxu3 %v1677_v18  ;;  %v2738_v62 = vpop.f32.mrf.mxu3  ;;  %v1737_v18 = vld [vmem:[%s9365_s4 + $0x2b18] sm:$0xff]  ;;  %v344_v29 = vmax.f32 %v262_v38, 0.0 }
 0x33d   :  { %3726 = vmatpush.msra.mxu0 %v1755_v54  ;;  %3746 = vmatpush.msra.mxu2 %v1787_v36  ;;  %v3816_v54 = vld [vmem:[%s9368_s7 + $0x8] sm:$0xff]  ;;  %v3790_v53 = vld [vmem:[%s9367_s6 + $0x38] sm:$0xff] }
 0x33e   :  { %3852 = vmatpush.msra.mxu1 %v3825_v20  ;;  %3694 = vmatpush.msra.mxu3 %v1675_v50  ;;  %v1803_v36 = vld [vmem:[%s9365_s4 + $0x2d28] sm:$0xff]  ;;  %v2678_v20 = vpop.f32.mrf.mxu0 }
 0x33f   :  { %3727 = vmatpush.msra.mxu0 %v1753_v45  ;;  %3747 = vmatpush.msra.mxu2 %v1785_v17  ;;  %v1735_v50 = vld [vmem:[%s9365_s4 + $0x2b08] sm:$0xff]  ;;  %v2659_v17 = vadd.f32 %v2658_v21, %v2639_v12  ;;  %v3793_v21 = vld [vmem:[%s9367_s6 + $0x50] sm:$0xff]  ;;  %v3838_v12 = vld [vmem:[%s9368_s7 + $0xb8] sm:$0xff] }
 0x340   :  { %3853 = vmatpush.msra.mxu1 %v3824_v48  ;;  %3695 = vmatpush.msra.mxu3 %v1673_v28  ;;  %v1767_v45 = vld [vmem:[%s9365_s4 + $0x2c08] sm:$0xff]  ;;  %v3798_v28 = vld [vmem:[%s9367_s6 + $0x78] sm:$0xff]  ;;  %s3990_s4 = sshll.u32 %s9372_s11, 4  ;;  %s3991_s4 = int_to_ptr.hbm [resolvable:$true] %s3990_s4 }
 0x341   :  { %3728 = vmatpush.msra.mxu0 %v1751_v31  ;;  %3748 = vmatpush.msra.mxu2 %v1783_v33  ;;  %v2679_v48 = vadd.f32 %v2678_v20, %v2659_v17  ;;  %v2698_v31 = vpop.f32.mrf.mxu1  ;;  %v4009_v33 = vld.sshfl [vmem:[#allocation1 + $0x18] sm:$0xff pattern:$0x73625140] }
 0x342   :  { %3854 = vmatpush.msra.mxu1 %v3823_v39  ;;  %3696 = vmatpush.msra.mxu3 %v1671_v56  ;;  %v4010_v39 = vld.sshfl [vmem:[#allocation1 + $0x20] sm:$0xff pattern:$0x73625140]  ;;  %v3797_v56 = vld [vmem:[%s9367_s6 + $0x70] sm:$0xff]  ;;  %v3786_v20 = vld [vmem:[%s9367_s6 + $0x18] sm:$0xff] }
 0x343   :  { %3729 = vmatpush.msra.mxu0 %v1749_v37  ;;  %3749 = vmatpush.msra.mxu2 %v1781_v41  ;;  %v3846_v37 = vld [vmem:[%s9368_s7 + $0xf8] sm:$0xff]  ;;  %v2699_v41 = vadd.f32 %v2698_v31, %v2679_v48  ;;  %v3784_v48 = vld [vmem:[%s9367_s6 + $0x8] sm:$0xff] }
 0x344   :  { %3855 = vmatpush.msra.mxu1 %v3822_v58  ;;  %3697 = vmatmul.f32.vlgmr.msra.gmra.mxu3 %v4007_v61  ;;  %v2818_v40 = vpop.f32.mrf.mxu3  ;;  %v3796_v58 = vld [vmem:[%s9367_s6 + $0x68] sm:$0xff] }
 0x345   :  { %3768 = vmatpush.msrb.mxu3 %v1815_v27  ;;  %3730 = vmatpush.msra.mxu0 %v1747_v52  ;;  %v4011_v27 = vld.sshfl [vmem:[#allocation1 + $0x28] sm:$0xff pattern:$0x73625140]  ;;  %v3845_v52 = vld [vmem:[%s9368_s7 + $0xf0] sm:$0xff]  ;;  %v2719_v46 = vadd.f32 %v2718_v55, %v2699_v41  ;;  %v3834_v55 = vld [vmem:[%s9368_s7 + $0x98] sm:$0xff] }
 0x346   :  { %3750 = vmatpush.msra.mxu2 %v1779_v42  ;;  %3856 = vmatpush.msra.mxu1 %v3821_v43  ;;  %v2798_v42 = vpop.f32.mrf.mxu2  ;;  %v3844_v43 = vld [vmem:[%s9368_s7 + $0xe8] sm:$0xff]  ;;  %v2758_v61 = vpop.f32.mrf.mxu0 }
 0x347   :  { %3769 = vmatpush.msrb.mxu3 %v1813_v25  ;;  %3731 = vmatpush.msra.mxu0 %v1745_v34  ;;  %v3843_v25 = vld [vmem:[%s9368_s7 + $0xe0] sm:$0xff]  ;;  %v2739_v34 = vadd.f32 %v2738_v62, %v2719_v46 }
 0x348   :  { %3751 = vmatpush.msra.mxu2 %v1777_v26  ;;  %3857 = vmatpush.msra.mxu1 %v3820_v0  ;;  %v3842_v0 = vld [vmem:[%s9368_s7 + $0xd8] sm:$0xff] }
 0x349   :  { %3770 = vmatpush.msrb.mxu3 %v1811_v4  ;;  %3732 = vmatpush.msra.mxu0 %v1743_v3  ;;  %v2759_v1 = vadd.f32 %v2758_v61, %v2739_v34  ;;  %v3792_v4 = vld [vmem:[%s9367_s6 + $0x48] sm:$0xff]  ;;  %v2778_v3 = vpop.f32.mrf.mxu1 }
 0x34a   :  { %3752 = vmatpush.msra.mxu2 %v1775_v59  ;;  %3858 = vmatpush.msra.mxu1 %v3819_v14  ;;  %v1819_v59 = vperm.slane %v4012_v24, 1  ;;  %v3791_v14 = vld [vmem:[%s9367_s6 + $0x40] sm:$0xff] }
 0x34b   :  { %3717 = vmatmul.f32.vlgmr.msrb.gmra.mxu1 %v4008_v51  ;;  %3771 = vmatpush.msrb.mxu3 %v1809_v7  ;;  %v171_v7 = vperm.slane %v9021_v57, 1  ;;  %v3789_v57 = vld [vmem:[%s9367_s6 + $0x30] sm:$0xff] }
 0x34c   :  { %3733 = vmatpush.msra.mxu0 %v1741_v15  ;;  %3753 = vmatpush.msra.mxu2 %v1773_v47  ;;  %v2858_v26 = vpop.f32.mrf.mxu3  ;;  %v3840_v15 = vld [vmem:[%s9368_s7 + $0xc8] sm:$0xff]  ;;  %v2779_v47 = vadd.f32 %v2778_v3, %v2759_v1 }
 0x34d   :  { %3859 = vmatpush.msra.mxu1 %v3818_v44  ;;  %3772 = vmatpush.msrb.mxu3 %v1807_v8  ;;  %v3839_v44 = vld [vmem:[%s9368_s7 + $0xc0] sm:$0xff]  ;;  %v282_v51 = vadd.f32 %v8412_v23, %v171_v7 }
 0x34e   :  { %3734 = vmatpush.msra.mxu0 %v1739_v10  ;;  %3754 = vmatpush.msra.mxu2 %v1771_v11  ;;  %v2878_v30 = vpop.f32.mrf.mxu2  ;;  %v2799_v8 = vadd.f32 %v2798_v42, %v2779_v47  ;;  %v2838_v10 = vpop.f32.mrf.mxu0  ;;  %v3787_v23 = vld [vmem:[%s9367_s6 + $0x20] sm:$0xff] }
 0x34f   :  { %3860 = vmatpush.msra.mxu1 %v3817_v13  ;;  %3773 = vmatpush.msrb.mxu3 %v1805_v16  ;;  %v2879_v9 = vadd.f32 %v2878_v30, %v1819_v59  ;;  %v3788_v13 = vld [vmem:[%s9367_s6 + $0x28] sm:$0xff]  ;;  %v3837_v16 = vld [vmem:[%s9368_s7 + $0xb0] sm:$0xff] }
 0x350   :  { %3735 = vmatpush.msra.mxu0 %v1737_v18  ;;  %3755 = vmatpush.msra.mxu2 %v1769_v2  ;;  %v2819_v62 = vadd.f32 %v2818_v40, %v2799_v8  ;;  %v302_v2 = vadd.f32 %v8440_v49, %v282_v51  ;;  %v3785_v49 = vld [vmem:[%s9367_s6 + $0x10] sm:$0xff]  ;;  %v3831_v40 = vld [vmem:[%s9368_s7 + $0x80] sm:$0xff] }
 0x351   :  { %3861 = vmatpush.msra.mxu1 %v3816_v54  ;;  %3774 = vmatpush.msrb.mxu3 %v1803_v36  ;;  %v2918_v54 = vpop.f32.mrf.mxu1  ;;  %v3836_v36 = vld [vmem:[%s9368_s7 + $0xa8] sm:$0xff] }
 0x352   :  { %3736 = vmatpush.msra.mxu0 %v1735_v50  ;;  %3756 = vmatpush.msra.mxu2 %v1767_v45  ;;  %v2839_v38 = vadd.f32 %v2838_v10, %v2819_v62  ;;  %v3835_v50 = vld [vmem:[%s9368_s7 + $0xa0] sm:$0xff]  ;;  %v322_v17 = vadd.f32 %v8466_v63, %v302_v2 }
 0x353   :  { %3862 = vmatpush.msra.mxu1 %v3815_v22  ;;  %3737 = vmatmul.f32.vlgmr.msra.gmra.mxu0 %v4009_v33  ;;  %v3783_v63 = vld [vmem:[%s9367_s6] sm:$0xff] }
 0x354   :  { %3757 = vmatmul.f32.vlgmr.msra.gmra.mxu2 %v4010_v39  ;;  %3775 = vmatpush.msrb.mxu3 %v1801_v32  ;;  %v2898_v11 = vpop.f32.mrf.mxu3  ;;  %v2859_v32 = vadd.f32 %v2858_v26, %v2839_v38  ;;  %v342_v31 = vadd.f32 %v8493_v6, %v322_v17  ;;  %v3808_v17 = vld [vmem:[%s9367_s6 + $0xc8] sm:$0xff] }
 0x355   :  { %3863 = vmatmul.f32.vlgmr.msra.gmra.mxu1 %v344_v29  ;;  %3887 = vmatpush.msrb.mxu0 %v3798_v28  ;;  %v2899_v18 = vadd.f32 %v2898_v11, %v2879_v9  ;;  %v3833_v28 = vld [vmem:[%s9368_s7 + $0x90] sm:$0xff]  ;;  %v3811_v11 = vld [vmem:[%s9367_s6 + $0xe0] sm:$0xff] }
 0x356   :  { %3776 = vmatpush.msrb.mxu3 %v1799_v35  ;;  %v2938_v22 = vpop.f32.mrf.mxu0  ;;  %v2958_v33 = vpop.f32.mrf.mxu2  ;;  %v3832_v35 = vld [vmem:[%s9368_s7 + $0x88] sm:$0xff]  ;;  %v3781_v39 = vmax.f32 %v2859_v32, 0.0  ;;  %v345_v41 = vmax.f32 %v342_v31, 0.0  ;;  %v3807_v32 = vld [vmem:[%s9367_s6 + $0xc0] sm:$0xff] }
 0x357   :  { %3888 = vmatpush.msrb.mxu0 %v3797_v56  ;;  %4000 = vmatmul.msk.f32.vlgmr.msrb.gmra.mxu3 %vm1938_vm0, %v4011_v27  ;;  %v2919_v45 = vadd.f32 %v2918_v54, %v2899_v18 }
 0x358   :  { %3867 = vmatpush.msra.mxu3 %v3846_v37 }
 0x359   :  { %3889 = vmatpush.msrb.mxu0 %v3796_v58  ;;  %v2939_v29 = vadd.f32 %v2938_v22, %v2919_v45  ;;  %v2998_v6 = vpop.f32.mrf.mxu1 }
 0x35a   :  { %3868 = vmatpush.msra.mxu3 %v3845_v52 }
 0x35b   :  { %3890 = vmatpush.msrb.mxu0 %v3795_v19  ;;  %v2959_v37 = vadd.f32 %v2958_v33, %v2939_v29  ;;  %v3806_v29 = vld [vmem:[%s9367_s6 + $0xb8] sm:$0xff] }
 0x35c   :  { %3869 = vmatpush.msra.mxu3 %v3844_v43  ;;  %v2978_v56 = vpop.f32.mrf.mxu3 }
 0x35d   :  { %3891 = vmatpush.msrb.mxu0 %v3794_v60  ;;  %v2979_v58 = vadd.f32 %v2978_v56, %v2959_v37 }
 0x35e   :  { %3870 = vmatpush.msra.mxu3 %v3843_v25  ;;  %v3018_v27 = vpop.f32.mrf.mxu0  ;;  %v3038_v46 = vpop.f32.mrf.mxu2 }
 0x35f   :  { %3892 = vmatpush.msrb.mxu0 %v3793_v21  ;;  %v2999_v52 = vadd.f32 %v2998_v6, %v2979_v58 }
 0x360   :  { %3871 = vmatpush.msra.mxu3 %v3842_v0 }
 0x361   :  { %3893 = vmatpush.msrb.mxu0 %v3792_v4  ;;  %v3019_v19 = vadd.f32 %v3018_v27, %v2999_v52  ;;  %v3078_v61 = vpop.f32.mrf.mxu1  ;;  %v3802_v27 = vld [vmem:[%s9367_s6 + $0x98] sm:$0xff] }
 0x362   :  { %3872 = vmatpush.msra.mxu3 %v3841_v5 }
 0x363   :  { %3894 = vmatpush.msrb.mxu0 %v3791_v14  ;;  %v3039_v43 = vadd.f32 %v3038_v46, %v3019_v19  ;;  %v3801_v19 = vld [vmem:[%s9367_s6 + $0x90] sm:$0xff] }
 0x364   :  { %3873 = vmatpush.msra.mxu3 %v3840_v15  ;;  %v3058_v42 = vpop.f32.mrf.mxu3 }
 0x365   :  { %3895 = vmatpush.msrb.mxu0 %v3790_v53  ;;  %v3059_v60 = vadd.f32 %v3058_v42, %v3039_v43  ;;  %v3814_v53 = vld [vmem:[%s9367_s6 + $0xf8] sm:$0xff]  ;;  %v3800_v43 = vld [vmem:[%s9367_s6 + $0x88] sm:$0xff] }
 0x366   :  { %3874 = vmatpush.msra.mxu3 %v3839_v44  ;;  %v3098_v25 = vpop.f32.mrf.mxu0  ;;  %v3118_v21 = vpop.f32.mrf.mxu2  ;;  %v3813_v44 = vld [vmem:[%s9367_s6 + $0xf0] sm:$0xff]  ;;  %3907 = vmatpush.msrb.mxu2 %v3814_v53 }
 0x367   :  { %3896 = vmatpush.msrb.mxu0 %v3789_v57  ;;  %v3079_v34 = vadd.f32 %v3078_v61, %v3059_v60  ;;  %v3812_v57 = vld [vmem:[%s9367_s6 + $0xe8] sm:$0xff]  ;;  %v3799_v61 = vld [vmem:[%s9367_s6 + $0x80] sm:$0xff] }
 0x368   :  { %3875 = vmatpush.msra.mxu3 %v3838_v12  ;;  %3908 = vmatpush.msrb.mxu2 %v3813_v44 }
 0x369   :  { %3897 = vmatpush.msrb.mxu0 %v3788_v13  ;;  %v3099_v26 = vadd.f32 %v3098_v25, %v3079_v34  ;;  %v3158_v3 = vpop.f32.mrf.mxu1 }
 0x36a   :  { %3876 = vmatpush.msra.mxu3 %v3837_v16  ;;  %3909 = vmatpush.msrb.mxu2 %v3812_v57  ;;  %v3810_v16 = vld [vmem:[%s9367_s6 + $0xd8] sm:$0xff] }
 0x36b   :  { %3898 = vmatpush.msrb.mxu0 %v3787_v23  ;;  %v3119_v1 = vadd.f32 %v3118_v21, %v3099_v26 }
 0x36c   :  { %3877 = vmatpush.msra.mxu3 %v3836_v36  ;;  %v3138_v0 = vpop.f32.mrf.mxu3  ;;  %3910 = vmatpush.msrb.mxu2 %v3811_v11  ;;  %v3948_v11 = vld [vmem:[%s9370_s9 + $0x78] sm:$0xf] }
 0x36d   :  { %3899 = vmatpush.msrb.mxu0 %v3786_v20  ;;  %v3139_v4 = vadd.f32 %v3138_v0, %v3119_v1  ;;  %4001 = vmatpush.msk.msrb.mxu1 %vm3957_vm1, %v3948_v11 }
 0x36e   :  { %3878 = vmatpush.msra.mxu3 %v3835_v50  ;;  %v3178_v5 = vpop.f32.mrf.mxu0  ;;  %v3198_v59 = vpop.f32.mrf.mxu2  ;;  %3911 = vmatpush.msrb.mxu2 %v3810_v16  ;;  %v3946_v16 = vld [vmem:[%s9370_s9 + $0x68] sm:$0xff] }
 0x36f   :  { %3900 = vmatpush.msrb.mxu0 %v3785_v49  ;;  %v3159_v24 = vadd.f32 %v3158_v3, %v3139_v4  ;;  %v3809_v49 = vld [vmem:[%s9367_s6 + $0xd0] sm:$0xff] }
 0x370   :  { %3879 = vmatpush.msra.mxu3 %v3834_v55  ;;  %3912 = vmatpush.msrb.mxu2 %v3809_v49  ;;  %v3935_v49 = vld [vmem:[%s9370_s9 + $0x10] sm:$0xff] }
 0x371   :  { %3901 = vmatpush.msrb.mxu0 %v3784_v48  ;;  %v3179_v14 = vadd.f32 %v3178_v5, %v3159_v24  ;;  %v3238_v47 = vpop.f32.mrf.mxu1 }
 0x372   :  { %3880 = vmatpush.msra.mxu3 %v3833_v28  ;;  %3913 = vmatpush.msrb.mxu2 %v3808_v17  ;;  %v3934_v17 = vld [vmem:[%s9370_s9 + $0x8] sm:$0xff] }
 0x373   :  { %3902 = vmatpush.msrb.mxu0 %v3783_v63  ;;  %v3199_v30 = vadd.f32 %v3198_v59, %v3179_v14 }
 0x374   :  { %3881 = vmatpush.msra.mxu3 %v3832_v35  ;;  %3903 = vmatmul.f32.vlgmr.msrb.gmra.mxu0 %v3781_v39  ;;  %v3218_v7 = vpop.f32.mrf.mxu3  ;;  %v3805_v35 = vld [vmem:[%s9367_s6 + $0xb0] sm:$0xff]  ;;  %v3804_v39 = vld [vmem:[%s9367_s6 + $0xa8] sm:$0xff] }
 0x375   :  { %v3219_v15 = vadd.f32 %v3218_v7, %v3199_v30  ;;  %3914 = vmatpush.msrb.mxu2 %v3807_v32 }
 0x376   :  { %3882 = vmatpush.msra.mxu3 %v3831_v40  ;;  %v3258_v8 = vpop.f32.mrf.mxu0  ;;  %v3278_v51 = vpop.f32.mrf.mxu2  ;;  %v3803_v40 = vld [vmem:[%s9367_s6 + $0xa0] sm:$0xff] }
 0x377   :  { %3883 = vmatmul.f32.vlgmr.msra.gmra.mxu3 %v345_v41  ;;  %v3239_v9 = vadd.f32 %v3238_v47, %v3219_v15  ;;  %3915 = vmatpush.msrb.mxu2 %v3806_v29 }
 0x379   :  { %v3259_v10 = vadd.f32 %v3258_v8, %v3239_v9  ;;  %v3318_v18 = vpop.f32.mrf.mxu1  ;;  %3916 = vmatpush.msrb.mxu2 %v3805_v35 }
 0x37b   :  { %v3279_v13 = vadd.f32 %v3278_v51, %v3259_v10  ;;  %3917 = vmatpush.msrb.mxu2 %v3804_v39 }
 0x37c   :  { %v3298_v12 = vpop.f32.mrf.mxu3 }
 0x37d   :  { %v3299_v62 = vadd.f32 %v3298_v12, %v3279_v13  ;;  %3918 = vmatpush.msrb.mxu2 %v3803_v40  ;;  %v3947_v12 = vld [vmem:[%s9370_s9 + $0x70] sm:$0xff] }
 0x37e   :  { %v3338_v23 = vpop.f32.mrf.mxu0  ;;  %v3358_v54 = vpop.f32.mrf.mxu2  ;;  %3962 = vmatpush.msrb.mxu1 %v3947_v12 }
 0x37f   :  { %v3319_v2 = vadd.f32 %v3318_v18, %v3299_v62  ;;  %3919 = vmatpush.msrb.mxu2 %v3802_v27  ;;  %v3945_v62 = vld [vmem:[%s9370_s9 + $0x60] sm:$0xff]  ;;  %v3944_v18 = vld [vmem:[%s9370_s9 + $0x58] sm:$0xff] }
 0x380   :  { %3963 = vmatpush.msrb.mxu1 %v3946_v16 }
 0x381   :  { %v3339_v36 = vadd.f32 %v3338_v23, %v3319_v2  ;;  %v3398_v45 = vpop.f32.mrf.mxu1  ;;  %3920 = vmatpush.msrb.mxu2 %v3801_v19  ;;  %v3943_v23 = vld [vmem:[%s9370_s9 + $0x50] sm:$0xff]  ;;  %v3942_v2 = vld [vmem:[%s9370_s9 + $0x48] sm:$0xff] }
 0x382   :  { %3964 = vmatpush.msrb.mxu1 %v3945_v62 }
 0x383   :  { %v3359_v20 = vadd.f32 %v3358_v54, %v3339_v36  ;;  %3921 = vmatpush.msrb.mxu2 %v3800_v43  ;;  %v3941_v54 = vld [vmem:[%s9370_s9 + $0x40] sm:$0xff]  ;;  %v3940_v36 = vld [vmem:[%s9370_s9 + $0x38] sm:$0xff] }
 0x384   :  { %v3378_v38 = vpop.f32.mrf.mxu3  ;;  %3965 = vmatpush.msrb.mxu1 %v3944_v18 }
 0x385   :  { %v3379_v50 = vadd.f32 %v3378_v38, %v3359_v20  ;;  %3922 = vmatpush.msrb.mxu2 %v3799_v61  ;;  %v3939_v38 = vld [vmem:[%s9370_s9 + $0x30] sm:$0xff]  ;;  %v3938_v20 = vld [vmem:[%s9370_s9 + $0x28] sm:$0xff] }
 0x386   :  { %v3418_v22 = vpop.f32.mrf.mxu0  ;;  %v3438_v48 = vpop.f32.mrf.mxu2  ;;  %3966 = vmatpush.msrb.mxu1 %v3943_v23 }
 0x387   :  { %v3399_v55 = vadd.f32 %v3398_v45, %v3379_v50  ;;  %v3937_v50 = vld [vmem:[%s9370_s9 + $0x20] sm:$0xff]  ;;  %v3936_v45 = vld [vmem:[%s9370_s9 + $0x18] sm:$0xff] }
 0x388   :  { %3967 = vmatpush.msrb.mxu1 %v3942_v2 }
 0x389   :  { %v3419_v28 = vadd.f32 %v3418_v22, %v3399_v55  ;;  %v3478_v56 = vpop.f32.mrf.mxu1  ;;  %v3933_v22 = vld [vmem:[%s9370_s9] sm:$0xff]  ;;  %s4039_s9 = smov [#allocation2]  }
 0x38a   :  { %3968 = vmatpush.msrb.mxu1 %v3941_v54  ;;  %s3988_s12 = sshll.u32 %s4039_s9, 4  ;;  %s3989_s12 = int_to_ptr.vmem [resolvable:$true] %s3988_s12 }
 0x38b   :  { %v3439_v31 = vadd.f32 %v3438_v48, %v3419_v28 }
 0x38c   :  { %v3458_v63 = vpop.f32.mrf.mxu3  ;;  %3969 = vmatpush.msrb.mxu1 %v3940_v36 }
 0x38d   :  { %v3459_v33 = vadd.f32 %v3458_v63, %v3439_v31  ;;  %v4004_v63 = vld [vmem:[%s9369_s8] ss:$0 sm:$0xff] }
 0x38e   :  { %v3498_v37 = vpop.f32.mrf.mxu0  ;;  %v3518_v58 = vpop.f32.mrf.mxu2  ;;  %3970 = vmatpush.msrb.mxu1 %v3939_v38 }
 0x38f   :  { %v3479_v41 = vadd.f32 %v3478_v56, %v3459_v33  ;;  %v4005_v56 = vld [vmem:[%s9371_s10] ss:$0 sm:$0xff] }
 0x390   :  { %3971 = vmatpush.msrb.mxu1 %v3938_v20 }
 0x391   :  { %v3499_v6 = vadd.f32 %v3498_v37, %v3479_v41  ;;  %v3558_v60 = vpop.f32.mrf.mxu1 }
 0x392   :  { %3972 = vmatpush.msrb.mxu1 %v3937_v50 }
 0x393   :  { %v3519_v46 = vadd.f32 %v3518_v58, %v3499_v6 }
 0x394   :  { %v3538_v52 = vpop.f32.mrf.mxu3  ;;  %3973 = vmatpush.msrb.mxu1 %v3936_v45 }
 0x395   :  { %v3539_v42 = vadd.f32 %v3538_v52, %v3519_v46 }
 0x396   :  { %v3578_v25 = vpop.f32.mrf.mxu0  ;;  %v3598_v21 = vpop.f32.mrf.mxu2  ;;  %3974 = vmatpush.msrb.mxu1 %v3935_v49 }
 0x397   :  { %v3559_v34 = vadd.f32 %v3558_v60, %v3539_v42 }
 0x398   :  { %3975 = vmatpush.msrb.mxu1 %v3934_v17 }
 0x399   :  { %v3579_v26 = vadd.f32 %v3578_v25, %v3559_v34 }
 0x39a   :  { %3976 = vmatpush.msrb.mxu1 %v3933_v22 }
 0x39b   :  { %v3599_v1 = vadd.f32 %v3598_v21, %v3579_v26 }
 0x3a5   :  { %v3618_v0 = vpop.f32.mrf.mxu3 }
 0x3a6   :  { %v3619_v4 = vadd.f32 %v3618_v0, %v3599_v1 }
 0x3a8   :  { %v3638_v3 = vpop.f32.mrf.mxu1 }
 0x3a9   :  { %v3639_v24 = vadd.f32 %v3638_v3, %v3619_v4 }
 0x3ae   :  { %v3658_v5 = vpop.f32.mrf.mxu0 }
 0x3af   :  { %v3659_v14 = vadd.f32 %v3658_v5, %v3639_v24 }
 0x3b5   :  { %v3678_v59 = vpop.f32.mrf.mxu2 }
 0x3b6   :  { %v3679_v30 = vadd.f32 %v3678_v59, %v3659_v14 }
 0x3c7   :  { %v3698_v7 = vpop.f32.mrf.mxu3 }
 0x3c8   :  { %v3699_v15 = vadd.f32 %v3698_v7, %v3679_v30  ;;  %v3718_v47 = vpop.f32.mrf.mxu1 }
 0x3ca   :  { %v3719_v44 = vadd.f32 %v3718_v47, %v3699_v15 }
 0x3d0   :  { %v3738_v53 = vpop.f32.mrf.mxu0 }
 0x3d1   :  { %v3739_v8 = vadd.f32 %v3738_v53, %v3719_v44 }
 0x3d2   :  { %v3864_v32 = vpop.f32.mrf.mxu1 }
 0x3d7   :  { %v3758_v9 = vpop.f32.mrf.mxu2 }
 0x3d8   :  { %v3759_v57 = vadd.f32 %v3758_v9, %v3739_v8 }
 0x3da   :  { %v3778_v51 = vpop.f32.mrf.mxu3 }
 0x3db   :  { %v3779_v10 = vadd.f32 %v3778_v51, %v3759_v57 }
 0x3dd   :  { %v3782_v13 = vmax.f32 %v3779_v10, 0.0 }
 0x3df   :  { %3923 = vmatmul.f32.vlgmr.msrb.gmra.mxu2 %v3782_v13 }
 0x3f1   :  { %v3904_v28 = vpop.f32.mrf.mxu0 }
 0x3fa   :  { %v3884_v55 = vpop.f32.mrf.mxu3 }
 0x3fb   :  { %v3885_v48 = vadd.f32 %v3884_v55, %v3864_v32 }
 0x3fd   :  { %v3905_v29 = vadd.f32 %v3904_v28, %v3885_v48 }
 0x462   :  { %v3924_v31 = vpop.f32.mrf.mxu2 }
 0x463   :  { %v3925_v33 = vadd.f32 %v3924_v31, %v3905_v29 }
 0x465   :  { %v3931_v35 = vadd.f32 %v4004_v63, %v3925_v33 }
 0x467   :  { %v3932_v39 = vmax.f32 %v3931_v35, 0.0 }
 0x469   :  { %4002 = vmatmul.msk.f32.vlgmr.msrb.gmra.mxu1 %vm3953_vm2, %v3932_v39 }
 0x4e6   :  { %v3978_v40 = vpop.f32.mrf.mxu1 }
 0x4e7   :  { %v3979_v37 = vadd.f32 %v4005_v56, %v3978_v40 }
 0x4e9   :  { %3982 = vst.msk [vmem:[#allocation2] sm:$0x3] %vm3981_vm3, %v3979_v37 }
 0x4ea   :  { %3993 = dma.vmem_to_hbm [thread:$0]  %s3989_s12, 32, %s3991_s4, [#allocation3]  }
 0x4eb   :  { %4037 = dma.done.wait [#allocation3], 32  }
 0x4ec   :  { %4038 = vsyncadd [#allocation3], 4294967264 }
 0x4ed   :  { %3998 = vsyncpa [#allocation3], 1 }

</bundles_post_ra>
